<compile_context>
chip_gen: v6e
topology: v6e:2x2x1
jax: 0.10.0
libtpu: 0.0.40
codegen_flags: <defaults>
</compile_context>

<pallas_src>
import functools
import math

import jax
import jax.numpy as jnp
from jax import lax
from jax.experimental import pallas as pl
from jax.experimental.pallas import tpu as pltpu

# ----------------------------- model config (small) -------------------------
HIDDEN = 32          # bert.config.hidden_size
NUM_HEADS = 4
HEAD_DIM = HIDDEN // NUM_HEADS
INTERMEDIATE = 64
VOCAB = 64           # len(tokenizer)  (correction dense output size)
VPAD = 128           # lane-padded vocab for a lane-dense logits store
MAX_POS = 16
NUM_LAYERS = 3       # full BERT encoder depth; DetectionNetwork uses layers[:2]
DET_LAYERS = 2
LN_EPS = 1e-12
NEG_BIAS = -10000.0  # HF-style additive mask value


# ----------------------------- in-kernel helpers -----------------------------
def _layer_norm(x, g, b):
    mu = jnp.mean(x, axis=-1, keepdims=True)
    var = jnp.mean((x - mu) ** 2, axis=-1, keepdims=True)
    return (x - mu) * lax.rsqrt(var + LN_EPS) * g + b


def _gelu(x):
    # TODO(synk): BERT uses exact erf-GELU; erf is not guaranteed to lower in
    # Mosaic, so the tanh approximation is used here.
    c = math.sqrt(2.0 / math.pi)
    return 0.5 * x * (1.0 + jnp.tanh(c * (x + 0.044715 * x * x * x)))


# ----------------------------- fused Pallas kernel ---------------------------
def mdcspell_fused_kernel(
        # activations / masks (row-blocked)
        det_in_ref, corr_in_ref, det_bias_ref, corr_bias_ref, amask_ref,
        # embedding LayerNorm
        emb_g_ref, emb_b_ref,
        # per-head stacked weights (layer*head leading axis, (in, out) oriented)
        wqh_ref, bqh_ref, wkh_ref, bkh_ref, wvh_ref, bvh_ref, woh_ref, bo_ref,
        # per-layer LN / FFN weights
        ln1_g_ref, ln1_b_ref, w1_ref, b1_ref, w2_ref, b2_ref,
        ln2_g_ref, ln2_b_ref,
        # output heads
        emb_t_ref, cbias_ref, det_w_ref, det_b_ref,
        # fused output (logits lanes 0..VOCAB-1, detection prob at lane VOCAB)
        out_ref,
        *, num_heads, head_dim, num_layers, det_layers):
    """Full MDCSpell forward for one row-block of sequences, VMEM-resident."""
    scale = 1.0 / math.sqrt(head_dim)
    bf16 = jnp.bfloat16

    det_bias = det_bias_ref[0]        # (R, R) block-diagonal (same-sequence)
    corr_bias = corr_bias_ref[0]      # (R, R) block-diagonal + padding

    # --- hoist every weight load once: layers 0-1 are shared by both branches
    layers = []
    for l in range(num_layers):
        heads = []
        for h in range(num_heads):
            idx = l * num_heads + h
            heads.append((wqh_ref[idx], bqh_ref[idx],
                          wkh_ref[idx], bkh_ref[idx],
                          wvh_ref[idx], bvh_ref[idx],
                          woh_ref[idx]))
        layers.append(dict(
            heads=heads, bo=bo_ref[l],
            ln1_g=ln1_g_ref[l], ln1_b=ln1_b_ref[l],
            w1=w1_ref[l], b1=b1_ref[l], w2=w2_ref[l], b2=b2_ref[l],
            ln2_g=ln2_g_ref[l], ln2_b=ln2_b_ref[l]))

    def encoder_layer(x, lw, bias):
        # x: (R, H) f32; whole-slab attention, per-head pre-split weights.
        xb = x.astype(bf16)
        acc = None
        for (wq, bq, wk, bk, wv, bv, wo) in lw["heads"]:
            q = jnp.dot(xb, wq, preferred_element_type=jnp.float32) + bq
            k = jnp.dot(xb, wk, preferred_element_type=jnp.float32) + bk
            v = jnp.dot(xb, wv, preferred_element_type=jnp.float32) + bv
            # scores over the whole row block; bias handles padding + batching
            s = lax.dot_general(q.astype(bf16), k.astype(bf16),
                                (((1,), (1,)), ((), ())),
                                preferred_element_type=jnp.float32)
            s = s * scale + bias
            s = s - jnp.max(s, axis=-1, keepdims=True)
            p = jnp.exp(s)
            p = p * pl.reciprocal(jnp.sum(p, axis=-1, keepdims=True),
                                  approx=True)
            ctx = jnp.dot(p.astype(bf16), v.astype(bf16),
                          preferred_element_type=jnp.float32)
            # Folded output projection per head: sum_h ctx_h @ Wo_h.
            part = jnp.dot(ctx.astype(bf16), wo,
                           preferred_element_type=jnp.float32)
            acc = part if acc is None else acc + part
        attn = acc + lw["bo"]                                   # (R, H)

        x1 = _layer_norm(x + attn, lw["ln1_g"], lw["ln1_b"])
        ff = jnp.dot(x1.astype(bf16), lw["w1"],
                     preferred_element_type=jnp.float32) + lw["b1"]
        ff = _gelu(ff)
        ff = jnp.dot(ff.astype(bf16), lw["w2"],
                     preferred_element_type=jnp.float32) + lw["b2"]
        return _layer_norm(x1 + ff, lw["ln2_g"], lw["ln2_b"])

    # --- DetectionNetwork: word_emb + pos_emb -> first det_layers blocks,
    #     no padding mask (HF BertLayer called without an attention mask).
    #     NOTE: detection/correction share layer-0/1 parameters, which matches
    #     the PyTorch model exactly at init (DetectionNetwork is a deepcopy).
    det_x = det_in_ref[...]
    for l in range(det_layers):
        det_x = encoder_layer(det_x, layers[l], det_bias)
    det_hidden = det_x

    # --- CorrectionNetwork: BERT with inputs_embeds (emb LN, then all layers)
    corr_x = _layer_norm(corr_in_ref[...], emb_g_ref[...], emb_b_ref[...])
    for l in range(num_layers):
        corr_x = encoder_layer(corr_x, layers[l], corr_bias)

    # --- output heads ---
    h = (corr_x + det_hidden).astype(bf16)                      # (R, H)
    logits = (jnp.dot(h, emb_t_ref[...],
                      preferred_element_type=jnp.float32)
              + cbias_ref[...])                                 # (R, VPAD)

    score = (jnp.dot(det_hidden.astype(bf16), det_w_ref[...],
                     preferred_element_type=jnp.float32)
             + det_b_ref[...])                                  # (R, 1)
    det_prob = pl.reciprocal(1.0 + jnp.exp(-score), approx=True) * amask_ref[...]

    # Fold the detection probability into padded lane column VOCAB so the
    # single output store stays lane-dense (one unmasked (R, 128) vst).
    col = lax.broadcasted_iota(jnp.int32, logits.shape, 1)
    out_ref[...] = jnp.where(col == VOCAB, det_prob, logits)


# ----------------------------- parameter packing -----------------------------
def pack_params(params):
    """Pre-transpose (out,in)->(in,out), split per head, stack, cast to bf16."""
    layers = params["layers"]
    bf16 = jnp.bfloat16

    def split_qkv(w):     # (H, H) torch (out,in) -> (NH, H, HD) per-head (in,out)
        return jnp.stack([w[h * HEAD_DIM:(h + 1) * HEAD_DIM, :].T
                          for h in range(NUM_HEADS)])

    def split_bias(b):    # (1, H) -> (NH, 1, HD)
        return jnp.stack([b[:, h * HEAD_DIM:(h + 1) * HEAD_DIM]
                          for h in range(NUM_HEADS)])

    def split_wo(w):      # (H, H) torch (out,in) -> (NH, HD, H)
        return jnp.stack([w[:, h * HEAD_DIM:(h + 1) * HEAD_DIM].T
                          for h in range(NUM_HEADS)])

    def stack_heads(fn, key, dtype):
        # (NUM_LAYERS*NUM_HEADS, ...) single leading axis for simple indexing
        return jnp.concatenate([fn(l[key]) for l in layers], axis=0).astype(dtype)

    def stack_t(key):     # FFN weight matrices: transpose then stack, bf16
        return jnp.stack([l[key].T for l in layers]).astype(bf16)

    def stack(key):       # biases / LN params: stack as-is, f32
        return jnp.stack([l[key] for l in layers])

    emb_t = params["word_emb"].T                                # (H, V)
    emb_t_pad = jnp.pad(emb_t, ((0, 0), (0, VPAD - VOCAB))).astype(bf16)
    cbias_pad = jnp.pad(params["corr_bias"], ((0, 0), (0, VPAD - VOCAB)))

    return {
        "wqh": stack_heads(split_qkv, "wq", bf16),
        "bqh": stack_heads(split_bias, "bq", jnp.float32),
        "wkh": stack_heads(split_qkv, "wk", bf16),
        "bkh": stack_heads(split_bias, "bk", jnp.float32),
        "wvh": stack_heads(split_qkv, "wv", bf16),
        "bvh": stack_heads(split_bias, "bv", jnp.float32),
        "woh": stack_heads(split_wo, "wo", bf16),
        "bo": stack("bo"),
        "ln1_g": stack("ln1_g"), "ln1_b": stack("ln1_b"),
        "w1": stack_t("w1"), "b1": stack("b1"),
        "w2": stack_t("w2"), "b2": stack("b2"),
        "ln2_g": stack("ln2_g"), "ln2_b": stack("ln2_b"),
        "emb_t_pad": emb_t_pad, "cbias_pad": cbias_pad,
        "det_wt": params["det_w"].T.astype(bf16),               # (H, 1)
    }


# ----------------------------- attention bias --------------------------------
def build_attn_bias(amask_f, num_blocks, include_padding):
    """(num_blocks, R, R) additive bias: block-diagonal same-sequence mask,
    optionally plus the HF-style key padding mask."""
    B, L = amask_f.shape
    bk = B // num_blocks
    R = bk * L
    seq_id = jnp.repeat(jnp.arange(bk, dtype=jnp.int32), L)     # (R,)
    same = (seq_id[:, None] == seq_id[None, :]).astype(jnp.float32)
    block_bias = (1.0 - same) * NEG_BIAS                        # (R, R)
    out = []
    for g in range(num_blocks):
        bias = block_bias
        if include_padding:
            key_mask = amask_f[g * bk:(g + 1) * bk].reshape(R)
            bias = bias + (1.0 - key_mask)[None, :] * NEG_BIAS
        out.append(bias)
    return jnp.stack(out)


def _num_row_blocks(batch):
    """2 row blocks on v7x (2 TensorCores/chip), else 1 (gridless behaviour)."""
    try:
        kind = jax.devices()[0].device_kind.lower()
    except Exception:
        return 1
    if (("v7" in kind) or ("tpu7" in kind)) and batch % 2 == 0:
        return 2
    return 1


# ----------------------------- full forward ----------------------------------
def mdcspell_forward(params, input_ids, attention_mask, token_type_ids):
    B, L = input_ids.shape
    # glue: embedding lookups (gathers) in plain JAX
    word_emb = jnp.take(params["word_emb"], input_ids, axis=0)        # (B,L,H)
    pos_emb = params["pos_emb"][:L]                                   # (L,H)
    type_emb = jnp.take(params["type_emb"], token_type_ids, axis=0)   # (B,L,H)

    packed = pack_params(params)

    # pre-add embeddings in the wrapper (2 activation slabs instead of 3)
    det_in = (word_emb + pos_emb[None]).reshape(B * L, HIDDEN)
    corr_in = (word_emb + pos_emb[None] + type_emb).reshape(B * L, HIDDEN)

    amask_f = attention_mask.astype(jnp.float32)
    amask_col = amask_f.reshape(B * L, 1)

    G = _num_row_blocks(B)            # grid over row blocks (sequences)
    R = (B // G) * L                  # rows per grid step

    det_bias = build_attn_bias(amask_f, G, include_padding=False)    # (G,R,R)
    corr_attn_bias = build_attn_bias(amask_f, G, include_padding=True)

    kernel = functools.partial(
        mdcspell_fused_kernel,
        num_heads=NUM_HEADS, head_dim=HEAD_DIM,
        num_layers=NUM_LAYERS, det_layers=DET_LAYERS)

    inputs = (
        det_in, corr_in, det_bias, corr_attn_bias, amask_col,
        params["emb_ln_g"], params["emb_ln_b"],
        packed["wqh"], packed["bqh"], packed["wkh"], packed["bkh"],
        packed["wvh"], packed["bvh"], packed["woh"], packed["bo"],
        packed["ln1_g"], packed["ln1_b"], packed["w1"], packed["b1"],
        packed["w2"], packed["b2"], packed["ln2_g"], packed["ln2_b"],
        packed["emb_t_pad"], packed["cbias_pad"],
        packed["det_wt"], params["det_b"],
    )

    def full_spec(a):
        nd = a.ndim
        return pl.BlockSpec(a.shape, lambda i, _nd=nd: (0,) * _nd)

    in_specs = [
        pl.BlockSpec((R, HIDDEN), lambda i: (i, 0)),      # det_in
        pl.BlockSpec((R, HIDDEN), lambda i: (i, 0)),      # corr_in
        pl.BlockSpec((1, R, R), lambda i: (i, 0, 0)),     # det attn bias
        pl.BlockSpec((1, R, R), lambda i: (i, 0, 0)),     # corr attn bias
        pl.BlockSpec((R, 1), lambda i: (i, 0)),           # attention mask col
    ] + [full_spec(a) for a in inputs[5:]]                # weights: resident

    out = pl.pallas_call(
        kernel,
        out_shape=jax.ShapeDtypeStruct((B * L, VPAD), jnp.float32),
        grid=(G,),
        in_specs=in_specs,
        out_specs=pl.BlockSpec((R, VPAD), lambda i: (i, 0)),
        compiler_params=pltpu.CompilerParams(
            dimension_semantics=("parallel",)),
    )(*inputs)

    corr_logits = out[:, :VOCAB].reshape(B, L, VOCAB)                 # (B,L,V)
    det_probs = out[:, VOCAB].reshape(B, L)                           # (B,L)
    return corr_logits, det_probs


# ----------------------------- deterministic init ----------------------------
def init_params(key):
    keys = iter(jax.random.split(key, 64))

    def nrm(shape, scale=0.02):
        return (scale * jax.random.normal(next(keys), shape)).astype(jnp.float32)

    params = {
        "word_emb": nrm((VOCAB, HIDDEN)),
        "pos_emb": nrm((MAX_POS, HIDDEN)),
        "type_emb": nrm((2, HIDDEN)),
        "emb_ln_g": jnp.ones((1, HIDDEN), jnp.float32),
        "emb_ln_b": jnp.zeros((1, HIDDEN), jnp.float32),
        # correction dense: weight tied to word_emb (see _init_correction_dense_layer)
        "corr_bias": nrm((1, VOCAB)),
        "det_w": nrm((1, HIDDEN)),
        "det_b": jnp.zeros((1, 1), jnp.float32),
        "layers": [],
    }
    for _ in range(NUM_LAYERS):
        layer = {
            "wq": nrm((HIDDEN, HIDDEN)), "bq": jnp.zeros((1, HIDDEN), jnp.float32),
            "wk": nrm((HIDDEN, HIDDEN)), "bk": jnp.zeros((1, HIDDEN), jnp.float32),
            "wv": nrm((HIDDEN, HIDDEN)), "bv": jnp.zeros((1, HIDDEN), jnp.float32),
            "wo": nrm((HIDDEN, HIDDEN)), "bo": jnp.zeros((1, HIDDEN), jnp.float32),
            "ln1_g": jnp.ones((1, HIDDEN), jnp.float32),
            "ln1_b": jnp.zeros((1, HIDDEN), jnp.float32),
            "w1": nrm((INTERMEDIATE, HIDDEN)),
            "b1": jnp.zeros((1, INTERMEDIATE), jnp.float32),
            "w2": nrm((HIDDEN, INTERMEDIATE)),
            "b2": jnp.zeros((1, HIDDEN), jnp.float32),
            "ln2_g": jnp.ones((1, HIDDEN), jnp.float32),
            "ln2_b": jnp.zeros((1, HIDDEN), jnp.float32),
        }
        params["layers"].append(layer)
    return params


# ----------------------------- main -------------------------------------------
if __name__ == "__main__":
    key = jax.random.PRNGKey(0)
    pkey, dkey = jax.random.split(key)
    params = init_params(pkey)

    B, L = 2, 8
    input_ids = jax.random.randint(dkey, (B, L), 0, VOCAB, dtype=jnp.int32)
    # synthetic tokenizer outputs: second sequence padded after 5 tokens
    attention_mask = jnp.array([[1, 1, 1, 1, 1, 1, 1, 1],
                                [1, 1, 1, 1, 1, 0, 0, 0]], jnp.float32)
    token_type_ids = jnp.zeros((B, L), jnp.int32)

    forward = jax.jit(mdcspell_forward)
    corr_logits, det_probs = forward(params, input_ids,
                                     attention_mask, token_type_ids)
    jax.block_until_ready((corr_logits, det_probs))

    assert corr_logits.shape == (B, L, VOCAB)
    assert det_probs.shape == (B, L)
    assert bool(jnp.all(jnp.isfinite(corr_logits)))
    assert bool(jnp.all(jnp.isfinite(det_probs)))
    print("KERNEL_OK")
</pallas_src>

<mosaic_0001>
module attributes {stable_mosaic.version = 11 : i64} {
  func.func @mdcspell_fused_kernel(%arg0: i32, %arg1: memref<16x32xf32, #tpu.memory_space<vmem>>, %arg2: memref<16x32xf32, #tpu.memory_space<vmem>>, %arg3: memref<1x16x16xf32, #tpu.memory_space<vmem>>, %arg4: memref<1x16x16xf32, #tpu.memory_space<vmem>>, %arg5: memref<16x1xf32, #tpu.memory_space<vmem>>, %arg6: memref<1x32xf32, #tpu.memory_space<vmem>>, %arg7: memref<1x32xf32, #tpu.memory_space<vmem>>, %arg8: memref<12x32x8xbf16, #tpu.memory_space<vmem>>, %arg9: memref<12x1x8xf32, #tpu.memory_space<vmem>>, %arg10: memref<12x32x8xbf16, #tpu.memory_space<vmem>>, %arg11: memref<12x1x8xf32, #tpu.memory_space<vmem>>, %arg12: memref<12x32x8xbf16, #tpu.memory_space<vmem>>, %arg13: memref<12x1x8xf32, #tpu.memory_space<vmem>>, %arg14: memref<12x8x32xbf16, #tpu.memory_space<vmem>>, %arg15: memref<3x1x32xf32, #tpu.memory_space<vmem>>, %arg16: memref<3x1x32xf32, #tpu.memory_space<vmem>>, %arg17: memref<3x1x32xf32, #tpu.memory_space<vmem>>, %arg18: memref<3x32x64xbf16, #tpu.memory_space<vmem>>, %arg19: memref<3x1x64xf32, #tpu.memory_space<vmem>>, %arg20: memref<3x64x32xbf16, #tpu.memory_space<vmem>>, %arg21: memref<3x1x32xf32, #tpu.memory_space<vmem>>, %arg22: memref<3x1x32xf32, #tpu.memory_space<vmem>>, %arg23: memref<3x1x32xf32, #tpu.memory_space<vmem>>, %arg24: memref<32x128xbf16, #tpu.memory_space<vmem>>, %arg25: memref<1x128xf32, #tpu.memory_space<vmem>>, %arg26: memref<32x1xbf16, #tpu.memory_space<vmem>>, %arg27: memref<1x1xf32, #tpu.memory_space<vmem>>, %arg28: memref<16x128xf32, #tpu.memory_space<vmem>>) attributes {dimension_semantics = [#tpu.dimension_semantics<parallel>], iteration_bounds = array<i64: 1>, scalar_prefetch = 0 : i64, scratch_operands = 0 : i64, tpu.core_type = #tpu.core_type<tc>, window_params = [{transform_indices = @transform_0, window_bounds = array<i64: 16, 32>}, {transform_indices = @transform_1, window_bounds = array<i64: 16, 32>}, {transform_indices = @transform_2, window_bounds = array<i64: 1, 16, 16>}, {transform_indices = @transform_3, window_bounds = array<i64: 1, 16, 16>}, {transform_indices = @transform_4, window_bounds = array<i64: 16, 1>}, {pipeline_mode = #tpu.pipeline_mode<synchronous>, transform_indices = @transform_5, window_bounds = array<i64: 1, 32>}, {pipeline_mode = #tpu.pipeline_mode<synchronous>, transform_indices = @transform_6, window_bounds = array<i64: 1, 32>}, {pipeline_mode = #tpu.pipeline_mode<synchronous>, transform_indices = @transform_7, window_bounds = array<i64: 12, 32, 8>}, {pipeline_mode = #tpu.pipeline_mode<synchronous>, transform_indices = @transform_8, window_bounds = array<i64: 12, 1, 8>}, {pipeline_mode = #tpu.pipeline_mode<synchronous>, transform_indices = @transform_9, window_bounds = array<i64: 12, 32, 8>}, {pipeline_mode = #tpu.pipeline_mode<synchronous>, transform_indices = @transform_10, window_bounds = array<i64: 12, 1, 8>}, {pipeline_mode = #tpu.pipeline_mode<synchronous>, transform_indices = @transform_11, window_bounds = array<i64: 12, 32, 8>}, {pipeline_mode = #tpu.pipeline_mode<synchronous>, transform_indices = @transform_12, window_bounds = array<i64: 12, 1, 8>}, {pipeline_mode = #tpu.pipeline_mode<synchronous>, transform_indices = @transform_13, window_bounds = array<i64: 12, 8, 32>}, {pipeline_mode = #tpu.pipeline_mode<synchronous>, transform_indices = @transform_14, window_bounds = array<i64: 3, 1, 32>}, {pipeline_mode = #tpu.pipeline_mode<synchronous>, transform_indices = @transform_15, window_bounds = array<i64: 3, 1, 32>}, {pipeline_mode = #tpu.pipeline_mode<synchronous>, transform_indices = @transform_16, window_bounds = array<i64: 3, 1, 32>}, {pipeline_mode = #tpu.pipeline_mode<synchronous>, transform_indices = @transform_17, window_bounds = array<i64: 3, 32, 64>}, {pipeline_mode = #tpu.pipeline_mode<synchronous>, transform_indices = @transform_18, window_bounds = array<i64: 3, 1, 64>}, {pipeline_mode = #tpu.pipeline_mode<synchronous>, transform_indices = @transform_19, window_bounds = array<i64: 3, 64, 32>}, {pipeline_mode = #tpu.pipeline_mode<synchronous>, transform_indices = @transform_20, window_bounds = array<i64: 3, 1, 32>}, {pipeline_mode = #tpu.pipeline_mode<synchronous>, transform_indices = @transform_21, window_bounds = array<i64: 3, 1, 32>}, {pipeline_mode = #tpu.pipeline_mode<synchronous>, transform_indices = @transform_22, window_bounds = array<i64: 3, 1, 32>}, {pipeline_mode = #tpu.pipeline_mode<synchronous>, transform_indices = @transform_23, window_bounds = array<i64: 32, 128>}, {pipeline_mode = #tpu.pipeline_mode<synchronous>, transform_indices = @transform_24, window_bounds = array<i64: 1, 128>}, {pipeline_mode = #tpu.pipeline_mode<synchronous>, transform_indices = @transform_25, window_bounds = array<i64: 32, 1>}, {pipeline_mode = #tpu.pipeline_mode<synchronous>, transform_indices = @transform_26, window_bounds = array<i64: 1, 1>}, {transform_indices = @transform_27, window_bounds = array<i64: 16, 128>}]} {
    %c0 = arith.constant 0 : index
    %c0_0 = arith.constant 0 : index
    %c0_1 = arith.constant 0 : index
    %0 = vector.load %arg3[%c0, %c0_0, %c0_1] : memref<1x16x16xf32, #tpu.memory_space<vmem>>, vector<1x16x16xf32>
    %1 = vector.shape_cast %0 : vector<1x16x16xf32> to vector<16x16xf32>
    %c0_2 = arith.constant 0 : index
    %c0_3 = arith.constant 0 : index
    %c0_4 = arith.constant 0 : index
    %2 = vector.load %arg4[%c0_2, %c0_3, %c0_4] : memref<1x16x16xf32, #tpu.memory_space<vmem>>, vector<1x16x16xf32>
    %3 = vector.shape_cast %2 : vector<1x16x16xf32> to vector<16x16xf32>
    %c0_5 = arith.constant 0 : index
    %c0_6 = arith.constant 0 : index
    %c0_7 = arith.constant 0 : index
    %4 = vector.load %arg8[%c0_5, %c0_6, %c0_7] : memref<12x32x8xbf16, #tpu.memory_space<vmem>>, vector<1x32x8xbf16>
    %5 = vector.shape_cast %4 : vector<1x32x8xbf16> to vector<32x8xbf16>
    %c0_8 = arith.constant 0 : index
    %c0_9 = arith.constant 0 : index
    %c0_10 = arith.constant 0 : index
    %6 = vector.load %arg9[%c0_8, %c0_9, %c0_10] : memref<12x1x8xf32, #tpu.memory_space<vmem>>, vector<1x1x8xf32>
    %7 = vector.shape_cast %6 : vector<1x1x8xf32> to vector<1x8xf32>
    %c0_11 = arith.constant 0 : index
    %c0_12 = arith.constant 0 : index
    %c0_13 = arith.constant 0 : index
    %8 = vector.load %arg10[%c0_11, %c0_12, %c0_13] : memref<12x32x8xbf16, #tpu.memory_space<vmem>>, vector<1x32x8xbf16>
    %9 = vector.shape_cast %8 : vector<1x32x8xbf16> to vector<32x8xbf16>
    %c0_14 = arith.constant 0 : index
    %c0_15 = arith.constant 0 : index
    %c0_16 = arith.constant 0 : index
    %10 = vector.load %arg11[%c0_14, %c0_15, %c0_16] : memref<12x1x8xf32, #tpu.memory_space<vmem>>, vector<1x1x8xf32>
    %11 = vector.shape_cast %10 : vector<1x1x8xf32> to vector<1x8xf32>
    %c0_17 = arith.constant 0 : index
    %c0_18 = arith.constant 0 : index
    %c0_19 = arith.constant 0 : index
    %12 = vector.load %arg12[%c0_17, %c0_18, %c0_19] : memref<12x32x8xbf16, #tpu.memory_space<vmem>>, vector<1x32x8xbf16>
    %13 = vector.shape_cast %12 : vector<1x32x8xbf16> to vector<32x8xbf16>
    %c0_20 = arith.constant 0 : index
    %c0_21 = arith.constant 0 : index
    %c0_22 = arith.constant 0 : index
    %14 = vector.load %arg13[%c0_20, %c0_21, %c0_22] : memref<12x1x8xf32, #tpu.memory_space<vmem>>, vector<1x1x8xf32>
    %15 = vector.shape_cast %14 : vector<1x1x8xf32> to vector<1x8xf32>
    %c0_23 = arith.constant 0 : index
    %c0_24 = arith.constant 0 : index
    %c0_25 = arith.constant 0 : index
    %16 = vector.load %arg14[%c0_23, %c0_24, %c0_25] : memref<12x8x32xbf16, #tpu.memory_space<vmem>>, vector<1x8x32xbf16>
    %17 = vector.shape_cast %16 : vector<1x8x32xbf16> to vector<8x32xbf16>
    %c1 = arith.constant 1 : index
    %c0_26 = arith.constant 0 : index
    %c0_27 = arith.constant 0 : index
    %18 = vector.load %arg8[%c1, %c0_26, %c0_27] : memref<12x32x8xbf16, #tpu.memory_space<vmem>>, vector<1x32x8xbf16>
    %19 = vector.shape_cast %18 : vector<1x32x8xbf16> to vector<32x8xbf16>
    %c1_28 = arith.constant 1 : index
    %c0_29 = arith.constant 0 : index
    %c0_30 = arith.constant 0 : index
    %20 = vector.load %arg9[%c1_28, %c0_29, %c0_30] : memref<12x1x8xf32, #tpu.memory_space<vmem>>, vector<1x1x8xf32>
    %21 = vector.shape_cast %20 : vector<1x1x8xf32> to vector<1x8xf32>
    %c1_31 = arith.constant 1 : index
    %c0_32 = arith.constant 0 : index
    %c0_33 = arith.constant 0 : index
    %22 = vector.load %arg10[%c1_31, %c0_32, %c0_33] : memref<12x32x8xbf16, #tpu.memory_space<vmem>>, vector<1x32x8xbf16>
    %23 = vector.shape_cast %22 : vector<1x32x8xbf16> to vector<32x8xbf16>
    %c1_34 = arith.constant 1 : index
    %c0_35 = arith.constant 0 : index
    %c0_36 = arith.constant 0 : index
    %24 = vector.load %arg11[%c1_34, %c0_35, %c0_36] : memref<12x1x8xf32, #tpu.memory_space<vmem>>, vector<1x1x8xf32>
    %25 = vector.shape_cast %24 : vector<1x1x8xf32> to vector<1x8xf32>
    %c1_37 = arith.constant 1 : index
    %c0_38 = arith.constant 0 : index
    %c0_39 = arith.constant 0 : index
    %26 = vector.load %arg12[%c1_37, %c0_38, %c0_39] : memref<12x32x8xbf16, #tpu.memory_space<vmem>>, vector<1x32x8xbf16>
    %27 = vector.shape_cast %26 : vector<1x32x8xbf16> to vector<32x8xbf16>
    %c1_40 = arith.constant 1 : index
    %c0_41 = arith.constant 0 : index
    %c0_42 = arith.constant 0 : index
    %28 = vector.load %arg13[%c1_40, %c0_41, %c0_42] : memref<12x1x8xf32, #tpu.memory_space<vmem>>, vector<1x1x8xf32>
    %29 = vector.shape_cast %28 : vector<1x1x8xf32> to vector<1x8xf32>
    %c1_43 = arith.constant 1 : index
    %c0_44 = arith.constant 0 : index
    %c0_45 = arith.constant 0 : index
    %30 = vector.load %arg14[%c1_43, %c0_44, %c0_45] : memref<12x8x32xbf16, #tpu.memory_space<vmem>>, vector<1x8x32xbf16>
    %31 = vector.shape_cast %30 : vector<1x8x32xbf16> to vector<8x32xbf16>
    %c2 = arith.constant 2 : index
    %c0_46 = arith.constant 0 : index
    %c0_47 = arith.constant 0 : index
    %32 = vector.load %arg8[%c2, %c0_46, %c0_47] : memref<12x32x8xbf16, #tpu.memory_space<vmem>>, vector<1x32x8xbf16>
    %33 = vector.shape_cast %32 : vector<1x32x8xbf16> to vector<32x8xbf16>
    %c2_48 = arith.constant 2 : index
    %c0_49 = arith.constant 0 : index
    %c0_50 = arith.constant 0 : index
    %34 = vector.load %arg9[%c2_48, %c0_49, %c0_50] : memref<12x1x8xf32, #tpu.memory_space<vmem>>, vector<1x1x8xf32>
    %35 = vector.shape_cast %34 : vector<1x1x8xf32> to vector<1x8xf32>
    %c2_51 = arith.constant 2 : index
    %c0_52 = arith.constant 0 : index
    %c0_53 = arith.constant 0 : index
    %36 = vector.load %arg10[%c2_51, %c0_52, %c0_53] : memref<12x32x8xbf16, #tpu.memory_space<vmem>>, vector<1x32x8xbf16>
    %37 = vector.shape_cast %36 : vector<1x32x8xbf16> to vector<32x8xbf16>
    %c2_54 = arith.constant 2 : index
    %c0_55 = arith.constant 0 : index
    %c0_56 = arith.constant 0 : index
    %38 = vector.load %arg11[%c2_54, %c0_55, %c0_56] : memref<12x1x8xf32, #tpu.memory_space<vmem>>, vector<1x1x8xf32>
    %39 = vector.shape_cast %38 : vector<1x1x8xf32> to vector<1x8xf32>
    %c2_57 = arith.constant 2 : index
    %c0_58 = arith.constant 0 : index
    %c0_59 = arith.constant 0 : index
    %40 = vector.load %arg12[%c2_57, %c0_58, %c0_59] : memref<12x32x8xbf16, #tpu.memory_space<vmem>>, vector<1x32x8xbf16>
    %41 = vector.shape_cast %40 : vector<1x32x8xbf16> to vector<32x8xbf16>
    %c2_60 = arith.constant 2 : index
    %c0_61 = arith.constant 0 : index
    %c0_62 = arith.constant 0 : index
    %42 = vector.load %arg13[%c2_60, %c0_61, %c0_62] : memref<12x1x8xf32, #tpu.memory_space<vmem>>, vector<1x1x8xf32>
    %43 = vector.shape_cast %42 : vector<1x1x8xf32> to vector<1x8xf32>
    %c2_63 = arith.constant 2 : index
    %c0_64 = arith.constant 0 : index
    %c0_65 = arith.constant 0 : index
    %44 = vector.load %arg14[%c2_63, %c0_64, %c0_65] : memref<12x8x32xbf16, #tpu.memory_space<vmem>>, vector<1x8x32xbf16>
    %45 = vector.shape_cast %44 : vector<1x8x32xbf16> to vector<8x32xbf16>
    %c3 = arith.constant 3 : index
    %c0_66 = arith.constant 0 : index
    %c0_67 = arith.constant 0 : index
    %46 = vector.load %arg8[%c3, %c0_66, %c0_67] : memref<12x32x8xbf16, #tpu.memory_space<vmem>>, vector<1x32x8xbf16>
    %47 = vector.shape_cast %46 : vector<1x32x8xbf16> to vector<32x8xbf16>
    %c3_68 = arith.constant 3 : index
    %c0_69 = arith.constant 0 : index
    %c0_70 = arith.constant 0 : index
    %48 = vector.load %arg9[%c3_68, %c0_69, %c0_70] : memref<12x1x8xf32, #tpu.memory_space<vmem>>, vector<1x1x8xf32>
    %49 = vector.shape_cast %48 : vector<1x1x8xf32> to vector<1x8xf32>
    %c3_71 = arith.constant 3 : index
    %c0_72 = arith.constant 0 : index
    %c0_73 = arith.constant 0 : index
    %50 = vector.load %arg10[%c3_71, %c0_72, %c0_73] : memref<12x32x8xbf16, #tpu.memory_space<vmem>>, vector<1x32x8xbf16>
    %51 = vector.shape_cast %50 : vector<1x32x8xbf16> to vector<32x8xbf16>
    %c3_74 = arith.constant 3 : index
    %c0_75 = arith.constant 0 : index
    %c0_76 = arith.constant 0 : index
    %52 = vector.load %arg11[%c3_74, %c0_75, %c0_76] : memref<12x1x8xf32, #tpu.memory_space<vmem>>, vector<1x1x8xf32>
    %53 = vector.shape_cast %52 : vector<1x1x8xf32> to vector<1x8xf32>
    %c3_77 = arith.constant 3 : index
    %c0_78 = arith.constant 0 : index
    %c0_79 = arith.constant 0 : index
    %54 = vector.load %arg12[%c3_77, %c0_78, %c0_79] : memref<12x32x8xbf16, #tpu.memory_space<vmem>>, vector<1x32x8xbf16>
    %55 = vector.shape_cast %54 : vector<1x32x8xbf16> to vector<32x8xbf16>
    %c3_80 = arith.constant 3 : index
    %c0_81 = arith.constant 0 : index
    %c0_82 = arith.constant 0 : index
    %56 = vector.load %arg13[%c3_80, %c0_81, %c0_82] : memref<12x1x8xf32, #tpu.memory_space<vmem>>, vector<1x1x8xf32>
    %57 = vector.shape_cast %56 : vector<1x1x8xf32> to vector<1x8xf32>
    %c3_83 = arith.constant 3 : index
    %c0_84 = arith.constant 0 : index
    %c0_85 = arith.constant 0 : index
    %58 = vector.load %arg14[%c3_83, %c0_84, %c0_85] : memref<12x8x32xbf16, #tpu.memory_space<vmem>>, vector<1x8x32xbf16>
    %59 = vector.shape_cast %58 : vector<1x8x32xbf16> to vector<8x32xbf16>
    %c0_86 = arith.constant 0 : index
    %c0_87 = arith.constant 0 : index
    %c0_88 = arith.constant 0 : index
    %60 = vector.load %arg15[%c0_86, %c0_87, %c0_88] : memref<3x1x32xf32, #tpu.memory_space<vmem>>, vector<1x1x32xf32>
    %61 = vector.shape_cast %60 : vector<1x1x32xf32> to vector<1x32xf32>
    %c0_89 = arith.constant 0 : index
    %c0_90 = arith.constant 0 : index
    %c0_91 = arith.constant 0 : index
    %62 = vector.load %arg16[%c0_89, %c0_90, %c0_91] : memref<3x1x32xf32, #tpu.memory_space<vmem>>, vector<1x1x32xf32>
    %63 = vector.shape_cast %62 : vector<1x1x32xf32> to vector<1x32xf32>
    %c0_92 = arith.constant 0 : index
    %c0_93 = arith.constant 0 : index
    %c0_94 = arith.constant 0 : index
    %64 = vector.load %arg17[%c0_92, %c0_93, %c0_94] : memref<3x1x32xf32, #tpu.memory_space<vmem>>, vector<1x1x32xf32>
    %65 = vector.shape_cast %64 : vector<1x1x32xf32> to vector<1x32xf32>
    %c0_95 = arith.constant 0 : index
    %c0_96 = arith.constant 0 : index
    %c0_97 = arith.constant 0 : index
    %66 = vector.load %arg18[%c0_95, %c0_96, %c0_97] : memref<3x32x64xbf16, #tpu.memory_space<vmem>>, vector<1x32x64xbf16>
    %67 = vector.shape_cast %66 : vector<1x32x64xbf16> to vector<32x64xbf16>
    %c0_98 = arith.constant 0 : index
    %c0_99 = arith.constant 0 : index
    %c0_100 = arith.constant 0 : index
    %68 = vector.load %arg19[%c0_98, %c0_99, %c0_100] : memref<3x1x64xf32, #tpu.memory_space<vmem>>, vector<1x1x64xf32>
    %69 = vector.shape_cast %68 : vector<1x1x64xf32> to vector<1x64xf32>
    %c0_101 = arith.constant 0 : index
    %c0_102 = arith.constant 0 : index
    %c0_103 = arith.constant 0 : index
    %70 = vector.load %arg20[%c0_101, %c0_102, %c0_103] : memref<3x64x32xbf16, #tpu.memory_space<vmem>>, vector<1x64x32xbf16>
    %71 = vector.shape_cast %70 : vector<1x64x32xbf16> to vector<64x32xbf16>
    %c0_104 = arith.constant 0 : index
    %c0_105 = arith.constant 0 : index
    %c0_106 = arith.constant 0 : index
    %72 = vector.load %arg21[%c0_104, %c0_105, %c0_106] : memref<3x1x32xf32, #tpu.memory_space<vmem>>, vector<1x1x32xf32>
    %73 = vector.shape_cast %72 : vector<1x1x32xf32> to vector<1x32xf32>
    %c0_107 = arith.constant 0 : index
    %c0_108 = arith.constant 0 : index
    %c0_109 = arith.constant 0 : index
    %74 = vector.load %arg22[%c0_107, %c0_108, %c0_109] : memref<3x1x32xf32, #tpu.memory_space<vmem>>, vector<1x1x32xf32>
    %75 = vector.shape_cast %74 : vector<1x1x32xf32> to vector<1x32xf32>
    %c0_110 = arith.constant 0 : index
    %c0_111 = arith.constant 0 : index
    %c0_112 = arith.constant 0 : index
    %76 = vector.load %arg23[%c0_110, %c0_111, %c0_112] : memref<3x1x32xf32, #tpu.memory_space<vmem>>, vector<1x1x32xf32>
    %77 = vector.shape_cast %76 : vector<1x1x32xf32> to vector<1x32xf32>
    %c4 = arith.constant 4 : index
    %c0_113 = arith.constant 0 : index
    %c0_114 = arith.constant 0 : index
    %78 = vector.load %arg8[%c4, %c0_113, %c0_114] : memref<12x32x8xbf16, #tpu.memory_space<vmem>>, vector<1x32x8xbf16>
    %79 = vector.shape_cast %78 : vector<1x32x8xbf16> to vector<32x8xbf16>
    %c4_115 = arith.constant 4 : index
    %c0_116 = arith.constant 0 : index
    %c0_117 = arith.constant 0 : index
    %80 = vector.load %arg9[%c4_115, %c0_116, %c0_117] : memref<12x1x8xf32, #tpu.memory_space<vmem>>, vector<1x1x8xf32>
    %81 = vector.shape_cast %80 : vector<1x1x8xf32> to vector<1x8xf32>
    %c4_118 = arith.constant 4 : index
    %c0_119 = arith.constant 0 : index
    %c0_120 = arith.constant 0 : index
    %82 = vector.load %arg10[%c4_118, %c0_119, %c0_120] : memref<12x32x8xbf16, #tpu.memory_space<vmem>>, vector<1x32x8xbf16>
    %83 = vector.shape_cast %82 : vector<1x32x8xbf16> to vector<32x8xbf16>
    %c4_121 = arith.constant 4 : index
    %c0_122 = arith.constant 0 : index
    %c0_123 = arith.constant 0 : index
    %84 = vector.load %arg11[%c4_121, %c0_122, %c0_123] : memref<12x1x8xf32, #tpu.memory_space<vmem>>, vector<1x1x8xf32>
    %85 = vector.shape_cast %84 : vector<1x1x8xf32> to vector<1x8xf32>
    %c4_124 = arith.constant 4 : index
    %c0_125 = arith.constant 0 : index
    %c0_126 = arith.constant 0 : index
    %86 = vector.load %arg12[%c4_124, %c0_125, %c0_126] : memref<12x32x8xbf16, #tpu.memory_space<vmem>>, vector<1x32x8xbf16>
    %87 = vector.shape_cast %86 : vector<1x32x8xbf16> to vector<32x8xbf16>
    %c4_127 = arith.constant 4 : index
    %c0_128 = arith.constant 0 : index
    %c0_129 = arith.constant 0 : index
    %88 = vector.load %arg13[%c4_127, %c0_128, %c0_129] : memref<12x1x8xf32, #tpu.memory_space<vmem>>, vector<1x1x8xf32>
    %89 = vector.shape_cast %88 : vector<1x1x8xf32> to vector<1x8xf32>
    %c4_130 = arith.constant 4 : index
    %c0_131 = arith.constant 0 : index
    %c0_132 = arith.constant 0 : index
    %90 = vector.load %arg14[%c4_130, %c0_131, %c0_132] : memref<12x8x32xbf16, #tpu.memory_space<vmem>>, vector<1x8x32xbf16>
    %91 = vector.shape_cast %90 : vector<1x8x32xbf16> to vector<8x32xbf16>
    %c5 = arith.constant 5 : index
    %c0_133 = arith.constant 0 : index
    %c0_134 = arith.constant 0 : index
    %92 = vector.load %arg8[%c5, %c0_133, %c0_134] : memref<12x32x8xbf16, #tpu.memory_space<vmem>>, vector<1x32x8xbf16>
    %93 = vector.shape_cast %92 : vector<1x32x8xbf16> to vector<32x8xbf16>
    %c5_135 = arith.constant 5 : index
    %c0_136 = arith.constant 0 : index
    %c0_137 = arith.constant 0 : index
    %94 = vector.load %arg9[%c5_135, %c0_136, %c0_137] : memref<12x1x8xf32, #tpu.memory_space<vmem>>, vector<1x1x8xf32>
    %95 = vector.shape_cast %94 : vector<1x1x8xf32> to vector<1x8xf32>
    %c5_138 = arith.constant 5 : index
    %c0_139 = arith.constant 0 : index
    %c0_140 = arith.constant 0 : index
    %96 = vector.load %arg10[%c5_138, %c0_139, %c0_140] : memref<12x32x8xbf16, #tpu.memory_space<vmem>>, vector<1x32x8xbf16>
    %97 = vector.shape_cast %96 : vector<1x32x8xbf16> to vector<32x8xbf16>
    %c5_141 = arith.constant 5 : index
    %c0_142 = arith.constant 0 : index
    %c0_143 = arith.constant 0 : index
    %98 = vector.load %arg11[%c5_141, %c0_142, %c0_143] : memref<12x1x8xf32, #tpu.memory_space<vmem>>, vector<1x1x8xf32>
    %99 = vector.shape_cast %98 : vector<1x1x8xf32> to vector<1x8xf32>
    %c5_144 = arith.constant 5 : index
    %c0_145 = arith.constant 0 : index
    %c0_146 = arith.constant 0 : index
    %100 = vector.load %arg12[%c5_144, %c0_145, %c0_146] : memref<12x32x8xbf16, #tpu.memory_space<vmem>>, vector<1x32x8xbf16>
    %101 = vector.shape_cast %100 : vector<1x32x8xbf16> to vector<32x8xbf16>
    %c5_147 = arith.constant 5 : index
    %c0_148 = arith.constant 0 : index
    %c0_149 = arith.constant 0 : index
    %102 = vector.load %arg13[%c5_147, %c0_148, %c0_149] : memref<12x1x8xf32, #tpu.memory_space<vmem>>, vector<1x1x8xf32>
    %103 = vector.shape_cast %102 : vector<1x1x8xf32> to vector<1x8xf32>
    %c5_150 = arith.constant 5 : index
    %c0_151 = arith.constant 0 : index
    %c0_152 = arith.constant 0 : index
    %104 = vector.load %arg14[%c5_150, %c0_151, %c0_152] : memref<12x8x32xbf16, #tpu.memory_space<vmem>>, vector<1x8x32xbf16>
    %105 = vector.shape_cast %104 : vector<1x8x32xbf16> to vector<8x32xbf16>
    %c6 = arith.constant 6 : index
    %c0_153 = arith.constant 0 : index
    %c0_154 = arith.constant 0 : index
    %106 = vector.load %arg8[%c6, %c0_153, %c0_154] : memref<12x32x8xbf16, #tpu.memory_space<vmem>>, vector<1x32x8xbf16>
    %107 = vector.shape_cast %106 : vector<1x32x8xbf16> to vector<32x8xbf16>
    %c6_155 = arith.constant 6 : index
    %c0_156 = arith.constant 0 : index
    %c0_157 = arith.constant 0 : index
    %108 = vector.load %arg9[%c6_155, %c0_156, %c0_157] : memref<12x1x8xf32, #tpu.memory_space<vmem>>, vector<1x1x8xf32>
    %109 = vector.shape_cast %108 : vector<1x1x8xf32> to vector<1x8xf32>
    %c6_158 = arith.constant 6 : index
    %c0_159 = arith.constant 0 : index
    %c0_160 = arith.constant 0 : index
    %110 = vector.load %arg10[%c6_158, %c0_159, %c0_160] : memref<12x32x8xbf16, #tpu.memory_space<vmem>>, vector<1x32x8xbf16>
    %111 = vector.shape_cast %110 : vector<1x32x8xbf16> to vector<32x8xbf16>
    %c6_161 = arith.constant 6 : index
    %c0_162 = arith.constant 0 : index
    %c0_163 = arith.constant 0 : index
    %112 = vector.load %arg11[%c6_161, %c0_162, %c0_163] : memref<12x1x8xf32, #tpu.memory_space<vmem>>, vector<1x1x8xf32>
    %113 = vector.shape_cast %112 : vector<1x1x8xf32> to vector<1x8xf32>
    %c6_164 = arith.constant 6 : index
    %c0_165 = arith.constant 0 : index
    %c0_166 = arith.constant 0 : index
    %114 = vector.load %arg12[%c6_164, %c0_165, %c0_166] : memref<12x32x8xbf16, #tpu.memory_space<vmem>>, vector<1x32x8xbf16>
    %115 = vector.shape_cast %114 : vector<1x32x8xbf16> to vector<32x8xbf16>
    %c6_167 = arith.constant 6 : index
    %c0_168 = arith.constant 0 : index
    %c0_169 = arith.constant 0 : index
    %116 = vector.load %arg13[%c6_167, %c0_168, %c0_169] : memref<12x1x8xf32, #tpu.memory_space<vmem>>, vector<1x1x8xf32>
    %117 = vector.shape_cast %116 : vector<1x1x8xf32> to vector<1x8xf32>
    %c6_170 = arith.constant 6 : index
    %c0_171 = arith.constant 0 : index
    %c0_172 = arith.constant 0 : index
    %118 = vector.load %arg14[%c6_170, %c0_171, %c0_172] : memref<12x8x32xbf16, #tpu.memory_space<vmem>>, vector<1x8x32xbf16>
    %119 = vector.shape_cast %118 : vector<1x8x32xbf16> to vector<8x32xbf16>
    %c7 = arith.constant 7 : index
    %c0_173 = arith.constant 0 : index
    %c0_174 = arith.constant 0 : index
    %120 = vector.load %arg8[%c7, %c0_173, %c0_174] : memref<12x32x8xbf16, #tpu.memory_space<vmem>>, vector<1x32x8xbf16>
    %121 = vector.shape_cast %120 : vector<1x32x8xbf16> to vector<32x8xbf16>
    %c7_175 = arith.constant 7 : index
    %c0_176 = arith.constant 0 : index
    %c0_177 = arith.constant 0 : index
    %122 = vector.load %arg9[%c7_175, %c0_176, %c0_177] : memref<12x1x8xf32, #tpu.memory_space<vmem>>, vector<1x1x8xf32>
    %123 = vector.shape_cast %122 : vector<1x1x8xf32> to vector<1x8xf32>
    %c7_178 = arith.constant 7 : index
    %c0_179 = arith.constant 0 : index
    %c0_180 = arith.constant 0 : index
    %124 = vector.load %arg10[%c7_178, %c0_179, %c0_180] : memref<12x32x8xbf16, #tpu.memory_space<vmem>>, vector<1x32x8xbf16>
    %125 = vector.shape_cast %124 : vector<1x32x8xbf16> to vector<32x8xbf16>
    %c7_181 = arith.constant 7 : index
    %c0_182 = arith.constant 0 : index
    %c0_183 = arith.constant 0 : index
    %126 = vector.load %arg11[%c7_181, %c0_182, %c0_183] : memref<12x1x8xf32, #tpu.memory_space<vmem>>, vector<1x1x8xf32>
    %127 = vector.shape_cast %126 : vector<1x1x8xf32> to vector<1x8xf32>
    %c7_184 = arith.constant 7 : index
    %c0_185 = arith.constant 0 : index
    %c0_186 = arith.constant 0 : index
    %128 = vector.load %arg12[%c7_184, %c0_185, %c0_186] : memref<12x32x8xbf16, #tpu.memory_space<vmem>>, vector<1x32x8xbf16>
    %129 = vector.shape_cast %128 : vector<1x32x8xbf16> to vector<32x8xbf16>
    %c7_187 = arith.constant 7 : index
    %c0_188 = arith.constant 0 : index
    %c0_189 = arith.constant 0 : index
    %130 = vector.load %arg13[%c7_187, %c0_188, %c0_189] : memref<12x1x8xf32, #tpu.memory_space<vmem>>, vector<1x1x8xf32>
    %131 = vector.shape_cast %130 : vector<1x1x8xf32> to vector<1x8xf32>
    %c7_190 = arith.constant 7 : index
    %c0_191 = arith.constant 0 : index
    %c0_192 = arith.constant 0 : index
    %132 = vector.load %arg14[%c7_190, %c0_191, %c0_192] : memref<12x8x32xbf16, #tpu.memory_space<vmem>>, vector<1x8x32xbf16>
    %133 = vector.shape_cast %132 : vector<1x8x32xbf16> to vector<8x32xbf16>
    %c1_193 = arith.constant 1 : index
    %c0_194 = arith.constant 0 : index
    %c0_195 = arith.constant 0 : index
    %134 = vector.load %arg15[%c1_193, %c0_194, %c0_195] : memref<3x1x32xf32, #tpu.memory_space<vmem>>, vector<1x1x32xf32>
    %135 = vector.shape_cast %134 : vector<1x1x32xf32> to vector<1x32xf32>
    %c1_196 = arith.constant 1 : index
    %c0_197 = arith.constant 0 : index
    %c0_198 = arith.constant 0 : index
    %136 = vector.load %arg16[%c1_196, %c0_197, %c0_198] : memref<3x1x32xf32, #tpu.memory_space<vmem>>, vector<1x1x32xf32>
    %137 = vector.shape_cast %136 : vector<1x1x32xf32> to vector<1x32xf32>
    %c1_199 = arith.constant 1 : index
    %c0_200 = arith.constant 0 : index
    %c0_201 = arith.constant 0 : index
    %138 = vector.load %arg17[%c1_199, %c0_200, %c0_201] : memref<3x1x32xf32, #tpu.memory_space<vmem>>, vector<1x1x32xf32>
    %139 = vector.shape_cast %138 : vector<1x1x32xf32> to vector<1x32xf32>
    %c1_202 = arith.constant 1 : index
    %c0_203 = arith.constant 0 : index
    %c0_204 = arith.constant 0 : index
    %140 = vector.load %arg18[%c1_202, %c0_203, %c0_204] : memref<3x32x64xbf16, #tpu.memory_space<vmem>>, vector<1x32x64xbf16>
    %141 = vector.shape_cast %140 : vector<1x32x64xbf16> to vector<32x64xbf16>
    %c1_205 = arith.constant 1 : index
    %c0_206 = arith.constant 0 : index
    %c0_207 = arith.constant 0 : index
    %142 = vector.load %arg19[%c1_205, %c0_206, %c0_207] : memref<3x1x64xf32, #tpu.memory_space<vmem>>, vector<1x1x64xf32>
    %143 = vector.shape_cast %142 : vector<1x1x64xf32> to vector<1x64xf32>
    %c1_208 = arith.constant 1 : index
    %c0_209 = arith.constant 0 : index
    %c0_210 = arith.constant 0 : index
    %144 = vector.load %arg20[%c1_208, %c0_209, %c0_210] : memref<3x64x32xbf16, #tpu.memory_space<vmem>>, vector<1x64x32xbf16>
    %145 = vector.shape_cast %144 : vector<1x64x32xbf16> to vector<64x32xbf16>
    %c1_211 = arith.constant 1 : index
    %c0_212 = arith.constant 0 : index
    %c0_213 = arith.constant 0 : index
    %146 = vector.load %arg21[%c1_211, %c0_212, %c0_213] : memref<3x1x32xf32, #tpu.memory_space<vmem>>, vector<1x1x32xf32>
    %147 = vector.shape_cast %146 : vector<1x1x32xf32> to vector<1x32xf32>
    %c1_214 = arith.constant 1 : index
    %c0_215 = arith.constant 0 : index
    %c0_216 = arith.constant 0 : index
    %148 = vector.load %arg22[%c1_214, %c0_215, %c0_216] : memref<3x1x32xf32, #tpu.memory_space<vmem>>, vector<1x1x32xf32>
    %149 = vector.shape_cast %148 : vector<1x1x32xf32> to vector<1x32xf32>
    %c1_217 = arith.constant 1 : index
    %c0_218 = arith.constant 0 : index
    %c0_219 = arith.constant 0 : index
    %150 = vector.load %arg23[%c1_217, %c0_218, %c0_219] : memref<3x1x32xf32, #tpu.memory_space<vmem>>, vector<1x1x32xf32>
    %151 = vector.shape_cast %150 : vector<1x1x32xf32> to vector<1x32xf32>
    %c8 = arith.constant 8 : index
    %c0_220 = arith.constant 0 : index
    %c0_221 = arith.constant 0 : index
    %152 = vector.load %arg8[%c8, %c0_220, %c0_221] : memref<12x32x8xbf16, #tpu.memory_space<vmem>>, vector<1x32x8xbf16>
    %153 = vector.shape_cast %152 : vector<1x32x8xbf16> to vector<32x8xbf16>
    %c8_222 = arith.constant 8 : index
    %c0_223 = arith.constant 0 : index
    %c0_224 = arith.constant 0 : index
    %154 = vector.load %arg9[%c8_222, %c0_223, %c0_224] : memref<12x1x8xf32, #tpu.memory_space<vmem>>, vector<1x1x8xf32>
    %155 = vector.shape_cast %154 : vector<1x1x8xf32> to vector<1x8xf32>
    %c8_225 = arith.constant 8 : index
    %c0_226 = arith.constant 0 : index
    %c0_227 = arith.constant 0 : index
    %156 = vector.load %arg10[%c8_225, %c0_226, %c0_227] : memref<12x32x8xbf16, #tpu.memory_space<vmem>>, vector<1x32x8xbf16>
    %157 = vector.shape_cast %156 : vector<1x32x8xbf16> to vector<32x8xbf16>
    %c8_228 = arith.constant 8 : index
    %c0_229 = arith.constant 0 : index
    %c0_230 = arith.constant 0 : index
    %158 = vector.load %arg11[%c8_228, %c0_229, %c0_230] : memref<12x1x8xf32, #tpu.memory_space<vmem>>, vector<1x1x8xf32>
    %159 = vector.shape_cast %158 : vector<1x1x8xf32> to vector<1x8xf32>
    %c8_231 = arith.constant 8 : index
    %c0_232 = arith.constant 0 : index
    %c0_233 = arith.constant 0 : index
    %160 = vector.load %arg12[%c8_231, %c0_232, %c0_233] : memref<12x32x8xbf16, #tpu.memory_space<vmem>>, vector<1x32x8xbf16>
    %161 = vector.shape_cast %160 : vector<1x32x8xbf16> to vector<32x8xbf16>
    %c8_234 = arith.constant 8 : index
    %c0_235 = arith.constant 0 : index
    %c0_236 = arith.constant 0 : index
    %162 = vector.load %arg13[%c8_234, %c0_235, %c0_236] : memref<12x1x8xf32, #tpu.memory_space<vmem>>, vector<1x1x8xf32>
    %163 = vector.shape_cast %162 : vector<1x1x8xf32> to vector<1x8xf32>
    %c8_237 = arith.constant 8 : index
    %c0_238 = arith.constant 0 : index
    %c0_239 = arith.constant 0 : index
    %164 = vector.load %arg14[%c8_237, %c0_238, %c0_239] : memref<12x8x32xbf16, #tpu.memory_space<vmem>>, vector<1x8x32xbf16>
    %165 = vector.shape_cast %164 : vector<1x8x32xbf16> to vector<8x32xbf16>
    %c9 = arith.constant 9 : index
    %c0_240 = arith.constant 0 : index
    %c0_241 = arith.constant 0 : index
    %166 = vector.load %arg8[%c9, %c0_240, %c0_241] : memref<12x32x8xbf16, #tpu.memory_space<vmem>>, vector<1x32x8xbf16>
    %167 = vector.shape_cast %166 : vector<1x32x8xbf16> to vector<32x8xbf16>
    %c9_242 = arith.constant 9 : index
    %c0_243 = arith.constant 0 : index
    %c0_244 = arith.constant 0 : index
    %168 = vector.load %arg9[%c9_242, %c0_243, %c0_244] : memref<12x1x8xf32, #tpu.memory_space<vmem>>, vector<1x1x8xf32>
    %169 = vector.shape_cast %168 : vector<1x1x8xf32> to vector<1x8xf32>
    %c9_245 = arith.constant 9 : index
    %c0_246 = arith.constant 0 : index
    %c0_247 = arith.constant 0 : index
    %170 = vector.load %arg10[%c9_245, %c0_246, %c0_247] : memref<12x32x8xbf16, #tpu.memory_space<vmem>>, vector<1x32x8xbf16>
    %171 = vector.shape_cast %170 : vector<1x32x8xbf16> to vector<32x8xbf16>
    %c9_248 = arith.constant 9 : index
    %c0_249 = arith.constant 0 : index
    %c0_250 = arith.constant 0 : index
    %172 = vector.load %arg11[%c9_248, %c0_249, %c0_250] : memref<12x1x8xf32, #tpu.memory_space<vmem>>, vector<1x1x8xf32>
    %173 = vector.shape_cast %172 : vector<1x1x8xf32> to vector<1x8xf32>
    %c9_251 = arith.constant 9 : index
    %c0_252 = arith.constant 0 : index
    %c0_253 = arith.constant 0 : index
    %174 = vector.load %arg12[%c9_251, %c0_252, %c0_253] : memref<12x32x8xbf16, #tpu.memory_space<vmem>>, vector<1x32x8xbf16>
    %175 = vector.shape_cast %174 : vector<1x32x8xbf16> to vector<32x8xbf16>
    %c9_254 = arith.constant 9 : index
    %c0_255 = arith.constant 0 : index
    %c0_256 = arith.constant 0 : index
    %176 = vector.load %arg13[%c9_254, %c0_255, %c0_256] : memref<12x1x8xf32, #tpu.memory_space<vmem>>, vector<1x1x8xf32>
    %177 = vector.shape_cast %176 : vector<1x1x8xf32> to vector<1x8xf32>
    %c9_257 = arith.constant 9 : index
    %c0_258 = arith.constant 0 : index
    %c0_259 = arith.constant 0 : index
    %178 = vector.load %arg14[%c9_257, %c0_258, %c0_259] : memref<12x8x32xbf16, #tpu.memory_space<vmem>>, vector<1x8x32xbf16>
    %179 = vector.shape_cast %178 : vector<1x8x32xbf16> to vector<8x32xbf16>
    %c10 = arith.constant 10 : index
    %c0_260 = arith.constant 0 : index
    %c0_261 = arith.constant 0 : index
    %180 = vector.load %arg8[%c10, %c0_260, %c0_261] : memref<12x32x8xbf16, #tpu.memory_space<vmem>>, vector<1x32x8xbf16>
    %181 = vector.shape_cast %180 : vector<1x32x8xbf16> to vector<32x8xbf16>
    %c10_262 = arith.constant 10 : index
    %c0_263 = arith.constant 0 : index
    %c0_264 = arith.constant 0 : index
    %182 = vector.load %arg9[%c10_262, %c0_263, %c0_264] : memref<12x1x8xf32, #tpu.memory_space<vmem>>, vector<1x1x8xf32>
    %183 = vector.shape_cast %182 : vector<1x1x8xf32> to vector<1x8xf32>
    %c10_265 = arith.constant 10 : index
    %c0_266 = arith.constant 0 : index
    %c0_267 = arith.constant 0 : index
    %184 = vector.load %arg10[%c10_265, %c0_266, %c0_267] : memref<12x32x8xbf16, #tpu.memory_space<vmem>>, vector<1x32x8xbf16>
    %185 = vector.shape_cast %184 : vector<1x32x8xbf16> to vector<32x8xbf16>
    %c10_268 = arith.constant 10 : index
    %c0_269 = arith.constant 0 : index
    %c0_270 = arith.constant 0 : index
    %186 = vector.load %arg11[%c10_268, %c0_269, %c0_270] : memref<12x1x8xf32, #tpu.memory_space<vmem>>, vector<1x1x8xf32>
    %187 = vector.shape_cast %186 : vector<1x1x8xf32> to vector<1x8xf32>
    %c10_271 = arith.constant 10 : index
    %c0_272 = arith.constant 0 : index
    %c0_273 = arith.constant 0 : index
    %188 = vector.load %arg12[%c10_271, %c0_272, %c0_273] : memref<12x32x8xbf16, #tpu.memory_space<vmem>>, vector<1x32x8xbf16>
    %189 = vector.shape_cast %188 : vector<1x32x8xbf16> to vector<32x8xbf16>
    %c10_274 = arith.constant 10 : index
    %c0_275 = arith.constant 0 : index
    %c0_276 = arith.constant 0 : index
    %190 = vector.load %arg13[%c10_274, %c0_275, %c0_276] : memref<12x1x8xf32, #tpu.memory_space<vmem>>, vector<1x1x8xf32>
    %191 = vector.shape_cast %190 : vector<1x1x8xf32> to vector<1x8xf32>
    %c10_277 = arith.constant 10 : index
    %c0_278 = arith.constant 0 : index
    %c0_279 = arith.constant 0 : index
    %192 = vector.load %arg14[%c10_277, %c0_278, %c0_279] : memref<12x8x32xbf16, #tpu.memory_space<vmem>>, vector<1x8x32xbf16>
    %193 = vector.shape_cast %192 : vector<1x8x32xbf16> to vector<8x32xbf16>
    %c11 = arith.constant 11 : index
    %c0_280 = arith.constant 0 : index
    %c0_281 = arith.constant 0 : index
    %194 = vector.load %arg8[%c11, %c0_280, %c0_281] : memref<12x32x8xbf16, #tpu.memory_space<vmem>>, vector<1x32x8xbf16>
    %195 = vector.shape_cast %194 : vector<1x32x8xbf16> to vector<32x8xbf16>
    %c11_282 = arith.constant 11 : index
    %c0_283 = arith.constant 0 : index
    %c0_284 = arith.constant 0 : index
    %196 = vector.load %arg9[%c11_282, %c0_283, %c0_284] : memref<12x1x8xf32, #tpu.memory_space<vmem>>, vector<1x1x8xf32>
    %197 = vector.shape_cast %196 : vector<1x1x8xf32> to vector<1x8xf32>
    %c11_285 = arith.constant 11 : index
    %c0_286 = arith.constant 0 : index
    %c0_287 = arith.constant 0 : index
    %198 = vector.load %arg10[%c11_285, %c0_286, %c0_287] : memref<12x32x8xbf16, #tpu.memory_space<vmem>>, vector<1x32x8xbf16>
    %199 = vector.shape_cast %198 : vector<1x32x8xbf16> to vector<32x8xbf16>
    %c11_288 = arith.constant 11 : index
    %c0_289 = arith.constant 0 : index
    %c0_290 = arith.constant 0 : index
    %200 = vector.load %arg11[%c11_288, %c0_289, %c0_290] : memref<12x1x8xf32, #tpu.memory_space<vmem>>, vector<1x1x8xf32>
    %201 = vector.shape_cast %200 : vector<1x1x8xf32> to vector<1x8xf32>
    %c11_291 = arith.constant 11 : index
    %c0_292 = arith.constant 0 : index
    %c0_293 = arith.constant 0 : index
    %202 = vector.load %arg12[%c11_291, %c0_292, %c0_293] : memref<12x32x8xbf16, #tpu.memory_space<vmem>>, vector<1x32x8xbf16>
    %203 = vector.shape_cast %202 : vector<1x32x8xbf16> to vector<32x8xbf16>
    %c11_294 = arith.constant 11 : index
    %c0_295 = arith.constant 0 : index
    %c0_296 = arith.constant 0 : index
    %204 = vector.load %arg13[%c11_294, %c0_295, %c0_296] : memref<12x1x8xf32, #tpu.memory_space<vmem>>, vector<1x1x8xf32>
    %205 = vector.shape_cast %204 : vector<1x1x8xf32> to vector<1x8xf32>
    %c11_297 = arith.constant 11 : index
    %c0_298 = arith.constant 0 : index
    %c0_299 = arith.constant 0 : index
    %206 = vector.load %arg14[%c11_297, %c0_298, %c0_299] : memref<12x8x32xbf16, #tpu.memory_space<vmem>>, vector<1x8x32xbf16>
    %207 = vector.shape_cast %206 : vector<1x8x32xbf16> to vector<8x32xbf16>
    %c2_300 = arith.constant 2 : index
    %c0_301 = arith.constant 0 : index
    %c0_302 = arith.constant 0 : index
    %208 = vector.load %arg15[%c2_300, %c0_301, %c0_302] : memref<3x1x32xf32, #tpu.memory_space<vmem>>, vector<1x1x32xf32>
    %209 = vector.shape_cast %208 : vector<1x1x32xf32> to vector<1x32xf32>
    %c2_303 = arith.constant 2 : index
    %c0_304 = arith.constant 0 : index
    %c0_305 = arith.constant 0 : index
    %210 = vector.load %arg16[%c2_303, %c0_304, %c0_305] : memref<3x1x32xf32, #tpu.memory_space<vmem>>, vector<1x1x32xf32>
    %211 = vector.shape_cast %210 : vector<1x1x32xf32> to vector<1x32xf32>
    %c2_306 = arith.constant 2 : index
    %c0_307 = arith.constant 0 : index
    %c0_308 = arith.constant 0 : index
    %212 = vector.load %arg17[%c2_306, %c0_307, %c0_308] : memref<3x1x32xf32, #tpu.memory_space<vmem>>, vector<1x1x32xf32>
    %213 = vector.shape_cast %212 : vector<1x1x32xf32> to vector<1x32xf32>
    %c2_309 = arith.constant 2 : index
    %c0_310 = arith.constant 0 : index
    %c0_311 = arith.constant 0 : index
    %214 = vector.load %arg18[%c2_309, %c0_310, %c0_311] : memref<3x32x64xbf16, #tpu.memory_space<vmem>>, vector<1x32x64xbf16>
    %215 = vector.shape_cast %214 : vector<1x32x64xbf16> to vector<32x64xbf16>
    %c2_312 = arith.constant 2 : index
    %c0_313 = arith.constant 0 : index
    %c0_314 = arith.constant 0 : index
    %216 = vector.load %arg19[%c2_312, %c0_313, %c0_314] : memref<3x1x64xf32, #tpu.memory_space<vmem>>, vector<1x1x64xf32>
    %217 = vector.shape_cast %216 : vector<1x1x64xf32> to vector<1x64xf32>
    %c2_315 = arith.constant 2 : index
    %c0_316 = arith.constant 0 : index
    %c0_317 = arith.constant 0 : index
    %218 = vector.load %arg20[%c2_315, %c0_316, %c0_317] : memref<3x64x32xbf16, #tpu.memory_space<vmem>>, vector<1x64x32xbf16>
    %219 = vector.shape_cast %218 : vector<1x64x32xbf16> to vector<64x32xbf16>
    %c2_318 = arith.constant 2 : index
    %c0_319 = arith.constant 0 : index
    %c0_320 = arith.constant 0 : index
    %220 = vector.load %arg21[%c2_318, %c0_319, %c0_320] : memref<3x1x32xf32, #tpu.memory_space<vmem>>, vector<1x1x32xf32>
    %221 = vector.shape_cast %220 : vector<1x1x32xf32> to vector<1x32xf32>
    %c2_321 = arith.constant 2 : index
    %c0_322 = arith.constant 0 : index
    %c0_323 = arith.constant 0 : index
    %222 = vector.load %arg22[%c2_321, %c0_322, %c0_323] : memref<3x1x32xf32, #tpu.memory_space<vmem>>, vector<1x1x32xf32>
    %223 = vector.shape_cast %222 : vector<1x1x32xf32> to vector<1x32xf32>
    %c2_324 = arith.constant 2 : index
    %c0_325 = arith.constant 0 : index
    %c0_326 = arith.constant 0 : index
    %224 = vector.load %arg23[%c2_324, %c0_325, %c0_326] : memref<3x1x32xf32, #tpu.memory_space<vmem>>, vector<1x1x32xf32>
    %225 = vector.shape_cast %224 : vector<1x1x32xf32> to vector<1x32xf32>
    %c0_327 = arith.constant 0 : index
    %c0_328 = arith.constant 0 : index
    %226 = vector.load %arg1[%c0_327, %c0_328] : memref<16x32xf32, #tpu.memory_space<vmem>>, vector<16x32xf32>
    %227 = arith.truncf %226 : vector<16x32xf32> to vector<16x32xbf16>
    %cst = arith.constant dense<0.000000e+00> : vector<16x8xf32>
    %228 = tpu.matmul %227, %5, %cst {dimension_numbers = #tpu.dot_dimension_numbers<[1], [0], [0], [1], [0, 0, 1, 1], [], []>} : vector<16x32xbf16>, vector<32x8xbf16>, vector<16x8xf32> -> vector<16x8xf32>
    %229 = vector.broadcast %7 : vector<1x8xf32> to vector<16x8xf32>
    %230 = arith.addf %228, %229 : vector<16x8xf32>
    %cst_329 = arith.constant dense<0.000000e+00> : vector<16x8xf32>
    %231 = tpu.matmul %227, %9, %cst_329 {dimension_numbers = #tpu.dot_dimension_numbers<[1], [0], [0], [1], [0, 0, 1, 1], [], []>} : vector<16x32xbf16>, vector<32x8xbf16>, vector<16x8xf32> -> vector<16x8xf32>
    %232 = vector.broadcast %11 : vector<1x8xf32> to vector<16x8xf32>
    %233 = arith.addf %231, %232 : vector<16x8xf32>
    %cst_330 = arith.constant dense<0.000000e+00> : vector<16x8xf32>
    %234 = tpu.matmul %227, %13, %cst_330 {dimension_numbers = #tpu.dot_dimension_numbers<[1], [0], [0], [1], [0, 0, 1, 1], [], []>} : vector<16x32xbf16>, vector<32x8xbf16>, vector<16x8xf32> -> vector<16x8xf32>
    %235 = vector.broadcast %15 : vector<1x8xf32> to vector<16x8xf32>
    %236 = arith.addf %234, %235 : vector<16x8xf32>
    %237 = arith.truncf %230 : vector<16x8xf32> to vector<16x8xbf16>
    %238 = arith.truncf %233 : vector<16x8xf32> to vector<16x8xbf16>
    %cst_331 = arith.constant dense<0.000000e+00> : vector<16x16xf32>
    %239 = tpu.matmul %237, %238, %cst_331 {dimension_numbers = #tpu.dot_dimension_numbers<[1], [1], [0], [0], [0, 0, 1, 0], [], []>} : vector<16x8xbf16>, vector<16x8xbf16>, vector<16x16xf32> -> vector<16x16xf32>
    %cst_332 = arith.constant 0.353553385 : f32
    %240 = vector.broadcast %cst_332 : f32 to vector<16x16xf32>
    %241 = arith.mulf %239, %240 : vector<16x16xf32>
    %242 = arith.addf %241, %1 : vector<16x16xf32>
    %cst_333 = arith.constant dense<0xFF800000> : vector<16xf32>
    %243 = vector.multi_reduction <maximumf>, %242, %cst_333 [1] : vector<16x16xf32> to vector<16xf32>
    %244 = vector.shape_cast %243 : vector<16xf32> to vector<16x1xf32>
    %245 = vector.broadcast %244 : vector<16x1xf32> to vector<16x16xf32>
    %246 = arith.subf %242, %245 : vector<16x16xf32>
    %247 = math.exp %246 : vector<16x16xf32>
    %cst_334 = arith.constant dense<0.000000e+00> : vector<16xf32>
    %248 = vector.multi_reduction <add>, %247, %cst_334 [1] : vector<16x16xf32> to vector<16xf32>
    %249 = vector.shape_cast %248 : vector<16xf32> to vector<16x1xf32>
    %250 = tpu.reciprocal %249 {approx = true} : vector<16x1xf32> -> vector<16x1xf32>
    %251 = vector.broadcast %250 : vector<16x1xf32> to vector<16x16xf32>
    %252 = arith.mulf %247, %251 : vector<16x16xf32>
    %253 = arith.truncf %252 : vector<16x16xf32> to vector<16x16xbf16>
    %254 = arith.truncf %236 : vector<16x8xf32> to vector<16x8xbf16>
    %cst_335 = arith.constant dense<0.000000e+00> : vector<16x8xf32>
    %255 = tpu.matmul %253, %254, %cst_335 {dimension_numbers = #tpu.dot_dimension_numbers<[1], [0], [0], [1], [0, 0, 1, 1], [], []>} : vector<16x16xbf16>, vector<16x8xbf16>, vector<16x8xf32> -> vector<16x8xf32>
    %256 = arith.truncf %255 : vector<16x8xf32> to vector<16x8xbf16>
    %cst_336 = arith.constant dense<0.000000e+00> : vector<16x32xf32>
    %257 = tpu.matmul %256, %17, %cst_336 {dimension_numbers = #tpu.dot_dimension_numbers<[1], [0], [0], [1], [0, 0, 1, 1], [], []>} : vector<16x8xbf16>, vector<8x32xbf16>, vector<16x32xf32> -> vector<16x32xf32>
    %cst_337 = arith.constant dense<0.000000e+00> : vector<16x8xf32>
    %258 = tpu.matmul %227, %19, %cst_337 {dimension_numbers = #tpu.dot_dimension_numbers<[1], [0], [0], [1], [0, 0, 1, 1], [], []>} : vector<16x32xbf16>, vector<32x8xbf16>, vector<16x8xf32> -> vector<16x8xf32>
    %259 = vector.broadcast %21 : vector<1x8xf32> to vector<16x8xf32>
    %260 = arith.addf %258, %259 : vector<16x8xf32>
    %cst_338 = arith.constant dense<0.000000e+00> : vector<16x8xf32>
    %261 = tpu.matmul %227, %23, %cst_338 {dimension_numbers = #tpu.dot_dimension_numbers<[1], [0], [0], [1], [0, 0, 1, 1], [], []>} : vector<16x32xbf16>, vector<32x8xbf16>, vector<16x8xf32> -> vector<16x8xf32>
    %262 = vector.broadcast %25 : vector<1x8xf32> to vector<16x8xf32>
    %263 = arith.addf %261, %262 : vector<16x8xf32>
    %cst_339 = arith.constant dense<0.000000e+00> : vector<16x8xf32>
    %264 = tpu.matmul %227, %27, %cst_339 {dimension_numbers = #tpu.dot_dimension_numbers<[1], [0], [0], [1], [0, 0, 1, 1], [], []>} : vector<16x32xbf16>, vector<32x8xbf16>, vector<16x8xf32> -> vector<16x8xf32>
    %265 = vector.broadcast %29 : vector<1x8xf32> to vector<16x8xf32>
    %266 = arith.addf %264, %265 : vector<16x8xf32>
    %267 = arith.truncf %260 : vector<16x8xf32> to vector<16x8xbf16>
    %268 = arith.truncf %263 : vector<16x8xf32> to vector<16x8xbf16>
    %cst_340 = arith.constant dense<0.000000e+00> : vector<16x16xf32>
    %269 = tpu.matmul %267, %268, %cst_340 {dimension_numbers = #tpu.dot_dimension_numbers<[1], [1], [0], [0], [0, 0, 1, 0], [], []>} : vector<16x8xbf16>, vector<16x8xbf16>, vector<16x16xf32> -> vector<16x16xf32>
    %cst_341 = arith.constant 0.353553385 : f32
    %270 = vector.broadcast %cst_341 : f32 to vector<16x16xf32>
    %271 = arith.mulf %269, %270 : vector<16x16xf32>
    %272 = arith.addf %271, %1 : vector<16x16xf32>
    %cst_342 = arith.constant dense<0xFF800000> : vector<16xf32>
    %273 = vector.multi_reduction <maximumf>, %272, %cst_342 [1] : vector<16x16xf32> to vector<16xf32>
    %274 = vector.shape_cast %273 : vector<16xf32> to vector<16x1xf32>
    %275 = vector.broadcast %274 : vector<16x1xf32> to vector<16x16xf32>
    %276 = arith.subf %272, %275 : vector<16x16xf32>
    %277 = math.exp %276 : vector<16x16xf32>
    %cst_343 = arith.constant dense<0.000000e+00> : vector<16xf32>
    %278 = vector.multi_reduction <add>, %277, %cst_343 [1] : vector<16x16xf32> to vector<16xf32>
    %279 = vector.shape_cast %278 : vector<16xf32> to vector<16x1xf32>
    %280 = tpu.reciprocal %279 {approx = true} : vector<16x1xf32> -> vector<16x1xf32>
    %281 = vector.broadcast %280 : vector<16x1xf32> to vector<16x16xf32>
    %282 = arith.mulf %277, %281 : vector<16x16xf32>
    %283 = arith.truncf %282 : vector<16x16xf32> to vector<16x16xbf16>
    %284 = arith.truncf %266 : vector<16x8xf32> to vector<16x8xbf16>
    %cst_344 = arith.constant dense<0.000000e+00> : vector<16x8xf32>
    %285 = tpu.matmul %283, %284, %cst_344 {dimension_numbers = #tpu.dot_dimension_numbers<[1], [0], [0], [1], [0, 0, 1, 1], [], []>} : vector<16x16xbf16>, vector<16x8xbf16>, vector<16x8xf32> -> vector<16x8xf32>
    %286 = arith.truncf %285 : vector<16x8xf32> to vector<16x8xbf16>
    %cst_345 = arith.constant dense<0.000000e+00> : vector<16x32xf32>
    %287 = tpu.matmul %286, %31, %cst_345 {dimension_numbers = #tpu.dot_dimension_numbers<[1], [0], [0], [1], [0, 0, 1, 1], [], []>} : vector<16x8xbf16>, vector<8x32xbf16>, vector<16x32xf32> -> vector<16x32xf32>
    %288 = arith.addf %257, %287 : vector<16x32xf32>
    %cst_346 = arith.constant dense<0.000000e+00> : vector<16x8xf32>
    %289 = tpu.matmul %227, %33, %cst_346 {dimension_numbers = #tpu.dot_dimension_numbers<[1], [0], [0], [1], [0, 0, 1, 1], [], []>} : vector<16x32xbf16>, vector<32x8xbf16>, vector<16x8xf32> -> vector<16x8xf32>
    %290 = vector.broadcast %35 : vector<1x8xf32> to vector<16x8xf32>
    %291 = arith.addf %289, %290 : vector<16x8xf32>
    %cst_347 = arith.constant dense<0.000000e+00> : vector<16x8xf32>
    %292 = tpu.matmul %227, %37, %cst_347 {dimension_numbers = #tpu.dot_dimension_numbers<[1], [0], [0], [1], [0, 0, 1, 1], [], []>} : vector<16x32xbf16>, vector<32x8xbf16>, vector<16x8xf32> -> vector<16x8xf32>
    %293 = vector.broadcast %39 : vector<1x8xf32> to vector<16x8xf32>
    %294 = arith.addf %292, %293 : vector<16x8xf32>
    %cst_348 = arith.constant dense<0.000000e+00> : vector<16x8xf32>
    %295 = tpu.matmul %227, %41, %cst_348 {dimension_numbers = #tpu.dot_dimension_numbers<[1], [0], [0], [1], [0, 0, 1, 1], [], []>} : vector<16x32xbf16>, vector<32x8xbf16>, vector<16x8xf32> -> vector<16x8xf32>
    %296 = vector.broadcast %43 : vector<1x8xf32> to vector<16x8xf32>
    %297 = arith.addf %295, %296 : vector<16x8xf32>
    %298 = arith.truncf %291 : vector<16x8xf32> to vector<16x8xbf16>
    %299 = arith.truncf %294 : vector<16x8xf32> to vector<16x8xbf16>
    %cst_349 = arith.constant dense<0.000000e+00> : vector<16x16xf32>
    %300 = tpu.matmul %298, %299, %cst_349 {dimension_numbers = #tpu.dot_dimension_numbers<[1], [1], [0], [0], [0, 0, 1, 0], [], []>} : vector<16x8xbf16>, vector<16x8xbf16>, vector<16x16xf32> -> vector<16x16xf32>
    %cst_350 = arith.constant 0.353553385 : f32
    %301 = vector.broadcast %cst_350 : f32 to vector<16x16xf32>
    %302 = arith.mulf %300, %301 : vector<16x16xf32>
    %303 = arith.addf %302, %1 : vector<16x16xf32>
    %cst_351 = arith.constant dense<0xFF800000> : vector<16xf32>
    %304 = vector.multi_reduction <maximumf>, %303, %cst_351 [1] : vector<16x16xf32> to vector<16xf32>
    %305 = vector.shape_cast %304 : vector<16xf32> to vector<16x1xf32>
    %306 = vector.broadcast %305 : vector<16x1xf32> to vector<16x16xf32>
    %307 = arith.subf %303, %306 : vector<16x16xf32>
    %308 = math.exp %307 : vector<16x16xf32>
    %cst_352 = arith.constant dense<0.000000e+00> : vector<16xf32>
    %309 = vector.multi_reduction <add>, %308, %cst_352 [1] : vector<16x16xf32> to vector<16xf32>
    %310 = vector.shape_cast %309 : vector<16xf32> to vector<16x1xf32>
    %311 = tpu.reciprocal %310 {approx = true} : vector<16x1xf32> -> vector<16x1xf32>
    %312 = vector.broadcast %311 : vector<16x1xf32> to vector<16x16xf32>
    %313 = arith.mulf %308, %312 : vector<16x16xf32>
    %314 = arith.truncf %313 : vector<16x16xf32> to vector<16x16xbf16>
    %315 = arith.truncf %297 : vector<16x8xf32> to vector<16x8xbf16>
    %cst_353 = arith.constant dense<0.000000e+00> : vector<16x8xf32>
    %316 = tpu.matmul %314, %315, %cst_353 {dimension_numbers = #tpu.dot_dimension_numbers<[1], [0], [0], [1], [0, 0, 1, 1], [], []>} : vector<16x16xbf16>, vector<16x8xbf16>, vector<16x8xf32> -> vector<16x8xf32>
    %317 = arith.truncf %316 : vector<16x8xf32> to vector<16x8xbf16>
    %cst_354 = arith.constant dense<0.000000e+00> : vector<16x32xf32>
    %318 = tpu.matmul %317, %45, %cst_354 {dimension_numbers = #tpu.dot_dimension_numbers<[1], [0], [0], [1], [0, 0, 1, 1], [], []>} : vector<16x8xbf16>, vector<8x32xbf16>, vector<16x32xf32> -> vector<16x32xf32>
    %319 = arith.addf %288, %318 : vector<16x32xf32>
    %cst_355 = arith.constant dense<0.000000e+00> : vector<16x8xf32>
    %320 = tpu.matmul %227, %47, %cst_355 {dimension_numbers = #tpu.dot_dimension_numbers<[1], [0], [0], [1], [0, 0, 1, 1], [], []>} : vector<16x32xbf16>, vector<32x8xbf16>, vector<16x8xf32> -> vector<16x8xf32>
    %321 = vector.broadcast %49 : vector<1x8xf32> to vector<16x8xf32>
    %322 = arith.addf %320, %321 : vector<16x8xf32>
    %cst_356 = arith.constant dense<0.000000e+00> : vector<16x8xf32>
    %323 = tpu.matmul %227, %51, %cst_356 {dimension_numbers = #tpu.dot_dimension_numbers<[1], [0], [0], [1], [0, 0, 1, 1], [], []>} : vector<16x32xbf16>, vector<32x8xbf16>, vector<16x8xf32> -> vector<16x8xf32>
    %324 = vector.broadcast %53 : vector<1x8xf32> to vector<16x8xf32>
    %325 = arith.addf %323, %324 : vector<16x8xf32>
    %cst_357 = arith.constant dense<0.000000e+00> : vector<16x8xf32>
    %326 = tpu.matmul %227, %55, %cst_357 {dimension_numbers = #tpu.dot_dimension_numbers<[1], [0], [0], [1], [0, 0, 1, 1], [], []>} : vector<16x32xbf16>, vector<32x8xbf16>, vector<16x8xf32> -> vector<16x8xf32>
    %327 = vector.broadcast %57 : vector<1x8xf32> to vector<16x8xf32>
    %328 = arith.addf %326, %327 : vector<16x8xf32>
    %329 = arith.truncf %322 : vector<16x8xf32> to vector<16x8xbf16>
    %330 = arith.truncf %325 : vector<16x8xf32> to vector<16x8xbf16>
    %cst_358 = arith.constant dense<0.000000e+00> : vector<16x16xf32>
    %331 = tpu.matmul %329, %330, %cst_358 {dimension_numbers = #tpu.dot_dimension_numbers<[1], [1], [0], [0], [0, 0, 1, 0], [], []>} : vector<16x8xbf16>, vector<16x8xbf16>, vector<16x16xf32> -> vector<16x16xf32>
    %cst_359 = arith.constant 0.353553385 : f32
    %332 = vector.broadcast %cst_359 : f32 to vector<16x16xf32>
    %333 = arith.mulf %331, %332 : vector<16x16xf32>
    %334 = arith.addf %333, %1 : vector<16x16xf32>
    %cst_360 = arith.constant dense<0xFF800000> : vector<16xf32>
    %335 = vector.multi_reduction <maximumf>, %334, %cst_360 [1] : vector<16x16xf32> to vector<16xf32>
    %336 = vector.shape_cast %335 : vector<16xf32> to vector<16x1xf32>
    %337 = vector.broadcast %336 : vector<16x1xf32> to vector<16x16xf32>
    %338 = arith.subf %334, %337 : vector<16x16xf32>
    %339 = math.exp %338 : vector<16x16xf32>
    %cst_361 = arith.constant dense<0.000000e+00> : vector<16xf32>
    %340 = vector.multi_reduction <add>, %339, %cst_361 [1] : vector<16x16xf32> to vector<16xf32>
    %341 = vector.shape_cast %340 : vector<16xf32> to vector<16x1xf32>
    %342 = tpu.reciprocal %341 {approx = true} : vector<16x1xf32> -> vector<16x1xf32>
    %343 = vector.broadcast %342 : vector<16x1xf32> to vector<16x16xf32>
    %344 = arith.mulf %339, %343 : vector<16x16xf32>
    %345 = arith.truncf %344 : vector<16x16xf32> to vector<16x16xbf16>
    %346 = arith.truncf %328 : vector<16x8xf32> to vector<16x8xbf16>
    %cst_362 = arith.constant dense<0.000000e+00> : vector<16x8xf32>
    %347 = tpu.matmul %345, %346, %cst_362 {dimension_numbers = #tpu.dot_dimension_numbers<[1], [0], [0], [1], [0, 0, 1, 1], [], []>} : vector<16x16xbf16>, vector<16x8xbf16>, vector<16x8xf32> -> vector<16x8xf32>
    %348 = arith.truncf %347 : vector<16x8xf32> to vector<16x8xbf16>
    %cst_363 = arith.constant dense<0.000000e+00> : vector<16x32xf32>
    %349 = tpu.matmul %348, %59, %cst_363 {dimension_numbers = #tpu.dot_dimension_numbers<[1], [0], [0], [1], [0, 0, 1, 1], [], []>} : vector<16x8xbf16>, vector<8x32xbf16>, vector<16x32xf32> -> vector<16x32xf32>
    %350 = arith.addf %319, %349 : vector<16x32xf32>
    %351 = vector.broadcast %61 : vector<1x32xf32> to vector<16x32xf32>
    %352 = arith.addf %350, %351 : vector<16x32xf32>
    %353 = arith.addf %226, %352 : vector<16x32xf32>
    %cst_364 = arith.constant dense<0.000000e+00> : vector<16xf32>
    %354 = vector.multi_reduction <add>, %353, %cst_364 [1] : vector<16x32xf32> to vector<16xf32>
    %355 = vector.shape_cast %354 : vector<16xf32> to vector<16x1xf32>
    %cst_365 = arith.constant 3.200000e+01 : f32
    %356 = vector.broadcast %cst_365 : f32 to vector<16x1xf32>
    %357 = arith.divf %355, %356 : vector<16x1xf32>
    %358 = vector.broadcast %357 : vector<16x1xf32> to vector<16x32xf32>
    %359 = arith.subf %353, %358 : vector<16x32xf32>
    %360 = arith.mulf %359, %359 : vector<16x32xf32>
    %cst_366 = arith.constant dense<0.000000e+00> : vector<16xf32>
    %361 = vector.multi_reduction <add>, %360, %cst_366 [1] : vector<16x32xf32> to vector<16xf32>
    %362 = vector.shape_cast %361 : vector<16xf32> to vector<16x1xf32>
    %cst_367 = arith.constant 3.200000e+01 : f32
    %363 = vector.broadcast %cst_367 : f32 to vector<16x1xf32>
    %364 = arith.divf %362, %363 : vector<16x1xf32>
    %365 = vector.broadcast %357 : vector<16x1xf32> to vector<16x32xf32>
    %366 = arith.subf %353, %365 : vector<16x32xf32>
    %cst_368 = arith.constant 9.99999996E-13 : f32
    %367 = vector.broadcast %cst_368 : f32 to vector<16x1xf32>
    %368 = arith.addf %364, %367 : vector<16x1xf32>
    %369 = math.rsqrt %368 : vector<16x1xf32>
    %370 = vector.broadcast %369 : vector<16x1xf32> to vector<16x32xf32>
    %371 = arith.mulf %366, %370 : vector<16x32xf32>
    %372 = vector.broadcast %63 : vector<1x32xf32> to vector<16x32xf32>
    %373 = arith.mulf %371, %372 : vector<16x32xf32>
    %374 = vector.broadcast %65 : vector<1x32xf32> to vector<16x32xf32>
    %375 = arith.addf %373, %374 : vector<16x32xf32>
    %376 = arith.truncf %375 : vector<16x32xf32> to vector<16x32xbf16>
    %cst_369 = arith.constant dense<0.000000e+00> : vector<16x64xf32>
    %377 = tpu.matmul %376, %67, %cst_369 {dimension_numbers = #tpu.dot_dimension_numbers<[1], [0], [0], [1], [0, 0, 1, 1], [], []>} : vector<16x32xbf16>, vector<32x64xbf16>, vector<16x64xf32> -> vector<16x64xf32>
    %378 = vector.broadcast %69 : vector<1x64xf32> to vector<16x64xf32>
    %379 = arith.addf %377, %378 : vector<16x64xf32>
    %cst_370 = arith.constant 5.000000e-01 : f32
    %380 = vector.broadcast %cst_370 : f32 to vector<16x64xf32>
    %381 = arith.mulf %380, %379 : vector<16x64xf32>
    %cst_371 = arith.constant 4.471500e-02 : f32
    %382 = vector.broadcast %cst_371 : f32 to vector<16x64xf32>
    %383 = arith.mulf %382, %379 : vector<16x64xf32>
    %384 = arith.mulf %383, %379 : vector<16x64xf32>
    %385 = arith.mulf %384, %379 : vector<16x64xf32>
    %386 = arith.addf %379, %385 : vector<16x64xf32>
    %cst_372 = arith.constant 0.797884583 : f32
    %387 = vector.broadcast %cst_372 : f32 to vector<16x64xf32>
    %388 = arith.mulf %387, %386 : vector<16x64xf32>
    %389 = math.tanh %388 : vector<16x64xf32>
    %cst_373 = arith.constant 1.000000e+00 : f32
    %390 = vector.broadcast %cst_373 : f32 to vector<16x64xf32>
    %391 = arith.addf %390, %389 : vector<16x64xf32>
    %392 = arith.mulf %381, %391 : vector<16x64xf32>
    %393 = arith.truncf %392 : vector<16x64xf32> to vector<16x64xbf16>
    %cst_374 = arith.constant dense<0.000000e+00> : vector<16x32xf32>
    %394 = tpu.matmul %393, %71, %cst_374 {dimension_numbers = #tpu.dot_dimension_numbers<[1], [0], [0], [1], [0, 0, 1, 1], [], []>} : vector<16x64xbf16>, vector<64x32xbf16>, vector<16x32xf32> -> vector<16x32xf32>
    %395 = vector.broadcast %73 : vector<1x32xf32> to vector<16x32xf32>
    %396 = arith.addf %394, %395 : vector<16x32xf32>
    %397 = arith.addf %375, %396 : vector<16x32xf32>
    %cst_375 = arith.constant dense<0.000000e+00> : vector<16xf32>
    %398 = vector.multi_reduction <add>, %397, %cst_375 [1] : vector<16x32xf32> to vector<16xf32>
    %399 = vector.shape_cast %398 : vector<16xf32> to vector<16x1xf32>
    %cst_376 = arith.constant 3.200000e+01 : f32
    %400 = vector.broadcast %cst_376 : f32 to vector<16x1xf32>
    %401 = arith.divf %399, %400 : vector<16x1xf32>
    %402 = vector.broadcast %401 : vector<16x1xf32> to vector<16x32xf32>
    %403 = arith.subf %397, %402 : vector<16x32xf32>
    %404 = arith.mulf %403, %403 : vector<16x32xf32>
    %cst_377 = arith.constant dense<0.000000e+00> : vector<16xf32>
    %405 = vector.multi_reduction <add>, %404, %cst_377 [1] : vector<16x32xf32> to vector<16xf32>
    %406 = vector.shape_cast %405 : vector<16xf32> to vector<16x1xf32>
    %cst_378 = arith.constant 3.200000e+01 : f32
    %407 = vector.broadcast %cst_378 : f32 to vector<16x1xf32>
    %408 = arith.divf %406, %407 : vector<16x1xf32>
    %409 = vector.broadcast %401 : vector<16x1xf32> to vector<16x32xf32>
    %410 = arith.subf %397, %409 : vector<16x32xf32>
    %cst_379 = arith.constant 9.99999996E-13 : f32
    %411 = vector.broadcast %cst_379 : f32 to vector<16x1xf32>
    %412 = arith.addf %408, %411 : vector<16x1xf32>
    %413 = math.rsqrt %412 : vector<16x1xf32>
    %414 = vector.broadcast %413 : vector<16x1xf32> to vector<16x32xf32>
    %415 = arith.mulf %410, %414 : vector<16x32xf32>
    %416 = vector.broadcast %75 : vector<1x32xf32> to vector<16x32xf32>
    %417 = arith.mulf %415, %416 : vector<16x32xf32>
    %418 = vector.broadcast %77 : vector<1x32xf32> to vector<16x32xf32>
    %419 = arith.addf %417, %418 : vector<16x32xf32>
    %420 = arith.truncf %419 : vector<16x32xf32> to vector<16x32xbf16>
    %cst_380 = arith.constant dense<0.000000e+00> : vector<16x8xf32>
    %421 = tpu.matmul %420, %79, %cst_380 {dimension_numbers = #tpu.dot_dimension_numbers<[1], [0], [0], [1], [0, 0, 1, 1], [], []>} : vector<16x32xbf16>, vector<32x8xbf16>, vector<16x8xf32> -> vector<16x8xf32>
    %422 = vector.broadcast %81 : vector<1x8xf32> to vector<16x8xf32>
    %423 = arith.addf %421, %422 : vector<16x8xf32>
    %cst_381 = arith.constant dense<0.000000e+00> : vector<16x8xf32>
    %424 = tpu.matmul %420, %83, %cst_381 {dimension_numbers = #tpu.dot_dimension_numbers<[1], [0], [0], [1], [0, 0, 1, 1], [], []>} : vector<16x32xbf16>, vector<32x8xbf16>, vector<16x8xf32> -> vector<16x8xf32>
    %425 = vector.broadcast %85 : vector<1x8xf32> to vector<16x8xf32>
    %426 = arith.addf %424, %425 : vector<16x8xf32>
    %cst_382 = arith.constant dense<0.000000e+00> : vector<16x8xf32>
    %427 = tpu.matmul %420, %87, %cst_382 {dimension_numbers = #tpu.dot_dimension_numbers<[1], [0], [0], [1], [0, 0, 1, 1], [], []>} : vector<16x32xbf16>, vector<32x8xbf16>, vector<16x8xf32> -> vector<16x8xf32>
    %428 = vector.broadcast %89 : vector<1x8xf32> to vector<16x8xf32>
    %429 = arith.addf %427, %428 : vector<16x8xf32>
    %430 = arith.truncf %423 : vector<16x8xf32> to vector<16x8xbf16>
    %431 = arith.truncf %426 : vector<16x8xf32> to vector<16x8xbf16>
    %cst_383 = arith.constant dense<0.000000e+00> : vector<16x16xf32>
    %432 = tpu.matmul %430, %431, %cst_383 {dimension_numbers = #tpu.dot_dimension_numbers<[1], [1], [0], [0], [0, 0, 1, 0], [], []>} : vector<16x8xbf16>, vector<16x8xbf16>, vector<16x16xf32> -> vector<16x16xf32>
    %cst_384 = arith.constant 0.353553385 : f32
    %433 = vector.broadcast %cst_384 : f32 to vector<16x16xf32>
    %434 = arith.mulf %432, %433 : vector<16x16xf32>
    %435 = arith.addf %434, %1 : vector<16x16xf32>
    %cst_385 = arith.constant dense<0xFF800000> : vector<16xf32>
    %436 = vector.multi_reduction <maximumf>, %435, %cst_385 [1] : vector<16x16xf32> to vector<16xf32>
    %437 = vector.shape_cast %436 : vector<16xf32> to vector<16x1xf32>
    %438 = vector.broadcast %437 : vector<16x1xf32> to vector<16x16xf32>
    %439 = arith.subf %435, %438 : vector<16x16xf32>
    %440 = math.exp %439 : vector<16x16xf32>
    %cst_386 = arith.constant dense<0.000000e+00> : vector<16xf32>
    %441 = vector.multi_reduction <add>, %440, %cst_386 [1] : vector<16x16xf32> to vector<16xf32>
    %442 = vector.shape_cast %441 : vector<16xf32> to vector<16x1xf32>
    %443 = tpu.reciprocal %442 {approx = true} : vector<16x1xf32> -> vector<16x1xf32>
    %444 = vector.broadcast %443 : vector<16x1xf32> to vector<16x16xf32>
    %445 = arith.mulf %440, %444 : vector<16x16xf32>
    %446 = arith.truncf %445 : vector<16x16xf32> to vector<16x16xbf16>
    %447 = arith.truncf %429 : vector<16x8xf32> to vector<16x8xbf16>
    %cst_387 = arith.constant dense<0.000000e+00> : vector<16x8xf32>
    %448 = tpu.matmul %446, %447, %cst_387 {dimension_numbers = #tpu.dot_dimension_numbers<[1], [0], [0], [1], [0, 0, 1, 1], [], []>} : vector<16x16xbf16>, vector<16x8xbf16>, vector<16x8xf32> -> vector<16x8xf32>
    %449 = arith.truncf %448 : vector<16x8xf32> to vector<16x8xbf16>
    %cst_388 = arith.constant dense<0.000000e+00> : vector<16x32xf32>
    %450 = tpu.matmul %449, %91, %cst_388 {dimension_numbers = #tpu.dot_dimension_numbers<[1], [0], [0], [1], [0, 0, 1, 1], [], []>} : vector<16x8xbf16>, vector<8x32xbf16>, vector<16x32xf32> -> vector<16x32xf32>
    %cst_389 = arith.constant dense<0.000000e+00> : vector<16x8xf32>
    %451 = tpu.matmul %420, %93, %cst_389 {dimension_numbers = #tpu.dot_dimension_numbers<[1], [0], [0], [1], [0, 0, 1, 1], [], []>} : vector<16x32xbf16>, vector<32x8xbf16>, vector<16x8xf32> -> vector<16x8xf32>
    %452 = vector.broadcast %95 : vector<1x8xf32> to vector<16x8xf32>
    %453 = arith.addf %451, %452 : vector<16x8xf32>
    %cst_390 = arith.constant dense<0.000000e+00> : vector<16x8xf32>
    %454 = tpu.matmul %420, %97, %cst_390 {dimension_numbers = #tpu.dot_dimension_numbers<[1], [0], [0], [1], [0, 0, 1, 1], [], []>} : vector<16x32xbf16>, vector<32x8xbf16>, vector<16x8xf32> -> vector<16x8xf32>
    %455 = vector.broadcast %99 : vector<1x8xf32> to vector<16x8xf32>
    %456 = arith.addf %454, %455 : vector<16x8xf32>
    %cst_391 = arith.constant dense<0.000000e+00> : vector<16x8xf32>
    %457 = tpu.matmul %420, %101, %cst_391 {dimension_numbers = #tpu.dot_dimension_numbers<[1], [0], [0], [1], [0, 0, 1, 1], [], []>} : vector<16x32xbf16>, vector<32x8xbf16>, vector<16x8xf32> -> vector<16x8xf32>
    %458 = vector.broadcast %103 : vector<1x8xf32> to vector<16x8xf32>
    %459 = arith.addf %457, %458 : vector<16x8xf32>
    %460 = arith.truncf %453 : vector<16x8xf32> to vector<16x8xbf16>
    %461 = arith.truncf %456 : vector<16x8xf32> to vector<16x8xbf16>
    %cst_392 = arith.constant dense<0.000000e+00> : vector<16x16xf32>
    %462 = tpu.matmul %460, %461, %cst_392 {dimension_numbers = #tpu.dot_dimension_numbers<[1], [1], [0], [0], [0, 0, 1, 0], [], []>} : vector<16x8xbf16>, vector<16x8xbf16>, vector<16x16xf32> -> vector<16x16xf32>
    %cst_393 = arith.constant 0.353553385 : f32
    %463 = vector.broadcast %cst_393 : f32 to vector<16x16xf32>
    %464 = arith.mulf %462, %463 : vector<16x16xf32>
    %465 = arith.addf %464, %1 : vector<16x16xf32>
    %cst_394 = arith.constant dense<0xFF800000> : vector<16xf32>
    %466 = vector.multi_reduction <maximumf>, %465, %cst_394 [1] : vector<16x16xf32> to vector<16xf32>
    %467 = vector.shape_cast %466 : vector<16xf32> to vector<16x1xf32>
    %468 = vector.broadcast %467 : vector<16x1xf32> to vector<16x16xf32>
    %469 = arith.subf %465, %468 : vector<16x16xf32>
    %470 = math.exp %469 : vector<16x16xf32>
    %cst_395 = arith.constant dense<0.000000e+00> : vector<16xf32>
    %471 = vector.multi_reduction <add>, %470, %cst_395 [1] : vector<16x16xf32> to vector<16xf32>
    %472 = vector.shape_cast %471 : vector<16xf32> to vector<16x1xf32>
    %473 = tpu.reciprocal %472 {approx = true} : vector<16x1xf32> -> vector<16x1xf32>
    %474 = vector.broadcast %473 : vector<16x1xf32> to vector<16x16xf32>
    %475 = arith.mulf %470, %474 : vector<16x16xf32>
    %476 = arith.truncf %475 : vector<16x16xf32> to vector<16x16xbf16>
    %477 = arith.truncf %459 : vector<16x8xf32> to vector<16x8xbf16>
    %cst_396 = arith.constant dense<0.000000e+00> : vector<16x8xf32>
    %478 = tpu.matmul %476, %477, %cst_396 {dimension_numbers = #tpu.dot_dimension_numbers<[1], [0], [0], [1], [0, 0, 1, 1], [], []>} : vector<16x16xbf16>, vector<16x8xbf16>, vector<16x8xf32> -> vector<16x8xf32>
    %479 = arith.truncf %478 : vector<16x8xf32> to vector<16x8xbf16>
    %cst_397 = arith.constant dense<0.000000e+00> : vector<16x32xf32>
    %480 = tpu.matmul %479, %105, %cst_397 {dimension_numbers = #tpu.dot_dimension_numbers<[1], [0], [0], [1], [0, 0, 1, 1], [], []>} : vector<16x8xbf16>, vector<8x32xbf16>, vector<16x32xf32> -> vector<16x32xf32>
    %481 = arith.addf %450, %480 : vector<16x32xf32>
    %cst_398 = arith.constant dense<0.000000e+00> : vector<16x8xf32>
    %482 = tpu.matmul %420, %107, %cst_398 {dimension_numbers = #tpu.dot_dimension_numbers<[1], [0], [0], [1], [0, 0, 1, 1], [], []>} : vector<16x32xbf16>, vector<32x8xbf16>, vector<16x8xf32> -> vector<16x8xf32>
    %483 = vector.broadcast %109 : vector<1x8xf32> to vector<16x8xf32>
    %484 = arith.addf %482, %483 : vector<16x8xf32>
    %cst_399 = arith.constant dense<0.000000e+00> : vector<16x8xf32>
    %485 = tpu.matmul %420, %111, %cst_399 {dimension_numbers = #tpu.dot_dimension_numbers<[1], [0], [0], [1], [0, 0, 1, 1], [], []>} : vector<16x32xbf16>, vector<32x8xbf16>, vector<16x8xf32> -> vector<16x8xf32>
    %486 = vector.broadcast %113 : vector<1x8xf32> to vector<16x8xf32>
    %487 = arith.addf %485, %486 : vector<16x8xf32>
    %cst_400 = arith.constant dense<0.000000e+00> : vector<16x8xf32>
    %488 = tpu.matmul %420, %115, %cst_400 {dimension_numbers = #tpu.dot_dimension_numbers<[1], [0], [0], [1], [0, 0, 1, 1], [], []>} : vector<16x32xbf16>, vector<32x8xbf16>, vector<16x8xf32> -> vector<16x8xf32>
    %489 = vector.broadcast %117 : vector<1x8xf32> to vector<16x8xf32>
    %490 = arith.addf %488, %489 : vector<16x8xf32>
    %491 = arith.truncf %484 : vector<16x8xf32> to vector<16x8xbf16>
    %492 = arith.truncf %487 : vector<16x8xf32> to vector<16x8xbf16>
    %cst_401 = arith.constant dense<0.000000e+00> : vector<16x16xf32>
    %493 = tpu.matmul %491, %492, %cst_401 {dimension_numbers = #tpu.dot_dimension_numbers<[1], [1], [0], [0], [0, 0, 1, 0], [], []>} : vector<16x8xbf16>, vector<16x8xbf16>, vector<16x16xf32> -> vector<16x16xf32>
    %cst_402 = arith.constant 0.353553385 : f32
    %494 = vector.broadcast %cst_402 : f32 to vector<16x16xf32>
    %495 = arith.mulf %493, %494 : vector<16x16xf32>
    %496 = arith.addf %495, %1 : vector<16x16xf32>
    %cst_403 = arith.constant dense<0xFF800000> : vector<16xf32>
    %497 = vector.multi_reduction <maximumf>, %496, %cst_403 [1] : vector<16x16xf32> to vector<16xf32>
    %498 = vector.shape_cast %497 : vector<16xf32> to vector<16x1xf32>
    %499 = vector.broadcast %498 : vector<16x1xf32> to vector<16x16xf32>
    %500 = arith.subf %496, %499 : vector<16x16xf32>
    %501 = math.exp %500 : vector<16x16xf32>
    %cst_404 = arith.constant dense<0.000000e+00> : vector<16xf32>
    %502 = vector.multi_reduction <add>, %501, %cst_404 [1] : vector<16x16xf32> to vector<16xf32>
    %503 = vector.shape_cast %502 : vector<16xf32> to vector<16x1xf32>
    %504 = tpu.reciprocal %503 {approx = true} : vector<16x1xf32> -> vector<16x1xf32>
    %505 = vector.broadcast %504 : vector<16x1xf32> to vector<16x16xf32>
    %506 = arith.mulf %501, %505 : vector<16x16xf32>
    %507 = arith.truncf %506 : vector<16x16xf32> to vector<16x16xbf16>
    %508 = arith.truncf %490 : vector<16x8xf32> to vector<16x8xbf16>
    %cst_405 = arith.constant dense<0.000000e+00> : vector<16x8xf32>
    %509 = tpu.matmul %507, %508, %cst_405 {dimension_numbers = #tpu.dot_dimension_numbers<[1], [0], [0], [1], [0, 0, 1, 1], [], []>} : vector<16x16xbf16>, vector<16x8xbf16>, vector<16x8xf32> -> vector<16x8xf32>
    %510 = arith.truncf %509 : vector<16x8xf32> to vector<16x8xbf16>
    %cst_406 = arith.constant dense<0.000000e+00> : vector<16x32xf32>
    %511 = tpu.matmul %510, %119, %cst_406 {dimension_numbers = #tpu.dot_dimension_numbers<[1], [0], [0], [1], [0, 0, 1, 1], [], []>} : vector<16x8xbf16>, vector<8x32xbf16>, vector<16x32xf32> -> vector<16x32xf32>
    %512 = arith.addf %481, %511 : vector<16x32xf32>
    %cst_407 = arith.constant dense<0.000000e+00> : vector<16x8xf32>
    %513 = tpu.matmul %420, %121, %cst_407 {dimension_numbers = #tpu.dot_dimension_numbers<[1], [0], [0], [1], [0, 0, 1, 1], [], []>} : vector<16x32xbf16>, vector<32x8xbf16>, vector<16x8xf32> -> vector<16x8xf32>
    %514 = vector.broadcast %123 : vector<1x8xf32> to vector<16x8xf32>
    %515 = arith.addf %513, %514 : vector<16x8xf32>
    %cst_408 = arith.constant dense<0.000000e+00> : vector<16x8xf32>
    %516 = tpu.matmul %420, %125, %cst_408 {dimension_numbers = #tpu.dot_dimension_numbers<[1], [0], [0], [1], [0, 0, 1, 1], [], []>} : vector<16x32xbf16>, vector<32x8xbf16>, vector<16x8xf32> -> vector<16x8xf32>
    %517 = vector.broadcast %127 : vector<1x8xf32> to vector<16x8xf32>
    %518 = arith.addf %516, %517 : vector<16x8xf32>
    %cst_409 = arith.constant dense<0.000000e+00> : vector<16x8xf32>
    %519 = tpu.matmul %420, %129, %cst_409 {dimension_numbers = #tpu.dot_dimension_numbers<[1], [0], [0], [1], [0, 0, 1, 1], [], []>} : vector<16x32xbf16>, vector<32x8xbf16>, vector<16x8xf32> -> vector<16x8xf32>
    %520 = vector.broadcast %131 : vector<1x8xf32> to vector<16x8xf32>
    %521 = arith.addf %519, %520 : vector<16x8xf32>
    %522 = arith.truncf %515 : vector<16x8xf32> to vector<16x8xbf16>
    %523 = arith.truncf %518 : vector<16x8xf32> to vector<16x8xbf16>
    %cst_410 = arith.constant dense<0.000000e+00> : vector<16x16xf32>
    %524 = tpu.matmul %522, %523, %cst_410 {dimension_numbers = #tpu.dot_dimension_numbers<[1], [1], [0], [0], [0, 0, 1, 0], [], []>} : vector<16x8xbf16>, vector<16x8xbf16>, vector<16x16xf32> -> vector<16x16xf32>
    %cst_411 = arith.constant 0.353553385 : f32
    %525 = vector.broadcast %cst_411 : f32 to vector<16x16xf32>
    %526 = arith.mulf %524, %525 : vector<16x16xf32>
    %527 = arith.addf %526, %1 : vector<16x16xf32>
    %cst_412 = arith.constant dense<0xFF800000> : vector<16xf32>
    %528 = vector.multi_reduction <maximumf>, %527, %cst_412 [1] : vector<16x16xf32> to vector<16xf32>
    %529 = vector.shape_cast %528 : vector<16xf32> to vector<16x1xf32>
    %530 = vector.broadcast %529 : vector<16x1xf32> to vector<16x16xf32>
    %531 = arith.subf %527, %530 : vector<16x16xf32>
    %532 = math.exp %531 : vector<16x16xf32>
    %cst_413 = arith.constant dense<0.000000e+00> : vector<16xf32>
    %533 = vector.multi_reduction <add>, %532, %cst_413 [1] : vector<16x16xf32> to vector<16xf32>
    %534 = vector.shape_cast %533 : vector<16xf32> to vector<16x1xf32>
    %535 = tpu.reciprocal %534 {approx = true} : vector<16x1xf32> -> vector<16x1xf32>
    %536 = vector.broadcast %535 : vector<16x1xf32> to vector<16x16xf32>
    %537 = arith.mulf %532, %536 : vector<16x16xf32>
    %538 = arith.truncf %537 : vector<16x16xf32> to vector<16x16xbf16>
    %539 = arith.truncf %521 : vector<16x8xf32> to vector<16x8xbf16>
    %cst_414 = arith.constant dense<0.000000e+00> : vector<16x8xf32>
    %540 = tpu.matmul %538, %539, %cst_414 {dimension_numbers = #tpu.dot_dimension_numbers<[1], [0], [0], [1], [0, 0, 1, 1], [], []>} : vector<16x16xbf16>, vector<16x8xbf16>, vector<16x8xf32> -> vector<16x8xf32>
    %541 = arith.truncf %540 : vector<16x8xf32> to vector<16x8xbf16>
    %cst_415 = arith.constant dense<0.000000e+00> : vector<16x32xf32>
    %542 = tpu.matmul %541, %133, %cst_415 {dimension_numbers = #tpu.dot_dimension_numbers<[1], [0], [0], [1], [0, 0, 1, 1], [], []>} : vector<16x8xbf16>, vector<8x32xbf16>, vector<16x32xf32> -> vector<16x32xf32>
    %543 = arith.addf %512, %542 : vector<16x32xf32>
    %544 = vector.broadcast %135 : vector<1x32xf32> to vector<16x32xf32>
    %545 = arith.addf %543, %544 : vector<16x32xf32>
    %546 = arith.addf %419, %545 : vector<16x32xf32>
    %cst_416 = arith.constant dense<0.000000e+00> : vector<16xf32>
    %547 = vector.multi_reduction <add>, %546, %cst_416 [1] : vector<16x32xf32> to vector<16xf32>
    %548 = vector.shape_cast %547 : vector<16xf32> to vector<16x1xf32>
    %cst_417 = arith.constant 3.200000e+01 : f32
    %549 = vector.broadcast %cst_417 : f32 to vector<16x1xf32>
    %550 = arith.divf %548, %549 : vector<16x1xf32>
    %551 = vector.broadcast %550 : vector<16x1xf32> to vector<16x32xf32>
    %552 = arith.subf %546, %551 : vector<16x32xf32>
    %553 = arith.mulf %552, %552 : vector<16x32xf32>
    %cst_418 = arith.constant dense<0.000000e+00> : vector<16xf32>
    %554 = vector.multi_reduction <add>, %553, %cst_418 [1] : vector<16x32xf32> to vector<16xf32>
    %555 = vector.shape_cast %554 : vector<16xf32> to vector<16x1xf32>
    %cst_419 = arith.constant 3.200000e+01 : f32
    %556 = vector.broadcast %cst_419 : f32 to vector<16x1xf32>
    %557 = arith.divf %555, %556 : vector<16x1xf32>
    %558 = vector.broadcast %550 : vector<16x1xf32> to vector<16x32xf32>
    %559 = arith.subf %546, %558 : vector<16x32xf32>
    %cst_420 = arith.constant 9.99999996E-13 : f32
    %560 = vector.broadcast %cst_420 : f32 to vector<16x1xf32>
    %561 = arith.addf %557, %560 : vector<16x1xf32>
    %562 = math.rsqrt %561 : vector<16x1xf32>
    %563 = vector.broadcast %562 : vector<16x1xf32> to vector<16x32xf32>
    %564 = arith.mulf %559, %563 : vector<16x32xf32>
    %565 = vector.broadcast %137 : vector<1x32xf32> to vector<16x32xf32>
    %566 = arith.mulf %564, %565 : vector<16x32xf32>
    %567 = vector.broadcast %139 : vector<1x32xf32> to vector<16x32xf32>
    %568 = arith.addf %566, %567 : vector<16x32xf32>
    %569 = arith.truncf %568 : vector<16x32xf32> to vector<16x32xbf16>
    %cst_421 = arith.constant dense<0.000000e+00> : vector<16x64xf32>
    %570 = tpu.matmul %569, %141, %cst_421 {dimension_numbers = #tpu.dot_dimension_numbers<[1], [0], [0], [1], [0, 0, 1, 1], [], []>} : vector<16x32xbf16>, vector<32x64xbf16>, vector<16x64xf32> -> vector<16x64xf32>
    %571 = vector.broadcast %143 : vector<1x64xf32> to vector<16x64xf32>
    %572 = arith.addf %570, %571 : vector<16x64xf32>
    %cst_422 = arith.constant 5.000000e-01 : f32
    %573 = vector.broadcast %cst_422 : f32 to vector<16x64xf32>
    %574 = arith.mulf %573, %572 : vector<16x64xf32>
    %cst_423 = arith.constant 4.471500e-02 : f32
    %575 = vector.broadcast %cst_423 : f32 to vector<16x64xf32>
    %576 = arith.mulf %575, %572 : vector<16x64xf32>
    %577 = arith.mulf %576, %572 : vector<16x64xf32>
    %578 = arith.mulf %577, %572 : vector<16x64xf32>
    %579 = arith.addf %572, %578 : vector<16x64xf32>
    %cst_424 = arith.constant 0.797884583 : f32
    %580 = vector.broadcast %cst_424 : f32 to vector<16x64xf32>
    %581 = arith.mulf %580, %579 : vector<16x64xf32>
    %582 = math.tanh %581 : vector<16x64xf32>
    %cst_425 = arith.constant 1.000000e+00 : f32
    %583 = vector.broadcast %cst_425 : f32 to vector<16x64xf32>
    %584 = arith.addf %583, %582 : vector<16x64xf32>
    %585 = arith.mulf %574, %584 : vector<16x64xf32>
    %586 = arith.truncf %585 : vector<16x64xf32> to vector<16x64xbf16>
    %cst_426 = arith.constant dense<0.000000e+00> : vector<16x32xf32>
    %587 = tpu.matmul %586, %145, %cst_426 {dimension_numbers = #tpu.dot_dimension_numbers<[1], [0], [0], [1], [0, 0, 1, 1], [], []>} : vector<16x64xbf16>, vector<64x32xbf16>, vector<16x32xf32> -> vector<16x32xf32>
    %588 = vector.broadcast %147 : vector<1x32xf32> to vector<16x32xf32>
    %589 = arith.addf %587, %588 : vector<16x32xf32>
    %590 = arith.addf %568, %589 : vector<16x32xf32>
    %cst_427 = arith.constant dense<0.000000e+00> : vector<16xf32>
    %591 = vector.multi_reduction <add>, %590, %cst_427 [1] : vector<16x32xf32> to vector<16xf32>
    %592 = vector.shape_cast %591 : vector<16xf32> to vector<16x1xf32>
    %cst_428 = arith.constant 3.200000e+01 : f32
    %593 = vector.broadcast %cst_428 : f32 to vector<16x1xf32>
    %594 = arith.divf %592, %593 : vector<16x1xf32>
    %595 = vector.broadcast %594 : vector<16x1xf32> to vector<16x32xf32>
    %596 = arith.subf %590, %595 : vector<16x32xf32>
    %597 = arith.mulf %596, %596 : vector<16x32xf32>
    %cst_429 = arith.constant dense<0.000000e+00> : vector<16xf32>
    %598 = vector.multi_reduction <add>, %597, %cst_429 [1] : vector<16x32xf32> to vector<16xf32>
    %599 = vector.shape_cast %598 : vector<16xf32> to vector<16x1xf32>
    %cst_430 = arith.constant 3.200000e+01 : f32
    %600 = vector.broadcast %cst_430 : f32 to vector<16x1xf32>
    %601 = arith.divf %599, %600 : vector<16x1xf32>
    %602 = vector.broadcast %594 : vector<16x1xf32> to vector<16x32xf32>
    %603 = arith.subf %590, %602 : vector<16x32xf32>
    %cst_431 = arith.constant 9.99999996E-13 : f32
    %604 = vector.broadcast %cst_431 : f32 to vector<16x1xf32>
    %605 = arith.addf %601, %604 : vector<16x1xf32>
    %606 = math.rsqrt %605 : vector<16x1xf32>
    %607 = vector.broadcast %606 : vector<16x1xf32> to vector<16x32xf32>
    %608 = arith.mulf %603, %607 : vector<16x32xf32>
    %609 = vector.broadcast %149 : vector<1x32xf32> to vector<16x32xf32>
    %610 = arith.mulf %608, %609 : vector<16x32xf32>
    %611 = vector.broadcast %151 : vector<1x32xf32> to vector<16x32xf32>
    %612 = arith.addf %610, %611 : vector<16x32xf32>
    %c0_432 = arith.constant 0 : index
    %c0_433 = arith.constant 0 : index
    %613 = vector.load %arg2[%c0_432, %c0_433] : memref<16x32xf32, #tpu.memory_space<vmem>>, vector<16x32xf32>
    %c0_434 = arith.constant 0 : index
    %c0_435 = arith.constant 0 : index
    %614 = vector.load %arg6[%c0_434, %c0_435] : memref<1x32xf32, #tpu.memory_space<vmem>>, vector<1x32xf32>
    %c0_436 = arith.constant 0 : index
    %c0_437 = arith.constant 0 : index
    %615 = vector.load %arg7[%c0_436, %c0_437] : memref<1x32xf32, #tpu.memory_space<vmem>>, vector<1x32xf32>
    %cst_438 = arith.constant dense<0.000000e+00> : vector<16xf32>
    %616 = vector.multi_reduction <add>, %613, %cst_438 [1] : vector<16x32xf32> to vector<16xf32>
    %617 = vector.shape_cast %616 : vector<16xf32> to vector<16x1xf32>
    %cst_439 = arith.constant 3.200000e+01 : f32
    %618 = vector.broadcast %cst_439 : f32 to vector<16x1xf32>
    %619 = arith.divf %617, %618 : vector<16x1xf32>
    %620 = vector.broadcast %619 : vector<16x1xf32> to vector<16x32xf32>
    %621 = arith.subf %613, %620 : vector<16x32xf32>
    %622 = arith.mulf %621, %621 : vector<16x32xf32>
    %cst_440 = arith.constant dense<0.000000e+00> : vector<16xf32>
    %623 = vector.multi_reduction <add>, %622, %cst_440 [1] : vector<16x32xf32> to vector<16xf32>
    %624 = vector.shape_cast %623 : vector<16xf32> to vector<16x1xf32>
    %cst_441 = arith.constant 3.200000e+01 : f32
    %625 = vector.broadcast %cst_441 : f32 to vector<16x1xf32>
    %626 = arith.divf %624, %625 : vector<16x1xf32>
    %627 = vector.broadcast %619 : vector<16x1xf32> to vector<16x32xf32>
    %628 = arith.subf %613, %627 : vector<16x32xf32>
    %cst_442 = arith.constant 9.99999996E-13 : f32
    %629 = vector.broadcast %cst_442 : f32 to vector<16x1xf32>
    %630 = arith.addf %626, %629 : vector<16x1xf32>
    %631 = math.rsqrt %630 : vector<16x1xf32>
    %632 = vector.broadcast %631 : vector<16x1xf32> to vector<16x32xf32>
    %633 = arith.mulf %628, %632 : vector<16x32xf32>
    %634 = vector.broadcast %614 : vector<1x32xf32> to vector<16x32xf32>
    %635 = arith.mulf %633, %634 : vector<16x32xf32>
    %636 = vector.broadcast %615 : vector<1x32xf32> to vector<16x32xf32>
    %637 = arith.addf %635, %636 : vector<16x32xf32>
    %638 = arith.truncf %637 : vector<16x32xf32> to vector<16x32xbf16>
    %cst_443 = arith.constant dense<0.000000e+00> : vector<16x8xf32>
    %639 = tpu.matmul %638, %5, %cst_443 {dimension_numbers = #tpu.dot_dimension_numbers<[1], [0], [0], [1], [0, 0, 1, 1], [], []>} : vector<16x32xbf16>, vector<32x8xbf16>, vector<16x8xf32> -> vector<16x8xf32>
    %640 = vector.broadcast %7 : vector<1x8xf32> to vector<16x8xf32>
    %641 = arith.addf %639, %640 : vector<16x8xf32>
    %cst_444 = arith.constant dense<0.000000e+00> : vector<16x8xf32>
    %642 = tpu.matmul %638, %9, %cst_444 {dimension_numbers = #tpu.dot_dimension_numbers<[1], [0], [0], [1], [0, 0, 1, 1], [], []>} : vector<16x32xbf16>, vector<32x8xbf16>, vector<16x8xf32> -> vector<16x8xf32>
    %643 = vector.broadcast %11 : vector<1x8xf32> to vector<16x8xf32>
    %644 = arith.addf %642, %643 : vector<16x8xf32>
    %cst_445 = arith.constant dense<0.000000e+00> : vector<16x8xf32>
    %645 = tpu.matmul %638, %13, %cst_445 {dimension_numbers = #tpu.dot_dimension_numbers<[1], [0], [0], [1], [0, 0, 1, 1], [], []>} : vector<16x32xbf16>, vector<32x8xbf16>, vector<16x8xf32> -> vector<16x8xf32>
    %646 = vector.broadcast %15 : vector<1x8xf32> to vector<16x8xf32>
    %647 = arith.addf %645, %646 : vector<16x8xf32>
    %648 = arith.truncf %641 : vector<16x8xf32> to vector<16x8xbf16>
    %649 = arith.truncf %644 : vector<16x8xf32> to vector<16x8xbf16>
    %cst_446 = arith.constant dense<0.000000e+00> : vector<16x16xf32>
    %650 = tpu.matmul %648, %649, %cst_446 {dimension_numbers = #tpu.dot_dimension_numbers<[1], [1], [0], [0], [0, 0, 1, 0], [], []>} : vector<16x8xbf16>, vector<16x8xbf16>, vector<16x16xf32> -> vector<16x16xf32>
    %cst_447 = arith.constant 0.353553385 : f32
    %651 = vector.broadcast %cst_447 : f32 to vector<16x16xf32>
    %652 = arith.mulf %650, %651 : vector<16x16xf32>
    %653 = arith.addf %652, %3 : vector<16x16xf32>
    %cst_448 = arith.constant dense<0xFF800000> : vector<16xf32>
    %654 = vector.multi_reduction <maximumf>, %653, %cst_448 [1] : vector<16x16xf32> to vector<16xf32>
    %655 = vector.shape_cast %654 : vector<16xf32> to vector<16x1xf32>
    %656 = vector.broadcast %655 : vector<16x1xf32> to vector<16x16xf32>
    %657 = arith.subf %653, %656 : vector<16x16xf32>
    %658 = math.exp %657 : vector<16x16xf32>
    %cst_449 = arith.constant dense<0.000000e+00> : vector<16xf32>
    %659 = vector.multi_reduction <add>, %658, %cst_449 [1] : vector<16x16xf32> to vector<16xf32>
    %660 = vector.shape_cast %659 : vector<16xf32> to vector<16x1xf32>
    %661 = tpu.reciprocal %660 {approx = true} : vector<16x1xf32> -> vector<16x1xf32>
    %662 = vector.broadcast %661 : vector<16x1xf32> to vector<16x16xf32>
    %663 = arith.mulf %658, %662 : vector<16x16xf32>
    %664 = arith.truncf %663 : vector<16x16xf32> to vector<16x16xbf16>
    %665 = arith.truncf %647 : vector<16x8xf32> to vector<16x8xbf16>
    %cst_450 = arith.constant dense<0.000000e+00> : vector<16x8xf32>
    %666 = tpu.matmul %664, %665, %cst_450 {dimension_numbers = #tpu.dot_dimension_numbers<[1], [0], [0], [1], [0, 0, 1, 1], [], []>} : vector<16x16xbf16>, vector<16x8xbf16>, vector<16x8xf32> -> vector<16x8xf32>
    %667 = arith.truncf %666 : vector<16x8xf32> to vector<16x8xbf16>
    %cst_451 = arith.constant dense<0.000000e+00> : vector<16x32xf32>
    %668 = tpu.matmul %667, %17, %cst_451 {dimension_numbers = #tpu.dot_dimension_numbers<[1], [0], [0], [1], [0, 0, 1, 1], [], []>} : vector<16x8xbf16>, vector<8x32xbf16>, vector<16x32xf32> -> vector<16x32xf32>
    %cst_452 = arith.constant dense<0.000000e+00> : vector<16x8xf32>
    %669 = tpu.matmul %638, %19, %cst_452 {dimension_numbers = #tpu.dot_dimension_numbers<[1], [0], [0], [1], [0, 0, 1, 1], [], []>} : vector<16x32xbf16>, vector<32x8xbf16>, vector<16x8xf32> -> vector<16x8xf32>
    %670 = vector.broadcast %21 : vector<1x8xf32> to vector<16x8xf32>
    %671 = arith.addf %669, %670 : vector<16x8xf32>
    %cst_453 = arith.constant dense<0.000000e+00> : vector<16x8xf32>
    %672 = tpu.matmul %638, %23, %cst_453 {dimension_numbers = #tpu.dot_dimension_numbers<[1], [0], [0], [1], [0, 0, 1, 1], [], []>} : vector<16x32xbf16>, vector<32x8xbf16>, vector<16x8xf32> -> vector<16x8xf32>
    %673 = vector.broadcast %25 : vector<1x8xf32> to vector<16x8xf32>
    %674 = arith.addf %672, %673 : vector<16x8xf32>
    %cst_454 = arith.constant dense<0.000000e+00> : vector<16x8xf32>
    %675 = tpu.matmul %638, %27, %cst_454 {dimension_numbers = #tpu.dot_dimension_numbers<[1], [0], [0], [1], [0, 0, 1, 1], [], []>} : vector<16x32xbf16>, vector<32x8xbf16>, vector<16x8xf32> -> vector<16x8xf32>
    %676 = vector.broadcast %29 : vector<1x8xf32> to vector<16x8xf32>
    %677 = arith.addf %675, %676 : vector<16x8xf32>
    %678 = arith.truncf %671 : vector<16x8xf32> to vector<16x8xbf16>
    %679 = arith.truncf %674 : vector<16x8xf32> to vector<16x8xbf16>
    %cst_455 = arith.constant dense<0.000000e+00> : vector<16x16xf32>
    %680 = tpu.matmul %678, %679, %cst_455 {dimension_numbers = #tpu.dot_dimension_numbers<[1], [1], [0], [0], [0, 0, 1, 0], [], []>} : vector<16x8xbf16>, vector<16x8xbf16>, vector<16x16xf32> -> vector<16x16xf32>
    %cst_456 = arith.constant 0.353553385 : f32
    %681 = vector.broadcast %cst_456 : f32 to vector<16x16xf32>
    %682 = arith.mulf %680, %681 : vector<16x16xf32>
    %683 = arith.addf %682, %3 : vector<16x16xf32>
    %cst_457 = arith.constant dense<0xFF800000> : vector<16xf32>
    %684 = vector.multi_reduction <maximumf>, %683, %cst_457 [1] : vector<16x16xf32> to vector<16xf32>
    %685 = vector.shape_cast %684 : vector<16xf32> to vector<16x1xf32>
    %686 = vector.broadcast %685 : vector<16x1xf32> to vector<16x16xf32>
    %687 = arith.subf %683, %686 : vector<16x16xf32>
    %688 = math.exp %687 : vector<16x16xf32>
    %cst_458 = arith.constant dense<0.000000e+00> : vector<16xf32>
    %689 = vector.multi_reduction <add>, %688, %cst_458 [1] : vector<16x16xf32> to vector<16xf32>
    %690 = vector.shape_cast %689 : vector<16xf32> to vector<16x1xf32>
    %691 = tpu.reciprocal %690 {approx = true} : vector<16x1xf32> -> vector<16x1xf32>
    %692 = vector.broadcast %691 : vector<16x1xf32> to vector<16x16xf32>
    %693 = arith.mulf %688, %692 : vector<16x16xf32>
    %694 = arith.truncf %693 : vector<16x16xf32> to vector<16x16xbf16>
    %695 = arith.truncf %677 : vector<16x8xf32> to vector<16x8xbf16>
    %cst_459 = arith.constant dense<0.000000e+00> : vector<16x8xf32>
    %696 = tpu.matmul %694, %695, %cst_459 {dimension_numbers = #tpu.dot_dimension_numbers<[1], [0], [0], [1], [0, 0, 1, 1], [], []>} : vector<16x16xbf16>, vector<16x8xbf16>, vector<16x8xf32> -> vector<16x8xf32>
    %697 = arith.truncf %696 : vector<16x8xf32> to vector<16x8xbf16>
    %cst_460 = arith.constant dense<0.000000e+00> : vector<16x32xf32>
    %698 = tpu.matmul %697, %31, %cst_460 {dimension_numbers = #tpu.dot_dimension_numbers<[1], [0], [0], [1], [0, 0, 1, 1], [], []>} : vector<16x8xbf16>, vector<8x32xbf16>, vector<16x32xf32> -> vector<16x32xf32>
    %699 = arith.addf %668, %698 : vector<16x32xf32>
    %cst_461 = arith.constant dense<0.000000e+00> : vector<16x8xf32>
    %700 = tpu.matmul %638, %33, %cst_461 {dimension_numbers = #tpu.dot_dimension_numbers<[1], [0], [0], [1], [0, 0, 1, 1], [], []>} : vector<16x32xbf16>, vector<32x8xbf16>, vector<16x8xf32> -> vector<16x8xf32>
    %701 = vector.broadcast %35 : vector<1x8xf32> to vector<16x8xf32>
    %702 = arith.addf %700, %701 : vector<16x8xf32>
    %cst_462 = arith.constant dense<0.000000e+00> : vector<16x8xf32>
    %703 = tpu.matmul %638, %37, %cst_462 {dimension_numbers = #tpu.dot_dimension_numbers<[1], [0], [0], [1], [0, 0, 1, 1], [], []>} : vector<16x32xbf16>, vector<32x8xbf16>, vector<16x8xf32> -> vector<16x8xf32>
    %704 = vector.broadcast %39 : vector<1x8xf32> to vector<16x8xf32>
    %705 = arith.addf %703, %704 : vector<16x8xf32>
    %cst_463 = arith.constant dense<0.000000e+00> : vector<16x8xf32>
    %706 = tpu.matmul %638, %41, %cst_463 {dimension_numbers = #tpu.dot_dimension_numbers<[1], [0], [0], [1], [0, 0, 1, 1], [], []>} : vector<16x32xbf16>, vector<32x8xbf16>, vector<16x8xf32> -> vector<16x8xf32>
    %707 = vector.broadcast %43 : vector<1x8xf32> to vector<16x8xf32>
    %708 = arith.addf %706, %707 : vector<16x8xf32>
    %709 = arith.truncf %702 : vector<16x8xf32> to vector<16x8xbf16>
    %710 = arith.truncf %705 : vector<16x8xf32> to vector<16x8xbf16>
    %cst_464 = arith.constant dense<0.000000e+00> : vector<16x16xf32>
    %711 = tpu.matmul %709, %710, %cst_464 {dimension_numbers = #tpu.dot_dimension_numbers<[1], [1], [0], [0], [0, 0, 1, 0], [], []>} : vector<16x8xbf16>, vector<16x8xbf16>, vector<16x16xf32> -> vector<16x16xf32>
    %cst_465 = arith.constant 0.353553385 : f32
    %712 = vector.broadcast %cst_465 : f32 to vector<16x16xf32>
    %713 = arith.mulf %711, %712 : vector<16x16xf32>
    %714 = arith.addf %713, %3 : vector<16x16xf32>
    %cst_466 = arith.constant dense<0xFF800000> : vector<16xf32>
    %715 = vector.multi_reduction <maximumf>, %714, %cst_466 [1] : vector<16x16xf32> to vector<16xf32>
    %716 = vector.shape_cast %715 : vector<16xf32> to vector<16x1xf32>
    %717 = vector.broadcast %716 : vector<16x1xf32> to vector<16x16xf32>
    %718 = arith.subf %714, %717 : vector<16x16xf32>
    %719 = math.exp %718 : vector<16x16xf32>
    %cst_467 = arith.constant dense<0.000000e+00> : vector<16xf32>
    %720 = vector.multi_reduction <add>, %719, %cst_467 [1] : vector<16x16xf32> to vector<16xf32>
    %721 = vector.shape_cast %720 : vector<16xf32> to vector<16x1xf32>
    %722 = tpu.reciprocal %721 {approx = true} : vector<16x1xf32> -> vector<16x1xf32>
    %723 = vector.broadcast %722 : vector<16x1xf32> to vector<16x16xf32>
    %724 = arith.mulf %719, %723 : vector<16x16xf32>
    %725 = arith.truncf %724 : vector<16x16xf32> to vector<16x16xbf16>
    %726 = arith.truncf %708 : vector<16x8xf32> to vector<16x8xbf16>
    %cst_468 = arith.constant dense<0.000000e+00> : vector<16x8xf32>
    %727 = tpu.matmul %725, %726, %cst_468 {dimension_numbers = #tpu.dot_dimension_numbers<[1], [0], [0], [1], [0, 0, 1, 1], [], []>} : vector<16x16xbf16>, vector<16x8xbf16>, vector<16x8xf32> -> vector<16x8xf32>
    %728 = arith.truncf %727 : vector<16x8xf32> to vector<16x8xbf16>
    %cst_469 = arith.constant dense<0.000000e+00> : vector<16x32xf32>
    %729 = tpu.matmul %728, %45, %cst_469 {dimension_numbers = #tpu.dot_dimension_numbers<[1], [0], [0], [1], [0, 0, 1, 1], [], []>} : vector<16x8xbf16>, vector<8x32xbf16>, vector<16x32xf32> -> vector<16x32xf32>
    %730 = arith.addf %699, %729 : vector<16x32xf32>
    %cst_470 = arith.constant dense<0.000000e+00> : vector<16x8xf32>
    %731 = tpu.matmul %638, %47, %cst_470 {dimension_numbers = #tpu.dot_dimension_numbers<[1], [0], [0], [1], [0, 0, 1, 1], [], []>} : vector<16x32xbf16>, vector<32x8xbf16>, vector<16x8xf32> -> vector<16x8xf32>
    %732 = vector.broadcast %49 : vector<1x8xf32> to vector<16x8xf32>
    %733 = arith.addf %731, %732 : vector<16x8xf32>
    %cst_471 = arith.constant dense<0.000000e+00> : vector<16x8xf32>
    %734 = tpu.matmul %638, %51, %cst_471 {dimension_numbers = #tpu.dot_dimension_numbers<[1], [0], [0], [1], [0, 0, 1, 1], [], []>} : vector<16x32xbf16>, vector<32x8xbf16>, vector<16x8xf32> -> vector<16x8xf32>
    %735 = vector.broadcast %53 : vector<1x8xf32> to vector<16x8xf32>
    %736 = arith.addf %734, %735 : vector<16x8xf32>
    %cst_472 = arith.constant dense<0.000000e+00> : vector<16x8xf32>
    %737 = tpu.matmul %638, %55, %cst_472 {dimension_numbers = #tpu.dot_dimension_numbers<[1], [0], [0], [1], [0, 0, 1, 1], [], []>} : vector<16x32xbf16>, vector<32x8xbf16>, vector<16x8xf32> -> vector<16x8xf32>
    %738 = vector.broadcast %57 : vector<1x8xf32> to vector<16x8xf32>
    %739 = arith.addf %737, %738 : vector<16x8xf32>
    %740 = arith.truncf %733 : vector<16x8xf32> to vector<16x8xbf16>
    %741 = arith.truncf %736 : vector<16x8xf32> to vector<16x8xbf16>
    %cst_473 = arith.constant dense<0.000000e+00> : vector<16x16xf32>
    %742 = tpu.matmul %740, %741, %cst_473 {dimension_numbers = #tpu.dot_dimension_numbers<[1], [1], [0], [0], [0, 0, 1, 0], [], []>} : vector<16x8xbf16>, vector<16x8xbf16>, vector<16x16xf32> -> vector<16x16xf32>
    %cst_474 = arith.constant 0.353553385 : f32
    %743 = vector.broadcast %cst_474 : f32 to vector<16x16xf32>
    %744 = arith.mulf %742, %743 : vector<16x16xf32>
    %745 = arith.addf %744, %3 : vector<16x16xf32>
    %cst_475 = arith.constant dense<0xFF800000> : vector<16xf32>
    %746 = vector.multi_reduction <maximumf>, %745, %cst_475 [1] : vector<16x16xf32> to vector<16xf32>
    %747 = vector.shape_cast %746 : vector<16xf32> to vector<16x1xf32>
    %748 = vector.broadcast %747 : vector<16x1xf32> to vector<16x16xf32>
    %749 = arith.subf %745, %748 : vector<16x16xf32>
    %750 = math.exp %749 : vector<16x16xf32>
    %cst_476 = arith.constant dense<0.000000e+00> : vector<16xf32>
    %751 = vector.multi_reduction <add>, %750, %cst_476 [1] : vector<16x16xf32> to vector<16xf32>
    %752 = vector.shape_cast %751 : vector<16xf32> to vector<16x1xf32>
    %753 = tpu.reciprocal %752 {approx = true} : vector<16x1xf32> -> vector<16x1xf32>
    %754 = vector.broadcast %753 : vector<16x1xf32> to vector<16x16xf32>
    %755 = arith.mulf %750, %754 : vector<16x16xf32>
    %756 = arith.truncf %755 : vector<16x16xf32> to vector<16x16xbf16>
    %757 = arith.truncf %739 : vector<16x8xf32> to vector<16x8xbf16>
    %cst_477 = arith.constant dense<0.000000e+00> : vector<16x8xf32>
    %758 = tpu.matmul %756, %757, %cst_477 {dimension_numbers = #tpu.dot_dimension_numbers<[1], [0], [0], [1], [0, 0, 1, 1], [], []>} : vector<16x16xbf16>, vector<16x8xbf16>, vector<16x8xf32> -> vector<16x8xf32>
    %759 = arith.truncf %758 : vector<16x8xf32> to vector<16x8xbf16>
    %cst_478 = arith.constant dense<0.000000e+00> : vector<16x32xf32>
    %760 = tpu.matmul %759, %59, %cst_478 {dimension_numbers = #tpu.dot_dimension_numbers<[1], [0], [0], [1], [0, 0, 1, 1], [], []>} : vector<16x8xbf16>, vector<8x32xbf16>, vector<16x32xf32> -> vector<16x32xf32>
    %761 = arith.addf %730, %760 : vector<16x32xf32>
    %762 = vector.broadcast %61 : vector<1x32xf32> to vector<16x32xf32>
    %763 = arith.addf %761, %762 : vector<16x32xf32>
    %764 = arith.addf %637, %763 : vector<16x32xf32>
    %cst_479 = arith.constant dense<0.000000e+00> : vector<16xf32>
    %765 = vector.multi_reduction <add>, %764, %cst_479 [1] : vector<16x32xf32> to vector<16xf32>
    %766 = vector.shape_cast %765 : vector<16xf32> to vector<16x1xf32>
    %cst_480 = arith.constant 3.200000e+01 : f32
    %767 = vector.broadcast %cst_480 : f32 to vector<16x1xf32>
    %768 = arith.divf %766, %767 : vector<16x1xf32>
    %769 = vector.broadcast %768 : vector<16x1xf32> to vector<16x32xf32>
    %770 = arith.subf %764, %769 : vector<16x32xf32>
    %771 = arith.mulf %770, %770 : vector<16x32xf32>
    %cst_481 = arith.constant dense<0.000000e+00> : vector<16xf32>
    %772 = vector.multi_reduction <add>, %771, %cst_481 [1] : vector<16x32xf32> to vector<16xf32>
    %773 = vector.shape_cast %772 : vector<16xf32> to vector<16x1xf32>
    %cst_482 = arith.constant 3.200000e+01 : f32
    %774 = vector.broadcast %cst_482 : f32 to vector<16x1xf32>
    %775 = arith.divf %773, %774 : vector<16x1xf32>
    %776 = vector.broadcast %768 : vector<16x1xf32> to vector<16x32xf32>
    %777 = arith.subf %764, %776 : vector<16x32xf32>
    %cst_483 = arith.constant 9.99999996E-13 : f32
    %778 = vector.broadcast %cst_483 : f32 to vector<16x1xf32>
    %779 = arith.addf %775, %778 : vector<16x1xf32>
    %780 = math.rsqrt %779 : vector<16x1xf32>
    %781 = vector.broadcast %780 : vector<16x1xf32> to vector<16x32xf32>
    %782 = arith.mulf %777, %781 : vector<16x32xf32>
    %783 = vector.broadcast %63 : vector<1x32xf32> to vector<16x32xf32>
    %784 = arith.mulf %782, %783 : vector<16x32xf32>
    %785 = vector.broadcast %65 : vector<1x32xf32> to vector<16x32xf32>
    %786 = arith.addf %784, %785 : vector<16x32xf32>
    %787 = arith.truncf %786 : vector<16x32xf32> to vector<16x32xbf16>
    %cst_484 = arith.constant dense<0.000000e+00> : vector<16x64xf32>
    %788 = tpu.matmul %787, %67, %cst_484 {dimension_numbers = #tpu.dot_dimension_numbers<[1], [0], [0], [1], [0, 0, 1, 1], [], []>} : vector<16x32xbf16>, vector<32x64xbf16>, vector<16x64xf32> -> vector<16x64xf32>
    %789 = vector.broadcast %69 : vector<1x64xf32> to vector<16x64xf32>
    %790 = arith.addf %788, %789 : vector<16x64xf32>
    %cst_485 = arith.constant 5.000000e-01 : f32
    %791 = vector.broadcast %cst_485 : f32 to vector<16x64xf32>
    %792 = arith.mulf %791, %790 : vector<16x64xf32>
    %cst_486 = arith.constant 4.471500e-02 : f32
    %793 = vector.broadcast %cst_486 : f32 to vector<16x64xf32>
    %794 = arith.mulf %793, %790 : vector<16x64xf32>
    %795 = arith.mulf %794, %790 : vector<16x64xf32>
    %796 = arith.mulf %795, %790 : vector<16x64xf32>
    %797 = arith.addf %790, %796 : vector<16x64xf32>
    %cst_487 = arith.constant 0.797884583 : f32
    %798 = vector.broadcast %cst_487 : f32 to vector<16x64xf32>
    %799 = arith.mulf %798, %797 : vector<16x64xf32>
    %800 = math.tanh %799 : vector<16x64xf32>
    %cst_488 = arith.constant 1.000000e+00 : f32
    %801 = vector.broadcast %cst_488 : f32 to vector<16x64xf32>
    %802 = arith.addf %801, %800 : vector<16x64xf32>
    %803 = arith.mulf %792, %802 : vector<16x64xf32>
    %804 = arith.truncf %803 : vector<16x64xf32> to vector<16x64xbf16>
    %cst_489 = arith.constant dense<0.000000e+00> : vector<16x32xf32>
    %805 = tpu.matmul %804, %71, %cst_489 {dimension_numbers = #tpu.dot_dimension_numbers<[1], [0], [0], [1], [0, 0, 1, 1], [], []>} : vector<16x64xbf16>, vector<64x32xbf16>, vector<16x32xf32> -> vector<16x32xf32>
    %806 = vector.broadcast %73 : vector<1x32xf32> to vector<16x32xf32>
    %807 = arith.addf %805, %806 : vector<16x32xf32>
    %808 = arith.addf %786, %807 : vector<16x32xf32>
    %cst_490 = arith.constant dense<0.000000e+00> : vector<16xf32>
    %809 = vector.multi_reduction <add>, %808, %cst_490 [1] : vector<16x32xf32> to vector<16xf32>
    %810 = vector.shape_cast %809 : vector<16xf32> to vector<16x1xf32>
    %cst_491 = arith.constant 3.200000e+01 : f32
    %811 = vector.broadcast %cst_491 : f32 to vector<16x1xf32>
    %812 = arith.divf %810, %811 : vector<16x1xf32>
    %813 = vector.broadcast %812 : vector<16x1xf32> to vector<16x32xf32>
    %814 = arith.subf %808, %813 : vector<16x32xf32>
    %815 = arith.mulf %814, %814 : vector<16x32xf32>
    %cst_492 = arith.constant dense<0.000000e+00> : vector<16xf32>
    %816 = vector.multi_reduction <add>, %815, %cst_492 [1] : vector<16x32xf32> to vector<16xf32>
    %817 = vector.shape_cast %816 : vector<16xf32> to vector<16x1xf32>
    %cst_493 = arith.constant 3.200000e+01 : f32
    %818 = vector.broadcast %cst_493 : f32 to vector<16x1xf32>
    %819 = arith.divf %817, %818 : vector<16x1xf32>
    %820 = vector.broadcast %812 : vector<16x1xf32> to vector<16x32xf32>
    %821 = arith.subf %808, %820 : vector<16x32xf32>
    %cst_494 = arith.constant 9.99999996E-13 : f32
    %822 = vector.broadcast %cst_494 : f32 to vector<16x1xf32>
    %823 = arith.addf %819, %822 : vector<16x1xf32>
    %824 = math.rsqrt %823 : vector<16x1xf32>
    %825 = vector.broadcast %824 : vector<16x1xf32> to vector<16x32xf32>
    %826 = arith.mulf %821, %825 : vector<16x32xf32>
    %827 = vector.broadcast %75 : vector<1x32xf32> to vector<16x32xf32>
    %828 = arith.mulf %826, %827 : vector<16x32xf32>
    %829 = vector.broadcast %77 : vector<1x32xf32> to vector<16x32xf32>
    %830 = arith.addf %828, %829 : vector<16x32xf32>
    %831 = arith.truncf %830 : vector<16x32xf32> to vector<16x32xbf16>
    %cst_495 = arith.constant dense<0.000000e+00> : vector<16x8xf32>
    %832 = tpu.matmul %831, %79, %cst_495 {dimension_numbers = #tpu.dot_dimension_numbers<[1], [0], [0], [1], [0, 0, 1, 1], [], []>} : vector<16x32xbf16>, vector<32x8xbf16>, vector<16x8xf32> -> vector<16x8xf32>
    %833 = vector.broadcast %81 : vector<1x8xf32> to vector<16x8xf32>
    %834 = arith.addf %832, %833 : vector<16x8xf32>
    %cst_496 = arith.constant dense<0.000000e+00> : vector<16x8xf32>
    %835 = tpu.matmul %831, %83, %cst_496 {dimension_numbers = #tpu.dot_dimension_numbers<[1], [0], [0], [1], [0, 0, 1, 1], [], []>} : vector<16x32xbf16>, vector<32x8xbf16>, vector<16x8xf32> -> vector<16x8xf32>
    %836 = vector.broadcast %85 : vector<1x8xf32> to vector<16x8xf32>
    %837 = arith.addf %835, %836 : vector<16x8xf32>
    %cst_497 = arith.constant dense<0.000000e+00> : vector<16x8xf32>
    %838 = tpu.matmul %831, %87, %cst_497 {dimension_numbers = #tpu.dot_dimension_numbers<[1], [0], [0], [1], [0, 0, 1, 1], [], []>} : vector<16x32xbf16>, vector<32x8xbf16>, vector<16x8xf32> -> vector<16x8xf32>
    %839 = vector.broadcast %89 : vector<1x8xf32> to vector<16x8xf32>
    %840 = arith.addf %838, %839 : vector<16x8xf32>
    %841 = arith.truncf %834 : vector<16x8xf32> to vector<16x8xbf16>
    %842 = arith.truncf %837 : vector<16x8xf32> to vector<16x8xbf16>
    %cst_498 = arith.constant dense<0.000000e+00> : vector<16x16xf32>
    %843 = tpu.matmul %841, %842, %cst_498 {dimension_numbers = #tpu.dot_dimension_numbers<[1], [1], [0], [0], [0, 0, 1, 0], [], []>} : vector<16x8xbf16>, vector<16x8xbf16>, vector<16x16xf32> -> vector<16x16xf32>
    %cst_499 = arith.constant 0.353553385 : f32
    %844 = vector.broadcast %cst_499 : f32 to vector<16x16xf32>
    %845 = arith.mulf %843, %844 : vector<16x16xf32>
    %846 = arith.addf %845, %3 : vector<16x16xf32>
    %cst_500 = arith.constant dense<0xFF800000> : vector<16xf32>
    %847 = vector.multi_reduction <maximumf>, %846, %cst_500 [1] : vector<16x16xf32> to vector<16xf32>
    %848 = vector.shape_cast %847 : vector<16xf32> to vector<16x1xf32>
    %849 = vector.broadcast %848 : vector<16x1xf32> to vector<16x16xf32>
    %850 = arith.subf %846, %849 : vector<16x16xf32>
    %851 = math.exp %850 : vector<16x16xf32>
    %cst_501 = arith.constant dense<0.000000e+00> : vector<16xf32>
    %852 = vector.multi_reduction <add>, %851, %cst_501 [1] : vector<16x16xf32> to vector<16xf32>
    %853 = vector.shape_cast %852 : vector<16xf32> to vector<16x1xf32>
    %854 = tpu.reciprocal %853 {approx = true} : vector<16x1xf32> -> vector<16x1xf32>
    %855 = vector.broadcast %854 : vector<16x1xf32> to vector<16x16xf32>
    %856 = arith.mulf %851, %855 : vector<16x16xf32>
    %857 = arith.truncf %856 : vector<16x16xf32> to vector<16x16xbf16>
    %858 = arith.truncf %840 : vector<16x8xf32> to vector<16x8xbf16>
    %cst_502 = arith.constant dense<0.000000e+00> : vector<16x8xf32>
    %859 = tpu.matmul %857, %858, %cst_502 {dimension_numbers = #tpu.dot_dimension_numbers<[1], [0], [0], [1], [0, 0, 1, 1], [], []>} : vector<16x16xbf16>, vector<16x8xbf16>, vector<16x8xf32> -> vector<16x8xf32>
    %860 = arith.truncf %859 : vector<16x8xf32> to vector<16x8xbf16>
    %cst_503 = arith.constant dense<0.000000e+00> : vector<16x32xf32>
    %861 = tpu.matmul %860, %91, %cst_503 {dimension_numbers = #tpu.dot_dimension_numbers<[1], [0], [0], [1], [0, 0, 1, 1], [], []>} : vector<16x8xbf16>, vector<8x32xbf16>, vector<16x32xf32> -> vector<16x32xf32>
    %cst_504 = arith.constant dense<0.000000e+00> : vector<16x8xf32>
    %862 = tpu.matmul %831, %93, %cst_504 {dimension_numbers = #tpu.dot_dimension_numbers<[1], [0], [0], [1], [0, 0, 1, 1], [], []>} : vector<16x32xbf16>, vector<32x8xbf16>, vector<16x8xf32> -> vector<16x8xf32>
    %863 = vector.broadcast %95 : vector<1x8xf32> to vector<16x8xf32>
    %864 = arith.addf %862, %863 : vector<16x8xf32>
    %cst_505 = arith.constant dense<0.000000e+00> : vector<16x8xf32>
    %865 = tpu.matmul %831, %97, %cst_505 {dimension_numbers = #tpu.dot_dimension_numbers<[1], [0], [0], [1], [0, 0, 1, 1], [], []>} : vector<16x32xbf16>, vector<32x8xbf16>, vector<16x8xf32> -> vector<16x8xf32>
    %866 = vector.broadcast %99 : vector<1x8xf32> to vector<16x8xf32>
    %867 = arith.addf %865, %866 : vector<16x8xf32>
    %cst_506 = arith.constant dense<0.000000e+00> : vector<16x8xf32>
    %868 = tpu.matmul %831, %101, %cst_506 {dimension_numbers = #tpu.dot_dimension_numbers<[1], [0], [0], [1], [0, 0, 1, 1], [], []>} : vector<16x32xbf16>, vector<32x8xbf16>, vector<16x8xf32> -> vector<16x8xf32>
    %869 = vector.broadcast %103 : vector<1x8xf32> to vector<16x8xf32>
    %870 = arith.addf %868, %869 : vector<16x8xf32>
    %871 = arith.truncf %864 : vector<16x8xf32> to vector<16x8xbf16>
    %872 = arith.truncf %867 : vector<16x8xf32> to vector<16x8xbf16>
    %cst_507 = arith.constant dense<0.000000e+00> : vector<16x16xf32>
    %873 = tpu.matmul %871, %872, %cst_507 {dimension_numbers = #tpu.dot_dimension_numbers<[1], [1], [0], [0], [0, 0, 1, 0], [], []>} : vector<16x8xbf16>, vector<16x8xbf16>, vector<16x16xf32> -> vector<16x16xf32>
    %cst_508 = arith.constant 0.353553385 : f32
    %874 = vector.broadcast %cst_508 : f32 to vector<16x16xf32>
    %875 = arith.mulf %873, %874 : vector<16x16xf32>
    %876 = arith.addf %875, %3 : vector<16x16xf32>
    %cst_509 = arith.constant dense<0xFF800000> : vector<16xf32>
    %877 = vector.multi_reduction <maximumf>, %876, %cst_509 [1] : vector<16x16xf32> to vector<16xf32>
    %878 = vector.shape_cast %877 : vector<16xf32> to vector<16x1xf32>
    %879 = vector.broadcast %878 : vector<16x1xf32> to vector<16x16xf32>
    %880 = arith.subf %876, %879 : vector<16x16xf32>
    %881 = math.exp %880 : vector<16x16xf32>
    %cst_510 = arith.constant dense<0.000000e+00> : vector<16xf32>
    %882 = vector.multi_reduction <add>, %881, %cst_510 [1] : vector<16x16xf32> to vector<16xf32>
    %883 = vector.shape_cast %882 : vector<16xf32> to vector<16x1xf32>
    %884 = tpu.reciprocal %883 {approx = true} : vector<16x1xf32> -> vector<16x1xf32>
    %885 = vector.broadcast %884 : vector<16x1xf32> to vector<16x16xf32>
    %886 = arith.mulf %881, %885 : vector<16x16xf32>
    %887 = arith.truncf %886 : vector<16x16xf32> to vector<16x16xbf16>
    %888 = arith.truncf %870 : vector<16x8xf32> to vector<16x8xbf16>
    %cst_511 = arith.constant dense<0.000000e+00> : vector<16x8xf32>
    %889 = tpu.matmul %887, %888, %cst_511 {dimension_numbers = #tpu.dot_dimension_numbers<[1], [0], [0], [1], [0, 0, 1, 1], [], []>} : vector<16x16xbf16>, vector<16x8xbf16>, vector<16x8xf32> -> vector<16x8xf32>
    %890 = arith.truncf %889 : vector<16x8xf32> to vector<16x8xbf16>
    %cst_512 = arith.constant dense<0.000000e+00> : vector<16x32xf32>
    %891 = tpu.matmul %890, %105, %cst_512 {dimension_numbers = #tpu.dot_dimension_numbers<[1], [0], [0], [1], [0, 0, 1, 1], [], []>} : vector<16x8xbf16>, vector<8x32xbf16>, vector<16x32xf32> -> vector<16x32xf32>
    %892 = arith.addf %861, %891 : vector<16x32xf32>
    %cst_513 = arith.constant dense<0.000000e+00> : vector<16x8xf32>
    %893 = tpu.matmul %831, %107, %cst_513 {dimension_numbers = #tpu.dot_dimension_numbers<[1], [0], [0], [1], [0, 0, 1, 1], [], []>} : vector<16x32xbf16>, vector<32x8xbf16>, vector<16x8xf32> -> vector<16x8xf32>
    %894 = vector.broadcast %109 : vector<1x8xf32> to vector<16x8xf32>
    %895 = arith.addf %893, %894 : vector<16x8xf32>
    %cst_514 = arith.constant dense<0.000000e+00> : vector<16x8xf32>
    %896 = tpu.matmul %831, %111, %cst_514 {dimension_numbers = #tpu.dot_dimension_numbers<[1], [0], [0], [1], [0, 0, 1, 1], [], []>} : vector<16x32xbf16>, vector<32x8xbf16>, vector<16x8xf32> -> vector<16x8xf32>
    %897 = vector.broadcast %113 : vector<1x8xf32> to vector<16x8xf32>
    %898 = arith.addf %896, %897 : vector<16x8xf32>
    %cst_515 = arith.constant dense<0.000000e+00> : vector<16x8xf32>
    %899 = tpu.matmul %831, %115, %cst_515 {dimension_numbers = #tpu.dot_dimension_numbers<[1], [0], [0], [1], [0, 0, 1, 1], [], []>} : vector<16x32xbf16>, vector<32x8xbf16>, vector<16x8xf32> -> vector<16x8xf32>
    %900 = vector.broadcast %117 : vector<1x8xf32> to vector<16x8xf32>
    %901 = arith.addf %899, %900 : vector<16x8xf32>
    %902 = arith.truncf %895 : vector<16x8xf32> to vector<16x8xbf16>
    %903 = arith.truncf %898 : vector<16x8xf32> to vector<16x8xbf16>
    %cst_516 = arith.constant dense<0.000000e+00> : vector<16x16xf32>
    %904 = tpu.matmul %902, %903, %cst_516 {dimension_numbers = #tpu.dot_dimension_numbers<[1], [1], [0], [0], [0, 0, 1, 0], [], []>} : vector<16x8xbf16>, vector<16x8xbf16>, vector<16x16xf32> -> vector<16x16xf32>
    %cst_517 = arith.constant 0.353553385 : f32
    %905 = vector.broadcast %cst_517 : f32 to vector<16x16xf32>
    %906 = arith.mulf %904, %905 : vector<16x16xf32>
    %907 = arith.addf %906, %3 : vector<16x16xf32>
    %cst_518 = arith.constant dense<0xFF800000> : vector<16xf32>
    %908 = vector.multi_reduction <maximumf>, %907, %cst_518 [1] : vector<16x16xf32> to vector<16xf32>
    %909 = vector.shape_cast %908 : vector<16xf32> to vector<16x1xf32>
    %910 = vector.broadcast %909 : vector<16x1xf32> to vector<16x16xf32>
    %911 = arith.subf %907, %910 : vector<16x16xf32>
    %912 = math.exp %911 : vector<16x16xf32>
    %cst_519 = arith.constant dense<0.000000e+00> : vector<16xf32>
    %913 = vector.multi_reduction <add>, %912, %cst_519 [1] : vector<16x16xf32> to vector<16xf32>
    %914 = vector.shape_cast %913 : vector<16xf32> to vector<16x1xf32>
    %915 = tpu.reciprocal %914 {approx = true} : vector<16x1xf32> -> vector<16x1xf32>
    %916 = vector.broadcast %915 : vector<16x1xf32> to vector<16x16xf32>
    %917 = arith.mulf %912, %916 : vector<16x16xf32>
    %918 = arith.truncf %917 : vector<16x16xf32> to vector<16x16xbf16>
    %919 = arith.truncf %901 : vector<16x8xf32> to vector<16x8xbf16>
    %cst_520 = arith.constant dense<0.000000e+00> : vector<16x8xf32>
    %920 = tpu.matmul %918, %919, %cst_520 {dimension_numbers = #tpu.dot_dimension_numbers<[1], [0], [0], [1], [0, 0, 1, 1], [], []>} : vector<16x16xbf16>, vector<16x8xbf16>, vector<16x8xf32> -> vector<16x8xf32>
    %921 = arith.truncf %920 : vector<16x8xf32> to vector<16x8xbf16>
    %cst_521 = arith.constant dense<0.000000e+00> : vector<16x32xf32>
    %922 = tpu.matmul %921, %119, %cst_521 {dimension_numbers = #tpu.dot_dimension_numbers<[1], [0], [0], [1], [0, 0, 1, 1], [], []>} : vector<16x8xbf16>, vector<8x32xbf16>, vector<16x32xf32> -> vector<16x32xf32>
    %923 = arith.addf %892, %922 : vector<16x32xf32>
    %cst_522 = arith.constant dense<0.000000e+00> : vector<16x8xf32>
    %924 = tpu.matmul %831, %121, %cst_522 {dimension_numbers = #tpu.dot_dimension_numbers<[1], [0], [0], [1], [0, 0, 1, 1], [], []>} : vector<16x32xbf16>, vector<32x8xbf16>, vector<16x8xf32> -> vector<16x8xf32>
    %925 = vector.broadcast %123 : vector<1x8xf32> to vector<16x8xf32>
    %926 = arith.addf %924, %925 : vector<16x8xf32>
    %cst_523 = arith.constant dense<0.000000e+00> : vector<16x8xf32>
    %927 = tpu.matmul %831, %125, %cst_523 {dimension_numbers = #tpu.dot_dimension_numbers<[1], [0], [0], [1], [0, 0, 1, 1], [], []>} : vector<16x32xbf16>, vector<32x8xbf16>, vector<16x8xf32> -> vector<16x8xf32>
    %928 = vector.broadcast %127 : vector<1x8xf32> to vector<16x8xf32>
    %929 = arith.addf %927, %928 : vector<16x8xf32>
    %cst_524 = arith.constant dense<0.000000e+00> : vector<16x8xf32>
    %930 = tpu.matmul %831, %129, %cst_524 {dimension_numbers = #tpu.dot_dimension_numbers<[1], [0], [0], [1], [0, 0, 1, 1], [], []>} : vector<16x32xbf16>, vector<32x8xbf16>, vector<16x8xf32> -> vector<16x8xf32>
    %931 = vector.broadcast %131 : vector<1x8xf32> to vector<16x8xf32>
    %932 = arith.addf %930, %931 : vector<16x8xf32>
    %933 = arith.truncf %926 : vector<16x8xf32> to vector<16x8xbf16>
    %934 = arith.truncf %929 : vector<16x8xf32> to vector<16x8xbf16>
    %cst_525 = arith.constant dense<0.000000e+00> : vector<16x16xf32>
    %935 = tpu.matmul %933, %934, %cst_525 {dimension_numbers = #tpu.dot_dimension_numbers<[1], [1], [0], [0], [0, 0, 1, 0], [], []>} : vector<16x8xbf16>, vector<16x8xbf16>, vector<16x16xf32> -> vector<16x16xf32>
    %cst_526 = arith.constant 0.353553385 : f32
    %936 = vector.broadcast %cst_526 : f32 to vector<16x16xf32>
    %937 = arith.mulf %935, %936 : vector<16x16xf32>
    %938 = arith.addf %937, %3 : vector<16x16xf32>
    %cst_527 = arith.constant dense<0xFF800000> : vector<16xf32>
    %939 = vector.multi_reduction <maximumf>, %938, %cst_527 [1] : vector<16x16xf32> to vector<16xf32>
    %940 = vector.shape_cast %939 : vector<16xf32> to vector<16x1xf32>
    %941 = vector.broadcast %940 : vector<16x1xf32> to vector<16x16xf32>
    %942 = arith.subf %938, %941 : vector<16x16xf32>
    %943 = math.exp %942 : vector<16x16xf32>
    %cst_528 = arith.constant dense<0.000000e+00> : vector<16xf32>
    %944 = vector.multi_reduction <add>, %943, %cst_528 [1] : vector<16x16xf32> to vector<16xf32>
    %945 = vector.shape_cast %944 : vector<16xf32> to vector<16x1xf32>
    %946 = tpu.reciprocal %945 {approx = true} : vector<16x1xf32> -> vector<16x1xf32>
    %947 = vector.broadcast %946 : vector<16x1xf32> to vector<16x16xf32>
    %948 = arith.mulf %943, %947 : vector<16x16xf32>
    %949 = arith.truncf %948 : vector<16x16xf32> to vector<16x16xbf16>
    %950 = arith.truncf %932 : vector<16x8xf32> to vector<16x8xbf16>
    %cst_529 = arith.constant dense<0.000000e+00> : vector<16x8xf32>
    %951 = tpu.matmul %949, %950, %cst_529 {dimension_numbers = #tpu.dot_dimension_numbers<[1], [0], [0], [1], [0, 0, 1, 1], [], []>} : vector<16x16xbf16>, vector<16x8xbf16>, vector<16x8xf32> -> vector<16x8xf32>
    %952 = arith.truncf %951 : vector<16x8xf32> to vector<16x8xbf16>
    %cst_530 = arith.constant dense<0.000000e+00> : vector<16x32xf32>
    %953 = tpu.matmul %952, %133, %cst_530 {dimension_numbers = #tpu.dot_dimension_numbers<[1], [0], [0], [1], [0, 0, 1, 1], [], []>} : vector<16x8xbf16>, vector<8x32xbf16>, vector<16x32xf32> -> vector<16x32xf32>
    %954 = arith.addf %923, %953 : vector<16x32xf32>
    %955 = vector.broadcast %135 : vector<1x32xf32> to vector<16x32xf32>
    %956 = arith.addf %954, %955 : vector<16x32xf32>
    %957 = arith.addf %830, %956 : vector<16x32xf32>
    %cst_531 = arith.constant dense<0.000000e+00> : vector<16xf32>
    %958 = vector.multi_reduction <add>, %957, %cst_531 [1] : vector<16x32xf32> to vector<16xf32>
    %959 = vector.shape_cast %958 : vector<16xf32> to vector<16x1xf32>
    %cst_532 = arith.constant 3.200000e+01 : f32
    %960 = vector.broadcast %cst_532 : f32 to vector<16x1xf32>
    %961 = arith.divf %959, %960 : vector<16x1xf32>
    %962 = vector.broadcast %961 : vector<16x1xf32> to vector<16x32xf32>
    %963 = arith.subf %957, %962 : vector<16x32xf32>
    %964 = arith.mulf %963, %963 : vector<16x32xf32>
    %cst_533 = arith.constant dense<0.000000e+00> : vector<16xf32>
    %965 = vector.multi_reduction <add>, %964, %cst_533 [1] : vector<16x32xf32> to vector<16xf32>
    %966 = vector.shape_cast %965 : vector<16xf32> to vector<16x1xf32>
    %cst_534 = arith.constant 3.200000e+01 : f32
    %967 = vector.broadcast %cst_534 : f32 to vector<16x1xf32>
    %968 = arith.divf %966, %967 : vector<16x1xf32>
    %969 = vector.broadcast %961 : vector<16x1xf32> to vector<16x32xf32>
    %970 = arith.subf %957, %969 : vector<16x32xf32>
    %cst_535 = arith.constant 9.99999996E-13 : f32
    %971 = vector.broadcast %cst_535 : f32 to vector<16x1xf32>
    %972 = arith.addf %968, %971 : vector<16x1xf32>
    %973 = math.rsqrt %972 : vector<16x1xf32>
    %974 = vector.broadcast %973 : vector<16x1xf32> to vector<16x32xf32>
    %975 = arith.mulf %970, %974 : vector<16x32xf32>
    %976 = vector.broadcast %137 : vector<1x32xf32> to vector<16x32xf32>
    %977 = arith.mulf %975, %976 : vector<16x32xf32>
    %978 = vector.broadcast %139 : vector<1x32xf32> to vector<16x32xf32>
    %979 = arith.addf %977, %978 : vector<16x32xf32>
    %980 = arith.truncf %979 : vector<16x32xf32> to vector<16x32xbf16>
    %cst_536 = arith.constant dense<0.000000e+00> : vector<16x64xf32>
    %981 = tpu.matmul %980, %141, %cst_536 {dimension_numbers = #tpu.dot_dimension_numbers<[1], [0], [0], [1], [0, 0, 1, 1], [], []>} : vector<16x32xbf16>, vector<32x64xbf16>, vector<16x64xf32> -> vector<16x64xf32>
    %982 = vector.broadcast %143 : vector<1x64xf32> to vector<16x64xf32>
    %983 = arith.addf %981, %982 : vector<16x64xf32>
    %cst_537 = arith.constant 5.000000e-01 : f32
    %984 = vector.broadcast %cst_537 : f32 to vector<16x64xf32>
    %985 = arith.mulf %984, %983 : vector<16x64xf32>
    %cst_538 = arith.constant 4.471500e-02 : f32
    %986 = vector.broadcast %cst_538 : f32 to vector<16x64xf32>
    %987 = arith.mulf %986, %983 : vector<16x64xf32>
    %988 = arith.mulf %987, %983 : vector<16x64xf32>
    %989 = arith.mulf %988, %983 : vector<16x64xf32>
    %990 = arith.addf %983, %989 : vector<16x64xf32>
    %cst_539 = arith.constant 0.797884583 : f32
    %991 = vector.broadcast %cst_539 : f32 to vector<16x64xf32>
    %992 = arith.mulf %991, %990 : vector<16x64xf32>
    %993 = math.tanh %992 : vector<16x64xf32>
    %cst_540 = arith.constant 1.000000e+00 : f32
    %994 = vector.broadcast %cst_540 : f32 to vector<16x64xf32>
    %995 = arith.addf %994, %993 : vector<16x64xf32>
    %996 = arith.mulf %985, %995 : vector<16x64xf32>
    %997 = arith.truncf %996 : vector<16x64xf32> to vector<16x64xbf16>
    %cst_541 = arith.constant dense<0.000000e+00> : vector<16x32xf32>
    %998 = tpu.matmul %997, %145, %cst_541 {dimension_numbers = #tpu.dot_dimension_numbers<[1], [0], [0], [1], [0, 0, 1, 1], [], []>} : vector<16x64xbf16>, vector<64x32xbf16>, vector<16x32xf32> -> vector<16x32xf32>
    %999 = vector.broadcast %147 : vector<1x32xf32> to vector<16x32xf32>
    %1000 = arith.addf %998, %999 : vector<16x32xf32>
    %1001 = arith.addf %979, %1000 : vector<16x32xf32>
    %cst_542 = arith.constant dense<0.000000e+00> : vector<16xf32>
    %1002 = vector.multi_reduction <add>, %1001, %cst_542 [1] : vector<16x32xf32> to vector<16xf32>
    %1003 = vector.shape_cast %1002 : vector<16xf32> to vector<16x1xf32>
    %cst_543 = arith.constant 3.200000e+01 : f32
    %1004 = vector.broadcast %cst_543 : f32 to vector<16x1xf32>
    %1005 = arith.divf %1003, %1004 : vector<16x1xf32>
    %1006 = vector.broadcast %1005 : vector<16x1xf32> to vector<16x32xf32>
    %1007 = arith.subf %1001, %1006 : vector<16x32xf32>
    %1008 = arith.mulf %1007, %1007 : vector<16x32xf32>
    %cst_544 = arith.constant dense<0.000000e+00> : vector<16xf32>
    %1009 = vector.multi_reduction <add>, %1008, %cst_544 [1] : vector<16x32xf32> to vector<16xf32>
    %1010 = vector.shape_cast %1009 : vector<16xf32> to vector<16x1xf32>
    %cst_545 = arith.constant 3.200000e+01 : f32
    %1011 = vector.broadcast %cst_545 : f32 to vector<16x1xf32>
    %1012 = arith.divf %1010, %1011 : vector<16x1xf32>
    %1013 = vector.broadcast %1005 : vector<16x1xf32> to vector<16x32xf32>
    %1014 = arith.subf %1001, %1013 : vector<16x32xf32>
    %cst_546 = arith.constant 9.99999996E-13 : f32
    %1015 = vector.broadcast %cst_546 : f32 to vector<16x1xf32>
    %1016 = arith.addf %1012, %1015 : vector<16x1xf32>
    %1017 = math.rsqrt %1016 : vector<16x1xf32>
    %1018 = vector.broadcast %1017 : vector<16x1xf32> to vector<16x32xf32>
    %1019 = arith.mulf %1014, %1018 : vector<16x32xf32>
    %1020 = vector.broadcast %149 : vector<1x32xf32> to vector<16x32xf32>
    %1021 = arith.mulf %1019, %1020 : vector<16x32xf32>
    %1022 = vector.broadcast %151 : vector<1x32xf32> to vector<16x32xf32>
    %1023 = arith.addf %1021, %1022 : vector<16x32xf32>
    %1024 = arith.truncf %1023 : vector<16x32xf32> to vector<16x32xbf16>
    %cst_547 = arith.constant dense<0.000000e+00> : vector<16x8xf32>
    %1025 = tpu.matmul %1024, %153, %cst_547 {dimension_numbers = #tpu.dot_dimension_numbers<[1], [0], [0], [1], [0, 0, 1, 1], [], []>} : vector<16x32xbf16>, vector<32x8xbf16>, vector<16x8xf32> -> vector<16x8xf32>
    %1026 = vector.broadcast %155 : vector<1x8xf32> to vector<16x8xf32>
    %1027 = arith.addf %1025, %1026 : vector<16x8xf32>
    %cst_548 = arith.constant dense<0.000000e+00> : vector<16x8xf32>
    %1028 = tpu.matmul %1024, %157, %cst_548 {dimension_numbers = #tpu.dot_dimension_numbers<[1], [0], [0], [1], [0, 0, 1, 1], [], []>} : vector<16x32xbf16>, vector<32x8xbf16>, vector<16x8xf32> -> vector<16x8xf32>
    %1029 = vector.broadcast %159 : vector<1x8xf32> to vector<16x8xf32>
    %1030 = arith.addf %1028, %1029 : vector<16x8xf32>
    %cst_549 = arith.constant dense<0.000000e+00> : vector<16x8xf32>
    %1031 = tpu.matmul %1024, %161, %cst_549 {dimension_numbers = #tpu.dot_dimension_numbers<[1], [0], [0], [1], [0, 0, 1, 1], [], []>} : vector<16x32xbf16>, vector<32x8xbf16>, vector<16x8xf32> -> vector<16x8xf32>
    %1032 = vector.broadcast %163 : vector<1x8xf32> to vector<16x8xf32>
    %1033 = arith.addf %1031, %1032 : vector<16x8xf32>
    %1034 = arith.truncf %1027 : vector<16x8xf32> to vector<16x8xbf16>
    %1035 = arith.truncf %1030 : vector<16x8xf32> to vector<16x8xbf16>
    %cst_550 = arith.constant dense<0.000000e+00> : vector<16x16xf32>
    %1036 = tpu.matmul %1034, %1035, %cst_550 {dimension_numbers = #tpu.dot_dimension_numbers<[1], [1], [0], [0], [0, 0, 1, 0], [], []>} : vector<16x8xbf16>, vector<16x8xbf16>, vector<16x16xf32> -> vector<16x16xf32>
    %cst_551 = arith.constant 0.353553385 : f32
    %1037 = vector.broadcast %cst_551 : f32 to vector<16x16xf32>
    %1038 = arith.mulf %1036, %1037 : vector<16x16xf32>
    %1039 = arith.addf %1038, %3 : vector<16x16xf32>
    %cst_552 = arith.constant dense<0xFF800000> : vector<16xf32>
    %1040 = vector.multi_reduction <maximumf>, %1039, %cst_552 [1] : vector<16x16xf32> to vector<16xf32>
    %1041 = vector.shape_cast %1040 : vector<16xf32> to vector<16x1xf32>
    %1042 = vector.broadcast %1041 : vector<16x1xf32> to vector<16x16xf32>
    %1043 = arith.subf %1039, %1042 : vector<16x16xf32>
    %1044 = math.exp %1043 : vector<16x16xf32>
    %cst_553 = arith.constant dense<0.000000e+00> : vector<16xf32>
    %1045 = vector.multi_reduction <add>, %1044, %cst_553 [1] : vector<16x16xf32> to vector<16xf32>
    %1046 = vector.shape_cast %1045 : vector<16xf32> to vector<16x1xf32>
    %1047 = tpu.reciprocal %1046 {approx = true} : vector<16x1xf32> -> vector<16x1xf32>
    %1048 = vector.broadcast %1047 : vector<16x1xf32> to vector<16x16xf32>
    %1049 = arith.mulf %1044, %1048 : vector<16x16xf32>
    %1050 = arith.truncf %1049 : vector<16x16xf32> to vector<16x16xbf16>
    %1051 = arith.truncf %1033 : vector<16x8xf32> to vector<16x8xbf16>
    %cst_554 = arith.constant dense<0.000000e+00> : vector<16x8xf32>
    %1052 = tpu.matmul %1050, %1051, %cst_554 {dimension_numbers = #tpu.dot_dimension_numbers<[1], [0], [0], [1], [0, 0, 1, 1], [], []>} : vector<16x16xbf16>, vector<16x8xbf16>, vector<16x8xf32> -> vector<16x8xf32>
    %1053 = arith.truncf %1052 : vector<16x8xf32> to vector<16x8xbf16>
    %cst_555 = arith.constant dense<0.000000e+00> : vector<16x32xf32>
    %1054 = tpu.matmul %1053, %165, %cst_555 {dimension_numbers = #tpu.dot_dimension_numbers<[1], [0], [0], [1], [0, 0, 1, 1], [], []>} : vector<16x8xbf16>, vector<8x32xbf16>, vector<16x32xf32> -> vector<16x32xf32>
    %cst_556 = arith.constant dense<0.000000e+00> : vector<16x8xf32>
    %1055 = tpu.matmul %1024, %167, %cst_556 {dimension_numbers = #tpu.dot_dimension_numbers<[1], [0], [0], [1], [0, 0, 1, 1], [], []>} : vector<16x32xbf16>, vector<32x8xbf16>, vector<16x8xf32> -> vector<16x8xf32>
    %1056 = vector.broadcast %169 : vector<1x8xf32> to vector<16x8xf32>
    %1057 = arith.addf %1055, %1056 : vector<16x8xf32>
    %cst_557 = arith.constant dense<0.000000e+00> : vector<16x8xf32>
    %1058 = tpu.matmul %1024, %171, %cst_557 {dimension_numbers = #tpu.dot_dimension_numbers<[1], [0], [0], [1], [0, 0, 1, 1], [], []>} : vector<16x32xbf16>, vector<32x8xbf16>, vector<16x8xf32> -> vector<16x8xf32>
    %1059 = vector.broadcast %173 : vector<1x8xf32> to vector<16x8xf32>
    %1060 = arith.addf %1058, %1059 : vector<16x8xf32>
    %cst_558 = arith.constant dense<0.000000e+00> : vector<16x8xf32>
    %1061 = tpu.matmul %1024, %175, %cst_558 {dimension_numbers = #tpu.dot_dimension_numbers<[1], [0], [0], [1], [0, 0, 1, 1], [], []>} : vector<16x32xbf16>, vector<32x8xbf16>, vector<16x8xf32> -> vector<16x8xf32>
    %1062 = vector.broadcast %177 : vector<1x8xf32> to vector<16x8xf32>
    %1063 = arith.addf %1061, %1062 : vector<16x8xf32>
    %1064 = arith.truncf %1057 : vector<16x8xf32> to vector<16x8xbf16>
    %1065 = arith.truncf %1060 : vector<16x8xf32> to vector<16x8xbf16>
    %cst_559 = arith.constant dense<0.000000e+00> : vector<16x16xf32>
    %1066 = tpu.matmul %1064, %1065, %cst_559 {dimension_numbers = #tpu.dot_dimension_numbers<[1], [1], [0], [0], [0, 0, 1, 0], [], []>} : vector<16x8xbf16>, vector<16x8xbf16>, vector<16x16xf32> -> vector<16x16xf32>
    %cst_560 = arith.constant 0.353553385 : f32
    %1067 = vector.broadcast %cst_560 : f32 to vector<16x16xf32>
    %1068 = arith.mulf %1066, %1067 : vector<16x16xf32>
    %1069 = arith.addf %1068, %3 : vector<16x16xf32>
    %cst_561 = arith.constant dense<0xFF800000> : vector<16xf32>
    %1070 = vector.multi_reduction <maximumf>, %1069, %cst_561 [1] : vector<16x16xf32> to vector<16xf32>
    %1071 = vector.shape_cast %1070 : vector<16xf32> to vector<16x1xf32>
    %1072 = vector.broadcast %1071 : vector<16x1xf32> to vector<16x16xf32>
    %1073 = arith.subf %1069, %1072 : vector<16x16xf32>
    %1074 = math.exp %1073 : vector<16x16xf32>
    %cst_562 = arith.constant dense<0.000000e+00> : vector<16xf32>
    %1075 = vector.multi_reduction <add>, %1074, %cst_562 [1] : vector<16x16xf32> to vector<16xf32>
    %1076 = vector.shape_cast %1075 : vector<16xf32> to vector<16x1xf32>
    %1077 = tpu.reciprocal %1076 {approx = true} : vector<16x1xf32> -> vector<16x1xf32>
    %1078 = vector.broadcast %1077 : vector<16x1xf32> to vector<16x16xf32>
    %1079 = arith.mulf %1074, %1078 : vector<16x16xf32>
    %1080 = arith.truncf %1079 : vector<16x16xf32> to vector<16x16xbf16>
    %1081 = arith.truncf %1063 : vector<16x8xf32> to vector<16x8xbf16>
    %cst_563 = arith.constant dense<0.000000e+00> : vector<16x8xf32>
    %1082 = tpu.matmul %1080, %1081, %cst_563 {dimension_numbers = #tpu.dot_dimension_numbers<[1], [0], [0], [1], [0, 0, 1, 1], [], []>} : vector<16x16xbf16>, vector<16x8xbf16>, vector<16x8xf32> -> vector<16x8xf32>
    %1083 = arith.truncf %1082 : vector<16x8xf32> to vector<16x8xbf16>
    %cst_564 = arith.constant dense<0.000000e+00> : vector<16x32xf32>
    %1084 = tpu.matmul %1083, %179, %cst_564 {dimension_numbers = #tpu.dot_dimension_numbers<[1], [0], [0], [1], [0, 0, 1, 1], [], []>} : vector<16x8xbf16>, vector<8x32xbf16>, vector<16x32xf32> -> vector<16x32xf32>
    %1085 = arith.addf %1054, %1084 : vector<16x32xf32>
    %cst_565 = arith.constant dense<0.000000e+00> : vector<16x8xf32>
    %1086 = tpu.matmul %1024, %181, %cst_565 {dimension_numbers = #tpu.dot_dimension_numbers<[1], [0], [0], [1], [0, 0, 1, 1], [], []>} : vector<16x32xbf16>, vector<32x8xbf16>, vector<16x8xf32> -> vector<16x8xf32>
    %1087 = vector.broadcast %183 : vector<1x8xf32> to vector<16x8xf32>
    %1088 = arith.addf %1086, %1087 : vector<16x8xf32>
    %cst_566 = arith.constant dense<0.000000e+00> : vector<16x8xf32>
    %1089 = tpu.matmul %1024, %185, %cst_566 {dimension_numbers = #tpu.dot_dimension_numbers<[1], [0], [0], [1], [0, 0, 1, 1], [], []>} : vector<16x32xbf16>, vector<32x8xbf16>, vector<16x8xf32> -> vector<16x8xf32>
    %1090 = vector.broadcast %187 : vector<1x8xf32> to vector<16x8xf32>
    %1091 = arith.addf %1089, %1090 : vector<16x8xf32>
    %cst_567 = arith.constant dense<0.000000e+00> : vector<16x8xf32>
    %1092 = tpu.matmul %1024, %189, %cst_567 {dimension_numbers = #tpu.dot_dimension_numbers<[1], [0], [0], [1], [0, 0, 1, 1], [], []>} : vector<16x32xbf16>, vector<32x8xbf16>, vector<16x8xf32> -> vector<16x8xf32>
    %1093 = vector.broadcast %191 : vector<1x8xf32> to vector<16x8xf32>
    %1094 = arith.addf %1092, %1093 : vector<16x8xf32>
    %1095 = arith.truncf %1088 : vector<16x8xf32> to vector<16x8xbf16>
    %1096 = arith.truncf %1091 : vector<16x8xf32> to vector<16x8xbf16>
    %cst_568 = arith.constant dense<0.000000e+00> : vector<16x16xf32>
    %1097 = tpu.matmul %1095, %1096, %cst_568 {dimension_numbers = #tpu.dot_dimension_numbers<[1], [1], [0], [0], [0, 0, 1, 0], [], []>} : vector<16x8xbf16>, vector<16x8xbf16>, vector<16x16xf32> -> vector<16x16xf32>
    %cst_569 = arith.constant 0.353553385 : f32
    %1098 = vector.broadcast %cst_569 : f32 to vector<16x16xf32>
    %1099 = arith.mulf %1097, %1098 : vector<16x16xf32>
    %1100 = arith.addf %1099, %3 : vector<16x16xf32>
    %cst_570 = arith.constant dense<0xFF800000> : vector<16xf32>
    %1101 = vector.multi_reduction <maximumf>, %1100, %cst_570 [1] : vector<16x16xf32> to vector<16xf32>
    %1102 = vector.shape_cast %1101 : vector<16xf32> to vector<16x1xf32>
    %1103 = vector.broadcast %1102 : vector<16x1xf32> to vector<16x16xf32>
    %1104 = arith.subf %1100, %1103 : vector<16x16xf32>
    %1105 = math.exp %1104 : vector<16x16xf32>
    %cst_571 = arith.constant dense<0.000000e+00> : vector<16xf32>
    %1106 = vector.multi_reduction <add>, %1105, %cst_571 [1] : vector<16x16xf32> to vector<16xf32>
    %1107 = vector.shape_cast %1106 : vector<16xf32> to vector<16x1xf32>
    %1108 = tpu.reciprocal %1107 {approx = true} : vector<16x1xf32> -> vector<16x1xf32>
    %1109 = vector.broadcast %1108 : vector<16x1xf32> to vector<16x16xf32>
    %1110 = arith.mulf %1105, %1109 : vector<16x16xf32>
    %1111 = arith.truncf %1110 : vector<16x16xf32> to vector<16x16xbf16>
    %1112 = arith.truncf %1094 : vector<16x8xf32> to vector<16x8xbf16>
    %cst_572 = arith.constant dense<0.000000e+00> : vector<16x8xf32>
    %1113 = tpu.matmul %1111, %1112, %cst_572 {dimension_numbers = #tpu.dot_dimension_numbers<[1], [0], [0], [1], [0, 0, 1, 1], [], []>} : vector<16x16xbf16>, vector<16x8xbf16>, vector<16x8xf32> -> vector<16x8xf32>
    %1114 = arith.truncf %1113 : vector<16x8xf32> to vector<16x8xbf16>
    %cst_573 = arith.constant dense<0.000000e+00> : vector<16x32xf32>
    %1115 = tpu.matmul %1114, %193, %cst_573 {dimension_numbers = #tpu.dot_dimension_numbers<[1], [0], [0], [1], [0, 0, 1, 1], [], []>} : vector<16x8xbf16>, vector<8x32xbf16>, vector<16x32xf32> -> vector<16x32xf32>
    %1116 = arith.addf %1085, %1115 : vector<16x32xf32>
    %cst_574 = arith.constant dense<0.000000e+00> : vector<16x8xf32>
    %1117 = tpu.matmul %1024, %195, %cst_574 {dimension_numbers = #tpu.dot_dimension_numbers<[1], [0], [0], [1], [0, 0, 1, 1], [], []>} : vector<16x32xbf16>, vector<32x8xbf16>, vector<16x8xf32> -> vector<16x8xf32>
    %1118 = vector.broadcast %197 : vector<1x8xf32> to vector<16x8xf32>
    %1119 = arith.addf %1117, %1118 : vector<16x8xf32>
    %cst_575 = arith.constant dense<0.000000e+00> : vector<16x8xf32>
    %1120 = tpu.matmul %1024, %199, %cst_575 {dimension_numbers = #tpu.dot_dimension_numbers<[1], [0], [0], [1], [0, 0, 1, 1], [], []>} : vector<16x32xbf16>, vector<32x8xbf16>, vector<16x8xf32> -> vector<16x8xf32>
    %1121 = vector.broadcast %201 : vector<1x8xf32> to vector<16x8xf32>
    %1122 = arith.addf %1120, %1121 : vector<16x8xf32>
    %cst_576 = arith.constant dense<0.000000e+00> : vector<16x8xf32>
    %1123 = tpu.matmul %1024, %203, %cst_576 {dimension_numbers = #tpu.dot_dimension_numbers<[1], [0], [0], [1], [0, 0, 1, 1], [], []>} : vector<16x32xbf16>, vector<32x8xbf16>, vector<16x8xf32> -> vector<16x8xf32>
    %1124 = vector.broadcast %205 : vector<1x8xf32> to vector<16x8xf32>
    %1125 = arith.addf %1123, %1124 : vector<16x8xf32>
    %1126 = arith.truncf %1119 : vector<16x8xf32> to vector<16x8xbf16>
    %1127 = arith.truncf %1122 : vector<16x8xf32> to vector<16x8xbf16>
    %cst_577 = arith.constant dense<0.000000e+00> : vector<16x16xf32>
    %1128 = tpu.matmul %1126, %1127, %cst_577 {dimension_numbers = #tpu.dot_dimension_numbers<[1], [1], [0], [0], [0, 0, 1, 0], [], []>} : vector<16x8xbf16>, vector<16x8xbf16>, vector<16x16xf32> -> vector<16x16xf32>
    %cst_578 = arith.constant 0.353553385 : f32
    %1129 = vector.broadcast %cst_578 : f32 to vector<16x16xf32>
    %1130 = arith.mulf %1128, %1129 : vector<16x16xf32>
    %1131 = arith.addf %1130, %3 : vector<16x16xf32>
    %cst_579 = arith.constant dense<0xFF800000> : vector<16xf32>
    %1132 = vector.multi_reduction <maximumf>, %1131, %cst_579 [1] : vector<16x16xf32> to vector<16xf32>
    %1133 = vector.shape_cast %1132 : vector<16xf32> to vector<16x1xf32>
    %1134 = vector.broadcast %1133 : vector<16x1xf32> to vector<16x16xf32>
    %1135 = arith.subf %1131, %1134 : vector<16x16xf32>
    %1136 = math.exp %1135 : vector<16x16xf32>
    %cst_580 = arith.constant dense<0.000000e+00> : vector<16xf32>
    %1137 = vector.multi_reduction <add>, %1136, %cst_580 [1] : vector<16x16xf32> to vector<16xf32>
    %1138 = vector.shape_cast %1137 : vector<16xf32> to vector<16x1xf32>
    %1139 = tpu.reciprocal %1138 {approx = true} : vector<16x1xf32> -> vector<16x1xf32>
    %1140 = vector.broadcast %1139 : vector<16x1xf32> to vector<16x16xf32>
    %1141 = arith.mulf %1136, %1140 : vector<16x16xf32>
    %1142 = arith.truncf %1141 : vector<16x16xf32> to vector<16x16xbf16>
    %1143 = arith.truncf %1125 : vector<16x8xf32> to vector<16x8xbf16>
    %cst_581 = arith.constant dense<0.000000e+00> : vector<16x8xf32>
    %1144 = tpu.matmul %1142, %1143, %cst_581 {dimension_numbers = #tpu.dot_dimension_numbers<[1], [0], [0], [1], [0, 0, 1, 1], [], []>} : vector<16x16xbf16>, vector<16x8xbf16>, vector<16x8xf32> -> vector<16x8xf32>
    %1145 = arith.truncf %1144 : vector<16x8xf32> to vector<16x8xbf16>
    %cst_582 = arith.constant dense<0.000000e+00> : vector<16x32xf32>
    %1146 = tpu.matmul %1145, %207, %cst_582 {dimension_numbers = #tpu.dot_dimension_numbers<[1], [0], [0], [1], [0, 0, 1, 1], [], []>} : vector<16x8xbf16>, vector<8x32xbf16>, vector<16x32xf32> -> vector<16x32xf32>
    %1147 = arith.addf %1116, %1146 : vector<16x32xf32>
    %1148 = vector.broadcast %209 : vector<1x32xf32> to vector<16x32xf32>
    %1149 = arith.addf %1147, %1148 : vector<16x32xf32>
    %1150 = arith.addf %1023, %1149 : vector<16x32xf32>
    %cst_583 = arith.constant dense<0.000000e+00> : vector<16xf32>
    %1151 = vector.multi_reduction <add>, %1150, %cst_583 [1] : vector<16x32xf32> to vector<16xf32>
    %1152 = vector.shape_cast %1151 : vector<16xf32> to vector<16x1xf32>
    %cst_584 = arith.constant 3.200000e+01 : f32
    %1153 = vector.broadcast %cst_584 : f32 to vector<16x1xf32>
    %1154 = arith.divf %1152, %1153 : vector<16x1xf32>
    %1155 = vector.broadcast %1154 : vector<16x1xf32> to vector<16x32xf32>
    %1156 = arith.subf %1150, %1155 : vector<16x32xf32>
    %1157 = arith.mulf %1156, %1156 : vector<16x32xf32>
    %cst_585 = arith.constant dense<0.000000e+00> : vector<16xf32>
    %1158 = vector.multi_reduction <add>, %1157, %cst_585 [1] : vector<16x32xf32> to vector<16xf32>
    %1159 = vector.shape_cast %1158 : vector<16xf32> to vector<16x1xf32>
    %cst_586 = arith.constant 3.200000e+01 : f32
    %1160 = vector.broadcast %cst_586 : f32 to vector<16x1xf32>
    %1161 = arith.divf %1159, %1160 : vector<16x1xf32>
    %1162 = vector.broadcast %1154 : vector<16x1xf32> to vector<16x32xf32>
    %1163 = arith.subf %1150, %1162 : vector<16x32xf32>
    %cst_587 = arith.constant 9.99999996E-13 : f32
    %1164 = vector.broadcast %cst_587 : f32 to vector<16x1xf32>
    %1165 = arith.addf %1161, %1164 : vector<16x1xf32>
    %1166 = math.rsqrt %1165 : vector<16x1xf32>
    %1167 = vector.broadcast %1166 : vector<16x1xf32> to vector<16x32xf32>
    %1168 = arith.mulf %1163, %1167 : vector<16x32xf32>
    %1169 = vector.broadcast %211 : vector<1x32xf32> to vector<16x32xf32>
    %1170 = arith.mulf %1168, %1169 : vector<16x32xf32>
    %1171 = vector.broadcast %213 : vector<1x32xf32> to vector<16x32xf32>
    %1172 = arith.addf %1170, %1171 : vector<16x32xf32>
    %1173 = arith.truncf %1172 : vector<16x32xf32> to vector<16x32xbf16>
    %cst_588 = arith.constant dense<0.000000e+00> : vector<16x64xf32>
    %1174 = tpu.matmul %1173, %215, %cst_588 {dimension_numbers = #tpu.dot_dimension_numbers<[1], [0], [0], [1], [0, 0, 1, 1], [], []>} : vector<16x32xbf16>, vector<32x64xbf16>, vector<16x64xf32> -> vector<16x64xf32>
    %1175 = vector.broadcast %217 : vector<1x64xf32> to vector<16x64xf32>
    %1176 = arith.addf %1174, %1175 : vector<16x64xf32>
    %cst_589 = arith.constant 5.000000e-01 : f32
    %1177 = vector.broadcast %cst_589 : f32 to vector<16x64xf32>
    %1178 = arith.mulf %1177, %1176 : vector<16x64xf32>
    %cst_590 = arith.constant 4.471500e-02 : f32
    %1179 = vector.broadcast %cst_590 : f32 to vector<16x64xf32>
    %1180 = arith.mulf %1179, %1176 : vector<16x64xf32>
    %1181 = arith.mulf %1180, %1176 : vector<16x64xf32>
    %1182 = arith.mulf %1181, %1176 : vector<16x64xf32>
    %1183 = arith.addf %1176, %1182 : vector<16x64xf32>
    %cst_591 = arith.constant 0.797884583 : f32
    %1184 = vector.broadcast %cst_591 : f32 to vector<16x64xf32>
    %1185 = arith.mulf %1184, %1183 : vector<16x64xf32>
    %1186 = math.tanh %1185 : vector<16x64xf32>
    %cst_592 = arith.constant 1.000000e+00 : f32
    %1187 = vector.broadcast %cst_592 : f32 to vector<16x64xf32>
    %1188 = arith.addf %1187, %1186 : vector<16x64xf32>
    %1189 = arith.mulf %1178, %1188 : vector<16x64xf32>
    %1190 = arith.truncf %1189 : vector<16x64xf32> to vector<16x64xbf16>
    %cst_593 = arith.constant dense<0.000000e+00> : vector<16x32xf32>
    %1191 = tpu.matmul %1190, %219, %cst_593 {dimension_numbers = #tpu.dot_dimension_numbers<[1], [0], [0], [1], [0, 0, 1, 1], [], []>} : vector<16x64xbf16>, vector<64x32xbf16>, vector<16x32xf32> -> vector<16x32xf32>
    %1192 = vector.broadcast %221 : vector<1x32xf32> to vector<16x32xf32>
    %1193 = arith.addf %1191, %1192 : vector<16x32xf32>
    %1194 = arith.addf %1172, %1193 : vector<16x32xf32>
    %cst_594 = arith.constant dense<0.000000e+00> : vector<16xf32>
    %1195 = vector.multi_reduction <add>, %1194, %cst_594 [1] : vector<16x32xf32> to vector<16xf32>
    %1196 = vector.shape_cast %1195 : vector<16xf32> to vector<16x1xf32>
    %cst_595 = arith.constant 3.200000e+01 : f32
    %1197 = vector.broadcast %cst_595 : f32 to vector<16x1xf32>
    %1198 = arith.divf %1196, %1197 : vector<16x1xf32>
    %1199 = vector.broadcast %1198 : vector<16x1xf32> to vector<16x32xf32>
    %1200 = arith.subf %1194, %1199 : vector<16x32xf32>
    %1201 = arith.mulf %1200, %1200 : vector<16x32xf32>
    %cst_596 = arith.constant dense<0.000000e+00> : vector<16xf32>
    %1202 = vector.multi_reduction <add>, %1201, %cst_596 [1] : vector<16x32xf32> to vector<16xf32>
    %1203 = vector.shape_cast %1202 : vector<16xf32> to vector<16x1xf32>
    %cst_597 = arith.constant 3.200000e+01 : f32
    %1204 = vector.broadcast %cst_597 : f32 to vector<16x1xf32>
    %1205 = arith.divf %1203, %1204 : vector<16x1xf32>
    %1206 = vector.broadcast %1198 : vector<16x1xf32> to vector<16x32xf32>
    %1207 = arith.subf %1194, %1206 : vector<16x32xf32>
    %cst_598 = arith.constant 9.99999996E-13 : f32
    %1208 = vector.broadcast %cst_598 : f32 to vector<16x1xf32>
    %1209 = arith.addf %1205, %1208 : vector<16x1xf32>
    %1210 = math.rsqrt %1209 : vector<16x1xf32>
    %1211 = vector.broadcast %1210 : vector<16x1xf32> to vector<16x32xf32>
    %1212 = arith.mulf %1207, %1211 : vector<16x32xf32>
    %1213 = vector.broadcast %223 : vector<1x32xf32> to vector<16x32xf32>
    %1214 = arith.mulf %1212, %1213 : vector<16x32xf32>
    %1215 = vector.broadcast %225 : vector<1x32xf32> to vector<16x32xf32>
    %1216 = arith.addf %1214, %1215 : vector<16x32xf32>
    %1217 = arith.addf %1216, %612 : vector<16x32xf32>
    %1218 = arith.truncf %1217 : vector<16x32xf32> to vector<16x32xbf16>
    %c0_599 = arith.constant 0 : index
    %c0_600 = arith.constant 0 : index
    %1219 = vector.load %arg24[%c0_599, %c0_600] : memref<32x128xbf16, #tpu.memory_space<vmem>>, vector<32x128xbf16>
    %cst_601 = arith.constant dense<0.000000e+00> : vector<16x128xf32>
    %1220 = tpu.matmul %1218, %1219, %cst_601 {dimension_numbers = #tpu.dot_dimension_numbers<[1], [0], [0], [1], [0, 0, 1, 1], [], []>} : vector<16x32xbf16>, vector<32x128xbf16>, vector<16x128xf32> -> vector<16x128xf32>
    %c0_602 = arith.constant 0 : index
    %c0_603 = arith.constant 0 : index
    %1221 = vector.load %arg25[%c0_602, %c0_603] : memref<1x128xf32, #tpu.memory_space<vmem>>, vector<1x128xf32>
    %1222 = vector.broadcast %1221 : vector<1x128xf32> to vector<16x128xf32>
    %1223 = arith.addf %1220, %1222 : vector<16x128xf32>
    %1224 = arith.truncf %612 : vector<16x32xf32> to vector<16x32xbf16>
    %c0_604 = arith.constant 0 : index
    %c0_605 = arith.constant 0 : index
    %1225 = vector.load %arg26[%c0_604, %c0_605] : memref<32x1xbf16, #tpu.memory_space<vmem>>, vector<32x1xbf16>
    %cst_606 = arith.constant dense<0.000000e+00> : vector<16x1xf32>
    %1226 = tpu.matmul %1224, %1225, %cst_606 {dimension_numbers = #tpu.dot_dimension_numbers<[1], [0], [0], [1], [0, 0, 1, 1], [], []>} : vector<16x32xbf16>, vector<32x1xbf16>, vector<16x1xf32> -> vector<16x1xf32>
    %c0_607 = arith.constant 0 : index
    %c0_608 = arith.constant 0 : index
    %1227 = vector.load %arg27[%c0_607, %c0_608] : memref<1x1xf32, #tpu.memory_space<vmem>>, vector<1x1xf32>
    %1228 = vector.broadcast %1227 : vector<1x1xf32> to vector<16x1xf32>
    %1229 = arith.addf %1226, %1228 : vector<16x1xf32>
    %cst_609 = arith.constant 0.000000e+00 : f32
    %1230 = vector.broadcast %cst_609 : f32 to vector<16x1xf32>
    %1231 = arith.subf %1230, %1229 : vector<16x1xf32>
    %1232 = math.exp %1231 : vector<16x1xf32>
    %cst_610 = arith.constant 1.000000e+00 : f32
    %1233 = vector.broadcast %cst_610 : f32 to vector<16x1xf32>
    %1234 = arith.addf %1233, %1232 : vector<16x1xf32>
    %1235 = tpu.reciprocal %1234 {approx = true} : vector<16x1xf32> -> vector<16x1xf32>
    %c0_611 = arith.constant 0 : index
    %c0_612 = arith.constant 0 : index
    %1236 = vector.load %arg5[%c0_611, %c0_612] : memref<16x1xf32, #tpu.memory_space<vmem>>, vector<16x1xf32>
    %1237 = arith.mulf %1235, %1236 : vector<16x1xf32>
    %1238 = tpu.iota {dimensions = array<i32: 1>} : vector<16x128xi32>
    %c64_i32 = arith.constant 64 : i32
    %1239 = vector.broadcast %c64_i32 : i32 to vector<16x128xi32>
    %1240 = arith.cmpi eq, %1238, %1239 : vector<16x128xi32>
    %1241 = vector.shape_cast %1237 : vector<16x1xf32> to vector<16x1xf32>
    %1242 = vector.broadcast %1241 : vector<16x1xf32> to vector<16x128xf32>
    %1243 = arith.select %1240, %1242, %1223 : vector<16x128xi1>, vector<16x128xf32>
    %c0_613 = arith.constant 0 : index
    %c0_614 = arith.constant 0 : index
    %1244 = vector.load %arg28[%c0_613, %c0_614] : memref<16x128xf32, #tpu.memory_space<vmem>>, vector<16x128xf32>
    tpu.vector_store %arg28[%c0_613, %c0_614], %1243 {strides = array<i32>} : memref<16x128xf32, #tpu.memory_space<vmem>>, vector<16x128xf32>,
    return
  }
  func.func @transform_0(%arg0: i32) -> (i32, i32) {
    %c0_i32 = arith.constant 0 : i32
    %c0_i32_0 = arith.constant 0 : i32
    return %arg0, %c0_i32 : i32, i32
  }
  func.func @transform_1(%arg0: i32) -> (i32, i32) {
    %c0_i32 = arith.constant 0 : i32
    %c0_i32_0 = arith.constant 0 : i32
    return %arg0, %c0_i32 : i32, i32
  }
  func.func @transform_2(%arg0: i32) -> (i32, i32, i32) {
    %c0_i32 = arith.constant 0 : i32
    %c0_i32_0 = arith.constant 0 : i32
    %c0_i32_1 = arith.constant 0 : i32
    return %arg0, %c0_i32, %c0_i32_0 : i32, i32, i32
  }
  func.func @transform_3(%arg0: i32) -> (i32, i32, i32) {
    %c0_i32 = arith.constant 0 : i32
    %c0_i32_0 = arith.constant 0 : i32
    %c0_i32_1 = arith.constant 0 : i32
    return %arg0, %c0_i32, %c0_i32_0 : i32, i32, i32
  }
  func.func @transform_4(%arg0: i32) -> (i32, i32) {
    %c0_i32 = arith.constant 0 : i32
    %c0_i32_0 = arith.constant 0 : i32
    return %arg0, %c0_i32 : i32, i32
  }
  func.func @transform_5(%arg0: i32) -> (i32, i32) {
    %c0_i32 = arith.constant 0 : i32
    %c0_i32_0 = arith.constant 0 : i32
    %c0_i32_1 = arith.constant 0 : i32
    return %c0_i32, %c0_i32_0 : i32, i32
  }
  func.func @transform_6(%arg0: i32) -> (i32, i32) {
    %c0_i32 = arith.constant 0 : i32
    %c0_i32_0 = arith.constant 0 : i32
    %c0_i32_1 = arith.constant 0 : i32
    return %c0_i32, %c0_i32_0 : i32, i32
  }
  func.func @transform_7(%arg0: i32) -> (i32, i32, i32) {
    %c0_i32 = arith.constant 0 : i32
    %c0_i32_0 = arith.constant 0 : i32
    %c0_i32_1 = arith.constant 0 : i32
    %c0_i32_2 = arith.constant 0 : i32
    return %c0_i32, %c0_i32_0, %c0_i32_1 : i32, i32, i32
  }
  func.func @transform_8(%arg0: i32) -> (i32, i32, i32) {
    %c0_i32 = arith.constant 0 : i32
    %c0_i32_0 = arith.constant 0 : i32
    %c0_i32_1 = arith.constant 0 : i32
    %c0_i32_2 = arith.constant 0 : i32
    return %c0_i32, %c0_i32_0, %c0_i32_1 : i32, i32, i32
  }
  func.func @transform_9(%arg0: i32) -> (i32, i32, i32) {
    %c0_i32 = arith.constant 0 : i32
    %c0_i32_0 = arith.constant 0 : i32
    %c0_i32_1 = arith.constant 0 : i32
    %c0_i32_2 = arith.constant 0 : i32
    return %c0_i32, %c0_i32_0, %c0_i32_1 : i32, i32, i32
  }
  func.func @transform_10(%arg0: i32) -> (i32, i32, i32) {
    %c0_i32 = arith.constant 0 : i32
    %c0_i32_0 = arith.constant 0 : i32
    %c0_i32_1 = arith.constant 0 : i32
    %c0_i32_2 = arith.constant 0 : i32
    return %c0_i32, %c0_i32_0, %c0_i32_1 : i32, i32, i32
  }
  func.func @transform_11(%arg0: i32) -> (i32, i32, i32) {
    %c0_i32 = arith.constant 0 : i32
    %c0_i32_0 = arith.constant 0 : i32
    %c0_i32_1 = arith.constant 0 : i32
    %c0_i32_2 = arith.constant 0 : i32
    return %c0_i32, %c0_i32_0, %c0_i32_1 : i32, i32, i32
  }
  func.func @transform_12(%arg0: i32) -> (i32, i32, i32) {
    %c0_i32 = arith.constant 0 : i32
    %c0_i32_0 = arith.constant 0 : i32
    %c0_i32_1 = arith.constant 0 : i32
    %c0_i32_2 = arith.constant 0 : i32
    return %c0_i32, %c0_i32_0, %c0_i32_1 : i32, i32, i32
  }
  func.func @transform_13(%arg0: i32) -> (i32, i32, i32) {
    %c0_i32 = arith.constant 0 : i32
    %c0_i32_0 = arith.constant 0 : i32
    %c0_i32_1 = arith.constant 0 : i32
    %c0_i32_2 = arith.constant 0 : i32
    return %c0_i32, %c0_i32_0, %c0_i32_1 : i32, i32, i32
  }
  func.func @transform_14(%arg0: i32) -> (i32, i32, i32) {
    %c0_i32 = arith.constant 0 : i32
    %c0_i32_0 = arith.constant 0 : i32
    %c0_i32_1 = arith.constant 0 : i32
    %c0_i32_2 = arith.constant 0 : i32
    return %c0_i32, %c0_i32_0, %c0_i32_1 : i32, i32, i32
  }
  func.func @transform_15(%arg0: i32) -> (i32, i32, i32) {
    %c0_i32 = arith.constant 0 : i32
    %c0_i32_0 = arith.constant 0 : i32
    %c0_i32_1 = arith.constant 0 : i32
    %c0_i32_2 = arith.constant 0 : i32
    return %c0_i32, %c0_i32_0, %c0_i32_1 : i32, i32, i32
  }
  func.func @transform_16(%arg0: i32) -> (i32, i32, i32) {
    %c0_i32 = arith.constant 0 : i32
    %c0_i32_0 = arith.constant 0 : i32
    %c0_i32_1 = arith.constant 0 : i32
    %c0_i32_2 = arith.constant 0 : i32
    return %c0_i32, %c0_i32_0, %c0_i32_1 : i32, i32, i32
  }
  func.func @transform_17(%arg0: i32) -> (i32, i32, i32) {
    %c0_i32 = arith.constant 0 : i32
    %c0_i32_0 = arith.constant 0 : i32
    %c0_i32_1 = arith.constant 0 : i32
    %c0_i32_2 = arith.constant 0 : i32
    return %c0_i32, %c0_i32_0, %c0_i32_1 : i32, i32, i32
  }
  func.func @transform_18(%arg0: i32) -> (i32, i32, i32) {
    %c0_i32 = arith.constant 0 : i32
    %c0_i32_0 = arith.constant 0 : i32
    %c0_i32_1 = arith.constant 0 : i32
    %c0_i32_2 = arith.constant 0 : i32
    return %c0_i32, %c0_i32_0, %c0_i32_1 : i32, i32, i32
  }
  func.func @transform_19(%arg0: i32) -> (i32, i32, i32) {
    %c0_i32 = arith.constant 0 : i32
    %c0_i32_0 = arith.constant 0 : i32
    %c0_i32_1 = arith.constant 0 : i32
    %c0_i32_2 = arith.constant 0 : i32
    return %c0_i32, %c0_i32_0, %c0_i32_1 : i32, i32, i32
  }
  func.func @transform_20(%arg0: i32) -> (i32, i32, i32) {
    %c0_i32 = arith.constant 0 : i32
    %c0_i32_0 = arith.constant 0 : i32
    %c0_i32_1 = arith.constant 0 : i32
    %c0_i32_2 = arith.constant 0 : i32
    return %c0_i32, %c0_i32_0, %c0_i32_1 : i32, i32, i32
  }
  func.func @transform_21(%arg0: i32) -> (i32, i32, i32) {
    %c0_i32 = arith.constant 0 : i32
    %c0_i32_0 = arith.constant 0 : i32
    %c0_i32_1 = arith.constant 0 : i32
    %c0_i32_2 = arith.constant 0 : i32
    return %c0_i32, %c0_i32_0, %c0_i32_1 : i32, i32, i32
  }
  func.func @transform_22(%arg0: i32) -> (i32, i32, i32) {
    %c0_i32 = arith.constant 0 : i32
    %c0_i32_0 = arith.constant 0 : i32
    %c0_i32_1 = arith.constant 0 : i32
    %c0_i32_2 = arith.constant 0 : i32
    return %c0_i32, %c0_i32_0, %c0_i32_1 : i32, i32, i32
  }
  func.func @transform_23(%arg0: i32) -> (i32, i32) {
    %c0_i32 = arith.constant 0 : i32
    %c0_i32_0 = arith.constant 0 : i32
    %c0_i32_1 = arith.constant 0 : i32
    return %c0_i32, %c0_i32_0 : i32, i32
  }
  func.func @transform_24(%arg0: i32) -> (i32, i32) {
    %c0_i32 = arith.constant 0 : i32
    %c0_i32_0 = arith.constant 0 : i32
    %c0_i32_1 = arith.constant 0 : i32
    return %c0_i32, %c0_i32_0 : i32, i32
  }
  func.func @transform_25(%arg0: i32) -> (i32, i32) {
    %c0_i32 = arith.constant 0 : i32
    %c0_i32_0 = arith.constant 0 : i32
    %c0_i32_1 = arith.constant 0 : i32
    return %c0_i32, %c0_i32_0 : i32, i32
  }
  func.func @transform_26(%arg0: i32) -> (i32, i32) {
    %c0_i32 = arith.constant 0 : i32
    %c0_i32_0 = arith.constant 0 : i32
    %c0_i32_1 = arith.constant 0 : i32
    return %c0_i32, %c0_i32_0 : i32, i32
  }
  func.func @transform_27(%arg0: i32) -> (i32, i32) {
    %c0_i32 = arith.constant 0 : i32
    %c0_i32_0 = arith.constant 0 : i32
    return %arg0, %c0_i32 : i32, i32
  }
}

</mosaic_0001>

<bundles_post_ra>
// kernel: squeeze.1
= control target key start
LH: loop header
LB: loop body
LE: loop exit
PB: predicated region body
PF: predicated region fallthrough
CT: control target
= control target key end

     0   :  { %s77_s0 = inlined_call_operand.vmem [shape: f32[16], index: 0, kind: input, shape index: {}]   ;;  %s78_s1 = inlined_call_operand.hbm [shape: f32[2,8], index: 1, kind: output, shape index: {}]  }
   0x1   :  { %v6_v0 = vld [vmem:[%s77_s0] sm:$0x1] }
   0x2   :  { %2 = vsyncpa [#allocation1], 0  ;;  %7 = vst [vmem:[#allocation3] sm:$0x1] %v6_v0  ;;  %vm9_vm0 = vcmask 64512   ;;  %s59_s0 = smov 120  }
   0x3   :  { %s60_s8 = smov [#allocation0]  }
   0x4   :  { %s29_s9 = sshll.u32 %s60_s8, 4  ;;  %s30_s9 = int_to_ptr.vmem [resolvable:$true] %s29_s9 }
   0x5   :  { %s37_s10 = scalar_lea.vmem %s30_s9, 32  ;;  %p42_p1 = scmp.lt.s32.totalorder %s30_s9, %s30_s9 }
   0x6   :  { %p38_p0 = scmp.ne.s32.totalorder %s30_s9, %s37_s10  ;;  %p43_p2 = scmp.lt.s32.totalorder %s37_s10, %s37_s10 }
   0x8   :  { %p44_p3 = por %p43_p2, %p42_p1 }
   0x9   :  { %v11_v1 = vld [vmem:[#allocation3] sm:$0x1]  }
   0xa   :  { %v8_v2 = vld [vmem:[#allocation3] sm:$0x1]   ;;  %12 = vrot.lane.b32.xlu0 %v11_v1, %s59_s0  ;;  %p45_p4 = pnand %p44_p3, %p38_p0 }
   0xb   :  { %10 = vst.msk [vmem:[#allocation2] sm:$0x1] %vm9_vm0, %v8_v2  }
  0x7c   :  { %v13_v3 = vpop.permute.xlu0 %12  }
  0x7d   :  { %16 = vst.msk [vmem:[#allocation2 + $0x1] sm:$0x1] %vm9_vm0, %v13_v3  }
  0x84   :  { %v21_v4 = vld [vmem:[#allocation2] sm:$0x3] }
  0x85   :  { %24 = vst [vmem:[#allocation0] sm:$0x3] %v21_v4 }
  0x86   :  { %48 = shalt.err (!%p45_p4)
}
  0x87   :  { %32 = dma.vmem_to_hbm [thread:$0]  %s30_s9, 32, %s78_s1, [#allocation1]  }
  0x88   :  { %57 = dma.done.wait [#allocation1], 32  }
  0x89   :  { %58 = vsyncadd [#allocation1], 4294967264 }
  0x8a   :  { %34 = vsyncpa [#allocation1], 1 }

// kernel: mdcspell_forward.1
= control target key start
LH: loop header
LB: loop body
LE: loop exit
PB: predicated region body
PF: predicated region fallthrough
CT: control target
= control target key end

     0   :  { %v10511_v0 = vmov 0.0   ;;  %vm10512_vm0 = vmmov 0   ;;  %vm458_vm1 = vcmask 261120   ;;  %vm623_vm2 = vcmask 64512   ;;  %s12620_s9 = inlined_call_operand.vmem [shape: bf16[12,32,8], index: 9, kind: input, shape index: {}]   ;;  %s12621_s7 = inlined_call_operand.vmem [shape: bf16[12,32,8], index: 7, kind: input, shape index: {}]   ;;  %s12622_s0 = inlined_call_operand.vmem [shape: f32[16,32], index: 0, kind: input, shape index: {}]   ;;  %s12623_s10 = inlined_call_operand.vmem [shape: f32[12,1,8], index: 10, kind: input, shape index: {}]   ;;  %s12624_s8 = inlined_call_operand.vmem [shape: f32[12,1,8], index: 8, kind: input, shape index: {}]   ;;  %s12625_s11 = inlined_call_operand.vmem [shape: bf16[12,32,8], index: 11, kind: input, shape index: {}]   ;;  %s12626_s2 = inlined_call_operand.vmem [shape: f32[1,16,16], index: 2, kind: input, shape index: {}]   ;;  %s12627_s12 = inlined_call_operand.vmem [shape: f32[12,1,8], index: 12, kind: input, shape index: {}]   ;;  %s12628_s13 = inlined_call_operand.vmem [shape: bf16[12,8,32], index: 13, kind: input, shape index: {}]   ;;  %s12629_s14 = inlined_call_operand.vmem [shape: f32[3,1,32], index: 14, kind: input, shape index: {}]   ;;  %s12630_s17 = inlined_call_operand.vmem [shape: bf16[3,32,64], index: 17, kind: input, shape index: {}]   ;;  %s12631_s15 = inlined_call_operand.vmem [shape: f32[3,1,32], index: 15, kind: input, shape index: {}]   ;;  %s12632_s16 = inlined_call_operand.vmem [shape: f32[3,1,32], index: 16, kind: input, shape index: {}]   ;;  %s12633_s19 = inlined_call_operand.vmem [shape: bf16[3,64,32], index: 19, kind: input, shape index: {}]   ;;  %s12634_s18 = inlined_call_operand.vmem [shape: f32[3,1,64], index: 18, kind: input, shape index: {}]   ;;  %s12635_s20 = inlined_call_operand.vmem [shape: f32[3,1,32], index: 20, kind: input, shape index: {}]   ;;  %s12636_s21 = inlined_call_operand.vmem [shape: f32[3,1,32], index: 21, kind: input, shape index: {}]   ;;  %s12637_s22 = inlined_call_operand.vmem [shape: f32[3,1,32], index: 22, kind: input, shape index: {}]   ;;  %s12638_s1 = inlined_call_operand.vmem [shape: f32[16,32], index: 1, kind: input, shape index: {}]   ;;  %s12639_s5 = inlined_call_operand.vmem [shape: f32[1,32], index: 5, kind: input, shape index: {}]   ;;  %s12640_s6 = inlined_call_operand.vmem [shape: f32[1,32], index: 6, kind: input, shape index: {}]   ;;  %s12641_s3 = inlined_call_operand.vmem [shape: f32[1,16,16], index: 3, kind: input, shape index: {}]   ;;  %s12642_s23 = inlined_call_operand.vmem [shape: bf16[32,128], index: 23, kind: input, shape index: {}]   ;;  %s12643_s25 = inlined_call_operand.vmem [shape: bf16[32,1], index: 25, kind: input, shape index: {}]   ;;  %s12644_s26 = inlined_call_operand.<no memory space> [shape: f32[1,1], index: 26, kind: input, shape index: {}]   ;;  %s12645_s4 = inlined_call_operand.vmem [shape: f32[16,1], index: 4, kind: input, shape index: {}]   ;;  %s12646_s24 = inlined_call_operand.vmem [shape: f32[1,128], index: 24, kind: input, shape index: {}]   ;;  %s12647_s27 = inlined_call_operand.vmem [shape: f32[16,128], index: 27, kind: output, shape index: {}]  }
   0x1   :  { %12662 = sst [smem:[#allocation3_spill]] %s12620_s9  ;;  %9127 = vmatprep.subr.bf16.mxu1 %v10511_v0  ;;  %9119 = vmatprep.subr.bf16.mxu0 %v10511_v0  ;;  %vm675_vm3 = vcmask 130048   ;;  %vm1047_vm4 = vcmask 1043456   ;;  %vm2000_vm5 = vcmask 523264  }
   0x2   :  { %12663 = sst [smem:[#allocation4_spill]] %s12621_s7  ;;  %9131 = vmatprep.mubr.msk.bf16.mxu1 %vm10512_vm0, %v10511_v0  ;;  %9123 = vmatprep.mubr.msk.bf16.mxu0 %vm10512_vm0, %v10511_v0 }
   0x3   :  { %12664 = sst [smem:[#allocation5_spill]] %s12622_s0 }
   0x4   :  { %12665 = sst [smem:[#allocation6_spill]] %s12623_s10 }
   0x5   :  { %12666 = sst [smem:[#allocation7_spill]] %s12624_s8 }
   0x6   :  { %12667 = sst [smem:[#allocation8_spill]] %s12625_s11 }
   0x7   :  { %12668 = sst [smem:[#allocation9_spill]] %s12626_s2 }
   0x8   :  { %12669 = sst [smem:[#allocation10_spill]] %s12627_s12 }
   0x9   :  { %12670 = sst [smem:[#allocation11_spill]] %s12628_s13 }
   0xa   :  { %12671 = sst [smem:[#allocation12_spill]] %s12629_s14 }
   0xb   :  { %12672 = sst [smem:[#allocation13_spill]] %s12630_s17 }
   0xc   :  { %12673 = sst [smem:[#allocation14_spill]] %s12631_s15 }
   0xd   :  { %12674 = sst [smem:[#allocation15_spill]] %s12644_s26 }
   0xe   :  { %12675 = sst [smem:[#allocation16_spill]] %s12645_s4 }
   0xf   :  { %12676 = sst [smem:[#allocation17_spill]] %s12646_s24 }
  0x10   :  { %12677 = sst [smem:[#allocation18_spill]] %s12647_s27 }
  0x11   :  { %s12678_s13 = sld [smem:[#allocation3_spill]] }
  0x12   :  { %s12679_s11 = sld [smem:[#allocation4_spill]] }
  0x13   :  { %s12680_s15 = sld [smem:[#allocation5_spill]] }
  0x14   :  { %s12681_s30 = sld [smem:[#allocation6_spill]] }
  0x15   :  { %s12682_s2 = sld [smem:[#allocation7_spill]] }
  0x16   :  { %s12683_s7 = sld [smem:[#allocation8_spill]] }
  0x17   :  { %v10080_v1 = vld [vmem:[%s12678_s13 + $0x8] sm:$0xff]   ;;  %v10082_v3 = vld [vmem:[%s12678_s13] sm:$0xff]   ;;  %s12684_s8 = sld [smem:[#allocation9_spill]] }
  0x18   :  { %v10081_v2 = vld [vmem:[%s12679_s11 + $0x8] sm:$0xff]   ;;  %9128 = vmatpush3.bf16.msra.mxu1 %v10080_v1  ;;  %v10083_v4 = vld [vmem:[%s12679_s11] sm:$0xff]   ;;  %s12685_s9 = sld [smem:[#allocation10_spill]]  ;;  %v10087_v57 = vld [vmem:[%s12679_s11 + $0x18] sm:$0xff]  }
  0x19   :  { %9120 = vmatpush3.bf16.msra.mxu0 %v10081_v2  ;;  %9129 = vmatprep.subr.bf16.mxu1 %v10511_v0  ;;  %v437_v5 = vld [vmem:[%s12680_s15] sm:$0xff]  ;;  %v438_v6 = vld [vmem:[%s12680_s15 + $0x8] sm:$0xff]  ;;  %v10089_v58 = vld [vmem:[%s12679_s11 + $0x10] sm:$0xff]   ;;  %s12686_s29 = sld [smem:[#allocation11_spill]] }
  0x1a   :  { %9121 = vmatprep.subr.bf16.mxu0 %v10511_v0  ;;  %v10680_v7 = vpack.c.bf16 %v438_v6, %v437_v5  ;;  %v8490_v10 = vld [vmem:[%s12681_s30] ss:$0 sm:$0xff]  ;;  %v10086_v2 = vld [vmem:[%s12678_s13 + $0x18] sm:$0xff]   ;;  %s12687_s12 = sld [smem:[#allocation12_spill]] }
  0x1b   :  { %v8486_v20 = vld [vmem:[%s12682_s2] ss:$0 sm:$0xff]  ;;  %v8500_v5 = vld [vmem:[%s12682_s2 + $0x1] ss:$0 sm:$0xff]  ;;  %s12688_s14 = sld [smem:[#allocation13_spill]] }
  0x1c   :  { %9130 = vmatpush3.bf16.msra.mxu1 %v10082_v3  ;;  %v10084_v25 = vld [vmem:[%s12683_s7 + $0x8] sm:$0xff]   ;;  %v10085_v26 = vld [vmem:[%s12683_s7] sm:$0xff]   ;;  %s12692_s4 = sld [smem:[#allocation17_spill]] }
  0x1d   :  { %9122 = vmatpush3.bf16.msra.mxu0 %v10083_v4  ;;  %9143 = vmatprep.subr.bf16.mxu1 %v10511_v0  ;;  %v10718_v28 = vld [vmem:[%s12684_s8] sm:$0xff]  ;;  %v10724_v33 = vld [vmem:[%s12684_s8 + $0x8] sm:$0xff]  ;;  %v10088_v4 = vld [vmem:[%s12678_s13 + $0x10] sm:$0xff]  }
  0x1e   :  { %9135 = vmatprep.subr.bf16.mxu0 %v10511_v0  ;;  %v8494_v50 = vld [vmem:[%s12685_s9] ss:$0 sm:$0xff] }
  0x1f   :  { %9132 = vmatmul.mubr.msk.bf16.vlgmr.msra.gmra.mxu1 %vm458_vm1, %v10680_v7 }
  0x20   :  { %9124 = vmatmul.mubr.msk.bf16.vlgmr.msra.gmra.mxu0 %vm458_vm1, %v10680_v7  ;;  %9145 = vmatprep.mubr.msk.bf16.mxu1 %vm10512_vm0, %v10511_v0 }
  0x21   :  { %9139 = vmatprep.mubr.msk.bf16.mxu0 %vm10512_vm0, %v10511_v0  ;;  %9136 = vmatpush3.bf16.msra.mxu0 %v10084_v25 }
  0x22   :  { %9137 = vmatprep.subr.bf16.mxu0 %v10511_v0 }
  0x25   :  { %9138 = vmatpush3.bf16.msra.mxu0 %v10085_v26 }
  0x26   :  { %9149 = vmatprep.subr.bf16.mxu0 %v10511_v0 }
  0x28   :  { %9140 = vmatmul.mubr.msk.bf16.vlgmr.msra.gmra.mxu0 %vm458_vm1, %v10680_v7 }
  0x29   :  { %9151 = vmatprep.mubr.msk.bf16.mxu0 %vm10512_vm0, %v10511_v0 }
  0xdf   :  { %v555_v8 = vpop.f32.mrf.mxu1 }
  0xe0   :  { %v496_v9 = vpop.f32.mrf.mxu0  ;;  %v556_v14 = vadd.f32 %v8490_v10, %v555_v8 }
  0xe1   :  { %v9133_v11 = vpop.f32.mrf.mxu1  ;;  %v497_v22 = vadd.f32 %v8486_v20, %v496_v9 }
  0xe2   :  { %v9125_v12 = vpop.f32.mrf.mxu0 }
  0xe3   :  { %v558_v13 = vpop.f32.mrf.mxu1 }
  0xe4   :  { %v559_v15 = vadd.f32 %v8490_v10, %v558_v13  ;;  %v499_v16 = vpop.f32.mrf.mxu0 }
  0xe5   :  { %v9134_v17 = vpop.f32.mrf.mxu1  ;;  %v500_v23 = vadd.f32 %v8486_v20, %v499_v16  ;;  %v8504_v20 = vld [vmem:[%s12681_s30 + $0x1] ss:$0 sm:$0xff] }
  0xe6   :  { %v622_v18 = vpack.c.bf16 %v559_v15, %v556_v14  ;;  %v9126_v19 = vpop.f32.mrf.mxu0 }
  0xe7   :  { %v621_v24 = vpack.c.bf16 %v500_v23, %v497_v22 }
  0xe8   :  { %v628_v21 = vsel %vm623_vm2, %v622_v18, 0  ;;  %v614_v49 = vpop.f32.mrf.mxu0 }
  0xe9   :  { %9144 = vmatpush3.bf16.xpose.msra.mxu1 %v628_v21  ;;  %v615_v52 = vadd.f32 %v8494_v50, %v614_v49 }
  0xea   :  { %9155 = vmatprep.subr.bf16.mxu1 %v10511_v0  ;;  %v9141_v51 = vpop.f32.mrf.mxu0 }
  0xec   :  { %v617_v53 = vpop.f32.mrf.mxu0 }
  0xed   :  { %v618_v54 = vadd.f32 %v8494_v50, %v617_v53 }
  0xee   :  { %v9142_v55 = vpop.f32.mrf.mxu0 }
  0xef   :  { %v699_v56 = vpack.c.bf16 %v618_v54, %v615_v52  ;;  %v8508_v52 = vld [vmem:[%s12685_s9 + $0x1] ss:$0 sm:$0xff] }
  0xf0   :  { %9146 = vmatmul.mubr.msk.bf16.vlgmr.msra.gmra.mxu1 %vm623_vm2, %v621_v24 }
  0xf1   :  { %9159 = vmatprep.mubr.msk.bf16.mxu1 %vm10512_vm0, %v10511_v0  ;;  %9150 = vmatpush3.bf16.msra.mxu0 %v699_v56 }
  0xf2   :  { %9163 = vmatprep.subr.bf16.mxu0 %v10511_v0  ;;  %9156 = vmatpush3.bf16.msra.mxu1 %v10087_v57 }
  0xf3   :  { %9157 = vmatprep.subr.bf16.mxu1 %v10511_v0 }
  0xf6   :  { %9158 = vmatpush3.bf16.msra.mxu1 %v10089_v58 }
  0xf7   :  { %9171 = vmatprep.subr.bf16.mxu1 %v10511_v0 }
  0xf9   :  { %9160 = vmatmul.mubr.msk.bf16.vlgmr.msra.gmra.mxu1 %vm458_vm1, %v10680_v7 }
  0xfa   :  { %9175 = vmatprep.mubr.msk.bf16.mxu1 %vm10512_vm0, %v10511_v0 }
 0x1b0   :  { %v664_v27 = vpop.f32.mrf.mxu1 }
 0x1b1   :  { %v671_v29 = vmul.f32 0.35355338, %v664_v27 }
 0x1b2   :  { %v9147_v30 = vpop.f32.mrf.mxu1 }
 0x1b3   :  { %v673_v31 = vadd.f32 %v671_v29, %v10718_v28  ;;  %v10090_v29 = vld [vmem:[%s12683_s7 + $0x18] sm:$0xff]   ;;  %v10091_v30 = vld [vmem:[%s12683_s7 + $0x10] sm:$0xff]  }
 0x1b4   :  { %v667_v32 = vpop.f32.mrf.mxu1  ;;  %9172 = vmatpush3.bf16.msra.mxu1 %v10090_v29 }
 0x1b5   :  { %v672_v34 = vmul.f32 0.35355338, %v667_v32  ;;  %v676_v35 = vsel %vm675_vm3, %v673_v31, -inf  ;;  %9173 = vmatprep.subr.bf16.mxu1 %v10511_v0 }
 0x1b6   :  { %677 = vmax.xlane.f32.xlu0 %v676_v35  ;;  %v9148_v36 = vpop.f32.mrf.mxu1 }
 0x1b7   :  { %v674_v37 = vadd.f32 %v672_v34, %v10724_v33 }
 0x1b8   :  { %9174 = vmatpush3.bf16.msra.mxu1 %v10091_v30 }
 0x1b9   :  { %v679_v38 = vsel %vm675_vm3, %v674_v37, -inf  ;;  %v797_v6 = vpop.f32.mrf.mxu1  ;;  %9185 = vmatprep.subr.bf16.mxu1 %v10511_v0 }
 0x1ba   :  { %680 = vmax.xlane.f32.xlu0 %v679_v38  ;;  %v798_v9 = vadd.f32 %v8500_v5, %v797_v6  ;;  %v10092_v6 = vld [vmem:[%s12678_s13 + $0x28] sm:$0xff]  }
 0x1bb   :  { %v9161_v8 = vpop.f32.mrf.mxu1  ;;  %9176 = vmatmul.mubr.msk.bf16.vlgmr.msra.gmra.mxu1 %vm458_vm1, %v10680_v7 }
 0x1bc   :  { %9187 = vmatprep.mubr.msk.bf16.mxu1 %vm10512_vm0, %v10511_v0  ;;  %v10093_v8 = vld [vmem:[%s12678_s13 + $0x20] sm:$0xff]  }
 0x1bd   :  { %v800_v10 = vpop.f32.mrf.mxu1 }
 0x1be   :  { %v801_v11 = vadd.f32 %v8500_v5, %v800_v10 }
 0x1bf   :  { %v9162_v12 = vpop.f32.mrf.mxu1 }
 0x1c0   :  { %v922_v13 = vpack.c.bf16 %v801_v11, %v798_v9  ;;  %v8287_v9 = vld [vmem:[%s12686_s29 + $0x4] sm:$0xf] }
 0x1c1   :  { %v10834_v10 = vsel %vm1047_vm4, %v8287_v9, 0 }
 0x23f   :  { %v678_v39 = vpop.xlane.xlu0 %677 }
 0x240   :  { %v682_v40 = vsub.f32 %v673_v31, %v678_v39 }
 0x242   :  { %v684_v41 = vmul.f32 1.442695, %v682_v40 }
 0x243   :  { %v681_v42 = vpop.xlane.xlu0 %680 }
 0x244   :  { %10174 = vpow2.f32 %v684_v41  ;;  %v683_v43 = vsub.f32 %v674_v37, %v681_v42 }
 0x246   :  { %v686_v44 = vmul.f32 1.442695, %v683_v43 }
 0x248   :  { %10176 = vpow2.f32 %v686_v44 }
 0x251   :  { %v10175_v45 = vpop.eup %10174 }
 0x252   :  { %v688_v46 = vsel %vm675_vm3, %v10175_v45, 0.0 }
 0x253   :  { %689 = vadd.xlane.f32.xlu1 %v688_v46 }
 0x255   :  { %v10177_v47 = vpop.eup %10176 }
 0x256   :  { %v691_v48 = vsel %vm675_vm3, %v10177_v47, 0.0 }
 0x257   :  { %692 = vadd.xlane.f32.xlu1 %v691_v48 }
 0x27b   :  { %v915_v53 = vpop.f32.mrf.mxu1 }
 0x27c   :  { %v916_v55 = vadd.f32 %v8508_v52, %v915_v53 }
 0x27d   :  { %v9177_v54 = vpop.f32.mrf.mxu1 }
 0x27f   :  { %v918_v56 = vpop.f32.mrf.mxu1 }
 0x280   :  { %v919_v57 = vadd.f32 %v8508_v52, %v918_v56 }
 0x281   :  { %v9178_v58 = vpop.f32.mrf.mxu1 }
 0x2dc   :  { %v690_v59 = vpop.xlane.xlu1 %689 }
 0x2dd   :  { %10178 = vrcp.f32 %v690_v59  ;;  %v998_v59 = vpack.c.bf16 %v919_v57, %v916_v55 }
 0x2df   :  { %9186 = vmatpush3.bf16.msra.mxu1 %v998_v59 }
 0x2e0   :  { %v693_v60 = vpop.xlane.xlu1 %692  ;;  %9197 = vmatprep.subr.bf16.mxu1 %v10511_v0 }
 0x2e1   :  { %10180 = vrcp.f32 %v693_v60 }
 0x2ea   :  { %v10179_v61 = vpop.eup %10178 }
 0x2eb   :  { %v696_v63 = vmul.f32 %v10179_v61, %v10175_v45 }
 0x2ee   :  { %v10181_v62 = vpop.eup %10180 }
 0x2ef   :  { %v697_v1 = vmul.f32 %v10181_v62, %v10177_v47 }
 0x2f1   :  { %v698_v3 = vpack.c.bf16 %v697_v1, %v696_v63  ;;  %v108_v1 = vld [vmem:[%s12686_s29] sm:$0xf] }
 0x2f2   :  { %v10805_v5 = vsel %vm1047_vm4, %v108_v1, 0 }
 0x2f3   :  { %9152 = vmatmul.mubr.msk.bf16.vlgmr.msra.gmra.mxu0 %vm675_vm3, %v698_v3 }
 0x2f4   :  { %9164 = vmatpush3.bf16.msra.mxu0 %v10086_v2  ;;  %9167 = vmatprep.mubr.msk.bf16.mxu0 %vm10512_vm0, %v10511_v0 }
 0x2f5   :  { %9165 = vmatprep.subr.bf16.mxu0 %v10511_v0 }
 0x2f8   :  { %9166 = vmatpush3.bf16.msra.mxu0 %v10088_v4 }
 0x2f9   :  { %9179 = vmatprep.subr.bf16.mxu0 %v10511_v0 }
 0x2fb   :  { %9168 = vmatmul.mubr.msk.bf16.vlgmr.msra.gmra.mxu0 %vm458_vm1, %v10680_v7 }
 0x2fc   :  { %9181 = vmatprep.mubr.msk.bf16.mxu0 %vm10512_vm0, %v10511_v0 }
 0x3b3   :  { %v10765_v14 = vpop.f32.mrf.mxu0 }
 0x3b5   :  { %v9153_v15 = vpop.f32.mrf.mxu0 }
 0x3b7   :  { %v10767_v16 = vpop.f32.mrf.mxu0 }
 0x3b8   :  { %v744_v17 = vpack.c.bf16 %v10767_v16, %v10765_v14  ;;  %v10094_v14 = vld [vmem:[%s12679_s11 + $0x28] sm:$0xff]  }
 0x3b9   :  { %v9154_v18 = vpop.f32.mrf.mxu0 }
 0x3ba   :  { %v10095_v18 = vld [vmem:[%s12679_s11 + $0x20] sm:$0xff]  }
 0x3bb   :  { %v856_v19 = vpop.f32.mrf.mxu0 }
 0x3bc   :  { %v857_v23 = vadd.f32 %v8504_v20, %v856_v19 }
 0x3bd   :  { %v9169_v21 = vpop.f32.mrf.mxu0 }
 0x3bf   :  { %v859_v22 = vpop.f32.mrf.mxu0 }
 0x3c0   :  { %v860_v24 = vadd.f32 %v8504_v20, %v859_v22 }
 0x3c1   :  { %v9170_v25 = vpop.f32.mrf.mxu0 }
 0x3c2   :  { %v923_v26 = vpack.c.bf16 %v860_v24, %v857_v23 }
 0x3c4   :  { %v928_v27 = vsel %vm623_vm2, %v923_v26, 0  ;;  %v8520_v26 = vld [vmem:[%s12681_s30 + $0x2] ss:$0 sm:$0xff] }
 0x3c5   :  { %9180 = vmatpush3.bf16.xpose.msra.mxu0 %v928_v27 }
 0x3c6   :  { %9191 = vmatprep.subr.bf16.mxu0 %v10511_v0 }
 0x3cc   :  { %9182 = vmatmul.mubr.msk.bf16.vlgmr.msra.gmra.mxu0 %vm623_vm2, %v922_v13 }
 0x3cd   :  { %9193 = vmatprep.mubr.msk.bf16.mxu0 %vm10512_vm0, %v10511_v0  ;;  %9192 = vmatpush3.bf16.msra.mxu0 %v10834_v10 }
 0x3ce   :  { %9203 = vmatprep.subr.bf16.mxu0 %v10511_v0 }
 0x48c   :  { %v964_v31 = vpop.f32.mrf.mxu0 }
 0x48d   :  { %v971_v32 = vmul.f32 0.35355338, %v964_v31 }
 0x48e   :  { %v9183_v34 = vpop.f32.mrf.mxu0 }
 0x48f   :  { %v973_v35 = vadd.f32 %v971_v32, %v10718_v28 }
 0x490   :  { %v967_v36 = vpop.f32.mrf.mxu0 }
 0x491   :  { %v972_v37 = vmul.f32 0.35355338, %v967_v36  ;;  %v975_v38 = vsel %vm675_vm3, %v973_v35, -inf }
 0x492   :  { %976 = vmax.xlane.f32.xlu0 %v975_v38  ;;  %v9184_v39 = vpop.f32.mrf.mxu0  ;;  %v8516_v38 = vld [vmem:[%s12682_s2 + $0x2] ss:$0 sm:$0xff] }
 0x493   :  { %v974_v40 = vadd.f32 %v972_v37, %v10724_v33 }
 0x495   :  { %v978_v41 = vsel %vm675_vm3, %v974_v40, -inf }
 0x496   :  { %979 = vmax.xlane.f32.xlu1 %v978_v41 }
 0x51b   :  { %v977_v42 = vpop.xlane.xlu0 %976 }
 0x51c   :  { %v981_v43 = vsub.f32 %v973_v35, %v977_v42 }
 0x51e   :  { %v983_v44 = vmul.f32 1.442695, %v981_v43 }
 0x51f   :  { %v980_v45 = vpop.xlane.xlu1 %979 }
 0x520   :  { %10182 = vpow2.f32 %v983_v44  ;;  %v982_v46 = vsub.f32 %v974_v40, %v980_v45  ;;  %v10096_v45 = vld [vmem:[%s12683_s7 + $0x28] sm:$0xff]  }
 0x522   :  { %v985_v47 = vmul.f32 1.442695, %v982_v46  ;;  %v10097_v46 = vld [vmem:[%s12683_s7 + $0x20] sm:$0xff]  }
 0x524   :  { %10184 = vpow2.f32 %v985_v47 }
 0x52d   :  { %v10183_v48 = vpop.eup %10182 }
 0x52e   :  { %v987_v49 = vsel %vm675_vm3, %v10183_v48, 0.0 }
 0x52f   :  { %988 = vadd.xlane.f32.xlu0 %v987_v49 }
 0x531   :  { %v10185_v50 = vpop.eup %10184 }
 0x532   :  { %v990_v51 = vsel %vm675_vm3, %v10185_v50, 0.0 }
 0x533   :  { %991 = vadd.xlane.f32.xlu1 %v990_v51 }
 0x5b8   :  { %v989_v60 = vpop.xlane.xlu0 %988 }
 0x5b9   :  { %10186 = vrcp.f32 %v989_v60 }
 0x5bc   :  { %v992_v61 = vpop.xlane.xlu1 %991 }
 0x5bd   :  { %10188 = vrcp.f32 %v992_v61 }
 0x5c6   :  { %v10187_v62 = vpop.eup %10186 }
 0x5c7   :  { %v995_v2 = vmul.f32 %v10187_v62, %v10183_v48 }
 0x5ca   :  { %v10189_v63 = vpop.eup %10188 }
 0x5cb   :  { %v996_v3 = vmul.f32 %v10189_v63, %v10185_v50 }
 0x5cd   :  { %v997_v4 = vpack.c.bf16 %v996_v3, %v995_v2 }
 0x5cf   :  { %9188 = vmatmul.mubr.msk.bf16.vlgmr.msra.gmra.mxu1 %vm675_vm3, %v997_v4  ;;  %v8524_v4 = vld [vmem:[%s12685_s9 + $0x2] ss:$0 sm:$0xff] }
 0x5d0   :  { %9198 = vmatpush3.bf16.msra.mxu1 %v10805_v5  ;;  %9199 = vmatprep.mubr.msk.bf16.mxu1 %vm10512_vm0, %v10511_v0 }
 0x5d1   :  { %9211 = vmatprep.subr.bf16.mxu1 %v10511_v0 }
 0x5d7   :  { %9200 = vmatmul.mubr.msk.bf16.vlgmr.msra.gmra.mxu1 %vm623_vm2, %v744_v17 }
 0x5d8   :  { %9212 = vmatpush3.bf16.msra.mxu1 %v10092_v6  ;;  %9215 = vmatprep.mubr.msk.bf16.mxu1 %vm10512_vm0, %v10511_v0 }
 0x5d9   :  { %9213 = vmatprep.subr.bf16.mxu1 %v10511_v0 }
 0x5dc   :  { %9214 = vmatpush3.bf16.msra.mxu1 %v10093_v8 }
 0x5dd   :  { %9227 = vmatprep.subr.bf16.mxu1 %v10511_v0 }
 0x5df   :  { %9216 = vmatmul.mubr.msk.bf16.vlgmr.msra.gmra.mxu1 %vm458_vm1, %v10680_v7 }
 0x5e0   :  { %9229 = vmatprep.mubr.msk.bf16.mxu1 %vm10512_vm0, %v10511_v0 }
 0x68f   :  { %v1036_v11 = vpop.f32.mrf.mxu1 }
 0x691   :  { %v9189_v12 = vpop.f32.mrf.mxu1 }
 0x693   :  { %v1039_v13 = vpop.f32.mrf.mxu1 }
 0x694   :  { %v1043_v15 = vpack.c.bf16 %v1039_v13, %v1036_v11 }
 0x695   :  { %v9190_v16 = vpop.f32.mrf.mxu1 }
 0x696   :  { %9194 = vmatmul.mubr.msk.bf16.vlgmr.msra.gmra.mxu0 %vm623_vm2, %v1043_v15 }
 0x697   :  { %v10842_v17 = vpop.f32.mrf.mxu1  ;;  %9204 = vmatpush3.bf16.msra.mxu0 %v10094_v14  ;;  %9207 = vmatprep.mubr.msk.bf16.mxu0 %vm10512_vm0, %v10511_v0 }
 0x698   :  { %9205 = vmatprep.subr.bf16.mxu0 %v10511_v0 }
 0x699   :  { %v9201_v19 = vpop.f32.mrf.mxu1 }
 0x69b   :  { %v10850_v20 = vpop.f32.mrf.mxu1  ;;  %9206 = vmatpush3.bf16.msra.mxu0 %v10095_v18 }
 0x69c   :  { %9219 = vmatprep.subr.bf16.mxu0 %v10511_v0 }
 0x69d   :  { %v9202_v21 = vpop.f32.mrf.mxu1 }
 0x69e   :  { %9208 = vmatmul.mubr.msk.bf16.vlgmr.msra.gmra.mxu0 %vm458_vm1, %v10680_v7 }
 0x69f   :  { %v1250_v22 = vpop.f32.mrf.mxu1  ;;  %9223 = vmatprep.mubr.msk.bf16.mxu0 %vm10512_vm0, %v10511_v0  ;;  %9220 = vmatpush3.bf16.msra.mxu0 %v10096_v45 }
 0x6a0   :  { %v1251_v27 = vadd.f32 %v8520_v26, %v1250_v22  ;;  %9221 = vmatprep.subr.bf16.mxu0 %v10511_v0 }
 0x6a1   :  { %v9217_v23 = vpop.f32.mrf.mxu1 }
 0x6a3   :  { %v1253_v24 = vpop.f32.mrf.mxu1  ;;  %9222 = vmatpush3.bf16.msra.mxu0 %v10097_v46 }
 0x6a4   :  { %v1254_v29 = vadd.f32 %v8520_v26, %v1253_v24  ;;  %9233 = vmatprep.subr.bf16.mxu0 %v10511_v0  ;;  %v8303_v24 = vld [vmem:[%s12686_s29 + $0x8] sm:$0xf]  ;;  %v10099_v26 = vld [vmem:[%s12679_s11 + $0x38] sm:$0xff]  }
 0x6a5   :  { %v9218_v25 = vpop.f32.mrf.mxu1 }
 0x6a6   :  { %v1317_v30 = vpack.c.bf16 %v1254_v29, %v1251_v27  ;;  %9224 = vmatmul.mubr.msk.bf16.vlgmr.msra.gmra.mxu0 %vm458_vm1, %v10680_v7  ;;  %v10901_v25 = vsel %vm1047_vm4, %v8303_v24, 0  ;;  %v10101_v27 = vld [vmem:[%s12679_s11 + $0x30] sm:$0xff]  }
 0x6a7   :  { %9235 = vmatprep.mubr.msk.bf16.mxu0 %vm10512_vm0, %v10511_v0 }
 0x6a8   :  { %v1322_v31 = vsel %vm623_vm2, %v1317_v30, 0 }
 0x6a9   :  { %9228 = vmatpush3.bf16.xpose.msra.mxu1 %v1322_v31 }
 0x6aa   :  { %9239 = vmatprep.subr.bf16.mxu1 %v10511_v0 }
 0x756   :  { %v10862_v32 = vpop.f32.mrf.mxu0 }
 0x758   :  { %v9195_v34 = vpop.f32.mrf.mxu0 }
 0x759   :  { %v10098_v34 = vld [vmem:[%s12678_s13 + $0x38] sm:$0xff]  }
 0x75a   :  { %v10864_v35 = vpop.f32.mrf.mxu0 }
 0x75c   :  { %v9196_v36 = vpop.f32.mrf.mxu0 }
 0x75e   :  { %v1191_v37 = vpop.f32.mrf.mxu0 }
 0x75f   :  { %v1192_v41 = vadd.f32 %v8516_v38, %v1191_v37 }
 0x760   :  { %v9209_v39 = vpop.f32.mrf.mxu0 }
 0x761   :  { %v8531_v39 = vld [vmem:[%s12682_s2 + $0x3] ss:$0 sm:$0xff] }
 0x762   :  { %v1194_v40 = vpop.f32.mrf.mxu0 }
 0x763   :  { %v1195_v42 = vadd.f32 %v8516_v38, %v1194_v40  ;;  %v10100_v38 = vld [vmem:[%s12678_s13 + $0x30] sm:$0xff]  }
 0x764   :  { %v9210_v43 = vpop.f32.mrf.mxu0 }
 0x765   :  { %v1316_v44 = vpack.c.bf16 %v1195_v42, %v1192_v41 }
 0x766   :  { %v1309_v6 = vpop.f32.mrf.mxu0 }
 0x767   :  { %9230 = vmatmul.mubr.msk.bf16.vlgmr.msra.gmra.mxu1 %vm623_vm2, %v1316_v44  ;;  %v1310_v9 = vadd.f32 %v8524_v4, %v1309_v6 }
 0x768   :  { %9241 = vmatprep.mubr.msk.bf16.mxu1 %vm10512_vm0, %v10511_v0  ;;  %v9225_v8 = vpop.f32.mrf.mxu0  ;;  %9240 = vmatpush3.bf16.msra.mxu1 %v10901_v25 }
 0x769   :  { %9253 = vmatprep.subr.bf16.mxu1 %v10511_v0 }
 0x76a   :  { %v1312_v11 = vpop.f32.mrf.mxu0 }
 0x76b   :  { %v1313_v12 = vadd.f32 %v8524_v4, %v1312_v11 }
 0x76c   :  { %v9226_v13 = vpop.f32.mrf.mxu0 }
 0x76d   :  { %v1392_v14 = vpack.c.bf16 %v1313_v12, %v1310_v9 }
 0x76f   :  { %9234 = vmatpush3.bf16.msra.mxu0 %v1392_v14 }
 0x770   :  { %9245 = vmatprep.subr.bf16.mxu0 %v10511_v0 }
 0x827   :  { %v1358_v47 = vpop.f32.mrf.mxu1 }
 0x828   :  { %v1365_v48 = vmul.f32 0.35355338, %v1358_v47  ;;  %v1133_v47 = vadd.f32 %v10842_v17, %v10862_v32 }
 0x829   :  { %v9231_v49 = vpop.f32.mrf.mxu1 }
 0x82a   :  { %v1367_v50 = vadd.f32 %v1365_v48, %v10718_v28 }
 0x82b   :  { %v1361_v51 = vpop.f32.mrf.mxu1 }
 0x82c   :  { %v1366_v52 = vmul.f32 0.35355338, %v1361_v51  ;;  %v1369_v53 = vsel %vm675_vm3, %v1367_v50, -inf  ;;  %v1136_v51 = vadd.f32 %v10850_v20, %v10864_v35  ;;  %v10102_v20 = vld [vmem:[%s12683_s7 + $0x38] sm:$0xff]   ;;  %v10103_v35 = vld [vmem:[%s12683_s7 + $0x30] sm:$0xff]  }
 0x82d   :  { %1370 = vmax.xlane.f32.xlu0 %v1369_v53  ;;  %v9232_v54 = vpop.f32.mrf.mxu1 }
 0x82e   :  { %v1368_v55 = vadd.f32 %v1366_v52, %v10724_v33 }
 0x830   :  { %v1372_v56 = vsel %vm675_vm3, %v1368_v55, -inf }
 0x831   :  { %1373 = vmax.xlane.f32.xlu1 %v1372_v56  ;;  %v8535_v56 = vld [vmem:[%s12681_s30 + $0x3] ss:$0 sm:$0xff] }
 0x8b6   :  { %v1371_v57 = vpop.xlane.xlu0 %1370 }
 0x8b7   :  { %v1375_v58 = vsub.f32 %v1367_v50, %v1371_v57 }
 0x8b9   :  { %v1377_v59 = vmul.f32 1.442695, %v1375_v58 }
 0x8ba   :  { %v1374_v60 = vpop.xlane.xlu1 %1373 }
 0x8bb   :  { %10190 = vpow2.f32 %v1377_v59  ;;  %v1376_v61 = vsub.f32 %v1368_v55, %v1374_v60 }
 0x8bd   :  { %v1379_v62 = vmul.f32 1.442695, %v1376_v61 }
 0x8bf   :  { %10192 = vpow2.f32 %v1379_v62 }
 0x8c8   :  { %v10191_v63 = vpop.eup %10190 }
 0x8c9   :  { %v1381_v1 = vsel %vm675_vm3, %v10191_v63, 0.0 }
 0x8ca   :  { %1382 = vadd.xlane.f32.xlu0 %v1381_v1 }
 0x8cc   :  { %v10193_v2 = vpop.eup %10192 }
 0x8cd   :  { %v1384_v3 = vsel %vm675_vm3, %v10193_v2, 0.0 }
 0x8ce   :  { %1385 = vadd.xlane.f32.xlu1 %v1384_v3 }
 0x953   :  { %v1383_v15 = vpop.xlane.xlu0 %1382 }
 0x954   :  { %10194 = vrcp.f32 %v1383_v15 }
 0x957   :  { %v1386_v16 = vpop.xlane.xlu1 %1385 }
 0x958   :  { %10196 = vrcp.f32 %v1386_v16 }
 0x961   :  { %v10195_v18 = vpop.eup %10194 }
 0x962   :  { %v1389_v21 = vmul.f32 %v10195_v18, %v10191_v63 }
 0x965   :  { %v10197_v19 = vpop.eup %10196 }
 0x966   :  { %v1390_v22 = vmul.f32 %v10197_v19, %v10193_v2 }
 0x968   :  { %v1391_v23 = vpack.c.bf16 %v1390_v22, %v1389_v21 }
 0x96a   :  { %9236 = vmatmul.mubr.msk.bf16.vlgmr.msra.gmra.mxu0 %vm675_vm3, %v1391_v23 }
 0x96b   :  { %9249 = vmatprep.mubr.msk.bf16.mxu0 %vm10512_vm0, %v10511_v0  ;;  %9246 = vmatpush3.bf16.msra.mxu0 %v10099_v26 }
 0x96c   :  { %9247 = vmatprep.subr.bf16.mxu0 %v10511_v0 }
 0x96f   :  { %9248 = vmatpush3.bf16.msra.mxu0 %v10101_v27 }
 0x970   :  { %9261 = vmatprep.subr.bf16.mxu0 %v10511_v0 }
 0x972   :  { %9250 = vmatmul.mubr.msk.bf16.vlgmr.msra.gmra.mxu0 %vm458_vm1, %v10680_v7 }
 0x973   :  { %9265 = vmatprep.mubr.msk.bf16.mxu0 %vm10512_vm0, %v10511_v0  ;;  %9262 = vmatpush3.bf16.msra.mxu0 %v10102_v20 }
 0x974   :  { %9263 = vmatprep.subr.bf16.mxu0 %v10511_v0 }
 0x977   :  { %9264 = vmatpush3.bf16.msra.mxu0 %v10103_v35 }
 0x978   :  { %9275 = vmatprep.subr.bf16.mxu0 %v10511_v0 }
 0x97a   :  { %9266 = vmatmul.mubr.msk.bf16.vlgmr.msra.gmra.mxu0 %vm458_vm1, %v10680_v7 }
 0x97b   :  { %9277 = vmatprep.mubr.msk.bf16.mxu0 %vm10512_vm0, %v10511_v0 }
 0xa2a   :  { %v1430_v29 = vpop.f32.mrf.mxu0 }
 0xa2c   :  { %v9237_v30 = vpop.f32.mrf.mxu0 }
 0xa2e   :  { %v1433_v31 = vpop.f32.mrf.mxu0 }
 0xa2f   :  { %v1437_v36 = vpack.c.bf16 %v1433_v31, %v1430_v29 }
 0xa30   :  { %v9238_v37 = vpop.f32.mrf.mxu0 }
 0xa31   :  { %9242 = vmatmul.mubr.msk.bf16.vlgmr.msra.gmra.mxu1 %vm623_vm2, %v1437_v36 }
 0xa32   :  { %9254 = vmatpush3.bf16.msra.mxu1 %v10098_v34  ;;  %9257 = vmatprep.mubr.msk.bf16.mxu1 %vm10512_vm0, %v10511_v0  ;;  %v1539_v40 = vpop.f32.mrf.mxu0 }
 0xa33   :  { %9255 = vmatprep.subr.bf16.mxu1 %v10511_v0  ;;  %v1540_v42 = vadd.f32 %v8531_v39, %v1539_v40 }
 0xa34   :  { %v9251_v41 = vpop.f32.mrf.mxu0 }
 0xa35   :  { %v8319_v41 = vld [vmem:[%s12686_s29 + $0xc] sm:$0xf] }
 0xa36   :  { %9256 = vmatpush3.bf16.msra.mxu1 %v10100_v38  ;;  %v1542_v43 = vpop.f32.mrf.mxu0 }
 0xa37   :  { %9269 = vmatprep.subr.bf16.mxu1 %v10511_v0  ;;  %v1543_v44 = vadd.f32 %v8531_v39, %v1542_v43 }
 0xa38   :  { %v9252_v45 = vpop.f32.mrf.mxu0 }
 0xa39   :  { %9258 = vmatmul.mubr.msk.bf16.vlgmr.msra.gmra.mxu1 %vm458_vm1, %v10680_v7  ;;  %v1664_v46 = vpack.c.bf16 %v1543_v44, %v1540_v42  ;;  %v10980_v42 = vsel %vm1047_vm4, %v8319_v41, 0 }
 0xa3a   :  { %9271 = vmatprep.mubr.msk.bf16.mxu1 %vm10512_vm0, %v10511_v0  ;;  %v1657_v22 = vpop.f32.mrf.mxu0 }
 0xa3c   :  { %v9267_v23 = vpop.f32.mrf.mxu0 }
 0xa3e   :  { %v1660_v26 = vpop.f32.mrf.mxu0 }
 0xa40   :  { %v9268_v29 = vpop.f32.mrf.mxu0 }
 0xa41   :  { %v10106_v29 = vld [vmem:[%s12633_s19 + $0x18] sm:$0xff]  }
 0xaf1   :  { %v1478_v48 = vpop.f32.mrf.mxu1 }
 0xaf2   :  { %v10937_v49 = vadd.f32 %v1478_v48, %v1133_v47  ;;  %v8546_v48 = vld [vmem:[%s12687_s12] ss:$0 sm:$0xff] }
 0xaf3   :  { %v9243_v50 = vpop.f32.mrf.mxu1 }
 0xaf5   :  { %v1481_v52 = vpop.f32.mrf.mxu1 }
 0xaf6   :  { %v10941_v53 = vadd.f32 %v1481_v52, %v1136_v51 }
 0xaf7   :  { %v9244_v54 = vpop.f32.mrf.mxu1 }
 0xaf9   :  { %v1598_v55 = vpop.f32.mrf.mxu1 }
 0xafa   :  { %v1599_v59 = vadd.f32 %v8535_v56, %v1598_v55 }
 0xafb   :  { %v9259_v57 = vpop.f32.mrf.mxu1 }
 0xafc   :  { %v10406_v57 = vld [vmem:[%s12680_s15] sm:$0xff] }
 0xafd   :  { %v1601_v58 = vpop.f32.mrf.mxu1 }
 0xafe   :  { %v1602_v17 = vadd.f32 %v8535_v56, %v1601_v58 }
 0xaff   :  { %v9260_v32 = vpop.f32.mrf.mxu1 }
 0xb00   :  { %v1665_v60 = vpack.c.bf16 %v1602_v17, %v1599_v59 }
 0xb02   :  { %v1670_v61 = vsel %vm623_vm2, %v1665_v60, 0  ;;  %v10407_v60 = vld [vmem:[%s12680_s15 + $0x8] sm:$0xff]  ;;  %s12689_s15 = sld [smem:[#allocation14_spill]] }
 0xb03   :  { %9270 = vmatpush3.bf16.xpose.msra.mxu1 %v1670_v61 }
 0xb04   :  { %9281 = vmatprep.subr.bf16.mxu1 %v10511_v0 }
 0xb0a   :  { %9272 = vmatmul.mubr.msk.bf16.vlgmr.msra.gmra.mxu1 %vm623_vm2, %v1664_v46 }
 0xb0b   :  { %9283 = vmatprep.mubr.msk.bf16.mxu1 %vm10512_vm0, %v10511_v0  ;;  %9282 = vmatpush3.bf16.msra.mxu1 %v10980_v42 }
 0xb0c   :  { %9295 = vmatprep.subr.bf16.mxu1 %v10511_v0 }
 0xbca   :  { %v1706_v62 = vpop.f32.mrf.mxu1 }
 0xbcb   :  { %v1713_v63 = vmul.f32 0.35355338, %v1706_v62 }
 0xbcc   :  { %v9273_v1 = vpop.f32.mrf.mxu1 }
 0xbcd   :  { %v1715_v2 = vadd.f32 %v1713_v63, %v10718_v28 }
 0xbce   :  { %v1709_v3 = vpop.f32.mrf.mxu1 }
 0xbcf   :  { %v1714_v4 = vmul.f32 0.35355338, %v1709_v3  ;;  %v1717_v6 = vsel %vm675_vm3, %v1715_v2, -inf }
 0xbd0   :  { %1718 = vmax.xlane.f32.xlu0 %v1717_v6  ;;  %v9274_v8 = vpop.f32.mrf.mxu1 }
 0xbd1   :  { %v1716_v9 = vadd.f32 %v1714_v4, %v10724_v33  ;;  %v8539_v33 = vld [vmem:[%s12685_s9 + $0x3] ss:$0 sm:$0xff]  ;;  %v10104_v8 = vld [vmem:[%s12688_s14 + $0x8] sm:$0xff]  }
 0xbd2   :  { %v1658_v24 = vadd.f32 %v8539_v33, %v1657_v22  ;;  %v1661_v27 = vadd.f32 %v8539_v33, %v1660_v26  ;;  %v8548_v22 = vld [vmem:[%s12632_s16] ss:$0 sm:$0xff] }
 0xbd3   :  { %v1720_v11 = vsel %vm675_vm3, %v1716_v9, -inf }
 0xbd4   :  { %1721 = vmax.xlane.f32.xlu1 %v1720_v11  ;;  %v1740_v30 = vpack.c.bf16 %v1661_v27, %v1658_v24 }
 0xbd6   :  { %9276 = vmatpush3.bf16.msra.mxu0 %v1740_v30  ;;  %v10107_v30 = vld [vmem:[%s12633_s19 + $0x10] sm:$0xff]  }
 0xbd7   :  { %9287 = vmatprep.subr.bf16.mxu0 %v10511_v0 }
 0xc59   :  { %v1719_v7 = vpop.xlane.xlu0 %1718 }
 0xc5a   :  { %v1723_v12 = vsub.f32 %v1715_v2, %v1719_v7 }
 0xc5c   :  { %v1725_v13 = vmul.f32 1.442695, %v1723_v12 }
 0xc5d   :  { %v1722_v14 = vpop.xlane.xlu1 %1721 }
 0xc5e   :  { %10198 = vpow2.f32 %v1725_v13  ;;  %v1724_v15 = vsub.f32 %v1716_v9, %v1722_v14  ;;  %v10105_v9 = vld [vmem:[%s12688_s14] sm:$0xff]  }
 0xc60   :  { %v1727_v16 = vmul.f32 1.442695, %v1724_v15 }
 0xc62   :  { %10200 = vpow2.f32 %v1727_v16 }
 0xc6b   :  { %v10199_v28 = vpop.eup %10198 }
 0xc6c   :  { %v1729_v18 = vsel %vm675_vm3, %v10199_v28, 0.0 }
 0xc6d   :  { %1730 = vadd.xlane.f32.xlu0 %v1729_v18  ;;  %v8547_v18 = vld [vmem:[%s12689_s15] ss:$0 sm:$0xff] }
 0xc6f   :  { %v10201_v19 = vpop.eup %10200 }
 0xc70   :  { %v1732_v21 = vsel %vm675_vm3, %v10201_v19, 0.0 }
 0xc71   :  { %1733 = vadd.xlane.f32.xlu1 %v1732_v21 }
 0xcf6   :  { %v1731_v31 = vpop.xlane.xlu0 %1730 }
 0xcf7   :  { %10202 = vrcp.f32 %v1731_v31  ;;  %v10108_v31 = vld [vmem:[%s12633_s19 + $0x8] sm:$0xff]  }
 0xcfa   :  { %v1734_v34 = vpop.xlane.xlu1 %1733 }
 0xcfb   :  { %10204 = vrcp.f32 %v1734_v34  ;;  %v10109_v34 = vld [vmem:[%s12633_s19] sm:$0xff]  }
 0xd04   :  { %v10203_v36 = vpop.eup %10202 }
 0xd05   :  { %v1737_v38 = vmul.f32 %v10203_v36, %v10199_v28  ;;  %v8549_v36 = vld [vmem:[%s12634_s18] ss:$0 sm:$0xff] }
 0xd08   :  { %v10205_v37 = vpop.eup %10204 }
 0xd09   :  { %v1738_v39 = vmul.f32 %v10205_v37, %v10201_v19 }
 0xd0b   :  { %v1739_v40 = vpack.c.bf16 %v1738_v39, %v1737_v38 }
 0xd0d   :  { %9278 = vmatmul.mubr.msk.bf16.vlgmr.msra.gmra.mxu0 %vm675_vm3, %v1739_v40 }
 0xd0e   :  { %9291 = vmatprep.mubr.msk.bf16.mxu0 %vm10512_vm0, %v10511_v0  ;;  %9288 = vmatpush3.bf16.msra.mxu0 %v10104_v8 }
 0xd0f   :  { %9289 = vmatprep.subr.bf16.mxu0 %v10511_v0 }
 0xd12   :  { %9290 = vmatpush3.bf16.msra.mxu0 %v10105_v9 }
 0xd13   :  { %9307 = vmatprep.subr.bf16.mxu0 %v10511_v0 }
 0xdcd   :  { %v1778_v43 = vpop.f32.mrf.mxu0 }
 0xdcf   :  { %v9279_v44 = vpop.f32.mrf.mxu0 }
 0xdd1   :  { %v1781_v45 = vpop.f32.mrf.mxu0 }
 0xdd2   :  { %v1785_v46 = vpack.c.bf16 %v1781_v45, %v1778_v43 }
 0xdd3   :  { %v9280_v47 = vpop.f32.mrf.mxu0 }
 0xdd4   :  { %9284 = vmatmul.mubr.msk.bf16.vlgmr.msra.gmra.mxu1 %vm623_vm2, %v1785_v46 }
 0xdd5   :  { %9303 = vmatprep.mubr.msk.bf16.mxu1 %vm10512_vm0, %v10511_v0  ;;  %9296 = vmatpush3.bf16.msra.mxu1 %v10106_v29 }
 0xdd6   :  { %9297 = vmatprep.subr.bf16.mxu1 %v10511_v0 }
 0xdd9   :  { %9298 = vmatpush3.bf16.msra.mxu1 %v10107_v30 }
 0xdda   :  { %9299 = vmatprep.subr.bf16.mxu1 %v10511_v0 }
 0xddd   :  { %9300 = vmatpush3.bf16.msra.mxu1 %v10108_v31 }
 0xdde   :  { %9301 = vmatprep.subr.bf16.mxu1 %v10511_v0 }
 0xde1   :  { %9302 = vmatpush3.bf16.msra.mxu1 %v10109_v34 }
 0xde2   :  { %9323 = vmatprep.subr.bf16.mxu1 %v10511_v0 }
 0xe94   :  { %v1826_v50 = vpop.f32.mrf.mxu1 }
 0xe95   :  { %v1833_v51 = vadd.f32 %v1826_v50, %v10937_v49 }
 0xe96   :  { %v9285_v52 = vpop.f32.mrf.mxu1 }
 0xe97   :  { %v1841_v54 = vadd.f32 %v8546_v48, %v1833_v51 }
 0xe98   :  { %v1829_v55 = vpop.f32.mrf.mxu1 }
 0xe99   :  { %v1834_v56 = vadd.f32 %v1829_v55, %v10941_v53  ;;  %v1843_v58 = vadd.f32 %v10406_v57, %v1841_v54 }
 0xe9a   :  { %v9286_v59 = vpop.f32.mrf.mxu1 }
 0xe9b   :  { %v1842_v17 = vadd.f32 %v8546_v48, %v1834_v56  ;;  %v1845_v32 = vsel %vm458_vm1, %v1843_v58, 0.0 }
 0xe9c   :  { %1846 = vadd.xlane.f32.xlu0 %v1845_v32 }
 0xe9d   :  { %v1844_v49 = vadd.f32 %v10407_v60, %v1842_v17 }
 0xe9f   :  { %v1848_v61 = vsel %vm458_vm1, %v1844_v49, 0.0 }
 0xea0   :  { %1849 = vadd.xlane.f32.xlu1 %v1848_v61 }
 0xf25   :  { %v1847_v20 = vpop.xlane.xlu0 %1846 }
 0xf26   :  { %v1852_v53 = vmul.f32 0.03125, %v1847_v20  ;;  %v8553_v20 = vld [vmem:[%s12635_s20] ss:$0 sm:$0xff] }
 0xf28   :  { %v1854_v35 = vsub.f32 %v1843_v58, %v1852_v53 }
 0xf29   :  { %v1850_v62 = vpop.xlane.xlu1 %1849 }
 0xf2a   :  { %v1853_v63 = vmul.f32 0.03125, %v1850_v62  ;;  %v1856_v1 = vmul.f32 %v1854_v35, %v1854_v35 }
 0xf2c   :  { %v1855_v2 = vsub.f32 %v1844_v49, %v1853_v63  ;;  %v1858_v3 = vsel %vm458_vm1, %v1856_v1, 0.0 }
 0xf2d   :  { %1859 = vadd.xlane.f32.xlu0 %v1858_v3 }
 0xf2e   :  { %v1857_v4 = vmul.f32 %v1855_v2, %v1855_v2 }
 0xf30   :  { %v1861_v6 = vsel %vm458_vm1, %v1857_v4, 0.0 }
 0xf31   :  { %1862 = vadd.xlane.f32.xlu1 %v1861_v6 }
 0xfb6   :  { %v1860_v11 = vpop.xlane.xlu0 %1859 }
 0xfb7   :  { %v1864_v7 = vmul.f32 0.03125, %v1860_v11 }
 0xfb9   :  { %v1866_v12 = vadd.f32 1e-12, %v1864_v7 }
 0xfba   :  { %v1863_v13 = vpop.xlane.xlu1 %1862 }
 0xfbb   :  { %10206 = vrsqrt.f32 %v1866_v12  ;;  %v1865_v14 = vmul.f32 0.03125, %v1863_v13 }
 0xfbd   :  { %v1867_v15 = vadd.f32 1e-12, %v1865_v14 }
 0xfbf   :  { %10208 = vrsqrt.f32 %v1867_v15 }
 0xfc8   :  { %v10207_v16 = vpop.eup %10206 }
 0xfc9   :  { %v1870_v28 = vmul.f32 %v10207_v16, %v1854_v35 }
 0xfcb   :  { %v1878_v33 = vmul.f32 %v8547_v18, %v1870_v28 }
 0xfcc   :  { %v10209_v19 = vpop.eup %10208 }
 0xfcd   :  { %v1871_v21 = vmul.f32 %v10209_v19, %v1855_v2  ;;  %v1886_v24 = vadd.f32 %v8548_v22, %v1878_v33  ;;  %v10110_v19 = vld [vmem:[%s12679_s11 + $0x48] sm:$0xff]   ;;  %v10112_v33 = vld [vmem:[%s12679_s11 + $0x40] sm:$0xff]  }
 0xfcf   :  { %v1879_v23 = vmul.f32 %v8547_v18, %v1871_v21  ;;  %v10111_v21 = vld [vmem:[%s12683_s7 + $0x48] sm:$0xff]  }
 0xfd1   :  { %v1887_v26 = vadd.f32 %v8548_v22, %v1879_v23  ;;  %v10113_v22 = vld [vmem:[%s12683_s7 + $0x40] sm:$0xff]  }
 0xfd3   :  { %v1888_v27 = vpack.c.bf16 %v1887_v26, %v1886_v24 }
 0xfd5   :  { %9292 = vmatmul.mubr.msk.bf16.vlgmr.msra.gmra.mxu0 %vm458_vm1, %v1888_v27 }
 0xfd6   :  { %9311 = vmatprep.mubr.msk.bf16.mxu0 %vm10512_vm0, %v10511_v0  ;;  %9308 = vmatpush3.bf16.msra.mxu0 %v10110_v19 }
 0xfd7   :  { %9309 = vmatprep.subr.bf16.mxu0 %v10511_v0 }
 0xfda   :  { %9310 = vmatpush3.bf16.msra.mxu0 %v10112_v33  ;;  %v11147_v33 = vld [vmem:[%s12684_s8 + $0x8] sm:$0xff] }
 0xfdb   :  { %9315 = vmatprep.subr.bf16.mxu0 %v10511_v0 }
0x1095   :  { %v1944_v37 = vpop.f32.mrf.mxu0 }
0x1096   :  { %v1945_v38 = vadd.f32 %v8549_v36, %v1944_v37 }
0x1097   :  { %v9293_v39 = vpop.f32.mrf.mxu0 }
0x1098   :  { %v1953_v40 = vmul.f32 0.044715, %v1945_v38  ;;  %v1951_v59 = vmul.f32 0.5, %v1945_v38 }
0x1099   :  { %v1947_v41 = vpop.f32.mrf.mxu0 }
0x109a   :  { %v1955_v43 = vmul.f32 %v1953_v40, %v1945_v38  ;;  %v1948_v44 = vadd.f32 %v8549_v36, %v1947_v41  ;;  %v8559_v36 = vld [vmem:[%s12636_s21] ss:$0 sm:$0xff] }
0x109b   :  { %v9294_v45 = vpop.f32.mrf.mxu0  ;;  %v8560_v40 = vld [vmem:[%s12637_s22] ss:$0 sm:$0xff] }
0x109c   :  { %v1957_v46 = vmul.f32 %v1955_v43, %v1945_v38  ;;  %v1954_v47 = vmul.f32 0.044715, %v1948_v44  ;;  %v1952_v17 = vmul.f32 0.5, %v1948_v44  ;;  %v10114_v45 = vld [vmem:[%s12678_s13 + $0x48] sm:$0xff]  }
0x109e   :  { %v1959_v48 = vadd.f32 %v1957_v46, %v1945_v38  ;;  %v1956_v50 = vmul.f32 %v1954_v47, %v1948_v44  ;;  %v10115_v47 = vld [vmem:[%s12678_s13 + $0x40] sm:$0xff]  }
0x10a0   :  { %v1961_v51 = vmul.f32 0.7978846, %v1959_v48  ;;  %v1958_v52 = vmul.f32 %v1956_v50, %v1948_v44 }
0x10a2   :  { %10210 = vtanh.f32 %v1961_v51  ;;  %v1960_v54 = vadd.f32 %v1958_v52, %v1948_v44  ;;  %v8569_v51 = vld [vmem:[%s12685_s9 + $0x4] ss:$0 sm:$0xff] }
0x10a4   :  { %v1962_v55 = vmul.f32 0.7978846, %v1960_v54 }
0x10a6   :  { %10212 = vtanh.f32 %v1962_v55 }
0x10af   :  { %v10211_v56 = vpop.eup %10210 }
0x10b0   :  { %v1965_v57 = vadd.f32 1.0, %v10211_v56 }
0x10b2   :  { %v1967_v60 = vmul.f32 %v1965_v57, %v1951_v59 }
0x10b3   :  { %v10213_v58 = vpop.eup %10212 }
0x10b4   :  { %v1966_v32 = vadd.f32 1.0, %v10213_v58 }
0x10b6   :  { %v1968_v49 = vmul.f32 %v1966_v32, %v1952_v17 }
0x10b8   :  { %v1969_v61 = vpack.c.bf16 %v1968_v49, %v1967_v60  ;;  %v8565_v49 = vld [vmem:[%s12681_s30 + $0x4] ss:$0 sm:$0xff] }
0x10ba   :  { %9304 = vmatmul.mubr.msk.bf16.vlgmr.msra.gmra.mxu1 %vm2000_vm5, %v1969_v61 }
0x10bb   :  { %9327 = vmatprep.mubr.msk.bf16.mxu1 %vm10512_vm0, %v10511_v0  ;;  %9324 = vmatpush3.bf16.msra.mxu1 %v10111_v21 }
0x10bc   :  { %9325 = vmatprep.subr.bf16.mxu1 %v10511_v0 }
0x10bf   :  { %9326 = vmatpush3.bf16.msra.mxu1 %v10113_v22 }
0x10c0   :  { %9337 = vmatprep.subr.bf16.mxu1 %v10511_v0 }
0x117a   :  { %v2038_v53 = vpop.f32.mrf.mxu1 }
0x117b   :  { %v2039_v35 = vadd.f32 %v8553_v20, %v2038_v53 }
0x117c   :  { %v9305_v62 = vpop.f32.mrf.mxu1 }
0x117d   :  { %v2045_v63 = vadd.f32 %v2039_v35, %v1886_v24 }
0x117e   :  { %v2041_v1 = vpop.f32.mrf.mxu1 }
0x117f   :  { %v2042_v2 = vadd.f32 %v8553_v20, %v2041_v1  ;;  %v2047_v3 = vsel %vm458_vm1, %v2045_v63, 0.0 }
0x1180   :  { %2048 = vadd.xlane.f32.xlu0 %v2047_v3  ;;  %v9306_v4 = vpop.f32.mrf.mxu1 }
0x1181   :  { %v2046_v6 = vadd.f32 %v2042_v2, %v1887_v26  ;;  %v8561_v2 = vld [vmem:[%s12682_s2 + $0x4] ss:$0 sm:$0xff] }
0x1183   :  { %v2050_v8 = vsel %vm458_vm1, %v2046_v6, 0.0 }
0x1184   :  { %2051 = vadd.xlane.f32.xlu1 %v2050_v8 }
0x1209   :  { %v2049_v9 = vpop.xlane.xlu0 %2048 }
0x120a   :  { %v2053_v11 = vmul.f32 0.03125, %v2049_v9  ;;  %v10117_v9 = vld [vmem:[%s12679_s11 + $0x50] sm:$0xff]  }
0x120c   :  { %v2055_v7 = vsub.f32 %v2045_v63, %v2053_v11  ;;  %v10118_v11 = vld [vmem:[%s12683_s7 + $0x58] sm:$0xff]  }
0x120d   :  { %v2052_v12 = vpop.xlane.xlu1 %2051 }
0x120e   :  { %v2054_v13 = vmul.f32 0.03125, %v2052_v12  ;;  %v2057_v14 = vmul.f32 %v2055_v7, %v2055_v7 }
0x1210   :  { %v2056_v15 = vsub.f32 %v2046_v6, %v2054_v13  ;;  %v2059_v16 = vsel %vm458_vm1, %v2057_v14, 0.0  ;;  %v10116_v6 = vld [vmem:[%s12679_s11 + $0x58] sm:$0xff]  }
0x1211   :  { %2060 = vadd.xlane.f32.xlu0 %v2059_v16 }
0x1212   :  { %v2058_v28 = vmul.f32 %v2056_v15, %v2056_v15 }
0x1214   :  { %v2062_v18 = vsel %vm458_vm1, %v2058_v28, 0.0 }
0x1215   :  { %2063 = vadd.xlane.f32.xlu1 %v2062_v18 }
0x129a   :  { %v2061_v23 = vpop.xlane.xlu0 %2060 }
0x129b   :  { %v2065_v24 = vmul.f32 0.03125, %v2061_v23 }
0x129d   :  { %v2067_v26 = vadd.f32 1e-12, %v2065_v24 }
0x129e   :  { %v2064_v27 = vpop.xlane.xlu1 %2063 }
0x129f   :  { %10214 = vrsqrt.f32 %v2067_v26  ;;  %v2066_v29 = vmul.f32 0.03125, %v2064_v27  ;;  %v8575_v26 = vld [vmem:[%s12682_s2 + $0x5] ss:$0 sm:$0xff] }
0x12a1   :  { %v2068_v30 = vadd.f32 1e-12, %v2066_v29 }
0x12a3   :  { %10216 = vrsqrt.f32 %v2068_v30 }
0x12ac   :  { %v10215_v31 = vpop.eup %10214 }
0x12ad   :  { %v2071_v34 = vmul.f32 %v10215_v31, %v2055_v7  ;;  %v10119_v7 = vld [vmem:[%s12683_s7 + $0x50] sm:$0xff]  }
0x12af   :  { %v2079_v38 = vmul.f32 %v8559_v36, %v2071_v34 }
0x12b0   :  { %v10217_v37 = vpop.eup %10216 }
0x12b1   :  { %v2072_v39 = vmul.f32 %v10217_v37, %v2056_v15  ;;  %v11070_v43 = vadd.f32 %v8560_v40, %v2079_v38  ;;  %v11140_v15 = vld [vmem:[%s12684_s8] sm:$0xff] }
0x12b2   :  { %v8583_v38 = vld [vmem:[%s12685_s9 + $0x5] ss:$0 sm:$0xff] }
0x12b3   :  { %v2080_v41 = vmul.f32 %v8559_v36, %v2072_v39 }
0x12b5   :  { %v11072_v44 = vadd.f32 %v8560_v40, %v2080_v41 }
0x12b7   :  { %v11079_v46 = vpack.c.bf16 %v11072_v44, %v11070_v43 }
0x12b9   :  { %9312 = vmatmul.mubr.msk.bf16.vlgmr.msra.gmra.mxu0 %vm458_vm1, %v11079_v46  ;;  %9328 = vmatmul.mubr.msk.bf16.vlgmr.msra.gmra.mxu1 %vm458_vm1, %v11079_v46 }
0x12ba   :  { %9316 = vmatpush3.bf16.msra.mxu0 %v10114_v45  ;;  %9319 = vmatprep.mubr.msk.bf16.mxu0 %vm10512_vm0, %v10511_v0 }
0x12bb   :  { %9317 = vmatprep.subr.bf16.mxu0 %v10511_v0  ;;  %9339 = vmatprep.mubr.msk.bf16.mxu1 %vm10512_vm0, %v10511_v0 }
0x12be   :  { %9318 = vmatpush3.bf16.msra.mxu0 %v10115_v47 }
0x12bf   :  { %9331 = vmatprep.subr.bf16.mxu0 %v10511_v0 }
0x12c1   :  { %9320 = vmatmul.mubr.msk.bf16.vlgmr.msra.gmra.mxu0 %vm458_vm1, %v11079_v46 }
0x12c2   :  { %9333 = vmatprep.mubr.msk.bf16.mxu0 %vm10512_vm0, %v10511_v0 }
0x1379   :  { %v2145_v48 = vpop.f32.mrf.mxu0  ;;  %v2263_v50 = vpop.f32.mrf.mxu1 }
0x137a   :  { %v2264_v57 = vadd.f32 %v8569_v51, %v2263_v50  ;;  %v2146_v4 = vadd.f32 %v8561_v2, %v2145_v48 }
0x137b   :  { %v9313_v52 = vpop.f32.mrf.mxu0  ;;  %v9329_v54 = vpop.f32.mrf.mxu1 }
0x137d   :  { %v2148_v55 = vpop.f32.mrf.mxu0  ;;  %v2266_v56 = vpop.f32.mrf.mxu1 }
0x137e   :  { %v2267_v58 = vadd.f32 %v8569_v51, %v2266_v56  ;;  %v2149_v3 = vadd.f32 %v8561_v2, %v2148_v55 }
0x137f   :  { %v9314_v59 = vpop.f32.mrf.mxu0  ;;  %v9330_v17 = vpop.f32.mrf.mxu1 }
0x1380   :  { %v2346_v32 = vpack.c.bf16 %v2267_v58, %v2264_v57  ;;  %v2270_v8 = vpack.c.bf16 %v2149_v3, %v2146_v4 }
0x1381   :  { %v2204_v60 = vpop.f32.mrf.mxu0 }
0x1382   :  { %9338 = vmatpush3.bf16.msra.mxu1 %v2346_v32  ;;  %v2205_v53 = vadd.f32 %v8565_v49, %v2204_v60 }
0x1383   :  { %v9321_v61 = vpop.f32.mrf.mxu0  ;;  %9351 = vmatprep.subr.bf16.mxu1 %v10511_v0 }
0x1385   :  { %v2207_v20 = vpop.f32.mrf.mxu0 }
0x1386   :  { %v2208_v35 = vadd.f32 %v8565_v49, %v2207_v20 }
0x1387   :  { %v9322_v62 = vpop.f32.mrf.mxu0 }
0x1388   :  { %v2271_v63 = vpack.c.bf16 %v2208_v35, %v2205_v53  ;;  %v10120_v35 = vld [vmem:[%s12678_s13 + $0x58] sm:$0xff]  }
0x138a   :  { %v2276_v1 = vsel %vm623_vm2, %v2271_v63, 0  ;;  %v10121_v63 = vld [vmem:[%s12678_s13 + $0x50] sm:$0xff]  }
0x138b   :  { %9332 = vmatpush3.bf16.xpose.msra.mxu0 %v2276_v1 }
0x138c   :  { %9343 = vmatprep.subr.bf16.mxu0 %v10511_v0 }
0x1392   :  { %9334 = vmatmul.mubr.msk.bf16.vlgmr.msra.gmra.mxu0 %vm623_vm2, %v2270_v8 }
0x1393   :  { %9344 = vmatpush3.bf16.msra.mxu0 %v10116_v6  ;;  %9347 = vmatprep.mubr.msk.bf16.mxu0 %vm10512_vm0, %v10511_v0 }
0x1394   :  { %9345 = vmatprep.subr.bf16.mxu0 %v10511_v0 }
0x1397   :  { %9346 = vmatpush3.bf16.msra.mxu0 %v10117_v9  ;;  %v8579_v9 = vld [vmem:[%s12681_s30 + $0x5] ss:$0 sm:$0xff] }
0x1398   :  { %9359 = vmatprep.subr.bf16.mxu0 %v10511_v0 }
0x139a   :  { %9348 = vmatmul.mubr.msk.bf16.vlgmr.msra.gmra.mxu0 %vm458_vm1, %v11079_v46 }
0x139b   :  { %9360 = vmatpush3.bf16.msra.mxu0 %v10118_v11  ;;  %9363 = vmatprep.mubr.msk.bf16.mxu0 %vm10512_vm0, %v10511_v0 }
0x139c   :  { %9361 = vmatprep.subr.bf16.mxu0 %v10511_v0 }
0x139f   :  { %9362 = vmatpush3.bf16.msra.mxu0 %v10119_v7 }
0x13a0   :  { %9373 = vmatprep.subr.bf16.mxu0 %v10511_v0 }
0x13a2   :  { %9364 = vmatmul.mubr.msk.bf16.vlgmr.msra.gmra.mxu0 %vm458_vm1, %v11079_v46 }
0x13a3   :  { %9375 = vmatprep.mubr.msk.bf16.mxu0 %vm10512_vm0, %v10511_v0 }
0x1452   :  { %v2312_v12 = vpop.f32.mrf.mxu0 }
0x1453   :  { %v2319_v13 = vmul.f32 0.35355338, %v2312_v12 }
0x1454   :  { %v9335_v14 = vpop.f32.mrf.mxu0 }
0x1455   :  { %v2321_v16 = vadd.f32 %v11140_v15, %v2319_v13 }
0x1456   :  { %v2315_v28 = vpop.f32.mrf.mxu0 }
0x1457   :  { %v2320_v18 = vmul.f32 0.35355338, %v2315_v28  ;;  %v2323_v19 = vsel %vm675_vm3, %v2321_v16, -inf }
0x1458   :  { %2324 = vmax.xlane.f32.xlu0 %v2323_v19  ;;  %v9336_v21 = vpop.f32.mrf.mxu0 }
0x1459   :  { %v2322_v22 = vadd.f32 %v11147_v33, %v2320_v18 }
0x145a   :  { %v2444_v23 = vpop.f32.mrf.mxu0 }
0x145b   :  { %v2326_v24 = vsel %vm675_vm3, %v2322_v22, -inf  ;;  %v11154_v30 = vadd.f32 %v8575_v26, %v2444_v23 }
0x145c   :  { %2327 = vmax.xlane.f32.xlu1 %v2326_v24  ;;  %v9349_v27 = vpop.f32.mrf.mxu0 }
0x145e   :  { %v2447_v29 = vpop.f32.mrf.mxu0 }
0x145f   :  { %v11156_v31 = vadd.f32 %v8575_v26, %v2447_v29 }
0x1460   :  { %v9350_v34 = vpop.f32.mrf.mxu0 }
0x1461   :  { %v2569_v36 = vpack.c.bf16 %v11156_v31, %v11154_v30 }
0x1462   :  { %v2562_v37 = vpop.f32.mrf.mxu0 }
0x1463   :  { %v2563_v41 = vadd.f32 %v8583_v38, %v2562_v37 }
0x1464   :  { %v9365_v39 = vpop.f32.mrf.mxu0 }
0x1466   :  { %v2565_v40 = vpop.f32.mrf.mxu0 }
0x1467   :  { %v2566_v45 = vadd.f32 %v8583_v38, %v2565_v40 }
0x1468   :  { %v9366_v47 = vpop.f32.mrf.mxu0 }
0x1469   :  { %v2645_v48 = vpack.c.bf16 %v2566_v45, %v2563_v41 }
0x146b   :  { %9374 = vmatpush3.bf16.msra.mxu0 %v2645_v48 }
0x146c   :  { %9385 = vmatprep.subr.bf16.mxu0 %v10511_v0 }
0x14e1   :  { %v2325_v50 = vpop.xlane.xlu0 %2324 }
0x14e2   :  { %v2329_v51 = vsub.f32 %v2321_v16, %v2325_v50 }
0x14e4   :  { %v2331_v52 = vmul.f32 1.442695, %v2329_v51 }
0x14e5   :  { %v2328_v54 = vpop.xlane.xlu1 %2327 }
0x14e6   :  { %10218 = vpow2.f32 %v2331_v52  ;;  %v2330_v55 = vsub.f32 %v2322_v22, %v2328_v54  ;;  %v8335_v54 = vld [vmem:[%s12686_s29 + $0x10] sm:$0xf] }
0x14e8   :  { %v2333_v56 = vmul.f32 1.442695, %v2330_v55 }
0x14ea   :  { %10220 = vpow2.f32 %v2333_v56 }
0x14f3   :  { %v10219_v57 = vpop.eup %10218 }
0x14f4   :  { %v2335_v58 = vsel %vm675_vm3, %v10219_v57, 0.0 }
0x14f5   :  { %2336 = vadd.xlane.f32.xlu0 %v2335_v58  ;;  %v11199_v58 = vsel %vm1047_vm4, %v8335_v54, 0 }
0x14f7   :  { %v10221_v59 = vpop.eup %10220 }
0x14f8   :  { %v2338_v17 = vsel %vm675_vm3, %v10221_v59, 0.0 }
0x14f9   :  { %2339 = vadd.xlane.f32.xlu1 %v2338_v17  ;;  %v10123_v17 = vld [vmem:[%s12678_s13 + $0x60] sm:$0xff]  }
0x157e   :  { %v2337_v32 = vpop.xlane.xlu0 %2336 }
0x157f   :  { %10222 = vrcp.f32 %v2337_v32  ;;  %v8351_v32 = vld [vmem:[%s12686_s29 + $0x14] sm:$0xf] }
0x1582   :  { %v2340_v60 = vpop.xlane.xlu1 %2339 }
0x1583   :  { %10224 = vrcp.f32 %v2340_v60  ;;  %v11225_v60 = vsel %vm1047_vm4, %v8351_v32, 0 }
0x158c   :  { %v10223_v49 = vpop.eup %10222 }
0x158d   :  { %v2343_v20 = vmul.f32 %v10223_v49, %v10219_v57 }
0x1590   :  { %v10225_v61 = vpop.eup %10224 }
0x1591   :  { %v2344_v53 = vmul.f32 %v10225_v61, %v10221_v59  ;;  %v10122_v59 = vld [vmem:[%s12678_s13 + $0x68] sm:$0xff]  }
0x1593   :  { %v2345_v62 = vpack.c.bf16 %v2344_v53, %v2343_v20  ;;  %v10124_v53 = vld [vmem:[%s12679_s11 + $0x68] sm:$0xff]  }
0x1595   :  { %9340 = vmatmul.mubr.msk.bf16.vlgmr.msra.gmra.mxu1 %vm675_vm3, %v2345_v62 }
0x1596   :  { %9352 = vmatpush3.bf16.msra.mxu1 %v10120_v35  ;;  %9355 = vmatprep.mubr.msk.bf16.mxu1 %vm10512_vm0, %v10511_v0 }
0x1597   :  { %9353 = vmatprep.subr.bf16.mxu1 %v10511_v0 }
0x159a   :  { %9354 = vmatpush3.bf16.msra.mxu1 %v10121_v63 }
0x159b   :  { %9367 = vmatprep.subr.bf16.mxu1 %v10511_v0 }
0x159d   :  { %9356 = vmatmul.mubr.msk.bf16.vlgmr.msra.gmra.mxu1 %vm458_vm1, %v11079_v46 }
0x159e   :  { %9369 = vmatprep.mubr.msk.bf16.mxu1 %vm10512_vm0, %v10511_v0 }
0x1655   :  { %v2384_v1 = vpop.f32.mrf.mxu1 }
0x1657   :  { %v9341_v2 = vpop.f32.mrf.mxu1 }
0x1659   :  { %v2387_v3 = vpop.f32.mrf.mxu1 }
0x165a   :  { %v2391_v4 = vpack.c.bf16 %v2387_v3, %v2384_v1  ;;  %v10125_v1 = vld [vmem:[%s12679_s11 + $0x60] sm:$0xff]  }
0x165b   :  { %v9342_v6 = vpop.f32.mrf.mxu1 }
0x165d   :  { %v2503_v8 = vpop.f32.mrf.mxu1 }
0x165e   :  { %v2504_v12 = vadd.f32 %v8579_v9, %v2503_v8 }
0x165f   :  { %v9357_v11 = vpop.f32.mrf.mxu1 }
0x1660   :  { %v8595_v11 = vld [vmem:[%s12681_s30 + $0x6] ss:$0 sm:$0xff] }
0x1661   :  { %v2506_v7 = vpop.f32.mrf.mxu1 }
0x1662   :  { %v2507_v13 = vadd.f32 %v8579_v9, %v2506_v7  ;;  %v10127_v9 = vld [vmem:[%s12683_s7 + $0x60] sm:$0xff]  }
0x1663   :  { %v9358_v14 = vpop.f32.mrf.mxu1 }
0x1664   :  { %v2570_v16 = vpack.c.bf16 %v2507_v13, %v2504_v12 }
0x1666   :  { %v2575_v28 = vsel %vm623_vm2, %v2570_v16, 0 }
0x1667   :  { %9368 = vmatpush3.bf16.xpose.msra.mxu1 %v2575_v28 }
0x1668   :  { %9379 = vmatprep.subr.bf16.mxu1 %v10511_v0 }
0x166e   :  { %9370 = vmatmul.mubr.msk.bf16.vlgmr.msra.gmra.mxu1 %vm623_vm2, %v2569_v36 }
0x166f   :  { %9381 = vmatprep.mubr.msk.bf16.mxu1 %vm10512_vm0, %v10511_v0  ;;  %9380 = vmatpush3.bf16.msra.mxu1 %v11225_v60 }
0x1670   :  { %9391 = vmatprep.subr.bf16.mxu1 %v10511_v0 }
0x172e   :  { %v2611_v18 = vpop.f32.mrf.mxu1 }
0x172f   :  { %v2618_v19 = vmul.f32 0.35355338, %v2611_v18 }
0x1730   :  { %v9371_v21 = vpop.f32.mrf.mxu1 }
0x1731   :  { %v2620_v22 = vadd.f32 %v11140_v15, %v2618_v19 }
0x1732   :  { %v2614_v23 = vpop.f32.mrf.mxu1 }
0x1733   :  { %v2619_v24 = vmul.f32 0.35355338, %v2614_v23  ;;  %v2622_v26 = vsel %vm675_vm3, %v2620_v22, -inf }
0x1734   :  { %2623 = vmax.xlane.f32.xlu0 %v2622_v26  ;;  %v9372_v27 = vpop.f32.mrf.mxu1  ;;  %v8591_v26 = vld [vmem:[%s12682_s2 + $0x6] ss:$0 sm:$0xff] }
0x1735   :  { %v2621_v29 = vadd.f32 %v11147_v33, %v2619_v24 }
0x1737   :  { %v2625_v30 = vsel %vm675_vm3, %v2621_v29, -inf }
0x1738   :  { %2626 = vmax.xlane.f32.xlu1 %v2625_v30 }
0x17bd   :  { %v2624_v31 = vpop.xlane.xlu0 %2623 }
0x17be   :  { %v2628_v34 = vsub.f32 %v2620_v22, %v2624_v31 }
0x17c0   :  { %v2630_v36 = vmul.f32 1.442695, %v2628_v34 }
0x17c1   :  { %v2627_v37 = vpop.xlane.xlu1 %2626 }
0x17c2   :  { %10226 = vpow2.f32 %v2630_v36  ;;  %v2629_v38 = vsub.f32 %v2621_v29, %v2627_v37 }
0x17c4   :  { %v2632_v39 = vmul.f32 1.442695, %v2629_v38  ;;  %v8599_v38 = vld [vmem:[%s12685_s9 + $0x6] ss:$0 sm:$0xff] }
0x17c6   :  { %10228 = vpow2.f32 %v2632_v39 }
0x17cf   :  { %v10227_v40 = vpop.eup %10226 }
0x17d0   :  { %v2634_v41 = vsel %vm675_vm3, %v10227_v40, 0.0 }
0x17d1   :  { %2635 = vadd.xlane.f32.xlu0 %v2634_v41 }
0x17d3   :  { %v10229_v45 = vpop.eup %10228 }
0x17d4   :  { %v2637_v47 = vsel %vm675_vm3, %v10229_v45, 0.0 }
0x17d5   :  { %2638 = vadd.xlane.f32.xlu1 %v2637_v47 }
0x185a   :  { %v2636_v48 = vpop.xlane.xlu0 %2635 }
0x185b   :  { %10230 = vrcp.f32 %v2636_v48 }
0x185e   :  { %v2639_v50 = vpop.xlane.xlu1 %2638 }
0x185f   :  { %10232 = vrcp.f32 %v2639_v50 }
0x1868   :  { %v10231_v51 = vpop.eup %10230 }
0x1869   :  { %v2642_v55 = vmul.f32 %v10231_v51, %v10227_v40 }
0x186c   :  { %v10233_v52 = vpop.eup %10232 }
0x186d   :  { %v2643_v56 = vmul.f32 %v10233_v52, %v10229_v45 }
0x186f   :  { %v2644_v57 = vpack.c.bf16 %v2643_v56, %v2642_v55 }
0x1871   :  { %9376 = vmatmul.mubr.msk.bf16.vlgmr.msra.gmra.mxu0 %vm675_vm3, %v2644_v57 }
0x1872   :  { %9386 = vmatpush3.bf16.msra.mxu0 %v11199_v58  ;;  %9387 = vmatprep.mubr.msk.bf16.mxu0 %vm10512_vm0, %v10511_v0 }
0x1873   :  { %9399 = vmatprep.subr.bf16.mxu0 %v10511_v0 }
0x1879   :  { %9388 = vmatmul.mubr.msk.bf16.vlgmr.msra.gmra.mxu0 %vm623_vm2, %v2391_v4  ;;  %v10126_v4 = vld [vmem:[%s12683_s7 + $0x68] sm:$0xff]  }
0x187a   :  { %9400 = vmatpush3.bf16.msra.mxu0 %v10122_v59  ;;  %9403 = vmatprep.mubr.msk.bf16.mxu0 %vm10512_vm0, %v10511_v0 }
0x187b   :  { %9401 = vmatprep.subr.bf16.mxu0 %v10511_v0 }
0x187e   :  { %9402 = vmatpush3.bf16.msra.mxu0 %v10123_v17 }
0x187f   :  { %9415 = vmatprep.subr.bf16.mxu0 %v10511_v0 }
0x1881   :  { %9404 = vmatmul.mubr.msk.bf16.vlgmr.msra.gmra.mxu0 %vm458_vm1, %v11079_v46 }
0x1882   :  { %9417 = vmatprep.mubr.msk.bf16.mxu0 %vm10512_vm0, %v10511_v0 }
0x1931   :  { %v2683_v49 = vpop.f32.mrf.mxu0 }
0x1933   :  { %v9377_v61 = vpop.f32.mrf.mxu0 }
0x1935   :  { %v2686_v20 = vpop.f32.mrf.mxu0 }
0x1936   :  { %v2690_v35 = vpack.c.bf16 %v2686_v20, %v2683_v49 }
0x1937   :  { %v9378_v62 = vpop.f32.mrf.mxu0 }
0x1938   :  { %9382 = vmatmul.mubr.msk.bf16.vlgmr.msra.gmra.mxu1 %vm623_vm2, %v2690_v35 }
0x1939   :  { %v11233_v63 = vpop.f32.mrf.mxu0  ;;  %9392 = vmatpush3.bf16.msra.mxu1 %v10124_v53  ;;  %9395 = vmatprep.mubr.msk.bf16.mxu1 %vm10512_vm0, %v10511_v0 }
0x193a   :  { %9393 = vmatprep.subr.bf16.mxu1 %v10511_v0 }
0x193b   :  { %v9389_v2 = vpop.f32.mrf.mxu0 }
0x193d   :  { %v11241_v3 = vpop.f32.mrf.mxu0  ;;  %9394 = vmatpush3.bf16.msra.mxu1 %v10125_v1 }
0x193e   :  { %9407 = vmatprep.subr.bf16.mxu1 %v10511_v0 }
0x193f   :  { %v9390_v6 = vpop.f32.mrf.mxu0 }
0x1940   :  { %9396 = vmatmul.mubr.msk.bf16.vlgmr.msra.gmra.mxu1 %vm458_vm1, %v11079_v46 }
0x1941   :  { %v2896_v8 = vpop.f32.mrf.mxu0  ;;  %9408 = vmatpush3.bf16.msra.mxu1 %v10126_v4  ;;  %9411 = vmatprep.mubr.msk.bf16.mxu1 %vm10512_vm0, %v10511_v0 }
0x1942   :  { %9409 = vmatprep.subr.bf16.mxu1 %v10511_v0  ;;  %v2897_v13 = vadd.f32 %v8595_v11, %v2896_v8 }
0x1943   :  { %v9405_v7 = vpop.f32.mrf.mxu0 }
0x1945   :  { %v2899_v12 = vpop.f32.mrf.mxu0  ;;  %9410 = vmatpush3.bf16.msra.mxu1 %v10127_v9 }
0x1946   :  { %v2900_v14 = vadd.f32 %v8595_v11, %v2899_v12  ;;  %9421 = vmatprep.subr.bf16.mxu1 %v10511_v0 }
0x1947   :  { %v9406_v16 = vpop.f32.mrf.mxu0 }
0x1948   :  { %v2963_v28 = vpack.c.bf16 %v2900_v14, %v2897_v13  ;;  %9412 = vmatmul.mubr.msk.bf16.vlgmr.msra.gmra.mxu1 %vm458_vm1, %v11079_v46  ;;  %v10128_v14 = vld [vmem:[%s12679_s11 + $0x78] sm:$0xff]  }
0x1949   :  { %9423 = vmatprep.mubr.msk.bf16.mxu1 %vm10512_vm0, %v10511_v0 }
0x194a   :  { %v2968_v18 = vsel %vm623_vm2, %v2963_v28, 0  ;;  %v10129_v28 = vld [vmem:[%s12679_s11 + $0x70] sm:$0xff]  }
0x194b   :  { %9416 = vmatpush3.bf16.xpose.msra.mxu0 %v2968_v18  ;;  %v10130_v18 = vld [vmem:[%s12683_s7 + $0x78] sm:$0xff]  }
0x194c   :  { %9427 = vmatprep.subr.bf16.mxu0 %v10511_v0 }
0x19f8   :  { %v11265_v19 = vpop.f32.mrf.mxu1 }
0x19fa   :  { %v9383_v21 = vpop.f32.mrf.mxu1 }
0x19fb   :  { %v10131_v21 = vld [vmem:[%s12683_s7 + $0x70] sm:$0xff]  }
0x19fc   :  { %v11267_v22 = vpop.f32.mrf.mxu1 }
0x19fe   :  { %v9384_v23 = vpop.f32.mrf.mxu1 }
0x19ff   :  { %v8367_v23 = vld [vmem:[%s12686_s29 + $0x18] sm:$0xf] }
0x1a00   :  { %v2837_v24 = vpop.f32.mrf.mxu1 }
0x1a01   :  { %v2838_v30 = vadd.f32 %v8591_v26, %v2837_v24  ;;  %v11316_v24 = vsel %vm1047_vm4, %v8367_v23, 0 }
0x1a02   :  { %v9397_v27 = vpop.f32.mrf.mxu1 }
0x1a04   :  { %v2840_v29 = vpop.f32.mrf.mxu1 }
0x1a05   :  { %v2841_v31 = vadd.f32 %v8591_v26, %v2840_v29 }
0x1a06   :  { %v9398_v34 = vpop.f32.mrf.mxu1 }
0x1a07   :  { %v2962_v36 = vpack.c.bf16 %v2841_v31, %v2838_v30  ;;  %v10132_v30 = vld [vmem:[%s12678_s13 + $0x78] sm:$0xff]  }
0x1a08   :  { %v2955_v37 = vpop.f32.mrf.mxu1 }
0x1a09   :  { %9418 = vmatmul.mubr.msk.bf16.vlgmr.msra.gmra.mxu0 %vm623_vm2, %v2962_v36  ;;  %v2956_v41 = vadd.f32 %v8599_v38, %v2955_v37  ;;  %v10133_v37 = vld [vmem:[%s12678_s13 + $0x70] sm:$0xff]  }
0x1a0a   :  { %v9413_v39 = vpop.f32.mrf.mxu1  ;;  %9429 = vmatprep.mubr.msk.bf16.mxu0 %vm10512_vm0, %v10511_v0  ;;  %9428 = vmatpush3.bf16.msra.mxu0 %v11316_v24 }
0x1a0b   :  { %9441 = vmatprep.subr.bf16.mxu0 %v10511_v0 }
0x1a0c   :  { %v2958_v40 = vpop.f32.mrf.mxu1 }
0x1a0d   :  { %v2959_v45 = vadd.f32 %v8599_v38, %v2958_v40  ;;  %v8606_v38 = vld [vmem:[%s12682_s2 + $0x7] ss:$0 sm:$0xff] }
0x1a0e   :  { %v9414_v47 = vpop.f32.mrf.mxu1 }
0x1a0f   :  { %v3038_v48 = vpack.c.bf16 %v2959_v45, %v2956_v41 }
0x1a11   :  { %9422 = vmatpush3.bf16.msra.mxu1 %v3038_v48 }
0x1a12   :  { %9433 = vmatprep.subr.bf16.mxu1 %v10511_v0 }
0x1ac9   :  { %v3004_v50 = vpop.f32.mrf.mxu0 }
0x1aca   :  { %v3011_v51 = vmul.f32 0.35355338, %v3004_v50 }
0x1acb   :  { %v9419_v52 = vpop.f32.mrf.mxu0 }
0x1acc   :  { %v3013_v54 = vadd.f32 %v11140_v15, %v3011_v51  ;;  %v8614_v51 = vld [vmem:[%s12685_s9 + $0x7] ss:$0 sm:$0xff] }
0x1acd   :  { %v3007_v55 = vpop.f32.mrf.mxu0 }
0x1ace   :  { %v3012_v56 = vmul.f32 0.35355338, %v3007_v55  ;;  %v3015_v57 = vsel %vm675_vm3, %v3013_v54, -inf }
0x1acf   :  { %3016 = vmax.xlane.f32.xlu0 %v3015_v57  ;;  %v9420_v59 = vpop.f32.mrf.mxu0 }
0x1ad0   :  { %v3014_v17 = vadd.f32 %v11147_v33, %v3012_v56 }
0x1ad2   :  { %v3018_v32 = vsel %vm675_vm3, %v3014_v17, -inf }
0x1ad3   :  { %3019 = vmax.xlane.f32.xlu1 %v3018_v32 }
0x1b58   :  { %v3017_v49 = vpop.xlane.xlu0 %3016 }
0x1b59   :  { %v3021_v61 = vsub.f32 %v3013_v54, %v3017_v49 }
0x1b5b   :  { %v3023_v20 = vmul.f32 1.442695, %v3021_v61  ;;  %v2782_v61 = vadd.f32 %v11241_v3, %v11267_v22 }
0x1b5c   :  { %v3020_v53 = vpop.xlane.xlu1 %3019 }
0x1b5d   :  { %10234 = vpow2.f32 %v3023_v20  ;;  %v3022_v35 = vsub.f32 %v3014_v17, %v3020_v53 }
0x1b5f   :  { %v3025_v62 = vmul.f32 1.442695, %v3022_v35 }
0x1b61   :  { %10236 = vpow2.f32 %v3025_v62 }
0x1b6a   :  { %v10235_v1 = vpop.eup %10234 }
0x1b6b   :  { %v3027_v2 = vsel %vm675_vm3, %v10235_v1, 0.0 }
0x1b6c   :  { %3028 = vadd.xlane.f32.xlu0 %v3027_v2 }
0x1b6e   :  { %v10237_v4 = vpop.eup %10236 }
0x1b6f   :  { %v3030_v6 = vsel %vm675_vm3, %v10237_v4, 0.0 }
0x1b70   :  { %3031 = vadd.xlane.f32.xlu1 %v3030_v6 }
0x1bf5   :  { %v3029_v8 = vpop.xlane.xlu0 %3028 }
0x1bf6   :  { %10238 = vrcp.f32 %v3029_v8 }
0x1bf9   :  { %v3032_v9 = vpop.xlane.xlu1 %3031 }
0x1bfa   :  { %10240 = vrcp.f32 %v3032_v9 }
0x1c03   :  { %v10239_v11 = vpop.eup %10238 }
0x1c04   :  { %v3035_v12 = vmul.f32 %v10239_v11, %v10235_v1  ;;  %v8610_v1 = vld [vmem:[%s12681_s30 + $0x7] ss:$0 sm:$0xff] }
0x1c07   :  { %v10241_v7 = vpop.eup %10240 }
0x1c08   :  { %v3036_v13 = vmul.f32 %v10241_v7, %v10237_v4 }
0x1c0a   :  { %v3037_v16 = vpack.c.bf16 %v3036_v13, %v3035_v12 }
0x1c0c   :  { %9424 = vmatmul.mubr.msk.bf16.vlgmr.msra.gmra.mxu1 %vm675_vm3, %v3037_v16 }
0x1c0d   :  { %9434 = vmatpush3.bf16.msra.mxu1 %v10128_v14  ;;  %9437 = vmatprep.mubr.msk.bf16.mxu1 %vm10512_vm0, %v10511_v0 }
0x1c0e   :  { %9435 = vmatprep.subr.bf16.mxu1 %v10511_v0 }
0x1c11   :  { %9436 = vmatpush3.bf16.msra.mxu1 %v10129_v28 }
0x1c12   :  { %9449 = vmatprep.subr.bf16.mxu1 %v10511_v0 }
0x1c14   :  { %9438 = vmatmul.mubr.msk.bf16.vlgmr.msra.gmra.mxu1 %vm458_vm1, %v11079_v46 }
0x1c15   :  { %9450 = vmatpush3.bf16.msra.mxu1 %v10130_v18  ;;  %9453 = vmatprep.mubr.msk.bf16.mxu1 %vm10512_vm0, %v10511_v0 }
0x1c16   :  { %9451 = vmatprep.subr.bf16.mxu1 %v10511_v0 }
0x1c19   :  { %9452 = vmatpush3.bf16.msra.mxu1 %v10131_v21 }
0x1c1a   :  { %9463 = vmatprep.subr.bf16.mxu1 %v10511_v0 }
0x1c1c   :  { %9454 = vmatmul.mubr.msk.bf16.vlgmr.msra.gmra.mxu1 %vm458_vm1, %v11079_v46 }
0x1c1d   :  { %9465 = vmatprep.mubr.msk.bf16.mxu1 %vm10512_vm0, %v10511_v0 }
0x1ccc   :  { %v3076_v26 = vpop.f32.mrf.mxu1 }
0x1cce   :  { %v9425_v27 = vpop.f32.mrf.mxu1 }
0x1cd0   :  { %v3079_v29 = vpop.f32.mrf.mxu1 }
0x1cd1   :  { %v3083_v31 = vpack.c.bf16 %v3079_v29, %v3076_v26 }
0x1cd2   :  { %v9426_v34 = vpop.f32.mrf.mxu1 }
0x1cd3   :  { %9430 = vmatmul.mubr.msk.bf16.vlgmr.msra.gmra.mxu0 %vm623_vm2, %v3083_v31 }
0x1cd4   :  { %v3185_v36 = vpop.f32.mrf.mxu1  ;;  %9442 = vmatpush3.bf16.msra.mxu0 %v10132_v30  ;;  %9445 = vmatprep.mubr.msk.bf16.mxu0 %vm10512_vm0, %v10511_v0 }
0x1cd5   :  { %9443 = vmatprep.subr.bf16.mxu0 %v10511_v0  ;;  %v3186_v41 = vadd.f32 %v8606_v38, %v3185_v36 }
0x1cd6   :  { %v9439_v39 = vpop.f32.mrf.mxu1 }
0x1cd8   :  { %v3188_v40 = vpop.f32.mrf.mxu1  ;;  %9444 = vmatpush3.bf16.msra.mxu0 %v10133_v37 }
0x1cd9   :  { %v3189_v45 = vadd.f32 %v8606_v38, %v3188_v40  ;;  %9457 = vmatprep.subr.bf16.mxu0 %v10511_v0 }
0x1cda   :  { %v9440_v47 = vpop.f32.mrf.mxu1 }
0x1cdb   :  { %v3310_v48 = vpack.c.bf16 %v3189_v45, %v3186_v41  ;;  %9446 = vmatmul.mubr.msk.bf16.vlgmr.msra.gmra.mxu0 %vm458_vm1, %v11079_v46  ;;  %v2779_v46 = vadd.f32 %v11233_v63, %v11265_v19  ;;  %v8383_v47 = vld [vmem:[%s12686_s29 + $0x1c] sm:$0xf] }
0x1cdc   :  { %v3303_v50 = vpop.f32.mrf.mxu1  ;;  %9459 = vmatprep.mubr.msk.bf16.mxu0 %vm10512_vm0, %v10511_v0 }
0x1cdd   :  { %v3304_v55 = vadd.f32 %v8614_v51, %v3303_v50 }
0x1cde   :  { %v9455_v52 = vpop.f32.mrf.mxu1 }
0x1ce0   :  { %v3306_v54 = vpop.f32.mrf.mxu1 }
0x1ce1   :  { %v3307_v56 = vadd.f32 %v8614_v51, %v3306_v54 }
0x1ce2   :  { %v9456_v57 = vpop.f32.mrf.mxu1 }
0x1ce3   :  { %v3386_v59 = vpack.c.bf16 %v3307_v56, %v3304_v55  ;;  %v8621_v56 = vld [vmem:[%s12687_s12 + $0x1] ss:$0 sm:$0xff] }
0x1ce5   :  { %9464 = vmatpush3.bf16.msra.mxu1 %v3386_v59 }
0x1ce6   :  { %9475 = vmatprep.subr.bf16.mxu1 %v10511_v0 }
0x1d93   :  { %v3124_v17 = vpop.f32.mrf.mxu0 }
0x1d94   :  { %v11344_v32 = vadd.f32 %v3124_v17, %v2779_v46 }
0x1d95   :  { %v9431_v49 = vpop.f32.mrf.mxu0 }
0x1d97   :  { %v3127_v20 = vpop.f32.mrf.mxu0 }
0x1d98   :  { %v11348_v53 = vadd.f32 %v3127_v20, %v2782_v61 }
0x1d99   :  { %v9432_v35 = vpop.f32.mrf.mxu0 }
0x1d9b   :  { %v3244_v62 = vpop.f32.mrf.mxu0 }
0x1d9c   :  { %v3245_v6 = vadd.f32 %v8610_v1, %v3244_v62  ;;  %v3733_v62 = vld [vmem:[%s12638_s1] sm:$0xff] }
0x1d9d   :  { %v9447_v2 = vpop.f32.mrf.mxu0 }
0x1d9f   :  { %v3247_v4 = vpop.f32.mrf.mxu0 }
0x1da0   :  { %v3248_v63 = vadd.f32 %v8610_v1, %v3247_v4  ;;  %v3737_v4 = vsel %vm458_vm1, %v3733_v62, 0.0 }
0x1da1   :  { %v9448_v19 = vpop.f32.mrf.mxu0 }
0x1da2   :  { %v3311_v8 = vpack.c.bf16 %v3248_v63, %v3245_v6  ;;  %v3734_v6 = vld [vmem:[%s12638_s1 + $0x8] sm:$0xff] }
0x1da4   :  { %v3316_v9 = vsel %vm623_vm2, %v3311_v8, 0 }
0x1da5   :  { %9458 = vmatpush3.bf16.xpose.msra.mxu0 %v3316_v9 }
0x1da6   :  { %9469 = vmatprep.subr.bf16.mxu0 %v10511_v0 }
0x1dac   :  { %9460 = vmatmul.mubr.msk.bf16.vlgmr.msra.gmra.mxu0 %vm623_vm2, %v3310_v48  ;;  %v11371_v48 = vsel %vm1047_vm4, %v8383_v47, 0 }
0x1dad   :  { %9471 = vmatprep.mubr.msk.bf16.mxu0 %vm10512_vm0, %v10511_v0  ;;  %9470 = vmatpush3.bf16.msra.mxu0 %v11371_v48 }
0x1dae   :  { %9483 = vmatprep.subr.bf16.mxu0 %v10511_v0 }
0x1e6c   :  { %v3352_v3 = vpop.f32.mrf.mxu0 }
0x1e6d   :  { %v3359_v22 = vmul.f32 0.35355338, %v3352_v3 }
0x1e6e   :  { %v9461_v11 = vpop.f32.mrf.mxu0 }
0x1e6f   :  { %v3361_v7 = vadd.f32 %v11140_v15, %v3359_v22 }
0x1e70   :  { %v3355_v12 = vpop.f32.mrf.mxu0 }
0x1e71   :  { %v3360_v13 = vmul.f32 0.35355338, %v3355_v12  ;;  %v3363_v14 = vsel %vm675_vm3, %v3361_v7, -inf }
0x1e72   :  { %3364 = vmax.xlane.f32.xlu0 %v3363_v14  ;;  %v9462_v16 = vpop.f32.mrf.mxu0 }
0x1e73   :  { %v3362_v28 = vadd.f32 %v11147_v33, %v3360_v13 }
0x1e75   :  { %v3366_v18 = vsel %vm675_vm3, %v3362_v28, -inf }
0x1e76   :  { %3367 = vmax.xlane.f32.xlu1 %v3366_v18 }
0x1efb   :  { %v3365_v21 = vpop.xlane.xlu0 %3364 }
0x1efc   :  { %v3369_v23 = vsub.f32 %v3361_v7, %v3365_v21 }
0x1efe   :  { %v3371_v26 = vmul.f32 1.442695, %v3369_v23 }
0x1eff   :  { %v3368_v27 = vpop.xlane.xlu1 %3367 }
0x1f00   :  { %10242 = vpow2.f32 %v3371_v26  ;;  %v3370_v29 = vsub.f32 %v3362_v28, %v3368_v27 }
0x1f02   :  { %v3373_v30 = vmul.f32 1.442695, %v3370_v29 }
0x1f04   :  { %10244 = vpow2.f32 %v3373_v30  ;;  %v10134_v30 = vld [vmem:[%s12688_s14 + $0x18] sm:$0xff]  }
0x1f0d   :  { %v10243_v15 = vpop.eup %10242 }
0x1f0e   :  { %v3375_v31 = vsel %vm675_vm3, %v10243_v15, 0.0 }
0x1f0f   :  { %3376 = vadd.xlane.f32.xlu0 %v3375_v31 }
0x1f11   :  { %v10245_v34 = vpop.eup %10244 }
0x1f12   :  { %v3378_v36 = vsel %vm675_vm3, %v10245_v34, 0.0 }
0x1f13   :  { %3379 = vadd.xlane.f32.xlu1 %v3378_v36 }
0x1f98   :  { %v3377_v33 = vpop.xlane.xlu0 %3376 }
0x1f99   :  { %10246 = vrcp.f32 %v3377_v33 }
0x1f9c   :  { %v3380_v37 = vpop.xlane.xlu1 %3379 }
0x1f9d   :  { %10248 = vrcp.f32 %v3380_v37 }
0x1fa6   :  { %v10247_v38 = vpop.eup %10246 }
0x1fa7   :  { %v3383_v40 = vmul.f32 %v10247_v38, %v10243_v15  ;;  %v10135_v15 = vld [vmem:[%s12688_s14 + $0x10] sm:$0xff]  }
0x1faa   :  { %v10249_v39 = vpop.eup %10248 }
0x1fab   :  { %v3384_v41 = vmul.f32 %v10249_v39, %v10245_v34 }
0x1fad   :  { %v3385_v45 = vpack.c.bf16 %v3384_v41, %v3383_v40 }
0x1faf   :  { %9466 = vmatmul.mubr.msk.bf16.vlgmr.msra.gmra.mxu1 %vm675_vm3, %v3385_v45 }
0x1fb0   :  { %9479 = vmatprep.mubr.msk.bf16.mxu1 %vm10512_vm0, %v10511_v0  ;;  %9476 = vmatpush3.bf16.msra.mxu1 %v10134_v30 }
0x1fb1   :  { %9477 = vmatprep.subr.bf16.mxu1 %v10511_v0 }
0x1fb4   :  { %9478 = vmatpush3.bf16.msra.mxu1 %v10135_v15 }
0x1fb5   :  { %9495 = vmatprep.subr.bf16.mxu1 %v10511_v0 }
0x206f   :  { %v3424_v50 = vpop.f32.mrf.mxu1 }
0x2071   :  { %v9467_v51 = vpop.f32.mrf.mxu1 }
0x2073   :  { %v3427_v52 = vpop.f32.mrf.mxu1 }
0x2074   :  { %v3431_v54 = vpack.c.bf16 %v3427_v52, %v3424_v50 }
0x2075   :  { %v9468_v55 = vpop.f32.mrf.mxu1 }
0x2076   :  { %9472 = vmatmul.mubr.msk.bf16.vlgmr.msra.gmra.mxu0 %vm623_vm2, %v3431_v54  ;;  %v8622_v54 = vld [vmem:[%s12689_s15 + $0x1] ss:$0 sm:$0xff] }
0x2077   :  { %9491 = vmatprep.mubr.msk.bf16.mxu0 %vm10512_vm0, %v10511_v0 }
0x2136   :  { %v3472_v57 = vpop.f32.mrf.mxu0 }
0x2137   :  { %v3479_v59 = vadd.f32 %v3472_v57, %v11344_v32 }
0x2138   :  { %v9473_v46 = vpop.f32.mrf.mxu0 }
0x2139   :  { %v3487_v17 = vadd.f32 %v8621_v56, %v3479_v59  ;;  %v8623_v46 = vld [vmem:[%s12632_s16 + $0x1] ss:$0 sm:$0xff] }
0x213a   :  { %v3475_v49 = vpop.f32.mrf.mxu0 }
0x213b   :  { %v3480_v61 = vadd.f32 %v3475_v49, %v11348_v53  ;;  %v3489_v20 = vadd.f32 %v3487_v17, %v11070_v43  ;;  %v3740_v43 = vsel %vm458_vm1, %v3734_v6, 0.0 }
0x213c   :  { %v9474_v35 = vpop.f32.mrf.mxu0 }
0x213d   :  { %v3488_v1 = vadd.f32 %v8621_v56, %v3480_v61  ;;  %v3491_v2 = vsel %vm458_vm1, %v3489_v20, 0.0 }
0x213e   :  { %3492 = vadd.xlane.f32.xlu0 %v3491_v2 }
0x213f   :  { %v3490_v32 = vadd.f32 %v3488_v1, %v11072_v44  ;;  %v8636_v1 = vld [vmem:[%s12639_s5] ss:$0 sm:$0xff] }
0x2141   :  { %v3494_v53 = vsel %vm458_vm1, %v3490_v32, 0.0 }
0x2142   :  { %3738 = vadd.xlane.f32.xlu0 %v3737_v4  ;;  %3495 = vadd.xlane.f32.xlu1 %v3494_v53  ;;  %v10410_v53 = vld [vmem:[%s12679_s11 + $0x8] sm:$0xff]  }
0x2146   :  { %3741 = vadd.xlane.f32.xlu1 %v3740_v43 }
0x21c7   :  { %v3493_v63 = vpop.xlane.xlu0 %3492 }
0x21c8   :  { %v3497_v19 = vmul.f32 0.03125, %v3493_v63 }
0x21ca   :  { %v3499_v8 = vsub.f32 %v3489_v20, %v3497_v19  ;;  %v10411_v19 = vld [vmem:[%s12679_s11] sm:$0xff]  }
0x21cb   :  { %v3739_v9 = vpop.xlane.xlu0 %3738  ;;  %v3496_v3 = vpop.xlane.xlu1 %3495 }
0x21cc   :  { %v3743_v22 = vmul.f32 0.03125, %v3739_v9  ;;  %v3498_v11 = vmul.f32 0.03125, %v3496_v3  ;;  %v3501_v7 = vmul.f32 %v3499_v8, %v3499_v8  ;;  %v10412_v9 = vld [vmem:[%s12678_s13 + $0x8] sm:$0xff]   ;;  %v10413_v3 = vld [vmem:[%s12678_s13] sm:$0xff]  }
0x21ce   :  { %v3745_v44 = vsub.f32 %v3733_v62, %v3743_v22  ;;  %v3500_v12 = vsub.f32 %v3490_v32, %v3498_v11  ;;  %v3503_v13 = vsel %vm458_vm1, %v3501_v7, 0.0  ;;  %v10136_v22 = vld [vmem:[%s12633_s19 + $0x38] sm:$0xff]   ;;  %v10137_v11 = vld [vmem:[%s12633_s19 + $0x30] sm:$0xff]   ;;  %v10138_v7 = vld [vmem:[%s12633_s19 + $0x28] sm:$0xff]  }
0x21cf   :  { %3504 = vadd.xlane.f32.xlu0 %v3503_v13  ;;  %v3742_v14 = vpop.xlane.xlu1 %3741  ;;  %9484 = vmatpush3.bf16.msra.mxu0 %v10136_v22  ;;  %v10419_v22 = vld [vmem:[%s12683_s7] sm:$0xff]  }
0x21d0   :  { %v3744_v16 = vmul.f32 0.03125, %v3742_v14  ;;  %v3747_v28 = vmul.f32 %v3745_v44, %v3745_v44  ;;  %v3502_v18 = vmul.f32 %v3500_v12, %v3500_v12  ;;  %9485 = vmatprep.subr.bf16.mxu0 %v10511_v0 }
0x21d2   :  { %v3746_v21 = vsub.f32 %v3734_v6, %v3744_v16  ;;  %v3749_v23 = vsel %vm458_vm1, %v3747_v28, 0.0  ;;  %v3506_v26 = vsel %vm458_vm1, %v3502_v18, 0.0  ;;  %v8637_v6 = vld [vmem:[%s12640_s6] ss:$0 sm:$0xff] }
0x21d3   :  { %3750 = vadd.xlane.f32.xlu0 %v3749_v23  ;;  %3507 = vadd.xlane.f32.xlu1 %v3506_v26 }
0x21d4   :  { %v3748_v27 = vmul.f32 %v3746_v21, %v3746_v21  ;;  %9486 = vmatpush3.bf16.msra.mxu0 %v10137_v11  ;;  %v10420_v11 = vld [vmem:[%s12683_s7 + $0x18] sm:$0xff]  }
0x21d5   :  { %9487 = vmatprep.subr.bf16.mxu0 %v10511_v0 }
0x21d6   :  { %v3752_v29 = vsel %vm458_vm1, %v3748_v27, 0.0 }
0x21d7   :  { %3753 = vadd.xlane.f32.xlu1 %v3752_v29 }
0x21d8   :  { %9488 = vmatpush3.bf16.msra.mxu0 %v10138_v7  ;;  %v10421_v7 = vld [vmem:[%s12683_s7 + $0x10] sm:$0xff]  }
0x21d9   :  { %9489 = vmatprep.subr.bf16.mxu0 %v10511_v0 }
0x2258   :  { %v3505_v31 = vpop.xlane.xlu0 %3504 }
0x2259   :  { %v3509_v34 = vmul.f32 0.03125, %v3505_v31 }
0x225b   :  { %v3511_v36 = vadd.f32 1e-12, %v3509_v34 }
0x225c   :  { %v3751_v33 = vpop.xlane.xlu0 %3750  ;;  %v3508_v37 = vpop.xlane.xlu1 %3507 }
0x225d   :  { %10250 = vrsqrt.f32 %v3511_v36  ;;  %v3755_v38 = vmul.f32 0.03125, %v3751_v33  ;;  %v3510_v39 = vmul.f32 0.03125, %v3508_v37 }
0x225f   :  { %v3512_v40 = vadd.f32 1e-12, %v3510_v39  ;;  %v3757_v41 = vadd.f32 1e-12, %v3755_v38 }
0x2260   :  { %v3754_v45 = vpop.xlane.xlu1 %3753 }
0x2261   :  { %v3756_v47 = vmul.f32 0.03125, %v3754_v45  ;;  %10252 = vrsqrt.f32 %v3512_v40 }
0x2262   :  { %10254 = vrsqrt.f32 %v3757_v41 }
0x2263   :  { %v3758_v50 = vadd.f32 1e-12, %v3756_v47 }
0x2265   :  { %10256 = vrsqrt.f32 %v3758_v50  ;;  %v10414_v50 = vld [vmem:[%s12681_s30] ss:$0 sm:$0xff] }
0x226a   :  { %v10251_v51 = vpop.eup %10250 }
0x226b   :  { %v3515_v52 = vmul.f32 %v10251_v51, %v3499_v8 }
0x226d   :  { %v3523_v57 = vmul.f32 %v8622_v54, %v3515_v52 }
0x226e   :  { %v10253_v55 = vpop.eup %10252 }
0x226f   :  { %v3516_v56 = vmul.f32 %v10253_v55, %v3500_v12  ;;  %v10255_v59 = vpop.eup %10254  ;;  %v11413_v35 = vadd.f32 %v8623_v46, %v3523_v57  ;;  %v8624_v12 = vld [vmem:[%s12634_s18 + $0x1] ss:$0 sm:$0xff] }
0x2270   :  { %v3761_v20 = vmul.f32 %v10255_v59, %v3745_v44  ;;  %v10139_v44 = vld [vmem:[%s12633_s19 + $0x20] sm:$0xff]  }
0x2271   :  { %v3524_v49 = vmul.f32 %v8622_v54, %v3516_v56  ;;  %9490 = vmatpush3.bf16.msra.mxu0 %v10139_v44  ;;  %v10415_v59 = vld [vmem:[%s12682_s2] ss:$0 sm:$0xff] }
0x2272   :  { %v10257_v17 = vpop.eup %10256  ;;  %v3769_v32 = vmul.f32 %v8636_v1, %v3761_v20  ;;  %9511 = vmatprep.subr.bf16.mxu0 %v10511_v0 }
0x2273   :  { %v3762_v61 = vmul.f32 %v10257_v17, %v3746_v21  ;;  %v11415_v62 = vadd.f32 %v8623_v46, %v3524_v49 }
0x2274   :  { %v11434_v63 = vadd.f32 %v8637_v6, %v3769_v32 }
0x2275   :  { %v3770_v2 = vmul.f32 %v8636_v1, %v3762_v61  ;;  %v3533_v4 = vpack.c.bf16 %v11415_v62, %v11413_v35 }
0x2277   :  { %9480 = vmatmul.mubr.msk.bf16.vlgmr.msra.gmra.mxu1 %vm458_vm1, %v3533_v4  ;;  %v11431_v43 = vadd.f32 %v8637_v6, %v3770_v2 }
0x2278   :  { %9496 = vmatpush3.bf16.msra.mxu1 %v10410_v53  ;;  %9499 = vmatprep.mubr.msk.bf16.mxu1 %vm10512_vm0, %v10511_v0  ;;  %v10416_v53 = vld [vmem:[%s12679_s11 + $0x18] sm:$0xff]  }
0x2279   :  { %9497 = vmatprep.subr.bf16.mxu1 %v10511_v0  ;;  %v11441_v8 = vpack.c.bf16 %v11431_v43, %v11434_v63 }
0x227c   :  { %9498 = vmatpush3.bf16.msra.mxu1 %v10411_v19 }
0x227d   :  { %9503 = vmatprep.subr.bf16.mxu1 %v10511_v0 }
0x227f   :  { %9500 = vmatmul.mubr.msk.bf16.vlgmr.msra.gmra.mxu1 %vm458_vm1, %v11441_v8 }
0x2280   :  { %9504 = vmatpush3.bf16.msra.mxu1 %v10412_v9  ;;  %9507 = vmatprep.mubr.msk.bf16.mxu1 %vm10512_vm0, %v10511_v0  ;;  %v10417_v9 = vld [vmem:[%s12683_s7 + $0x8] sm:$0xff]  }
0x2281   :  { %9505 = vmatprep.subr.bf16.mxu1 %v10511_v0 }
0x2284   :  { %9506 = vmatpush3.bf16.msra.mxu1 %v10413_v3  ;;  %v10418_v3 = vld [vmem:[%s12679_s11 + $0x10] sm:$0xff]  }
0x2285   :  { %9519 = vmatprep.subr.bf16.mxu1 %v10511_v0 }
0x2287   :  { %9508 = vmatmul.mubr.msk.bf16.vlgmr.msra.gmra.mxu1 %vm458_vm1, %v11441_v8 }
0x2288   :  { %9521 = vmatprep.mubr.msk.bf16.mxu1 %vm10512_vm0, %v10511_v0 }
0x2337   :  { %v3589_v13 = vpop.f32.mrf.mxu1 }
0x2338   :  { %v3590_v14 = vadd.f32 %v8624_v12, %v3589_v13 }
0x2339   :  { %v9481_v16 = vpop.f32.mrf.mxu1 }
0x233a   :  { %v3598_v28 = vmul.f32 0.044715, %v3590_v14  ;;  %v3596_v20 = vmul.f32 0.5, %v3590_v14 }
0x233b   :  { %v3592_v18 = vpop.f32.mrf.mxu1 }
0x233c   :  { %v3600_v21 = vmul.f32 %v3598_v28, %v3590_v14  ;;  %v3593_v23 = vadd.f32 %v8624_v12, %v3592_v18  ;;  %v11532_v12 = vld [vmem:[%s12641_s3] sm:$0xff] }
0x233d   :  { %v9482_v26 = vpop.f32.mrf.mxu1 }
0x233e   :  { %v3602_v27 = vmul.f32 %v3600_v21, %v3590_v14  ;;  %v3599_v29 = vmul.f32 0.044715, %v3593_v23  ;;  %v3597_v1 = vmul.f32 0.5, %v3593_v23  ;;  %v11540_v21 = vld [vmem:[%s12641_s3 + $0x8] sm:$0xff] }
0x233f   :  { %v3817_v30 = vpop.f32.mrf.mxu1 }
0x2340   :  { %v3604_v15 = vadd.f32 %v3602_v27, %v3590_v14  ;;  %v3601_v31 = vmul.f32 %v3599_v29, %v3593_v23  ;;  %v3818_v17 = vadd.f32 %v10415_v59, %v3817_v30 }
0x2341   :  { %v9501_v34 = vpop.f32.mrf.mxu1 }
0x2342   :  { %v3606_v36 = vmul.f32 0.7978846, %v3604_v15  ;;  %v3603_v33 = vmul.f32 %v3601_v31, %v3593_v23 }
0x2343   :  { %v3820_v37 = vpop.f32.mrf.mxu1 }
0x2344   :  { %10258 = vtanh.f32 %v3606_v36  ;;  %v3605_v38 = vadd.f32 %v3603_v33, %v3593_v23  ;;  %v3821_v46 = vadd.f32 %v10415_v59, %v3820_v37 }
0x2345   :  { %v9502_v39 = vpop.f32.mrf.mxu1 }
0x2346   :  { %v3607_v40 = vmul.f32 0.7978846, %v3605_v38  ;;  %v3906_v2 = vpack.c.bf16 %v3821_v46, %v3818_v17  ;;  %v10422_v39 = vld [vmem:[%s12682_s2 + $0x1] ss:$0 sm:$0xff] }
0x2347   :  { %v3858_v41 = vpop.f32.mrf.mxu1 }
0x2348   :  { %10260 = vtanh.f32 %v3607_v40  ;;  %v3859_v51 = vadd.f32 %v10414_v50, %v3858_v41 }
0x2349   :  { %v9509_v45 = vpop.f32.mrf.mxu1 }
0x234b   :  { %v3861_v47 = vpop.f32.mrf.mxu1 }
0x234c   :  { %v3862_v52 = vadd.f32 %v10414_v50, %v3861_v47 }
0x234d   :  { %v9510_v54 = vpop.f32.mrf.mxu1 }
0x234e   :  { %v3907_v55 = vpack.c.bf16 %v3862_v52, %v3859_v51  ;;  %v10423_v54 = vld [vmem:[%s12685_s9] ss:$0 sm:$0xff] }
0x2350   :  { %v3912_v56 = vsel %vm623_vm2, %v3907_v55, 0 }
0x2351   :  { %v10259_v57 = vpop.eup %10258  ;;  %9520 = vmatpush3.bf16.xpose.msra.mxu1 %v3912_v56 }
0x2352   :  { %9531 = vmatprep.subr.bf16.mxu1 %v10511_v0  ;;  %v3610_v49 = vadd.f32 1.0, %v10259_v57 }
0x2354   :  { %v3612_v32 = vmul.f32 %v3610_v49, %v3596_v20  ;;  %v10424_v49 = vld [vmem:[%s12685_s9 + $0x1] ss:$0 sm:$0xff] }
0x2355   :  { %v10261_v61 = vpop.eup %10260 }
0x2356   :  { %v3611_v4 = vadd.f32 1.0, %v10261_v61 }
0x2358   :  { %9522 = vmatmul.mubr.msk.bf16.vlgmr.msra.gmra.mxu1 %vm623_vm2, %v3906_v2  ;;  %v3613_v6 = vmul.f32 %v3611_v4, %v3597_v1 }
0x2359   :  { %9532 = vmatpush3.bf16.msra.mxu1 %v10416_v53  ;;  %9535 = vmatprep.mubr.msk.bf16.mxu1 %vm10512_vm0, %v10511_v0 }
0x235a   :  { %v3614_v19 = vpack.c.bf16 %v3613_v6, %v3612_v32  ;;  %9533 = vmatprep.subr.bf16.mxu1 %v10511_v0 }
0x235c   :  { %9492 = vmatmul.mubr.msk.bf16.vlgmr.msra.gmra.mxu0 %vm2000_vm5, %v3614_v19 }
0x235d   :  { %9512 = vmatpush3.bf16.msra.mxu0 %v10417_v9  ;;  %9534 = vmatpush3.bf16.msra.mxu1 %v10418_v3 }
0x235e   :  { %9513 = vmatprep.subr.bf16.mxu0 %v10511_v0  ;;  %9547 = vmatprep.subr.bf16.mxu1 %v10511_v0 }
0x235f   :  { %9515 = vmatprep.mubr.msk.bf16.mxu0 %vm10512_vm0, %v10511_v0 }
0x2360   :  { %9536 = vmatmul.mubr.msk.bf16.vlgmr.msra.gmra.mxu1 %vm458_vm1, %v11441_v8 }
0x2361   :  { %9514 = vmatpush3.bf16.msra.mxu0 %v10419_v22  ;;  %9548 = vmatpush3.bf16.msra.mxu1 %v10420_v11 }
0x2362   :  { %9549 = vmatprep.subr.bf16.mxu1 %v10511_v0  ;;  %9551 = vmatprep.mubr.msk.bf16.mxu1 %vm10512_vm0, %v10511_v0 }
0x2363   :  { %9525 = vmatprep.subr.bf16.mxu0 %v10511_v0 }
0x2364   :  { %9516 = vmatmul.mubr.msk.bf16.vlgmr.msra.gmra.mxu0 %vm458_vm1, %v11441_v8 }
0x2365   :  { %9550 = vmatpush3.bf16.msra.mxu1 %v10421_v7  ;;  %9527 = vmatprep.mubr.msk.bf16.mxu0 %vm10512_vm0, %v10511_v0 }
0x2366   :  { %9561 = vmatprep.subr.bf16.mxu1 %v10511_v0 }
0x2368   :  { %9552 = vmatmul.mubr.msk.bf16.vlgmr.msra.gmra.mxu1 %vm458_vm1, %v11441_v8 }
0x2369   :  { %9563 = vmatprep.mubr.msk.bf16.mxu1 %vm10512_vm0, %v10511_v0 }
0x2418   :  { %v3948_v44 = vpop.f32.mrf.mxu1 }
0x2419   :  { %v3955_v13 = vmul.f32 0.35355338, %v3948_v44 }
0x241a   :  { %v9523_v14 = vpop.f32.mrf.mxu1 }
0x241b   :  { %v3957_v16 = vadd.f32 %v3955_v13, %v11532_v12 }
0x241c   :  { %v11535_v28 = vpop.f32.mrf.mxu0  ;;  %v3951_v18 = vpop.f32.mrf.mxu1 }
0x241d   :  { %v3956_v23 = vmul.f32 0.35355338, %v3951_v18  ;;  %v3959_v26 = vsel %vm675_vm3, %v3957_v16, -inf }
0x241e   :  { %3960 = vmax.xlane.f32.xlu0 %v3959_v26  ;;  %v9493_v27 = vpop.f32.mrf.mxu0  ;;  %v9524_v29 = vpop.f32.mrf.mxu1 }
0x241f   :  { %v3958_v30 = vadd.f32 %v3956_v23, %v11540_v21  ;;  %v10425_v27 = vld [vmem:[%s12678_s13 + $0x18] sm:$0xff]   ;;  %v10426_v29 = vld [vmem:[%s12678_s13 + $0x10] sm:$0xff]  }
0x2420   :  { %v11544_v15 = vpop.f32.mrf.mxu0  ;;  %v4062_v31 = vpop.f32.mrf.mxu1 }
0x2421   :  { %v3962_v34 = vsel %vm675_vm3, %v3958_v30, -inf  ;;  %v11550_v40 = vadd.f32 %v10422_v39, %v4062_v31 }
0x2422   :  { %3963 = vmax.xlane.f32.xlu1 %v3962_v34  ;;  %v9494_v36 = vpop.f32.mrf.mxu0  ;;  %v9537_v33 = vpop.f32.mrf.mxu1 }
0x2424   :  { %v3899_v37 = vpop.f32.mrf.mxu0  ;;  %v4065_v38 = vpop.f32.mrf.mxu1 }
0x2425   :  { %v11552_v41 = vadd.f32 %v10422_v39, %v4065_v38  ;;  %v3900_v55 = vadd.f32 %v10423_v54, %v3899_v37 }
0x2426   :  { %v9517_v45 = vpop.f32.mrf.mxu0  ;;  %v9538_v47 = vpop.f32.mrf.mxu1 }
0x2427   :  { %v4151_v50 = vpack.c.bf16 %v11552_v41, %v11550_v40  ;;  %v10427_v45 = vld [vmem:[%s12681_s30 + $0x1] ss:$0 sm:$0xff] }
0x2428   :  { %v3902_v51 = vpop.f32.mrf.mxu0  ;;  %v4144_v52 = vpop.f32.mrf.mxu1 }
0x2429   :  { %v3903_v56 = vadd.f32 %v10423_v54, %v3902_v51  ;;  %v4145_v61 = vadd.f32 %v10424_v49, %v4144_v52 }
0x242a   :  { %v9518_v57 = vpop.f32.mrf.mxu0  ;;  %v9553_v59 = vpop.f32.mrf.mxu1 }
0x242b   :  { %v3982_v46 = vpack.c.bf16 %v3903_v56, %v3900_v55 }
0x242c   :  { %v4147_v17 = vpop.f32.mrf.mxu1 }
0x242d   :  { %v4148_v20 = vadd.f32 %v10424_v49, %v4147_v17  ;;  %9526 = vmatpush3.bf16.msra.mxu0 %v3982_v46 }
0x242e   :  { %v9554_v1 = vpop.f32.mrf.mxu1  ;;  %9539 = vmatprep.subr.bf16.mxu0 %v10511_v0 }
0x242f   :  { %v4227_v2 = vpack.c.bf16 %v4148_v20, %v4145_v61 }
0x2431   :  { %9562 = vmatpush3.bf16.msra.mxu1 %v4227_v2 }
0x2432   :  { %9573 = vmatprep.subr.bf16.mxu1 %v10511_v0 }
0x24a7   :  { %v3961_v4 = vpop.xlane.xlu0 %3960 }
0x24a8   :  { %v3965_v32 = vsub.f32 %v3957_v16, %v3961_v4 }
0x24aa   :  { %v3967_v6 = vmul.f32 1.442695, %v3965_v32 }
0x24ab   :  { %v3964_v53 = vpop.xlane.xlu1 %3963 }
0x24ac   :  { %10262 = vpow2.f32 %v3967_v6  ;;  %v3966_v19 = vsub.f32 %v3958_v30, %v3964_v53 }
0x24ae   :  { %v3969_v9 = vmul.f32 1.442695, %v3966_v19 }
0x24b0   :  { %10264 = vpow2.f32 %v3969_v9 }
0x24b9   :  { %v10263_v3 = vpop.eup %10262 }
0x24ba   :  { %v3971_v22 = vsel %vm675_vm3, %v10263_v3, 0.0 }
0x24bb   :  { %3972 = vadd.xlane.f32.xlu0 %v3971_v22 }
0x24bd   :  { %v10265_v11 = vpop.eup %10264 }
0x24be   :  { %v3974_v7 = vsel %vm675_vm3, %v10265_v11, 0.0 }
0x24bf   :  { %3975 = vadd.xlane.f32.xlu1 %v3974_v7 }
0x2544   :  { %v3973_v44 = vpop.xlane.xlu0 %3972 }
0x2545   :  { %10266 = vrcp.f32 %v3973_v44 }
0x2548   :  { %v3976_v13 = vpop.xlane.xlu1 %3975 }
0x2549   :  { %10268 = vrcp.f32 %v3976_v13 }
0x2552   :  { %v10267_v14 = vpop.eup %10266 }
0x2553   :  { %v3979_v18 = vmul.f32 %v10267_v14, %v10263_v3 }
0x2556   :  { %v10269_v16 = vpop.eup %10268 }
0x2557   :  { %v3980_v23 = vmul.f32 %v10269_v16, %v10265_v11  ;;  %v10428_v16 = vld [vmem:[%s12678_s13 + $0x28] sm:$0xff]  }
0x2559   :  { %v3981_v26 = vpack.c.bf16 %v3980_v23, %v3979_v18 }
0x255b   :  { %9528 = vmatmul.mubr.msk.bf16.vlgmr.msra.gmra.mxu0 %vm675_vm3, %v3981_v26 }
0x255c   :  { %9540 = vmatpush3.bf16.msra.mxu0 %v10425_v27  ;;  %9543 = vmatprep.mubr.msk.bf16.mxu0 %vm10512_vm0, %v10511_v0 }
0x255d   :  { %9541 = vmatprep.subr.bf16.mxu0 %v10511_v0 }
0x2560   :  { %9542 = vmatpush3.bf16.msra.mxu0 %v10426_v29 }
0x2561   :  { %9555 = vmatprep.subr.bf16.mxu0 %v10511_v0 }
0x2563   :  { %9544 = vmatmul.mubr.msk.bf16.vlgmr.msra.gmra.mxu0 %vm458_vm1, %v11441_v8 }
0x2564   :  { %9557 = vmatprep.mubr.msk.bf16.mxu0 %vm10512_vm0, %v10511_v0 }
0x261b   :  { %v4020_v30 = vpop.f32.mrf.mxu0 }
0x261d   :  { %v9529_v31 = vpop.f32.mrf.mxu0 }
0x261e   :  { %v10430_v31 = vld [vmem:[%s12679_s11 + $0x28] sm:$0xff]  }
0x261f   :  { %v4023_v34 = vpop.f32.mrf.mxu0 }
0x2620   :  { %v4027_v36 = vpack.c.bf16 %v4023_v34, %v4020_v30 }
0x2621   :  { %v9530_v33 = vpop.f32.mrf.mxu0 }
0x2622   :  { %v10431_v33 = vld [vmem:[%s12679_s11 + $0x20] sm:$0xff]  }
0x2623   :  { %v4103_v37 = vpop.f32.mrf.mxu0 }
0x2624   :  { %v4104_v47 = vadd.f32 %v10427_v45, %v4103_v37 }
0x2625   :  { %v9545_v38 = vpop.f32.mrf.mxu0 }
0x2627   :  { %v4106_v39 = vpop.f32.mrf.mxu0 }
0x2628   :  { %v4107_v51 = vadd.f32 %v10427_v45, %v4106_v39  ;;  %v10432_v39 = vld [vmem:[%s12683_s7 + $0x28] sm:$0xff]  }
0x2629   :  { %v9546_v52 = vpop.f32.mrf.mxu0 }
0x262a   :  { %v4152_v54 = vpack.c.bf16 %v4107_v51, %v4104_v47  ;;  %v10433_v51 = vld [vmem:[%s12683_s7 + $0x20] sm:$0xff]  }
0x262b   :  { %v10434_v52 = vld [vmem:[%s12681_s30 + $0x2] ss:$0 sm:$0xff] }
0x262c   :  { %v4157_v55 = vsel %vm623_vm2, %v4152_v54, 0 }
0x262d   :  { %9556 = vmatpush3.bf16.xpose.msra.mxu0 %v4157_v55 }
0x262e   :  { %9567 = vmatprep.subr.bf16.mxu0 %v10511_v0 }
0x2634   :  { %9558 = vmatmul.mubr.msk.bf16.vlgmr.msra.gmra.mxu0 %vm623_vm2, %v4151_v50 }
0x2635   :  { %9568 = vmatpush3.bf16.msra.mxu0 %v10834_v10  ;;  %9569 = vmatprep.mubr.msk.bf16.mxu0 %vm10512_vm0, %v10511_v0 }
0x2636   :  { %9579 = vmatprep.subr.bf16.mxu0 %v10511_v0 }
0x26f4   :  { %v4193_v56 = vpop.f32.mrf.mxu0 }
0x26f5   :  { %v4200_v57 = vmul.f32 0.35355338, %v4193_v56 }
0x26f6   :  { %v9559_v59 = vpop.f32.mrf.mxu0 }
0x26f7   :  { %v4202_v46 = vadd.f32 %v4200_v57, %v11532_v12 }
0x26f8   :  { %v4196_v17 = vpop.f32.mrf.mxu0 }
0x26f9   :  { %v4201_v49 = vmul.f32 0.35355338, %v4196_v17  ;;  %v4204_v61 = vsel %vm675_vm3, %v4202_v46, -inf }
0x26fa   :  { %4205 = vmax.xlane.f32.xlu0 %v4204_v61  ;;  %v9560_v40 = vpop.f32.mrf.mxu0 }
0x26fb   :  { %v4203_v41 = vadd.f32 %v4201_v49, %v11540_v21 }
0x26fd   :  { %v4207_v10 = vsel %vm675_vm3, %v4203_v41, -inf }
0x26fe   :  { %4208 = vmax.xlane.f32.xlu1 %v4207_v10 }
0x2783   :  { %v4206_v50 = vpop.xlane.xlu0 %4205 }
0x2784   :  { %v4210_v20 = vsub.f32 %v4202_v46, %v4206_v50  ;;  %v10435_v50 = vld [vmem:[%s12682_s2 + $0x2] ss:$0 sm:$0xff] }
0x2786   :  { %v4212_v1 = vmul.f32 1.442695, %v4210_v20 }
0x2787   :  { %v4209_v2 = vpop.xlane.xlu1 %4208 }
0x2788   :  { %10270 = vpow2.f32 %v4212_v1  ;;  %v4211_v4 = vsub.f32 %v4203_v41, %v4209_v2 }
0x278a   :  { %v4214_v32 = vmul.f32 1.442695, %v4211_v4 }
0x278c   :  { %10272 = vpow2.f32 %v4214_v32 }
0x2795   :  { %v10271_v6 = vpop.eup %10270 }
0x2796   :  { %v4216_v53 = vsel %vm675_vm3, %v10271_v6, 0.0 }
0x2797   :  { %4217 = vadd.xlane.f32.xlu0 %v4216_v53 }
0x2799   :  { %v10273_v19 = vpop.eup %10272 }
0x279a   :  { %v4219_v9 = vsel %vm675_vm3, %v10273_v19, 0.0 }
0x279b   :  { %4220 = vadd.xlane.f32.xlu1 %v4219_v9 }
0x2820   :  { %v4218_v3 = vpop.xlane.xlu0 %4217 }
0x2821   :  { %10274 = vrcp.f32 %v4218_v3 }
0x2824   :  { %v4221_v22 = vpop.xlane.xlu1 %4220 }
0x2825   :  { %10276 = vrcp.f32 %v4221_v22 }
0x282e   :  { %v10275_v11 = vpop.eup %10274 }
0x282f   :  { %v4224_v44 = vmul.f32 %v10275_v11, %v10271_v6 }
0x2832   :  { %v10277_v7 = vpop.eup %10276 }
0x2833   :  { %v4225_v13 = vmul.f32 %v10277_v7, %v10273_v19  ;;  %v10436_v19 = vld [vmem:[%s12685_s9 + $0x2] ss:$0 sm:$0xff] }
0x2835   :  { %v4226_v14 = vpack.c.bf16 %v4225_v13, %v4224_v44 }
0x2837   :  { %9564 = vmatmul.mubr.msk.bf16.vlgmr.msra.gmra.mxu1 %vm675_vm3, %v4226_v14 }
0x2838   :  { %9574 = vmatpush3.bf16.msra.mxu1 %v10805_v5  ;;  %9575 = vmatprep.mubr.msk.bf16.mxu1 %vm10512_vm0, %v10511_v0  ;;  %v10429_v5 = vld [vmem:[%s12678_s13 + $0x20] sm:$0xff]  }
0x2839   :  { %9587 = vmatprep.subr.bf16.mxu1 %v10511_v0 }
0x283f   :  { %9576 = vmatmul.mubr.msk.bf16.vlgmr.msra.gmra.mxu1 %vm623_vm2, %v4027_v36 }
0x2840   :  { %9588 = vmatpush3.bf16.msra.mxu1 %v10428_v16  ;;  %9591 = vmatprep.mubr.msk.bf16.mxu1 %vm10512_vm0, %v10511_v0 }
0x2841   :  { %9589 = vmatprep.subr.bf16.mxu1 %v10511_v0 }
0x2844   :  { %9590 = vmatpush3.bf16.msra.mxu1 %v10429_v5 }
0x2845   :  { %9603 = vmatprep.subr.bf16.mxu1 %v10511_v0 }
0x2847   :  { %9592 = vmatmul.mubr.msk.bf16.vlgmr.msra.gmra.mxu1 %vm458_vm1, %v11441_v8 }
0x2848   :  { %9605 = vmatprep.mubr.msk.bf16.mxu1 %vm10512_vm0, %v10511_v0 }
0x28f7   :  { %v4265_v18 = vpop.f32.mrf.mxu1 }
0x28f9   :  { %v9565_v23 = vpop.f32.mrf.mxu1 }
0x28fb   :  { %v4268_v26 = vpop.f32.mrf.mxu1 }
0x28fc   :  { %v4272_v27 = vpack.c.bf16 %v4268_v26, %v4265_v18 }
0x28fd   :  { %v9566_v29 = vpop.f32.mrf.mxu1 }
0x28fe   :  { %9570 = vmatmul.mubr.msk.bf16.vlgmr.msra.gmra.mxu0 %vm623_vm2, %v4272_v27 }
0x28ff   :  { %v11621_v30 = vpop.f32.mrf.mxu1  ;;  %9580 = vmatpush3.bf16.msra.mxu0 %v10430_v31  ;;  %9583 = vmatprep.mubr.msk.bf16.mxu0 %vm10512_vm0, %v10511_v0 }
0x2900   :  { %9581 = vmatprep.subr.bf16.mxu0 %v10511_v0 }
0x2901   :  { %v9577_v34 = vpop.f32.mrf.mxu1 }
0x2903   :  { %v11629_v36 = vpop.f32.mrf.mxu1  ;;  %9582 = vmatpush3.bf16.msra.mxu0 %v10431_v33 }
0x2904   :  { %9595 = vmatprep.subr.bf16.mxu0 %v10511_v0 }
0x2905   :  { %v9578_v37 = vpop.f32.mrf.mxu1 }
0x2906   :  { %9584 = vmatmul.mubr.msk.bf16.vlgmr.msra.gmra.mxu0 %vm458_vm1, %v11441_v8 }
0x2907   :  { %v4436_v38 = vpop.f32.mrf.mxu1  ;;  %9596 = vmatpush3.bf16.msra.mxu0 %v10432_v39  ;;  %9599 = vmatprep.mubr.msk.bf16.mxu0 %vm10512_vm0, %v10511_v0 }
0x2908   :  { %9597 = vmatprep.subr.bf16.mxu0 %v10511_v0  ;;  %v4437_v54 = vadd.f32 %v10434_v52, %v4436_v38 }
0x2909   :  { %v9593_v45 = vpop.f32.mrf.mxu1 }
0x290b   :  { %v4439_v47 = vpop.f32.mrf.mxu1  ;;  %9598 = vmatpush3.bf16.msra.mxu0 %v10433_v51 }
0x290c   :  { %v4440_v55 = vadd.f32 %v10434_v52, %v4439_v47  ;;  %9609 = vmatprep.subr.bf16.mxu0 %v10511_v0 }
0x290d   :  { %v9594_v56 = vpop.f32.mrf.mxu1 }
0x290e   :  { %v4485_v57 = vpack.c.bf16 %v4440_v55, %v4437_v54  ;;  %9600 = vmatmul.mubr.msk.bf16.vlgmr.msra.gmra.mxu0 %vm458_vm1, %v11441_v8 }
0x290f   :  { %9611 = vmatprep.mubr.msk.bf16.mxu0 %vm10512_vm0, %v10511_v0 }
0x2910   :  { %v4490_v59 = vsel %vm623_vm2, %v4485_v57, 0 }
0x2911   :  { %9604 = vmatpush3.bf16.xpose.msra.mxu1 %v4490_v59 }
0x2912   :  { %9615 = vmatprep.subr.bf16.mxu1 %v10511_v0 }
0x29be   :  { %v11656_v46 = vpop.f32.mrf.mxu0 }
0x29c0   :  { %v9571_v17 = vpop.f32.mrf.mxu0 }
0x29c1   :  { %v10437_v17 = vld [vmem:[%s12679_s11 + $0x38] sm:$0xff]  }
0x29c2   :  { %v11658_v49 = vpop.f32.mrf.mxu0 }
0x29c4   :  { %v9572_v61 = vpop.f32.mrf.mxu0 }
0x29c5   :  { %v10438_v61 = vld [vmem:[%s12679_s11 + $0x30] sm:$0xff]  }
0x29c6   :  { %v4395_v40 = vpop.f32.mrf.mxu0 }
0x29c7   :  { %v4396_v20 = vadd.f32 %v10435_v50, %v4395_v40  ;;  %v10439_v40 = vld [vmem:[%s12683_s7 + $0x38] sm:$0xff]  }
0x29c8   :  { %v9585_v41 = vpop.f32.mrf.mxu0 }
0x29c9   :  { %v10440_v41 = vld [vmem:[%s12683_s7 + $0x30] sm:$0xff]  }
0x29ca   :  { %v4398_v10 = vpop.f32.mrf.mxu0 }
0x29cb   :  { %v4399_v1 = vadd.f32 %v10435_v50, %v4398_v10 }
0x29cc   :  { %v9586_v2 = vpop.f32.mrf.mxu0 }
0x29cd   :  { %v4484_v4 = vpack.c.bf16 %v4399_v1, %v4396_v20 }
0x29ce   :  { %v4477_v32 = vpop.f32.mrf.mxu0 }
0x29cf   :  { %9606 = vmatmul.mubr.msk.bf16.vlgmr.msra.gmra.mxu1 %vm623_vm2, %v4484_v4  ;;  %v4478_v9 = vadd.f32 %v10436_v19, %v4477_v32  ;;  %v10441_v32 = vld [vmem:[%s12678_s13 + $0x38] sm:$0xff]  }
0x29d0   :  { %v9601_v6 = vpop.f32.mrf.mxu0  ;;  %9616 = vmatpush3.bf16.msra.mxu1 %v10901_v25  ;;  %9617 = vmatprep.mubr.msk.bf16.mxu1 %vm10512_vm0, %v10511_v0 }
0x29d1   :  { %9629 = vmatprep.subr.bf16.mxu1 %v10511_v0 }
0x29d2   :  { %v4480_v53 = vpop.f32.mrf.mxu0 }
0x29d3   :  { %v4481_v3 = vadd.f32 %v10436_v19, %v4480_v53  ;;  %v10442_v19 = vld [vmem:[%s12678_s13 + $0x30] sm:$0xff]  }
0x29d4   :  { %v9602_v22 = vpop.f32.mrf.mxu0 }
0x29d5   :  { %v4560_v11 = vpack.c.bf16 %v4481_v3, %v4478_v9  ;;  %v10443_v9 = vld [vmem:[%s12682_s2 + $0x3] ss:$0 sm:$0xff] }
0x29d7   :  { %9610 = vmatpush3.bf16.msra.mxu0 %v4560_v11 }
0x29d8   :  { %9621 = vmatprep.subr.bf16.mxu0 %v10511_v0 }
0x2a8f   :  { %v4526_v7 = vpop.f32.mrf.mxu1 }
0x2a90   :  { %v4533_v44 = vmul.f32 0.35355338, %v4526_v7 }
0x2a91   :  { %v9607_v25 = vpop.f32.mrf.mxu1 }
0x2a92   :  { %v4535_v13 = vadd.f32 %v4533_v44, %v11532_v12 }
0x2a93   :  { %v4529_v14 = vpop.f32.mrf.mxu1 }
0x2a94   :  { %v4534_v16 = vmul.f32 0.35355338, %v4529_v14  ;;  %v4537_v5 = vsel %vm675_vm3, %v4535_v13, -inf  ;;  %v10444_v14 = vld [vmem:[%s12685_s9 + $0x3] ss:$0 sm:$0xff] }
0x2a95   :  { %4538 = vmax.xlane.f32.xlu0 %v4537_v5  ;;  %v9608_v18 = vpop.f32.mrf.mxu1 }
0x2a96   :  { %v4536_v23 = vadd.f32 %v4534_v16, %v11540_v21 }
0x2a98   :  { %v4540_v26 = vsel %vm675_vm3, %v4536_v23, -inf }
0x2a99   :  { %4541 = vmax.xlane.f32.xlu1 %v4540_v26 }
0x2b1e   :  { %v4539_v27 = vpop.xlane.xlu0 %4538 }
0x2b1f   :  { %v4543_v29 = vsub.f32 %v4535_v13, %v4539_v27 }
0x2b21   :  { %v4545_v31 = vmul.f32 1.442695, %v4543_v29 }
0x2b22   :  { %v4542_v34 = vpop.xlane.xlu1 %4541 }
0x2b23   :  { %10278 = vpow2.f32 %v4545_v31  ;;  %v4544_v33 = vsub.f32 %v4536_v23, %v4542_v34  ;;  %v4358_v31 = vadd.f32 %v11629_v36, %v11658_v49 }
0x2b25   :  { %v4547_v37 = vmul.f32 1.442695, %v4544_v33 }
0x2b27   :  { %10280 = vpow2.f32 %v4547_v37 }
0x2b30   :  { %v10279_v38 = vpop.eup %10278 }
0x2b31   :  { %v4549_v39 = vsel %vm675_vm3, %v10279_v38, 0.0 }
0x2b32   :  { %4550 = vadd.xlane.f32.xlu0 %v4549_v39 }
0x2b34   :  { %v10281_v45 = vpop.eup %10280 }
0x2b35   :  { %v4552_v47 = vsel %vm675_vm3, %v10281_v45, 0.0 }
0x2b36   :  { %4553 = vadd.xlane.f32.xlu1 %v4552_v47  ;;  %v10445_v47 = vld [vmem:[%s12681_s30 + $0x3] ss:$0 sm:$0xff] }
0x2bbb   :  { %v4551_v51 = vpop.xlane.xlu0 %4550 }
0x2bbc   :  { %10282 = vrcp.f32 %v4551_v51 }
0x2bbf   :  { %v4554_v52 = vpop.xlane.xlu1 %4553 }
0x2bc0   :  { %10284 = vrcp.f32 %v4554_v52 }
0x2bc9   :  { %v10283_v54 = vpop.eup %10282 }
0x2bca   :  { %v4557_v56 = vmul.f32 %v10283_v54, %v10279_v38 }
0x2bcd   :  { %v10285_v55 = vpop.eup %10284 }
0x2bce   :  { %v4558_v57 = vmul.f32 %v10285_v55, %v10281_v45 }
0x2bd0   :  { %v4559_v59 = vpack.c.bf16 %v4558_v57, %v4557_v56 }
0x2bd2   :  { %9612 = vmatmul.mubr.msk.bf16.vlgmr.msra.gmra.mxu0 %vm675_vm3, %v4559_v59 }
0x2bd3   :  { %9622 = vmatpush3.bf16.msra.mxu0 %v10437_v17  ;;  %9625 = vmatprep.mubr.msk.bf16.mxu0 %vm10512_vm0, %v10511_v0 }
0x2bd4   :  { %9623 = vmatprep.subr.bf16.mxu0 %v10511_v0 }
0x2bd7   :  { %9624 = vmatpush3.bf16.msra.mxu0 %v10438_v61 }
0x2bd8   :  { %9637 = vmatprep.subr.bf16.mxu0 %v10511_v0 }
0x2bda   :  { %9626 = vmatmul.mubr.msk.bf16.vlgmr.msra.gmra.mxu0 %vm458_vm1, %v11441_v8 }
0x2bdb   :  { %9638 = vmatpush3.bf16.msra.mxu0 %v10439_v40  ;;  %9641 = vmatprep.mubr.msk.bf16.mxu0 %vm10512_vm0, %v10511_v0 }
0x2bdc   :  { %9639 = vmatprep.subr.bf16.mxu0 %v10511_v0 }
0x2bdf   :  { %9640 = vmatpush3.bf16.msra.mxu0 %v10440_v41 }
0x2be0   :  { %9651 = vmatprep.subr.bf16.mxu0 %v10511_v0 }
0x2be2   :  { %9642 = vmatmul.mubr.msk.bf16.vlgmr.msra.gmra.mxu0 %vm458_vm1, %v11441_v8 }
0x2be3   :  { %9653 = vmatprep.mubr.msk.bf16.mxu0 %vm10512_vm0, %v10511_v0 }
0x2c92   :  { %v4598_v10 = vpop.f32.mrf.mxu0 }
0x2c94   :  { %v9613_v50 = vpop.f32.mrf.mxu0 }
0x2c96   :  { %v4601_v20 = vpop.f32.mrf.mxu0 }
0x2c97   :  { %v4605_v1 = vpack.c.bf16 %v4601_v20, %v4598_v10 }
0x2c98   :  { %v9614_v2 = vpop.f32.mrf.mxu0 }
0x2c99   :  { %9618 = vmatmul.mubr.msk.bf16.vlgmr.msra.gmra.mxu1 %vm623_vm2, %v4605_v1 }
0x2c9a   :  { %v4686_v4 = vpop.f32.mrf.mxu0  ;;  %9630 = vmatpush3.bf16.msra.mxu1 %v10441_v32  ;;  %9633 = vmatprep.mubr.msk.bf16.mxu1 %vm10512_vm0, %v10511_v0 }
0x2c9b   :  { %9631 = vmatprep.subr.bf16.mxu1 %v10511_v0  ;;  %v4687_v3 = vadd.f32 %v10443_v9, %v4686_v4 }
0x2c9c   :  { %v9627_v6 = vpop.f32.mrf.mxu0 }
0x2c9e   :  { %v4689_v53 = vpop.f32.mrf.mxu0  ;;  %9632 = vmatpush3.bf16.msra.mxu1 %v10442_v19 }
0x2c9f   :  { %v4690_v22 = vadd.f32 %v10443_v9, %v4689_v53  ;;  %9645 = vmatprep.subr.bf16.mxu1 %v10511_v0 }
0x2ca0   :  { %v9628_v11 = vpop.f32.mrf.mxu0 }
0x2ca1   :  { %v4775_v7 = vpack.c.bf16 %v4690_v22, %v4687_v3  ;;  %9634 = vmatmul.mubr.msk.bf16.vlgmr.msra.gmra.mxu1 %vm458_vm1, %v11441_v8  ;;  %v4355_v8 = vadd.f32 %v11621_v30, %v11656_v46 }
0x2ca2   :  { %v4768_v44 = vpop.f32.mrf.mxu0  ;;  %9647 = vmatprep.mubr.msk.bf16.mxu1 %vm10512_vm0, %v10511_v0 }
0x2ca3   :  { %v4769_v16 = vadd.f32 %v10444_v14, %v4768_v44  ;;  %v10447_v44 = vld [vmem:[%s12688_s14] sm:$0xff]  }
0x2ca4   :  { %v9643_v25 = vpop.f32.mrf.mxu0 }
0x2ca6   :  { %v4771_v13 = vpop.f32.mrf.mxu0 }
0x2ca7   :  { %v4772_v5 = vadd.f32 %v10444_v14, %v4771_v13 }
0x2ca8   :  { %v9644_v18 = vpop.f32.mrf.mxu0 }
0x2ca9   :  { %v4851_v23 = vpack.c.bf16 %v4772_v5, %v4769_v16  ;;  %v10448_v18 = vld [vmem:[%s12633_s19 + $0x18] sm:$0xff]  }
0x2cab   :  { %9652 = vmatpush3.bf16.msra.mxu0 %v4851_v23  ;;  %v10449_v23 = vld [vmem:[%s12633_s19 + $0x10] sm:$0xff]  }
0x2cac   :  { %9663 = vmatprep.subr.bf16.mxu0 %v10511_v0 }
0x2d59   :  { %v4643_v26 = vpop.f32.mrf.mxu1 }
0x2d5a   :  { %v11729_v27 = vadd.f32 %v4643_v26, %v4355_v8  ;;  %v10450_v8 = vld [vmem:[%s12633_s19 + $0x8] sm:$0xff]   ;;  %v10451_v26 = vld [vmem:[%s12633_s19] sm:$0xff]  }
0x2d5b   :  { %v9619_v29 = vpop.f32.mrf.mxu1 }
0x2d5d   :  { %v4646_v34 = vpop.f32.mrf.mxu1 }
0x2d5e   :  { %v11733_v33 = vadd.f32 %v4646_v34, %v4358_v31 }
0x2d5f   :  { %v9620_v37 = vpop.f32.mrf.mxu1 }
0x2d60   :  { %v10452_v37 = vld [vmem:[%s12687_s12] ss:$0 sm:$0xff] }
0x2d61   :  { %v4727_v38 = vpop.f32.mrf.mxu1 }
0x2d62   :  { %v4728_v51 = vadd.f32 %v10445_v47, %v4727_v38 }
0x2d63   :  { %v9635_v39 = vpop.f32.mrf.mxu1 }
0x2d65   :  { %v4730_v45 = vpop.f32.mrf.mxu1 }
0x2d66   :  { %v4731_v30 = vadd.f32 %v10445_v47, %v4730_v45 }
0x2d67   :  { %v9636_v46 = vpop.f32.mrf.mxu1 }
0x2d68   :  { %v4776_v52 = vpack.c.bf16 %v4731_v30, %v4728_v51 }
0x2d6a   :  { %v4781_v54 = vsel %vm623_vm2, %v4776_v52, 0 }
0x2d6b   :  { %9646 = vmatpush3.bf16.xpose.msra.mxu1 %v4781_v54 }
0x2d6c   :  { %9657 = vmatprep.subr.bf16.mxu1 %v10511_v0 }
0x2d72   :  { %9648 = vmatmul.mubr.msk.bf16.vlgmr.msra.gmra.mxu1 %vm623_vm2, %v4775_v7  ;;  %v10446_v7 = vld [vmem:[%s12688_s14 + $0x8] sm:$0xff]  }
0x2d73   :  { %9658 = vmatpush3.bf16.msra.mxu1 %v10980_v42  ;;  %9659 = vmatprep.mubr.msk.bf16.mxu1 %vm10512_vm0, %v10511_v0 }
0x2d74   :  { %9671 = vmatprep.subr.bf16.mxu1 %v10511_v0 }
0x2e32   :  { %v4817_v36 = vpop.f32.mrf.mxu1 }
0x2e33   :  { %v4824_v49 = vmul.f32 0.35355338, %v4817_v36 }
0x2e34   :  { %v9649_v55 = vpop.f32.mrf.mxu1 }
0x2e35   :  { %v4826_v56 = vadd.f32 %v4824_v49, %v11532_v12 }
0x2e36   :  { %v4820_v57 = vpop.f32.mrf.mxu1 }
0x2e37   :  { %v4825_v59 = vmul.f32 0.35355338, %v4820_v57  ;;  %v4828_v17 = vsel %vm675_vm3, %v4826_v56, -inf }
0x2e38   :  { %4829 = vmax.xlane.f32.xlu0 %v4828_v17  ;;  %v9650_v61 = vpop.f32.mrf.mxu1 }
0x2e39   :  { %v4827_v40 = vadd.f32 %v4825_v59, %v11540_v21 }
0x2e3b   :  { %v4831_v42 = vsel %vm675_vm3, %v4827_v40, -inf }
0x2e3c   :  { %4832 = vmax.xlane.f32.xlu1 %v4831_v42 }
0x2ec1   :  { %v4830_v41 = vpop.xlane.xlu0 %4829 }
0x2ec2   :  { %v4834_v10 = vsub.f32 %v4826_v56, %v4830_v41 }
0x2ec4   :  { %v4836_v50 = vmul.f32 1.442695, %v4834_v10 }
0x2ec5   :  { %v4833_v20 = vpop.xlane.xlu1 %4832 }
0x2ec6   :  { %10286 = vpow2.f32 %v4836_v50  ;;  %v4835_v1 = vsub.f32 %v4827_v40, %v4833_v20 }
0x2ec8   :  { %v4838_v2 = vmul.f32 1.442695, %v4835_v1 }
0x2eca   :  { %10288 = vpow2.f32 %v4838_v2  ;;  %v10453_v2 = vld [vmem:[%s12689_s15] ss:$0 sm:$0xff] }
0x2ed3   :  { %v10287_v12 = vpop.eup %10286 }
0x2ed4   :  { %v4840_v4 = vsel %vm675_vm3, %v10287_v12, 0.0 }
0x2ed5   :  { %4841 = vadd.xlane.f32.xlu0 %v4840_v4 }
0x2ed7   :  { %v10289_v32 = vpop.eup %10288 }
0x2ed8   :  { %v4843_v6 = vsel %vm675_vm3, %v10289_v32, 0.0 }
0x2ed9   :  { %4844 = vadd.xlane.f32.xlu1 %v4843_v6  ;;  %v10454_v6 = vld [vmem:[%s12632_s16] ss:$0 sm:$0xff] }
0x2f5e   :  { %v4842_v21 = vpop.xlane.xlu0 %4841 }
0x2f5f   :  { %10290 = vrcp.f32 %v4842_v21 }
0x2f62   :  { %v4845_v53 = vpop.xlane.xlu1 %4844 }
0x2f63   :  { %10292 = vrcp.f32 %v4845_v53 }
0x2f6c   :  { %v10291_v19 = vpop.eup %10290 }
0x2f6d   :  { %v4848_v3 = vmul.f32 %v10291_v19, %v10287_v12 }
0x2f70   :  { %v10293_v9 = vpop.eup %10292 }
0x2f71   :  { %v4849_v22 = vmul.f32 %v10293_v9, %v10289_v32  ;;  %v10455_v9 = vld [vmem:[%s12679_s11 + $0x48] sm:$0xff]  }
0x2f73   :  { %v4850_v11 = vpack.c.bf16 %v4849_v22, %v4848_v3  ;;  %v10456_v3 = vld [vmem:[%s12679_s11 + $0x40] sm:$0xff]  }
0x2f75   :  { %9654 = vmatmul.mubr.msk.bf16.vlgmr.msra.gmra.mxu0 %vm675_vm3, %v4850_v11  ;;  %v10457_v11 = vld [vmem:[%s12634_s18] ss:$0 sm:$0xff] }
0x2f76   :  { %9664 = vmatpush3.bf16.msra.mxu0 %v10446_v7  ;;  %9667 = vmatprep.mubr.msk.bf16.mxu0 %vm10512_vm0, %v10511_v0 }
0x2f77   :  { %9665 = vmatprep.subr.bf16.mxu0 %v10511_v0 }
0x2f7a   :  { %9666 = vmatpush3.bf16.msra.mxu0 %v10447_v44 }
0x2f7b   :  { %9683 = vmatprep.subr.bf16.mxu0 %v10511_v0 }
0x3035   :  { %v4889_v25 = vpop.f32.mrf.mxu0 }
0x3037   :  { %v9655_v13 = vpop.f32.mrf.mxu0 }
0x3039   :  { %v4892_v14 = vpop.f32.mrf.mxu0 }
0x303a   :  { %v4896_v16 = vpack.c.bf16 %v4892_v14, %v4889_v25 }
0x303b   :  { %v9656_v5 = vpop.f32.mrf.mxu0 }
0x303c   :  { %9660 = vmatmul.mubr.msk.bf16.vlgmr.msra.gmra.mxu1 %vm623_vm2, %v4896_v16 }
0x303d   :  { %9672 = vmatpush3.bf16.msra.mxu1 %v10448_v18  ;;  %9679 = vmatprep.mubr.msk.bf16.mxu1 %vm10512_vm0, %v10511_v0 }
0x303e   :  { %9673 = vmatprep.subr.bf16.mxu1 %v10511_v0 }
0x3041   :  { %9674 = vmatpush3.bf16.msra.mxu1 %v10449_v23 }
0x3042   :  { %9675 = vmatprep.subr.bf16.mxu1 %v10511_v0 }
0x3045   :  { %9676 = vmatpush3.bf16.msra.mxu1 %v10450_v8 }
0x3046   :  { %9677 = vmatprep.subr.bf16.mxu1 %v10511_v0 }
0x3049   :  { %9678 = vmatpush3.bf16.msra.mxu1 %v10451_v26 }
0x304a   :  { %9699 = vmatprep.subr.bf16.mxu1 %v10511_v0 }
0x30fc   :  { %v4934_v29 = vpop.f32.mrf.mxu1 }
0x30fd   :  { %v4941_v31 = vadd.f32 %v4934_v29, %v11729_v27 }
0x30fe   :  { %v9661_v34 = vpop.f32.mrf.mxu1 }
0x30ff   :  { %v4943_v38 = vadd.f32 %v10452_v37, %v4941_v31 }
0x3100   :  { %v4937_v39 = vpop.f32.mrf.mxu1 }
0x3101   :  { %v4942_v45 = vadd.f32 %v4937_v39, %v11733_v33  ;;  %v4945_v47 = vadd.f32 %v4943_v38, %v11434_v63 }
0x3102   :  { %v9662_v51 = vpop.f32.mrf.mxu1 }
0x3103   :  { %v4944_v30 = vadd.f32 %v10452_v37, %v4942_v45  ;;  %v4947_v46 = vsel %vm458_vm1, %v4945_v47, 0.0 }
0x3104   :  { %4948 = vadd.xlane.f32.xlu0 %v4947_v46 }
0x3105   :  { %v4946_v52 = vadd.f32 %v4944_v30, %v11431_v43 }
0x3107   :  { %v4950_v27 = vsel %vm458_vm1, %v4946_v52, 0.0 }
0x3108   :  { %4951 = vadd.xlane.f32.xlu1 %v4950_v27 }
0x318d   :  { %v4949_v54 = vpop.xlane.xlu0 %4948 }
0x318e   :  { %v4953_v36 = vmul.f32 0.03125, %v4949_v54  ;;  %v10458_v54 = vld [vmem:[%s12683_s7 + $0x48] sm:$0xff]  }
0x3190   :  { %v4955_v49 = vsub.f32 %v4945_v47, %v4953_v36  ;;  %v10459_v36 = vld [vmem:[%s12683_s7 + $0x40] sm:$0xff]  }
0x3191   :  { %v4952_v55 = vpop.xlane.xlu1 %4951 }
0x3192   :  { %v4954_v56 = vmul.f32 0.03125, %v4952_v55  ;;  %v4957_v57 = vmul.f32 %v4955_v49, %v4955_v49  ;;  %v10460_v55 = vld [vmem:[%s12635_s20] ss:$0 sm:$0xff] }
0x3194   :  { %v4956_v59 = vsub.f32 %v4946_v52, %v4954_v56  ;;  %v4959_v33 = vsel %vm458_vm1, %v4957_v57, 0.0 }
0x3195   :  { %4960 = vadd.xlane.f32.xlu0 %v4959_v33 }
0x3196   :  { %v4958_v63 = vmul.f32 %v4956_v59, %v4956_v59 }
0x3198   :  { %v4962_v17 = vsel %vm458_vm1, %v4958_v63, 0.0 }
0x3199   :  { %4963 = vadd.xlane.f32.xlu1 %v4962_v17 }
0x321e   :  { %v4961_v61 = vpop.xlane.xlu0 %4960 }
0x321f   :  { %v4965_v40 = vmul.f32 0.03125, %v4961_v61 }
0x3221   :  { %v4967_v43 = vadd.f32 1e-12, %v4965_v40 }
0x3222   :  { %v4964_v42 = vpop.xlane.xlu1 %4963 }
0x3223   :  { %10294 = vrsqrt.f32 %v4967_v43  ;;  %v4966_v41 = vmul.f32 0.03125, %v4964_v42 }
0x3225   :  { %v4968_v10 = vadd.f32 1e-12, %v4966_v41 }
0x3227   :  { %10296 = vrsqrt.f32 %v4968_v10 }
0x3230   :  { %v10295_v50 = vpop.eup %10294 }
0x3231   :  { %v4971_v20 = vmul.f32 %v10295_v50, %v4955_v49 }
0x3233   :  { %v4973_v12 = vmul.f32 %v10453_v2, %v4971_v20 }
0x3234   :  { %v10297_v1 = vpop.eup %10296 }
0x3235   :  { %v4972_v4 = vmul.f32 %v10297_v1, %v4956_v59  ;;  %v4975_v21 = vadd.f32 %v10454_v6, %v4973_v12 }
0x3237   :  { %v4974_v32 = vmul.f32 %v10453_v2, %v4972_v4 }
0x3239   :  { %v4976_v53 = vadd.f32 %v10454_v6, %v4974_v32 }
0x323b   :  { %v4977_v19 = vpack.c.bf16 %v4976_v53, %v4975_v21 }
0x323d   :  { %9668 = vmatmul.mubr.msk.bf16.vlgmr.msra.gmra.mxu0 %vm458_vm1, %v4977_v19 }
0x323e   :  { %9684 = vmatpush3.bf16.msra.mxu0 %v10455_v9  ;;  %9687 = vmatprep.mubr.msk.bf16.mxu0 %vm10512_vm0, %v10511_v0 }
0x323f   :  { %9685 = vmatprep.subr.bf16.mxu0 %v10511_v0 }
0x3242   :  { %9686 = vmatpush3.bf16.msra.mxu0 %v10456_v3 }
0x3243   :  { %9691 = vmatprep.subr.bf16.mxu0 %v10511_v0 }
0x32fd   :  { %v5015_v22 = vpop.f32.mrf.mxu0 }
0x32fe   :  { %v5016_v7 = vadd.f32 %v10457_v11, %v5015_v22 }
0x32ff   :  { %v9669_v44 = vpop.f32.mrf.mxu0 }
0x3300   :  { %v5024_v25 = vmul.f32 0.044715, %v5016_v7  ;;  %v5022_v47 = vmul.f32 0.5, %v5016_v7  ;;  %v10461_v44 = vld [vmem:[%s12636_s21] ss:$0 sm:$0xff] }
0x3301   :  { %v5018_v13 = vpop.f32.mrf.mxu0 }
0x3302   :  { %v5026_v14 = vmul.f32 %v5024_v25, %v5016_v7  ;;  %v5019_v16 = vadd.f32 %v10457_v11, %v5018_v13 }
0x3303   :  { %v9670_v5 = vpop.f32.mrf.mxu0 }
0x3304   :  { %v5028_v18 = vmul.f32 %v5026_v14, %v5016_v7  ;;  %v5025_v23 = vmul.f32 0.044715, %v5019_v16  ;;  %v5023_v51 = vmul.f32 0.5, %v5019_v16 }
0x3306   :  { %v5030_v8 = vadd.f32 %v5028_v18, %v5016_v7  ;;  %v5027_v26 = vmul.f32 %v5025_v23, %v5019_v16 }
0x3308   :  { %v5032_v29 = vmul.f32 0.7978846, %v5030_v8  ;;  %v5029_v31 = vmul.f32 %v5027_v26, %v5019_v16  ;;  %v10463_v8 = vld [vmem:[%s12678_s13 + $0x48] sm:$0xff]   ;;  %v10464_v26 = vld [vmem:[%s12678_s13 + $0x40] sm:$0xff]  }
0x330a   :  { %10298 = vtanh.f32 %v5032_v29  ;;  %v5031_v34 = vadd.f32 %v5029_v31, %v5019_v16  ;;  %v10462_v16 = vld [vmem:[%s12637_s22] ss:$0 sm:$0xff] }
0x330c   :  { %v5033_v37 = vmul.f32 0.7978846, %v5031_v34 }
0x330e   :  { %10300 = vtanh.f32 %v5033_v37 }
0x3317   :  { %v10299_v38 = vpop.eup %10298 }
0x3318   :  { %v5036_v39 = vadd.f32 1.0, %v10299_v38 }
0x331a   :  { %v5038_v46 = vmul.f32 %v5036_v39, %v5022_v47 }
0x331b   :  { %v10301_v45 = vpop.eup %10300 }
0x331c   :  { %v5037_v30 = vadd.f32 1.0, %v10301_v45  ;;  %v10465_v45 = vld [vmem:[%s12685_s9 + $0x4] ss:$0 sm:$0xff] }
0x331e   :  { %v5039_v52 = vmul.f32 %v5037_v30, %v5023_v51 }
0x3320   :  { %v5040_v27 = vpack.c.bf16 %v5039_v52, %v5038_v46 }
0x3322   :  { %9680 = vmatmul.mubr.msk.bf16.vlgmr.msra.gmra.mxu1 %vm2000_vm5, %v5040_v27 }
0x3323   :  { %9700 = vmatpush3.bf16.msra.mxu1 %v10458_v54  ;;  %9703 = vmatprep.mubr.msk.bf16.mxu1 %vm10512_vm0, %v10511_v0 }
0x3324   :  { %9701 = vmatprep.subr.bf16.mxu1 %v10511_v0 }
0x3327   :  { %9702 = vmatpush3.bf16.msra.mxu1 %v10459_v36 }
0x3328   :  { %9713 = vmatprep.subr.bf16.mxu1 %v10511_v0 }
0x33e2   :  { %v5078_v49 = vpop.f32.mrf.mxu1 }
0x33e3   :  { %v5079_v56 = vadd.f32 %v10460_v55, %v5078_v49  ;;  %v10466_v49 = vld [vmem:[%s12681_s30 + $0x4] ss:$0 sm:$0xff] }
0x33e4   :  { %v9681_v57 = vpop.f32.mrf.mxu1 }
0x33e5   :  { %v5085_v59 = vadd.f32 %v5079_v56, %v4975_v21 }
0x33e6   :  { %v5081_v33 = vpop.f32.mrf.mxu1 }
0x33e7   :  { %v5082_v63 = vadd.f32 %v10460_v55, %v5081_v33  ;;  %v5087_v17 = vsel %vm458_vm1, %v5085_v59, 0.0 }
0x33e8   :  { %5088 = vadd.xlane.f32.xlu0 %v5087_v17  ;;  %v9682_v61 = vpop.f32.mrf.mxu1 }
0x33e9   :  { %v5086_v40 = vadd.f32 %v5082_v63, %v4976_v53  ;;  %v10467_v63 = vld [vmem:[%s12682_s2 + $0x4] ss:$0 sm:$0xff] }
0x33eb   :  { %v5090_v43 = vsel %vm458_vm1, %v5086_v40, 0.0 }
0x33ec   :  { %5091 = vadd.xlane.f32.xlu1 %v5090_v43  ;;  %v10468_v43 = vld [vmem:[%s12679_s11 + $0x58] sm:$0xff]  }
0x3471   :  { %v5089_v42 = vpop.xlane.xlu0 %5088 }
0x3472   :  { %v5093_v41 = vmul.f32 0.03125, %v5089_v42  ;;  %v10469_v42 = vld [vmem:[%s12679_s11 + $0x50] sm:$0xff]  }
0x3474   :  { %v5095_v10 = vsub.f32 %v5085_v59, %v5093_v41  ;;  %v10470_v41 = vld [vmem:[%s12683_s7 + $0x58] sm:$0xff]  }
0x3475   :  { %v5092_v50 = vpop.xlane.xlu1 %5091 }
0x3476   :  { %v5094_v20 = vmul.f32 0.03125, %v5092_v50  ;;  %v5097_v1 = vmul.f32 %v5095_v10, %v5095_v10 }
0x3478   :  { %v5096_v2 = vsub.f32 %v5086_v40, %v5094_v20  ;;  %v5099_v12 = vsel %vm458_vm1, %v5097_v1, 0.0 }
0x3479   :  { %5100 = vadd.xlane.f32.xlu0 %v5099_v12 }
0x347a   :  { %v5098_v4 = vmul.f32 %v5096_v2, %v5096_v2 }
0x347c   :  { %v5102_v32 = vsel %vm458_vm1, %v5098_v4, 0.0 }
0x347d   :  { %5103 = vadd.xlane.f32.xlu1 %v5102_v32 }
0x3502   :  { %v5101_v6 = vpop.xlane.xlu0 %5100 }
0x3503   :  { %v5105_v21 = vmul.f32 0.03125, %v5101_v6 }
0x3505   :  { %v5107_v53 = vadd.f32 1e-12, %v5105_v21 }
0x3506   :  { %v5104_v19 = vpop.xlane.xlu1 %5103 }
0x3507   :  { %10302 = vrsqrt.f32 %v5107_v53  ;;  %v5106_v9 = vmul.f32 0.03125, %v5104_v19  ;;  %v11913_v53 = vld [vmem:[%s12641_s3 + $0x8] sm:$0xff] }
0x3509   :  { %v5108_v3 = vadd.f32 1e-12, %v5106_v9 }
0x350b   :  { %10304 = vrsqrt.f32 %v5108_v3 }
0x3514   :  { %v10303_v22 = vpop.eup %10302 }
0x3515   :  { %v5111_v11 = vmul.f32 %v10303_v22, %v5095_v10  ;;  %v10471_v10 = vld [vmem:[%s12683_s7 + $0x50] sm:$0xff]  }
0x3517   :  { %v5113_v25 = vmul.f32 %v10461_v44, %v5111_v11 }
0x3518   :  { %v10305_v7 = vpop.eup %10304 }
0x3519   :  { %v5112_v13 = vmul.f32 %v10305_v7, %v5096_v2  ;;  %v11836_v5 = vadd.f32 %v10462_v16, %v5113_v25  ;;  %v11906_v2 = vld [vmem:[%s12641_s3] sm:$0xff] }
0x351a   :  { %v10474_v7 = vld [vmem:[%s12682_s2 + $0x5] ss:$0 sm:$0xff] }
0x351b   :  { %v5114_v14 = vmul.f32 %v10461_v44, %v5112_v13 }
0x351d   :  { %v11838_v18 = vadd.f32 %v10462_v16, %v5114_v14 }
0x351f   :  { %v11842_v23 = vpack.c.bf16 %v11838_v18, %v11836_v5 }
0x3521   :  { %9688 = vmatmul.mubr.msk.bf16.vlgmr.msra.gmra.mxu0 %vm458_vm1, %v11842_v23  ;;  %9704 = vmatmul.mubr.msk.bf16.vlgmr.msra.gmra.mxu1 %vm458_vm1, %v11842_v23 }
0x3522   :  { %9692 = vmatpush3.bf16.msra.mxu0 %v10463_v8  ;;  %9695 = vmatprep.mubr.msk.bf16.mxu0 %vm10512_vm0, %v10511_v0 }
0x3523   :  { %9693 = vmatprep.subr.bf16.mxu0 %v10511_v0  ;;  %9715 = vmatprep.mubr.msk.bf16.mxu1 %vm10512_vm0, %v10511_v0 }
0x3526   :  { %9694 = vmatpush3.bf16.msra.mxu0 %v10464_v26 }
0x3527   :  { %9707 = vmatprep.subr.bf16.mxu0 %v10511_v0 }
0x3529   :  { %9696 = vmatmul.mubr.msk.bf16.vlgmr.msra.gmra.mxu0 %vm458_vm1, %v11842_v23 }
0x352a   :  { %9709 = vmatprep.mubr.msk.bf16.mxu0 %vm10512_vm0, %v10511_v0 }
0x35e1   :  { %v5155_v29 = vpop.f32.mrf.mxu0  ;;  %v5237_v31 = vpop.f32.mrf.mxu1 }
0x35e2   :  { %v5238_v47 = vadd.f32 %v10465_v45, %v5237_v31  ;;  %v5156_v61 = vadd.f32 %v10467_v63, %v5155_v29  ;;  %v10475_v29 = vld [vmem:[%s12685_s9 + $0x5] ss:$0 sm:$0xff] }
0x35e3   :  { %v9689_v34 = vpop.f32.mrf.mxu0  ;;  %v9705_v37 = vpop.f32.mrf.mxu1 }
0x35e5   :  { %v5158_v38 = vpop.f32.mrf.mxu0  ;;  %v5240_v39 = vpop.f32.mrf.mxu1 }
0x35e6   :  { %v5241_v51 = vadd.f32 %v10465_v45, %v5240_v39  ;;  %v5159_v17 = vadd.f32 %v10467_v63, %v5158_v38 }
0x35e7   :  { %v9690_v30 = vpop.f32.mrf.mxu0  ;;  %v9706_v46 = vpop.f32.mrf.mxu1 }
0x35e8   :  { %v5320_v52 = vpack.c.bf16 %v5241_v51, %v5238_v47  ;;  %v5244_v40 = vpack.c.bf16 %v5159_v17, %v5156_v61  ;;  %v10476_v17 = vld [vmem:[%s12678_s13 + $0x58] sm:$0xff]   ;;  %v10477_v61 = vld [vmem:[%s12678_s13 + $0x50] sm:$0xff]  }
0x35e9   :  { %v5196_v27 = vpop.f32.mrf.mxu0 }
0x35ea   :  { %9714 = vmatpush3.bf16.msra.mxu1 %v5320_v52  ;;  %v5197_v55 = vadd.f32 %v10466_v49, %v5196_v27 }
0x35eb   :  { %v9697_v54 = vpop.f32.mrf.mxu0  ;;  %9727 = vmatprep.subr.bf16.mxu1 %v10511_v0 }
0x35ed   :  { %v5199_v36 = vpop.f32.mrf.mxu0 }
0x35ee   :  { %v5200_v56 = vadd.f32 %v10466_v49, %v5199_v36 }
0x35ef   :  { %v9698_v57 = vpop.f32.mrf.mxu0 }
0x35f0   :  { %v5245_v59 = vpack.c.bf16 %v5200_v56, %v5197_v55 }
0x35f2   :  { %v5250_v33 = vsel %vm623_vm2, %v5245_v59, 0 }
0x35f3   :  { %9708 = vmatpush3.bf16.xpose.msra.mxu0 %v5250_v33 }
0x35f4   :  { %9719 = vmatprep.subr.bf16.mxu0 %v10511_v0 }
0x35fa   :  { %9710 = vmatmul.mubr.msk.bf16.vlgmr.msra.gmra.mxu0 %vm623_vm2, %v5244_v40 }
0x35fb   :  { %9720 = vmatpush3.bf16.msra.mxu0 %v10468_v43  ;;  %9723 = vmatprep.mubr.msk.bf16.mxu0 %vm10512_vm0, %v10511_v0 }
0x35fc   :  { %9721 = vmatprep.subr.bf16.mxu0 %v10511_v0 }
0x35ff   :  { %9722 = vmatpush3.bf16.msra.mxu0 %v10469_v42 }
0x3600   :  { %9735 = vmatprep.subr.bf16.mxu0 %v10511_v0 }
0x3602   :  { %9724 = vmatmul.mubr.msk.bf16.vlgmr.msra.gmra.mxu0 %vm458_vm1, %v11842_v23 }
0x3603   :  { %9736 = vmatpush3.bf16.msra.mxu0 %v10470_v41  ;;  %9739 = vmatprep.mubr.msk.bf16.mxu0 %vm10512_vm0, %v10511_v0 }
0x3604   :  { %9737 = vmatprep.subr.bf16.mxu0 %v10511_v0 }
0x3607   :  { %9738 = vmatpush3.bf16.msra.mxu0 %v10471_v10 }
0x3608   :  { %9749 = vmatprep.subr.bf16.mxu0 %v10511_v0 }
0x360a   :  { %9740 = vmatmul.mubr.msk.bf16.vlgmr.msra.gmra.mxu0 %vm458_vm1, %v11842_v23 }
0x360b   :  { %9751 = vmatprep.mubr.msk.bf16.mxu0 %vm10512_vm0, %v10511_v0 }
0x36ba   :  { %v5286_v50 = vpop.f32.mrf.mxu0 }
0x36bb   :  { %v5293_v20 = vmul.f32 0.35355338, %v5286_v50 }
0x36bc   :  { %v9711_v1 = vpop.f32.mrf.mxu0 }
0x36bd   :  { %v5295_v12 = vadd.f32 %v11906_v2, %v5293_v20 }
0x36be   :  { %v5289_v4 = vpop.f32.mrf.mxu0 }
0x36bf   :  { %v5294_v32 = vmul.f32 0.35355338, %v5289_v4  ;;  %v5297_v6 = vsel %vm675_vm3, %v5295_v12, -inf }
0x36c0   :  { %5298 = vmax.xlane.f32.xlu0 %v5297_v6  ;;  %v9712_v21 = vpop.f32.mrf.mxu0 }
0x36c1   :  { %v5296_v19 = vadd.f32 %v11913_v53, %v5294_v32 }
0x36c2   :  { %v5400_v9 = vpop.f32.mrf.mxu0 }
0x36c3   :  { %v5300_v3 = vsel %vm675_vm3, %v5296_v19, -inf  ;;  %v11920_v44 = vadd.f32 %v10474_v7, %v5400_v9 }
0x36c4   :  { %5301 = vmax.xlane.f32.xlu1 %v5300_v3  ;;  %v9725_v22 = vpop.f32.mrf.mxu0 }
0x36c6   :  { %v5403_v11 = vpop.f32.mrf.mxu0 }
0x36c7   :  { %v11922_v25 = vadd.f32 %v10474_v7, %v5403_v11 }
0x36c8   :  { %v9726_v13 = vpop.f32.mrf.mxu0 }
0x36c9   :  { %v5489_v14 = vpack.c.bf16 %v11922_v25, %v11920_v44 }
0x36ca   :  { %v5482_v16 = vpop.f32.mrf.mxu0 }
0x36cb   :  { %v5483_v31 = vadd.f32 %v10475_v29, %v5482_v16 }
0x36cc   :  { %v9741_v8 = vpop.f32.mrf.mxu0 }
0x36ce   :  { %v5485_v26 = vpop.f32.mrf.mxu0 }
0x36cf   :  { %v5486_v34 = vadd.f32 %v10475_v29, %v5485_v26 }
0x36d0   :  { %v9742_v37 = vpop.f32.mrf.mxu0 }
0x36d1   :  { %v5565_v38 = vpack.c.bf16 %v5486_v34, %v5483_v31 }
0x36d3   :  { %9750 = vmatpush3.bf16.msra.mxu0 %v5565_v38 }
0x36d4   :  { %9761 = vmatprep.subr.bf16.mxu0 %v10511_v0 }
0x3749   :  { %v5299_v39 = vpop.xlane.xlu0 %5298 }
0x374a   :  { %v5303_v45 = vsub.f32 %v5295_v12, %v5299_v39  ;;  %v10478_v12 = vld [vmem:[%s12681_s30 + $0x5] ss:$0 sm:$0xff] }
0x374c   :  { %v5305_v47 = vmul.f32 1.442695, %v5303_v45 }
0x374d   :  { %v5302_v51 = vpop.xlane.xlu1 %5301 }
0x374e   :  { %10306 = vpow2.f32 %v5305_v47  ;;  %v5304_v30 = vsub.f32 %v5296_v19, %v5302_v51 }
0x3750   :  { %v5307_v46 = vmul.f32 1.442695, %v5304_v30 }
0x3752   :  { %10308 = vpow2.f32 %v5307_v46 }
0x375b   :  { %v10307_v52 = vpop.eup %10306 }
0x375c   :  { %v5309_v27 = vsel %vm675_vm3, %v10307_v52, 0.0 }
0x375d   :  { %5310 = vadd.xlane.f32.xlu0 %v5309_v27 }
0x375f   :  { %v10309_v54 = vpop.eup %10308 }
0x3760   :  { %v5312_v36 = vsel %vm675_vm3, %v10309_v54, 0.0 }
0x3761   :  { %5313 = vadd.xlane.f32.xlu1 %v5312_v36  ;;  %v10479_v36 = vld [vmem:[%s12678_s13 + $0x68] sm:$0xff]  }
0x37e6   :  { %v5311_v49 = vpop.xlane.xlu0 %5310 }
0x37e7   :  { %10310 = vrcp.f32 %v5311_v49 }
0x37ea   :  { %v5314_v55 = vpop.xlane.xlu1 %5313 }
0x37eb   :  { %10312 = vrcp.f32 %v5314_v55 }
0x37f4   :  { %v10311_v56 = vpop.eup %10310 }
0x37f5   :  { %v5317_v59 = vmul.f32 %v10311_v56, %v10307_v52 }
0x37f8   :  { %v10313_v57 = vpop.eup %10312 }
0x37f9   :  { %v5318_v33 = vmul.f32 %v10313_v57, %v10309_v54 }
0x37fb   :  { %v5319_v63 = vpack.c.bf16 %v5318_v33, %v5317_v59 }
0x37fd   :  { %9716 = vmatmul.mubr.msk.bf16.vlgmr.msra.gmra.mxu1 %vm675_vm3, %v5319_v63  ;;  %v10481_v63 = vld [vmem:[%s12679_s11 + $0x68] sm:$0xff]  }
0x37fe   :  { %9728 = vmatpush3.bf16.msra.mxu1 %v10476_v17  ;;  %9731 = vmatprep.mubr.msk.bf16.mxu1 %vm10512_vm0, %v10511_v0 }
0x37ff   :  { %9729 = vmatprep.subr.bf16.mxu1 %v10511_v0 }
0x3802   :  { %9730 = vmatpush3.bf16.msra.mxu1 %v10477_v61 }
0x3803   :  { %9743 = vmatprep.subr.bf16.mxu1 %v10511_v0 }
0x3805   :  { %9732 = vmatmul.mubr.msk.bf16.vlgmr.msra.gmra.mxu1 %vm458_vm1, %v11842_v23 }
0x3806   :  { %9745 = vmatprep.mubr.msk.bf16.mxu1 %vm10512_vm0, %v10511_v0 }
0x38bd   :  { %v5358_v40 = vpop.f32.mrf.mxu1 }
0x38bf   :  { %v9717_v43 = vpop.f32.mrf.mxu1 }
0x38c1   :  { %v5361_v42 = vpop.f32.mrf.mxu1 }
0x38c2   :  { %v5365_v41 = vpack.c.bf16 %v5361_v42, %v5358_v40  ;;  %v10482_v40 = vld [vmem:[%s12679_s11 + $0x60] sm:$0xff]  }
0x38c3   :  { %v9718_v10 = vpop.f32.mrf.mxu1 }
0x38c5   :  { %v5441_v50 = vpop.f32.mrf.mxu1 }
0x38c6   :  { %v5442_v4 = vadd.f32 %v10478_v12, %v5441_v50 }
0x38c7   :  { %v9733_v20 = vpop.f32.mrf.mxu1 }
0x38c8   :  { %v10484_v20 = vld [vmem:[%s12683_s7 + $0x60] sm:$0xff]  }
0x38c9   :  { %v5444_v1 = vpop.f32.mrf.mxu1 }
0x38ca   :  { %v5445_v32 = vadd.f32 %v10478_v12, %v5444_v1  ;;  %v10485_v1 = vld [vmem:[%s12681_s30 + $0x6] ss:$0 sm:$0xff] }
0x38cb   :  { %v9734_v6 = vpop.f32.mrf.mxu1 }
0x38cc   :  { %v5490_v21 = vpack.c.bf16 %v5445_v32, %v5442_v4 }
0x38ce   :  { %v5495_v19 = vsel %vm623_vm2, %v5490_v21, 0 }
0x38cf   :  { %9744 = vmatpush3.bf16.xpose.msra.mxu1 %v5495_v19 }
0x38d0   :  { %9755 = vmatprep.subr.bf16.mxu1 %v10511_v0 }
0x38d6   :  { %9746 = vmatmul.mubr.msk.bf16.vlgmr.msra.gmra.mxu1 %vm623_vm2, %v5489_v14 }
0x38d7   :  { %9756 = vmatpush3.bf16.msra.mxu1 %v11225_v60  ;;  %9757 = vmatprep.mubr.msk.bf16.mxu1 %vm10512_vm0, %v10511_v0 }
0x38d8   :  { %9767 = vmatprep.subr.bf16.mxu1 %v10511_v0 }
0x3996   :  { %v5531_v9 = vpop.f32.mrf.mxu1 }
0x3997   :  { %v5538_v3 = vmul.f32 0.35355338, %v5531_v9 }
0x3998   :  { %v9747_v22 = vpop.f32.mrf.mxu1 }
0x3999   :  { %v5540_v11 = vadd.f32 %v11906_v2, %v5538_v3 }
0x399a   :  { %v5534_v7 = vpop.f32.mrf.mxu1 }
0x399b   :  { %v5539_v44 = vmul.f32 0.35355338, %v5534_v7  ;;  %v5542_v25 = vsel %vm675_vm3, %v5540_v11, -inf }
0x399c   :  { %5543 = vmax.xlane.f32.xlu0 %v5542_v25  ;;  %v9748_v13 = vpop.f32.mrf.mxu1  ;;  %v10486_v25 = vld [vmem:[%s12682_s2 + $0x6] ss:$0 sm:$0xff] }
0x399d   :  { %v5541_v14 = vadd.f32 %v11913_v53, %v5539_v44 }
0x399f   :  { %v5545_v60 = vsel %vm675_vm3, %v5541_v14, -inf }
0x39a0   :  { %5546 = vmax.xlane.f32.xlu1 %v5545_v60 }
0x3a25   :  { %v5544_v16 = vpop.xlane.xlu0 %5543 }
0x3a26   :  { %v5548_v8 = vsub.f32 %v5540_v11, %v5544_v16 }
0x3a28   :  { %v5550_v26 = vmul.f32 1.442695, %v5548_v8 }
0x3a29   :  { %v5547_v29 = vpop.xlane.xlu1 %5546 }
0x3a2a   :  { %10314 = vpow2.f32 %v5550_v26  ;;  %v5549_v31 = vsub.f32 %v5541_v14, %v5547_v29 }
0x3a2c   :  { %v5552_v34 = vmul.f32 1.442695, %v5549_v31  ;;  %v10487_v31 = vld [vmem:[%s12685_s9 + $0x6] ss:$0 sm:$0xff] }
0x3a2e   :  { %10316 = vpow2.f32 %v5552_v34 }
0x3a37   :  { %v10315_v37 = vpop.eup %10314 }
0x3a38   :  { %v5554_v38 = vsel %vm675_vm3, %v10315_v37, 0.0 }
0x3a39   :  { %5555 = vadd.xlane.f32.xlu0 %v5554_v38 }
0x3a3b   :  { %v10317_v39 = vpop.eup %10316 }
0x3a3c   :  { %v5557_v45 = vsel %vm675_vm3, %v10317_v39, 0.0 }
0x3a3d   :  { %5558 = vadd.xlane.f32.xlu1 %v5557_v45 }
0x3ac2   :  { %v5556_v47 = vpop.xlane.xlu0 %5555 }
0x3ac3   :  { %10318 = vrcp.f32 %v5556_v47 }
0x3ac6   :  { %v5559_v51 = vpop.xlane.xlu1 %5558 }
0x3ac7   :  { %10320 = vrcp.f32 %v5559_v51 }
0x3ad0   :  { %v10319_v30 = vpop.eup %10318 }
0x3ad1   :  { %v5562_v52 = vmul.f32 %v10319_v30, %v10315_v37 }
0x3ad4   :  { %v10321_v46 = vpop.eup %10320 }
0x3ad5   :  { %v5563_v27 = vmul.f32 %v10321_v46, %v10317_v39 }
0x3ad7   :  { %v5564_v54 = vpack.c.bf16 %v5563_v27, %v5562_v52 }
0x3ad9   :  { %9752 = vmatmul.mubr.msk.bf16.vlgmr.msra.gmra.mxu0 %vm675_vm3, %v5564_v54 }
0x3ada   :  { %9762 = vmatpush3.bf16.msra.mxu0 %v11199_v58  ;;  %9763 = vmatprep.mubr.msk.bf16.mxu0 %vm10512_vm0, %v10511_v0  ;;  %v10480_v58 = vld [vmem:[%s12678_s13 + $0x60] sm:$0xff]  }
0x3adb   :  { %9775 = vmatprep.subr.bf16.mxu0 %v10511_v0 }
0x3ae1   :  { %9764 = vmatmul.mubr.msk.bf16.vlgmr.msra.gmra.mxu0 %vm623_vm2, %v5365_v41  ;;  %v10483_v41 = vld [vmem:[%s12683_s7 + $0x68] sm:$0xff]  }
0x3ae2   :  { %9776 = vmatpush3.bf16.msra.mxu0 %v10479_v36  ;;  %9779 = vmatprep.mubr.msk.bf16.mxu0 %vm10512_vm0, %v10511_v0 }
0x3ae3   :  { %9777 = vmatprep.subr.bf16.mxu0 %v10511_v0 }
0x3ae6   :  { %9778 = vmatpush3.bf16.msra.mxu0 %v10480_v58 }
0x3ae7   :  { %9791 = vmatprep.subr.bf16.mxu0 %v10511_v0 }
0x3ae9   :  { %9780 = vmatmul.mubr.msk.bf16.vlgmr.msra.gmra.mxu0 %vm458_vm1, %v11842_v23 }
0x3aea   :  { %9793 = vmatprep.mubr.msk.bf16.mxu0 %vm10512_vm0, %v10511_v0 }
0x3b99   :  { %v5603_v49 = vpop.f32.mrf.mxu0 }
0x3b9b   :  { %v9753_v55 = vpop.f32.mrf.mxu0 }
0x3b9d   :  { %v5606_v56 = vpop.f32.mrf.mxu0 }
0x3b9e   :  { %v5610_v57 = vpack.c.bf16 %v5606_v56, %v5603_v49 }
0x3b9f   :  { %v9754_v59 = vpop.f32.mrf.mxu0 }
0x3ba0   :  { %9758 = vmatmul.mubr.msk.bf16.vlgmr.msra.gmra.mxu1 %vm623_vm2, %v5610_v57 }
0x3ba1   :  { %v11984_v33 = vpop.f32.mrf.mxu0  ;;  %9768 = vmatpush3.bf16.msra.mxu1 %v10481_v63  ;;  %9771 = vmatprep.mubr.msk.bf16.mxu1 %vm10512_vm0, %v10511_v0 }
0x3ba2   :  { %9769 = vmatprep.subr.bf16.mxu1 %v10511_v0 }
0x3ba3   :  { %v9765_v17 = vpop.f32.mrf.mxu0 }
0x3ba5   :  { %v11992_v61 = vpop.f32.mrf.mxu0  ;;  %9770 = vmatpush3.bf16.msra.mxu1 %v10482_v40 }
0x3ba6   :  { %9783 = vmatprep.subr.bf16.mxu1 %v10511_v0 }
0x3ba7   :  { %v9766_v43 = vpop.f32.mrf.mxu0 }
0x3ba8   :  { %9772 = vmatmul.mubr.msk.bf16.vlgmr.msra.gmra.mxu1 %vm458_vm1, %v11842_v23 }
0x3ba9   :  { %v5774_v42 = vpop.f32.mrf.mxu0  ;;  %9784 = vmatpush3.bf16.msra.mxu1 %v10483_v41  ;;  %9787 = vmatprep.mubr.msk.bf16.mxu1 %vm10512_vm0, %v10511_v0 }
0x3baa   :  { %9785 = vmatprep.subr.bf16.mxu1 %v10511_v0  ;;  %v5775_v12 = vadd.f32 %v10485_v1, %v5774_v42 }
0x3bab   :  { %v9781_v10 = vpop.f32.mrf.mxu0 }
0x3bad   :  { %v5777_v50 = vpop.f32.mrf.mxu0  ;;  %9786 = vmatpush3.bf16.msra.mxu1 %v10484_v20 }
0x3bae   :  { %v5778_v4 = vadd.f32 %v10485_v1, %v5777_v50  ;;  %9797 = vmatprep.subr.bf16.mxu1 %v10511_v0 }
0x3baf   :  { %v9782_v32 = vpop.f32.mrf.mxu0 }
0x3bb0   :  { %v5823_v6 = vpack.c.bf16 %v5778_v4, %v5775_v12  ;;  %9788 = vmatmul.mubr.msk.bf16.vlgmr.msra.gmra.mxu1 %vm458_vm1, %v11842_v23  ;;  %v10488_v4 = vld [vmem:[%s12679_s11 + $0x78] sm:$0xff]   ;;  %v10489_v32 = vld [vmem:[%s12679_s11 + $0x70] sm:$0xff]  }
0x3bb1   :  { %9799 = vmatprep.mubr.msk.bf16.mxu1 %vm10512_vm0, %v10511_v0 }
0x3bb2   :  { %v5828_v21 = vsel %vm623_vm2, %v5823_v6, 0  ;;  %v10490_v6 = vld [vmem:[%s12683_s7 + $0x78] sm:$0xff]  }
0x3bb3   :  { %9792 = vmatpush3.bf16.xpose.msra.mxu0 %v5828_v21  ;;  %v10491_v21 = vld [vmem:[%s12683_s7 + $0x70] sm:$0xff]  }
0x3bb4   :  { %9803 = vmatprep.subr.bf16.mxu0 %v10511_v0 }
0x3c60   :  { %v12019_v19 = vpop.f32.mrf.mxu1 }
0x3c62   :  { %v9759_v9 = vpop.f32.mrf.mxu1 }
0x3c64   :  { %v12021_v3 = vpop.f32.mrf.mxu1 }
0x3c66   :  { %v9760_v22 = vpop.f32.mrf.mxu1 }
0x3c68   :  { %v5733_v11 = vpop.f32.mrf.mxu1 }
0x3c69   :  { %v5734_v13 = vadd.f32 %v10486_v25, %v5733_v11 }
0x3c6a   :  { %v9773_v7 = vpop.f32.mrf.mxu1 }
0x3c6c   :  { %v5736_v44 = vpop.f32.mrf.mxu1 }
0x3c6d   :  { %v5737_v14 = vadd.f32 %v10486_v25, %v5736_v44 }
0x3c6e   :  { %v9774_v60 = vpop.f32.mrf.mxu1 }
0x3c6f   :  { %v5822_v16 = vpack.c.bf16 %v5737_v14, %v5734_v13  ;;  %v10492_v13 = vld [vmem:[%s12678_s13 + $0x78] sm:$0xff]  }
0x3c70   :  { %v5815_v8 = vpop.f32.mrf.mxu1 }
0x3c71   :  { %9794 = vmatmul.mubr.msk.bf16.vlgmr.msra.gmra.mxu0 %vm623_vm2, %v5822_v16  ;;  %v5816_v34 = vadd.f32 %v10487_v31, %v5815_v8  ;;  %v10493_v16 = vld [vmem:[%s12678_s13 + $0x70] sm:$0xff]   ;;  %v10494_v8 = vld [vmem:[%s12682_s2 + $0x7] ss:$0 sm:$0xff] }
0x3c72   :  { %v9789_v26 = vpop.f32.mrf.mxu1  ;;  %9804 = vmatpush3.bf16.msra.mxu0 %v11316_v24  ;;  %9805 = vmatprep.mubr.msk.bf16.mxu0 %vm10512_vm0, %v10511_v0 }
0x3c73   :  { %9817 = vmatprep.subr.bf16.mxu0 %v10511_v0 }
0x3c74   :  { %v5818_v29 = vpop.f32.mrf.mxu1 }
0x3c75   :  { %v5819_v37 = vadd.f32 %v10487_v31, %v5818_v29 }
0x3c76   :  { %v9790_v38 = vpop.f32.mrf.mxu1 }
0x3c77   :  { %v5898_v39 = vpack.c.bf16 %v5819_v37, %v5816_v34 }
0x3c79   :  { %9798 = vmatpush3.bf16.msra.mxu1 %v5898_v39 }
0x3c7a   :  { %9809 = vmatprep.subr.bf16.mxu1 %v10511_v0 }
0x3d31   :  { %v5864_v45 = vpop.f32.mrf.mxu0 }
0x3d32   :  { %v5871_v47 = vmul.f32 0.35355338, %v5864_v45  ;;  %v10495_v45 = vld [vmem:[%s12685_s9 + $0x7] ss:$0 sm:$0xff] }
0x3d33   :  { %v9795_v24 = vpop.f32.mrf.mxu0 }
0x3d34   :  { %v5873_v51 = vadd.f32 %v11906_v2, %v5871_v47 }
0x3d35   :  { %v5867_v30 = vpop.f32.mrf.mxu0 }
0x3d36   :  { %v5872_v46 = vmul.f32 0.35355338, %v5867_v30  ;;  %v5875_v52 = vsel %vm675_vm3, %v5873_v51, -inf }
0x3d37   :  { %5876 = vmax.xlane.f32.xlu0 %v5875_v52  ;;  %v9796_v27 = vpop.f32.mrf.mxu0 }
0x3d38   :  { %v5874_v54 = vadd.f32 %v11913_v53, %v5872_v46 }
0x3d3a   :  { %v5878_v36 = vsel %vm675_vm3, %v5874_v54, -inf }
0x3d3b   :  { %5879 = vmax.xlane.f32.xlu1 %v5878_v36 }
0x3dc0   :  { %v5877_v58 = vpop.xlane.xlu0 %5876 }
0x3dc1   :  { %v5881_v49 = vsub.f32 %v5873_v51, %v5877_v58 }
0x3dc3   :  { %v5883_v55 = vmul.f32 1.442695, %v5881_v49 }
0x3dc4   :  { %v5880_v56 = vpop.xlane.xlu1 %5879 }
0x3dc5   :  { %10322 = vpow2.f32 %v5883_v55  ;;  %v5882_v57 = vsub.f32 %v5874_v54, %v5880_v56  ;;  %v5696_v54 = vadd.f32 %v11992_v61, %v12021_v3 }
0x3dc7   :  { %v5885_v59 = vmul.f32 1.442695, %v5882_v57 }
0x3dc9   :  { %10324 = vpow2.f32 %v5885_v59  ;;  %v10496_v59 = vld [vmem:[%s12681_s30 + $0x7] ss:$0 sm:$0xff] }
0x3dd2   :  { %v10323_v63 = vpop.eup %10322 }
0x3dd3   :  { %v5887_v17 = vsel %vm675_vm3, %v10323_v63, 0.0 }
0x3dd4   :  { %5888 = vadd.xlane.f32.xlu0 %v5887_v17 }
0x3dd6   :  { %v10325_v40 = vpop.eup %10324 }
0x3dd7   :  { %v5890_v43 = vsel %vm675_vm3, %v10325_v40, 0.0 }
0x3dd8   :  { %5891 = vadd.xlane.f32.xlu1 %v5890_v43 }
0x3e5d   :  { %v5889_v42 = vpop.xlane.xlu0 %5888 }
0x3e5e   :  { %10326 = vrcp.f32 %v5889_v42 }
0x3e61   :  { %v5892_v41 = vpop.xlane.xlu1 %5891 }
0x3e62   :  { %10328 = vrcp.f32 %v5892_v41 }
0x3e6b   :  { %v10327_v10 = vpop.eup %10326 }
0x3e6c   :  { %v5895_v20 = vmul.f32 %v10327_v10, %v10323_v63 }
0x3e6f   :  { %v10329_v50 = vpop.eup %10328 }
0x3e70   :  { %v5896_v1 = vmul.f32 %v10329_v50, %v10325_v40 }
0x3e72   :  { %v5897_v12 = vpack.c.bf16 %v5896_v1, %v5895_v20 }
0x3e74   :  { %9800 = vmatmul.mubr.msk.bf16.vlgmr.msra.gmra.mxu1 %vm675_vm3, %v5897_v12 }
0x3e75   :  { %9810 = vmatpush3.bf16.msra.mxu1 %v10488_v4  ;;  %9813 = vmatprep.mubr.msk.bf16.mxu1 %vm10512_vm0, %v10511_v0 }
0x3e76   :  { %9811 = vmatprep.subr.bf16.mxu1 %v10511_v0 }
0x3e79   :  { %9812 = vmatpush3.bf16.msra.mxu1 %v10489_v32 }
0x3e7a   :  { %9825 = vmatprep.subr.bf16.mxu1 %v10511_v0 }
0x3e7c   :  { %9814 = vmatmul.mubr.msk.bf16.vlgmr.msra.gmra.mxu1 %vm458_vm1, %v11842_v23 }
0x3e7d   :  { %9826 = vmatpush3.bf16.msra.mxu1 %v10490_v6  ;;  %9829 = vmatprep.mubr.msk.bf16.mxu1 %vm10512_vm0, %v10511_v0 }
0x3e7e   :  { %9827 = vmatprep.subr.bf16.mxu1 %v10511_v0 }
0x3e81   :  { %9828 = vmatpush3.bf16.msra.mxu1 %v10491_v21 }
0x3e82   :  { %9839 = vmatprep.subr.bf16.mxu1 %v10511_v0 }
0x3e84   :  { %9830 = vmatmul.mubr.msk.bf16.vlgmr.msra.gmra.mxu1 %vm458_vm1, %v11842_v23 }
0x3e85   :  { %9841 = vmatprep.mubr.msk.bf16.mxu1 %vm10512_vm0, %v10511_v0 }
0x3f34   :  { %v5936_v9 = vpop.f32.mrf.mxu1 }
0x3f36   :  { %v9801_v22 = vpop.f32.mrf.mxu1 }
0x3f38   :  { %v5939_v11 = vpop.f32.mrf.mxu1 }
0x3f39   :  { %v5943_v7 = vpack.c.bf16 %v5939_v11, %v5936_v9 }
0x3f3a   :  { %v9802_v44 = vpop.f32.mrf.mxu1 }
0x3f3b   :  { %9806 = vmatmul.mubr.msk.bf16.vlgmr.msra.gmra.mxu0 %vm623_vm2, %v5943_v7 }
0x3f3c   :  { %v6024_v25 = vpop.f32.mrf.mxu1  ;;  %9818 = vmatpush3.bf16.msra.mxu0 %v10492_v13  ;;  %9821 = vmatprep.mubr.msk.bf16.mxu0 %vm10512_vm0, %v10511_v0 }
0x3f3d   :  { %9819 = vmatprep.subr.bf16.mxu0 %v10511_v0  ;;  %v6025_v26 = vadd.f32 %v10494_v8, %v6024_v25 }
0x3f3e   :  { %v9815_v14 = vpop.f32.mrf.mxu1 }
0x3f40   :  { %v6027_v60 = vpop.f32.mrf.mxu1  ;;  %9820 = vmatpush3.bf16.msra.mxu0 %v10493_v16 }
0x3f41   :  { %v6028_v29 = vadd.f32 %v10494_v8, %v6027_v60  ;;  %9833 = vmatprep.subr.bf16.mxu0 %v10511_v0  ;;  %v10497_v8 = vld [vmem:[%s12688_s14 + $0x18] sm:$0xff]  }
0x3f42   :  { %v9816_v31 = vpop.f32.mrf.mxu1 }
0x3f43   :  { %v6113_v34 = vpack.c.bf16 %v6028_v29, %v6025_v26  ;;  %9822 = vmatmul.mubr.msk.bf16.vlgmr.msra.gmra.mxu0 %vm458_vm1, %v11842_v23  ;;  %v5693_v23 = vadd.f32 %v11984_v33, %v12019_v19  ;;  %v10498_v26 = vld [vmem:[%s12688_s14 + $0x10] sm:$0xff]  }
0x3f44   :  { %v6106_v37 = vpop.f32.mrf.mxu1  ;;  %9835 = vmatprep.mubr.msk.bf16.mxu0 %vm10512_vm0, %v10511_v0 }
0x3f45   :  { %v6107_v47 = vadd.f32 %v10495_v45, %v6106_v37 }
0x3f46   :  { %v9831_v38 = vpop.f32.mrf.mxu1 }
0x3f48   :  { %v6109_v39 = vpop.f32.mrf.mxu1 }
0x3f49   :  { %v6110_v24 = vadd.f32 %v10495_v45, %v6109_v39  ;;  %v10499_v39 = vld [vmem:[%s12633_s19 + $0x38] sm:$0xff]   ;;  %v10500_v45 = vld [vmem:[%s12633_s19 + $0x30] sm:$0xff]  }
0x3f4a   :  { %v9832_v51 = vpop.f32.mrf.mxu1 }
0x3f4b   :  { %v6189_v30 = vpack.c.bf16 %v6110_v24, %v6107_v47  ;;  %v10501_v47 = vld [vmem:[%s12633_s19 + $0x28] sm:$0xff]   ;;  %v10502_v24 = vld [vmem:[%s12633_s19 + $0x20] sm:$0xff]  }
0x3f4d   :  { %9840 = vmatpush3.bf16.msra.mxu1 %v6189_v30 }
0x3f4e   :  { %9851 = vmatprep.subr.bf16.mxu1 %v10511_v0 }
0x3ffb   :  { %v5981_v46 = vpop.f32.mrf.mxu0 }
0x3ffc   :  { %v12092_v52 = vadd.f32 %v5981_v46, %v5693_v23  ;;  %v10503_v46 = vld [vmem:[%s12687_s12 + $0x1] ss:$0 sm:$0xff] }
0x3ffd   :  { %v9807_v27 = vpop.f32.mrf.mxu0 }
0x3fff   :  { %v5984_v36 = vpop.f32.mrf.mxu0 }
0x4000   :  { %v12096_v58 = vadd.f32 %v5984_v36, %v5696_v54 }
0x4001   :  { %v9808_v49 = vpop.f32.mrf.mxu0 }
0x4003   :  { %v6065_v55 = vpop.f32.mrf.mxu0 }
0x4004   :  { %v6066_v63 = vadd.f32 %v10496_v59, %v6065_v55 }
0x4005   :  { %v9823_v56 = vpop.f32.mrf.mxu0 }
0x4007   :  { %v6068_v57 = vpop.f32.mrf.mxu0 }
0x4008   :  { %v6069_v33 = vadd.f32 %v10496_v59, %v6068_v57 }
0x4009   :  { %v9824_v19 = vpop.f32.mrf.mxu0 }
0x400a   :  { %v6114_v17 = vpack.c.bf16 %v6069_v33, %v6066_v63 }
0x400c   :  { %v6119_v40 = vsel %vm623_vm2, %v6114_v17, 0 }
0x400d   :  { %9834 = vmatpush3.bf16.xpose.msra.mxu0 %v6119_v40 }
0x400e   :  { %9845 = vmatprep.subr.bf16.mxu0 %v10511_v0 }
0x4014   :  { %9836 = vmatmul.mubr.msk.bf16.vlgmr.msra.gmra.mxu0 %vm623_vm2, %v6113_v34 }
0x4015   :  { %9846 = vmatpush3.bf16.msra.mxu0 %v11371_v48  ;;  %9847 = vmatprep.mubr.msk.bf16.mxu0 %vm10512_vm0, %v10511_v0 }
0x4016   :  { %9859 = vmatprep.subr.bf16.mxu0 %v10511_v0 }
0x40d4   :  { %v6155_v61 = vpop.f32.mrf.mxu0 }
0x40d5   :  { %v6162_v3 = vmul.f32 0.35355338, %v6155_v61 }
0x40d6   :  { %v9837_v43 = vpop.f32.mrf.mxu0 }
0x40d7   :  { %v6164_v42 = vadd.f32 %v11906_v2, %v6162_v3 }
0x40d8   :  { %v6158_v41 = vpop.f32.mrf.mxu0 }
0x40d9   :  { %v6163_v10 = vmul.f32 0.35355338, %v6158_v41  ;;  %v6166_v50 = vsel %vm675_vm3, %v6164_v42, -inf }
0x40da   :  { %6167 = vmax.xlane.f32.xlu0 %v6166_v50  ;;  %v9838_v20 = vpop.f32.mrf.mxu0 }
0x40db   :  { %v6165_v1 = vadd.f32 %v11913_v53, %v6163_v10 }
0x40dd   :  { %v6169_v48 = vsel %vm675_vm3, %v6165_v1, -inf }
0x40de   :  { %6170 = vmax.xlane.f32.xlu1 %v6169_v48 }
0x4163   :  { %v6168_v12 = vpop.xlane.xlu0 %6167 }
0x4164   :  { %v6172_v4 = vsub.f32 %v6164_v42, %v6168_v12 }
0x4166   :  { %v6174_v32 = vmul.f32 1.442695, %v6172_v4  ;;  %v10504_v4 = vld [vmem:[%s12689_s15 + $0x1] ss:$0 sm:$0xff] }
0x4167   :  { %v6171_v6 = vpop.xlane.xlu1 %6170 }
0x4168   :  { %10330 = vpow2.f32 %v6174_v32  ;;  %v6173_v21 = vsub.f32 %v6165_v1, %v6171_v6 }
0x416a   :  { %v6176_v9 = vmul.f32 1.442695, %v6173_v21 }
0x416c   :  { %10332 = vpow2.f32 %v6176_v9  ;;  %v10505_v9 = vld [vmem:[%s12632_s16 + $0x1] ss:$0 sm:$0xff] }
0x4175   :  { %v10331_v2 = vpop.eup %10330 }
0x4176   :  { %v6178_v22 = vsel %vm675_vm3, %v10331_v2, 0.0 }
0x4177   :  { %6179 = vadd.xlane.f32.xlu0 %v6178_v22 }
0x4179   :  { %v10333_v11 = vpop.eup %10332 }
0x417a   :  { %v6181_v7 = vsel %vm675_vm3, %v10333_v11, 0.0 }
0x417b   :  { %6182 = vadd.xlane.f32.xlu1 %v6181_v7 }
0x4200   :  { %v6180_v53 = vpop.xlane.xlu0 %6179 }
0x4201   :  { %10334 = vrcp.f32 %v6180_v53  ;;  %v10506_v53 = vld [vmem:[%s12634_s18 + $0x1] ss:$0 sm:$0xff] }
0x4204   :  { %v6183_v44 = vpop.xlane.xlu1 %6182 }
0x4205   :  { %10336 = vrcp.f32 %v6183_v44 }
0x420e   :  { %v10335_v25 = vpop.eup %10334 }
0x420f   :  { %v6186_v14 = vmul.f32 %v10335_v25, %v10331_v2 }
0x4212   :  { %v10337_v13 = vpop.eup %10336 }
0x4213   :  { %v6187_v60 = vmul.f32 %v10337_v13, %v10333_v11 }
0x4215   :  { %v6188_v16 = vpack.c.bf16 %v6187_v60, %v6186_v14 }
0x4217   :  { %9842 = vmatmul.mubr.msk.bf16.vlgmr.msra.gmra.mxu1 %vm675_vm3, %v6188_v16 }
0x4218   :  { %9852 = vmatpush3.bf16.msra.mxu1 %v10497_v8  ;;  %9855 = vmatprep.mubr.msk.bf16.mxu1 %vm10512_vm0, %v10511_v0 }
0x4219   :  { %9853 = vmatprep.subr.bf16.mxu1 %v10511_v0 }
0x421c   :  { %9854 = vmatpush3.bf16.msra.mxu1 %v10498_v26 }
0x421d   :  { %9871 = vmatprep.subr.bf16.mxu1 %v10511_v0 }
0x42d7   :  { %v6227_v29 = vpop.f32.mrf.mxu1 }
0x42d9   :  { %v9843_v31 = vpop.f32.mrf.mxu1 }
0x42db   :  { %v6230_v34 = vpop.f32.mrf.mxu1 }
0x42dc   :  { %v6234_v37 = vpack.c.bf16 %v6230_v34, %v6227_v29 }
0x42dd   :  { %v9844_v38 = vpop.f32.mrf.mxu1 }
0x42de   :  { %9848 = vmatmul.mubr.msk.bf16.vlgmr.msra.gmra.mxu0 %vm623_vm2, %v6234_v37 }
0x42df   :  { %9860 = vmatpush3.bf16.msra.mxu0 %v10499_v39  ;;  %9867 = vmatprep.mubr.msk.bf16.mxu0 %vm10512_vm0, %v10511_v0 }
0x42e0   :  { %9861 = vmatprep.subr.bf16.mxu0 %v10511_v0 }
0x42e3   :  { %9862 = vmatpush3.bf16.msra.mxu0 %v10500_v45 }
0x42e4   :  { %9863 = vmatprep.subr.bf16.mxu0 %v10511_v0 }
0x42e7   :  { %9864 = vmatpush3.bf16.msra.mxu0 %v10501_v47 }
0x42e8   :  { %9865 = vmatprep.subr.bf16.mxu0 %v10511_v0 }
0x42eb   :  { %9866 = vmatpush3.bf16.msra.mxu0 %v10502_v24 }
0x42ec   :  { %9887 = vmatprep.subr.bf16.mxu0 %v10511_v0 }
0x439e   :  { %v6272_v51 = vpop.f32.mrf.mxu0 }
0x439f   :  { %v6279_v30 = vadd.f32 %v6272_v51, %v12092_v52 }
0x43a0   :  { %v9849_v23 = vpop.f32.mrf.mxu0 }
0x43a1   :  { %v6281_v27 = vadd.f32 %v10503_v46, %v6279_v30 }
0x43a2   :  { %v6275_v54 = vpop.f32.mrf.mxu0 }
0x43a3   :  { %v6280_v36 = vadd.f32 %v6275_v54, %v12096_v58  ;;  %v6283_v49 = vadd.f32 %v6281_v27, %v11836_v5 }
0x43a4   :  { %v9850_v55 = vpop.f32.mrf.mxu0 }
0x43a5   :  { %v6282_v56 = vadd.f32 %v10503_v46, %v6280_v36  ;;  %v6285_v57 = vsel %vm458_vm1, %v6283_v49, 0.0 }
0x43a6   :  { %6286 = vadd.xlane.f32.xlu0 %v6285_v57 }
0x43a7   :  { %v6284_v59 = vadd.f32 %v6282_v56, %v11838_v18 }
0x43a9   :  { %v6288_v52 = vsel %vm458_vm1, %v6284_v59, 0.0 }
0x43aa   :  { %6289 = vadd.xlane.f32.xlu1 %v6288_v52 }
0x442f   :  { %v6287_v63 = vpop.xlane.xlu0 %6286 }
0x4430   :  { %v6291_v33 = vmul.f32 0.03125, %v6287_v63 }
0x4432   :  { %v6293_v19 = vsub.f32 %v6283_v49, %v6291_v33  ;;  %v12173_v49 = vld [vmem:[%s12635_s20 + $0x1] ss:$0 sm:$0xff] }
0x4433   :  { %v6290_v17 = vpop.xlane.xlu1 %6289 }
0x4434   :  { %v6292_v40 = vmul.f32 0.03125, %v6290_v17  ;;  %v6295_v61 = vmul.f32 %v6293_v19, %v6293_v19 }
0x4436   :  { %v6294_v3 = vsub.f32 %v6284_v59, %v6292_v40  ;;  %v6297_v58 = vsel %vm458_vm1, %v6295_v61, 0.0 }
0x4437   :  { %6298 = vadd.xlane.f32.xlu0 %v6297_v58 }
0x4438   :  { %v6296_v5 = vmul.f32 %v6294_v3, %v6294_v3 }
0x443a   :  { %v6300_v43 = vsel %vm458_vm1, %v6296_v5, 0.0 }
0x443b   :  { %6301 = vadd.xlane.f32.xlu1 %v6300_v43 }
0x44c0   :  { %v6299_v42 = vpop.xlane.xlu0 %6298 }
0x44c1   :  { %v6303_v41 = vmul.f32 0.03125, %v6299_v42 }
0x44c3   :  { %v6305_v18 = vadd.f32 1e-12, %v6303_v41 }
0x44c4   :  { %v6302_v10 = vpop.xlane.xlu1 %6301 }
0x44c5   :  { %10338 = vrsqrt.f32 %v6305_v18  ;;  %v6304_v50 = vmul.f32 0.03125, %v6302_v10 }
0x44c7   :  { %v6306_v20 = vadd.f32 1e-12, %v6304_v50 }
0x44c9   :  { %10340 = vrsqrt.f32 %v6306_v20  ;;  %v10140_v20 = vld [vmem:[%s12679_s11 + $0x88] sm:$0xff]  }
0x44d2   :  { %v10339_v1 = vpop.eup %10338 }
0x44d3   :  { %v6309_v48 = vmul.f32 %v10339_v1, %v6293_v19  ;;  %v10141_v1 = vld [vmem:[%s12683_s7 + $0x88] sm:$0xff]  }
0x44d5   :  { %v6311_v32 = vmul.f32 %v10504_v4, %v6309_v48  ;;  %v10142_v48 = vld [vmem:[%s12679_s11 + $0x80] sm:$0xff]  }
0x44d6   :  { %v10341_v12 = vpop.eup %10340 }
0x44d7   :  { %v6310_v6 = vmul.f32 %v10341_v12, %v6294_v3  ;;  %v6313_v2 = vadd.f32 %v10505_v9, %v6311_v32  ;;  %v10143_v12 = vld [vmem:[%s12683_s7 + $0x80] sm:$0xff]  }
0x44d9   :  { %v6312_v21 = vmul.f32 %v10504_v4, %v6310_v6 }
0x44db   :  { %v6314_v22 = vadd.f32 %v10505_v9, %v6312_v21 }
0x44dd   :  { %v6315_v11 = vpack.c.bf16 %v6314_v22, %v6313_v2 }
0x44df   :  { %9856 = vmatmul.mubr.msk.bf16.vlgmr.msra.gmra.mxu1 %vm458_vm1, %v6315_v11 }
0x44e0   :  { %9875 = vmatprep.mubr.msk.bf16.mxu1 %vm10512_vm0, %v10511_v0  ;;  %9872 = vmatpush3.bf16.msra.mxu1 %v10140_v20 }
0x44e1   :  { %9873 = vmatprep.subr.bf16.mxu1 %v10511_v0 }
0x44e4   :  { %9874 = vmatpush3.bf16.msra.mxu1 %v10142_v48 }
0x44e5   :  { %9879 = vmatprep.subr.bf16.mxu1 %v10511_v0 }
0x459f   :  { %v6353_v7 = vpop.f32.mrf.mxu1 }
0x45a0   :  { %v6354_v44 = vadd.f32 %v10506_v53, %v6353_v7  ;;  %v8634_v7 = vld [vmem:[%s12636_s21 + $0x1] ss:$0 sm:$0xff] }
0x45a1   :  { %v9857_v25 = vpop.f32.mrf.mxu1 }
0x45a2   :  { %v6362_v13 = vmul.f32 0.044715, %v6354_v44  ;;  %v6360_v30 = vmul.f32 0.5, %v6354_v44 }
0x45a3   :  { %v6356_v14 = vpop.f32.mrf.mxu1 }
0x45a4   :  { %v6364_v60 = vmul.f32 %v6362_v13, %v6354_v44  ;;  %v6357_v16 = vadd.f32 %v10506_v53, %v6356_v14  ;;  %v8635_v13 = vld [vmem:[%s12637_s22 + $0x1] ss:$0 sm:$0xff] }
0x45a5   :  { %v9858_v8 = vpop.f32.mrf.mxu1 }
0x45a6   :  { %v6366_v26 = vmul.f32 %v6364_v60, %v6354_v44  ;;  %v6363_v29 = vmul.f32 0.044715, %v6357_v16  ;;  %v6361_v23 = vmul.f32 0.5, %v6357_v16  ;;  %v10144_v8 = vld [vmem:[%s12678_s13 + $0x88] sm:$0xff]  }
0x45a8   :  { %v6368_v31 = vadd.f32 %v6366_v26, %v6354_v44  ;;  %v6365_v34 = vmul.f32 %v6363_v29, %v6357_v16  ;;  %v10145_v29 = vld [vmem:[%s12678_s13 + $0x80] sm:$0xff]  }
0x45aa   :  { %v6370_v37 = vmul.f32 0.7978846, %v6368_v31  ;;  %v6367_v38 = vmul.f32 %v6365_v34, %v6357_v16 }
0x45ac   :  { %10342 = vtanh.f32 %v6370_v37  ;;  %v6369_v39 = vadd.f32 %v6367_v38, %v6357_v16  ;;  %v8698_v37 = vld [vmem:[%s12685_s9 + $0x8] ss:$0 sm:$0xff] }
0x45ae   :  { %v6371_v45 = vmul.f32 0.7978846, %v6369_v39 }
0x45b0   :  { %10344 = vtanh.f32 %v6371_v45 }
0x45b9   :  { %v10343_v47 = vpop.eup %10342 }
0x45ba   :  { %v6374_v24 = vadd.f32 1.0, %v10343_v47 }
0x45bc   :  { %v6376_v27 = vmul.f32 %v6374_v24, %v6360_v30 }
0x45bd   :  { %v10345_v51 = vpop.eup %10344 }
0x45be   :  { %v6375_v46 = vadd.f32 1.0, %v10345_v51 }
0x45c0   :  { %v6377_v54 = vmul.f32 %v6375_v46, %v6361_v23 }
0x45c2   :  { %v6378_v36 = vpack.c.bf16 %v6377_v54, %v6376_v27  ;;  %v8694_v54 = vld [vmem:[%s12681_s30 + $0x8] ss:$0 sm:$0xff] }
0x45c4   :  { %9868 = vmatmul.mubr.msk.bf16.vlgmr.msra.gmra.mxu0 %vm2000_vm5, %v6378_v36 }
0x45c5   :  { %9891 = vmatprep.mubr.msk.bf16.mxu0 %vm10512_vm0, %v10511_v0  ;;  %9888 = vmatpush3.bf16.msra.mxu0 %v10141_v1 }
0x45c6   :  { %9889 = vmatprep.subr.bf16.mxu0 %v10511_v0 }
0x45c9   :  { %9890 = vmatpush3.bf16.msra.mxu0 %v10143_v12  ;;  %v12280_v12 = vld [vmem:[%s12641_s3 + $0x8] sm:$0xff] }
0x45ca   :  { %9901 = vmatprep.subr.bf16.mxu0 %v10511_v0 }
0x4684   :  { %v6416_v55 = vpop.f32.mrf.mxu0 }
0x4685   :  { %v6417_v56 = vadd.f32 %v12173_v49, %v6416_v55 }
0x4686   :  { %v9869_v57 = vpop.f32.mrf.mxu0 }
0x4687   :  { %v6423_v59 = vadd.f32 %v6417_v56, %v6313_v2 }
0x4688   :  { %v6419_v52 = vpop.f32.mrf.mxu0 }
0x4689   :  { %v6420_v63 = vadd.f32 %v12173_v49, %v6419_v52  ;;  %v6425_v33 = vsel %vm458_vm1, %v6423_v59, 0.0 }
0x468a   :  { %6426 = vadd.xlane.f32.xlu0 %v6425_v33  ;;  %v9870_v19 = vpop.f32.mrf.mxu0  ;;  %v8690_v33 = vld [vmem:[%s12682_s2 + $0x8] ss:$0 sm:$0xff] }
0x468b   :  { %v6424_v17 = vadd.f32 %v6420_v63, %v6314_v22 }
0x468d   :  { %v6428_v40 = vsel %vm458_vm1, %v6424_v17, 0.0 }
0x468e   :  { %6429 = vadd.xlane.f32.xlu1 %v6428_v40  ;;  %v10146_v40 = vld [vmem:[%s12679_s11 + $0x98] sm:$0xff]  }
0x4713   :  { %v6427_v61 = vpop.xlane.xlu0 %6426 }
0x4714   :  { %v6431_v3 = vmul.f32 0.03125, %v6427_v61 }
0x4716   :  { %v6433_v58 = vsub.f32 %v6423_v59, %v6431_v3  ;;  %v10147_v3 = vld [vmem:[%s12679_s11 + $0x90] sm:$0xff]  }
0x4717   :  { %v6430_v5 = vpop.xlane.xlu1 %6429 }
0x4718   :  { %v6432_v43 = vmul.f32 0.03125, %v6430_v5  ;;  %v6435_v42 = vmul.f32 %v6433_v58, %v6433_v58  ;;  %v10149_v5 = vld [vmem:[%s12683_s7 + $0x90] sm:$0xff]  }
0x471a   :  { %v6434_v41 = vsub.f32 %v6424_v17, %v6432_v43  ;;  %v6437_v18 = vsel %vm458_vm1, %v6435_v42, 0.0 }
0x471b   :  { %6438 = vadd.xlane.f32.xlu0 %v6437_v18  ;;  %v12273_v18 = vld [vmem:[%s12641_s3] sm:$0xff] }
0x471c   :  { %v6436_v10 = vmul.f32 %v6434_v41, %v6434_v41 }
0x471e   :  { %v6440_v50 = vsel %vm458_vm1, %v6436_v10, 0.0 }
0x471f   :  { %6441 = vadd.xlane.f32.xlu1 %v6440_v50 }
0x47a4   :  { %v6439_v4 = vpop.xlane.xlu0 %6438 }
0x47a5   :  { %v6443_v32 = vmul.f32 0.03125, %v6439_v4 }
0x47a7   :  { %v6445_v6 = vadd.f32 1e-12, %v6443_v32 }
0x47a8   :  { %v6442_v21 = vpop.xlane.xlu1 %6441 }
0x47a9   :  { %10346 = vrsqrt.f32 %v6445_v6  ;;  %v6444_v9 = vmul.f32 0.03125, %v6442_v21  ;;  %v8704_v21 = vld [vmem:[%s12682_s2 + $0x9] ss:$0 sm:$0xff] }
0x47ab   :  { %v6446_v2 = vadd.f32 1e-12, %v6444_v9 }
0x47ad   :  { %10348 = vrsqrt.f32 %v6446_v2 }
0x47b6   :  { %v10347_v22 = vpop.eup %10346 }
0x47b7   :  { %v6449_v11 = vmul.f32 %v10347_v22, %v6433_v58  ;;  %v10148_v58 = vld [vmem:[%s12683_s7 + $0x98] sm:$0xff]  }
0x47b9   :  { %v6451_v44 = vmul.f32 %v8634_v7, %v6449_v11 }
0x47ba   :  { %v10349_v53 = vpop.eup %10348 }
0x47bb   :  { %v6450_v25 = vmul.f32 %v10349_v53, %v6434_v41  ;;  %v12203_v60 = vadd.f32 %v8635_v13, %v6451_v44 }
0x47bd   :  { %v6452_v14 = vmul.f32 %v8634_v7, %v6450_v25  ;;  %v8712_v25 = vld [vmem:[%s12685_s9 + $0x9] ss:$0 sm:$0xff] }
0x47bf   :  { %v12205_v16 = vadd.f32 %v8635_v13, %v6452_v14 }
0x47c1   :  { %v12212_v26 = vpack.c.bf16 %v12205_v16, %v12203_v60 }
0x47c3   :  { %9876 = vmatmul.mubr.msk.bf16.vlgmr.msra.gmra.mxu1 %vm458_vm1, %v12212_v26  ;;  %9892 = vmatmul.mubr.msk.bf16.vlgmr.msra.gmra.mxu0 %vm458_vm1, %v12212_v26 }
0x47c4   :  { %9880 = vmatpush3.bf16.msra.mxu1 %v10144_v8  ;;  %9883 = vmatprep.mubr.msk.bf16.mxu1 %vm10512_vm0, %v10511_v0 }
0x47c5   :  { %9881 = vmatprep.subr.bf16.mxu1 %v10511_v0  ;;  %9903 = vmatprep.mubr.msk.bf16.mxu0 %vm10512_vm0, %v10511_v0 }
0x47c8   :  { %9882 = vmatpush3.bf16.msra.mxu1 %v10145_v29 }
0x47c9   :  { %9895 = vmatprep.subr.bf16.mxu1 %v10511_v0 }
0x47cb   :  { %9884 = vmatmul.mubr.msk.bf16.vlgmr.msra.gmra.mxu1 %vm458_vm1, %v12212_v26 }
0x47cc   :  { %9897 = vmatprep.mubr.msk.bf16.mxu1 %vm10512_vm0, %v10511_v0 }
0x4883   :  { %v6511_v31 = vpop.f32.mrf.mxu1  ;;  %v6629_v34 = vpop.f32.mrf.mxu0 }
0x4884   :  { %v6630_v24 = vadd.f32 %v8698_v37, %v6629_v34  ;;  %v6512_v17 = vadd.f32 %v8690_v33, %v6511_v31 }
0x4885   :  { %v9877_v38 = vpop.f32.mrf.mxu1  ;;  %v9893_v39 = vpop.f32.mrf.mxu0 }
0x4887   :  { %v6514_v45 = vpop.f32.mrf.mxu1  ;;  %v6632_v47 = vpop.f32.mrf.mxu0 }
0x4888   :  { %v6633_v51 = vadd.f32 %v8698_v37, %v6632_v47  ;;  %v6515_v19 = vadd.f32 %v8690_v33, %v6514_v45 }
0x4889   :  { %v9878_v30 = vpop.f32.mrf.mxu1  ;;  %v9894_v23 = vpop.f32.mrf.mxu0 }
0x488a   :  { %v6712_v46 = vpack.c.bf16 %v6633_v51, %v6630_v24  ;;  %v6636_v61 = vpack.c.bf16 %v6515_v19, %v6512_v17 }
0x488b   :  { %v6570_v27 = vpop.f32.mrf.mxu1 }
0x488c   :  { %9902 = vmatpush3.bf16.msra.mxu0 %v6712_v46  ;;  %v6571_v56 = vadd.f32 %v8694_v54, %v6570_v27 }
0x488d   :  { %v9885_v36 = vpop.f32.mrf.mxu1  ;;  %9915 = vmatprep.subr.bf16.mxu0 %v10511_v0 }
0x488f   :  { %v6573_v55 = vpop.f32.mrf.mxu1 }
0x4890   :  { %v6574_v57 = vadd.f32 %v8694_v54, %v6573_v55 }
0x4891   :  { %v9886_v59 = vpop.f32.mrf.mxu1 }
0x4892   :  { %v6637_v52 = vpack.c.bf16 %v6574_v57, %v6571_v56  ;;  %v10150_v59 = vld [vmem:[%s12678_s13 + $0x98] sm:$0xff]  }
0x4894   :  { %v6642_v63 = vsel %vm623_vm2, %v6637_v52, 0 }
0x4895   :  { %9896 = vmatpush3.bf16.xpose.msra.mxu1 %v6642_v63  ;;  %v10151_v63 = vld [vmem:[%s12678_s13 + $0x90] sm:$0xff]  }
0x4896   :  { %9907 = vmatprep.subr.bf16.mxu1 %v10511_v0 }
0x489c   :  { %9898 = vmatmul.mubr.msk.bf16.vlgmr.msra.gmra.mxu1 %vm623_vm2, %v6636_v61 }
0x489d   :  { %9908 = vmatpush3.bf16.msra.mxu1 %v10146_v40  ;;  %9911 = vmatprep.mubr.msk.bf16.mxu1 %vm10512_vm0, %v10511_v0 }
0x489e   :  { %9909 = vmatprep.subr.bf16.mxu1 %v10511_v0 }
0x48a1   :  { %9910 = vmatpush3.bf16.msra.mxu1 %v10147_v3 }
0x48a2   :  { %9923 = vmatprep.subr.bf16.mxu1 %v10511_v0 }
0x48a4   :  { %9912 = vmatmul.mubr.msk.bf16.vlgmr.msra.gmra.mxu1 %vm458_vm1, %v12212_v26 }
0x48a5   :  { %9924 = vmatpush3.bf16.msra.mxu1 %v10148_v58  ;;  %9927 = vmatprep.mubr.msk.bf16.mxu1 %vm10512_vm0, %v10511_v0  ;;  %v8708_v58 = vld [vmem:[%s12681_s30 + $0x9] ss:$0 sm:$0xff] }
0x48a6   :  { %9925 = vmatprep.subr.bf16.mxu1 %v10511_v0 }
0x48a9   :  { %9926 = vmatpush3.bf16.msra.mxu1 %v10149_v5 }
0x48aa   :  { %9937 = vmatprep.subr.bf16.mxu1 %v10511_v0 }
0x48ac   :  { %9928 = vmatmul.mubr.msk.bf16.vlgmr.msra.gmra.mxu1 %vm458_vm1, %v12212_v26 }
0x48ad   :  { %9939 = vmatprep.mubr.msk.bf16.mxu1 %vm10512_vm0, %v10511_v0 }
0x495c   :  { %v6678_v43 = vpop.f32.mrf.mxu1 }
0x495d   :  { %v6685_v42 = vmul.f32 0.35355338, %v6678_v43 }
0x495e   :  { %v9899_v41 = vpop.f32.mrf.mxu1 }
0x495f   :  { %v6687_v10 = vadd.f32 %v12273_v18, %v6685_v42 }
0x4960   :  { %v6681_v50 = vpop.f32.mrf.mxu1 }
0x4961   :  { %v6686_v20 = vmul.f32 0.35355338, %v6681_v50  ;;  %v6689_v1 = vsel %vm675_vm3, %v6687_v10, -inf }
0x4962   :  { %6690 = vmax.xlane.f32.xlu0 %v6689_v1  ;;  %v9900_v48 = vpop.f32.mrf.mxu1 }
0x4963   :  { %v6688_v4 = vadd.f32 %v12280_v12, %v6686_v20 }
0x4964   :  { %v6810_v32 = vpop.f32.mrf.mxu1 }
0x4965   :  { %v6692_v6 = vsel %vm675_vm3, %v6688_v4, -inf  ;;  %v12287_v22 = vadd.f32 %v8704_v21, %v6810_v32 }
0x4966   :  { %6693 = vmax.xlane.f32.xlu1 %v6692_v6  ;;  %v9913_v9 = vpop.f32.mrf.mxu1 }
0x4968   :  { %v6813_v2 = vpop.f32.mrf.mxu1 }
0x4969   :  { %v12289_v11 = vadd.f32 %v8704_v21, %v6813_v2 }
0x496a   :  { %v9914_v7 = vpop.f32.mrf.mxu1 }
0x496b   :  { %v6935_v53 = vpack.c.bf16 %v12289_v11, %v12287_v22 }
0x496c   :  { %v6928_v44 = vpop.f32.mrf.mxu1 }
0x496d   :  { %v6929_v8 = vadd.f32 %v8712_v25, %v6928_v44 }
0x496e   :  { %v9929_v13 = vpop.f32.mrf.mxu1 }
0x4970   :  { %v6931_v14 = vpop.f32.mrf.mxu1 }
0x4971   :  { %v6932_v29 = vadd.f32 %v8712_v25, %v6931_v14 }
0x4972   :  { %v9930_v31 = vpop.f32.mrf.mxu1 }
0x4973   :  { %v7011_v34 = vpack.c.bf16 %v6932_v29, %v6929_v8 }
0x4975   :  { %9938 = vmatpush3.bf16.msra.mxu1 %v7011_v34 }
0x4976   :  { %9949 = vmatprep.subr.bf16.mxu1 %v10511_v0 }
0x49eb   :  { %v6691_v37 = vpop.xlane.xlu0 %6690 }
0x49ec   :  { %v6695_v38 = vsub.f32 %v6687_v10, %v6691_v37 }
0x49ee   :  { %v6697_v39 = vmul.f32 1.442695, %v6695_v38 }
0x49ef   :  { %v6694_v45 = vpop.xlane.xlu1 %6693 }
0x49f0   :  { %10350 = vpow2.f32 %v6697_v39  ;;  %v6696_v47 = vsub.f32 %v6688_v4, %v6694_v45 }
0x49f2   :  { %v6699_v24 = vmul.f32 1.442695, %v6696_v47  ;;  %v8418_v47 = vld [vmem:[%s12686_s29 + $0x20] sm:$0xf] }
0x49f4   :  { %10352 = vpow2.f32 %v6699_v24 }
0x49fd   :  { %v10351_v51 = vpop.eup %10350 }
0x49fe   :  { %v6701_v30 = vsel %vm675_vm3, %v10351_v51, 0.0 }
0x49ff   :  { %6702 = vadd.xlane.f32.xlu0 %v6701_v30 }
0x4a01   :  { %v10353_v23 = vpop.eup %10352 }
0x4a02   :  { %v6704_v46 = vsel %vm675_vm3, %v10353_v23, 0.0 }
0x4a03   :  { %6705 = vadd.xlane.f32.xlu1 %v6704_v46  ;;  %v10152_v46 = vld [vmem:[%s12678_s13 + $0xa8] sm:$0xff]  }
0x4a88   :  { %v6703_v27 = vpop.xlane.xlu0 %6702 }
0x4a89   :  { %10354 = vrcp.f32 %v6703_v27  ;;  %v10153_v27 = vld [vmem:[%s12678_s13 + $0xa0] sm:$0xff]  }
0x4a8c   :  { %v6706_v54 = vpop.xlane.xlu1 %6705 }
0x4a8d   :  { %10356 = vrcp.f32 %v6706_v54  ;;  %v8434_v54 = vld [vmem:[%s12686_s29 + $0x24] sm:$0xf] }
0x4a96   :  { %v10355_v36 = vpop.eup %10354 }
0x4a97   :  { %v6709_v56 = vmul.f32 %v10355_v36, %v10351_v51  ;;  %v7061_v36 = vsel %vm1047_vm4, %v8434_v54, 0 }
0x4a9a   :  { %v10357_v55 = vpop.eup %10356 }
0x4a9b   :  { %v6710_v57 = vmul.f32 %v10357_v55, %v10353_v23  ;;  %v7108_v23 = vsel %vm1047_vm4, %v8418_v47, 0 }
0x4a9d   :  { %v6711_v52 = vpack.c.bf16 %v6710_v57, %v6709_v56 }
0x4a9f   :  { %9904 = vmatmul.mubr.msk.bf16.vlgmr.msra.gmra.mxu0 %vm675_vm3, %v6711_v52 }
0x4aa0   :  { %9916 = vmatpush3.bf16.msra.mxu0 %v10150_v59  ;;  %9919 = vmatprep.mubr.msk.bf16.mxu0 %vm10512_vm0, %v10511_v0  ;;  %v10154_v59 = vld [vmem:[%s12679_s11 + $0xa8] sm:$0xff]  }
0x4aa1   :  { %9917 = vmatprep.subr.bf16.mxu0 %v10511_v0 }
0x4aa4   :  { %9918 = vmatpush3.bf16.msra.mxu0 %v10151_v63 }
0x4aa5   :  { %9931 = vmatprep.subr.bf16.mxu0 %v10511_v0 }
0x4aa7   :  { %9920 = vmatmul.mubr.msk.bf16.vlgmr.msra.gmra.mxu0 %vm458_vm1, %v12212_v26 }
0x4aa8   :  { %9933 = vmatprep.mubr.msk.bf16.mxu0 %vm10512_vm0, %v10511_v0 }
0x4b5f   :  { %v6750_v33 = vpop.f32.mrf.mxu0 }
0x4b61   :  { %v9905_v19 = vpop.f32.mrf.mxu0 }
0x4b62   :  { %v10155_v19 = vld [vmem:[%s12679_s11 + $0xa0] sm:$0xff]  }
0x4b63   :  { %v6753_v17 = vpop.f32.mrf.mxu0 }
0x4b64   :  { %v6757_v40 = vpack.c.bf16 %v6753_v17, %v6750_v33 }
0x4b65   :  { %v9906_v61 = vpop.f32.mrf.mxu0 }
0x4b66   :  { %v10156_v61 = vld [vmem:[%s12683_s7 + $0xa8] sm:$0xff]  }
0x4b67   :  { %v6869_v3 = vpop.f32.mrf.mxu0 }
0x4b68   :  { %v6870_v42 = vadd.f32 %v8708_v58, %v6869_v3 }
0x4b69   :  { %v9921_v5 = vpop.f32.mrf.mxu0 }
0x4b6a   :  { %v10157_v5 = vld [vmem:[%s12683_s7 + $0xa0] sm:$0xff]  }
0x4b6b   :  { %v6872_v43 = vpop.f32.mrf.mxu0 }
0x4b6c   :  { %v6873_v41 = vadd.f32 %v8708_v58, %v6872_v43  ;;  %v8724_v43 = vld [vmem:[%s12681_s30 + $0xa] ss:$0 sm:$0xff] }
0x4b6d   :  { %v9922_v10 = vpop.f32.mrf.mxu0 }
0x4b6e   :  { %v6936_v50 = vpack.c.bf16 %v6873_v41, %v6870_v42 }
0x4b70   :  { %v6941_v20 = vsel %vm623_vm2, %v6936_v50, 0 }
0x4b71   :  { %9932 = vmatpush3.bf16.xpose.msra.mxu0 %v6941_v20 }
0x4b72   :  { %9943 = vmatprep.subr.bf16.mxu0 %v10511_v0 }
0x4b78   :  { %9934 = vmatmul.mubr.msk.bf16.vlgmr.msra.gmra.mxu0 %vm623_vm2, %v6935_v53 }
0x4b79   :  { %9945 = vmatprep.mubr.msk.bf16.mxu0 %vm10512_vm0, %v10511_v0  ;;  %9944 = vmatpush3.bf16.msra.mxu0 %v7061_v36 }
0x4b7a   :  { %9955 = vmatprep.subr.bf16.mxu0 %v10511_v0 }
0x4c38   :  { %v6977_v1 = vpop.f32.mrf.mxu0 }
0x4c39   :  { %v6984_v48 = vmul.f32 0.35355338, %v6977_v1 }
0x4c3a   :  { %v9935_v4 = vpop.f32.mrf.mxu0 }
0x4c3b   :  { %v6986_v32 = vadd.f32 %v12273_v18, %v6984_v48 }
0x4c3c   :  { %v6980_v6 = vpop.f32.mrf.mxu0 }
0x4c3d   :  { %v6985_v21 = vmul.f32 0.35355338, %v6980_v6  ;;  %v6988_v9 = vsel %vm675_vm3, %v6986_v32, -inf }
0x4c3e   :  { %6989 = vmax.xlane.f32.xlu0 %v6988_v9  ;;  %v9936_v2 = vpop.f32.mrf.mxu0 }
0x4c3f   :  { %v6987_v22 = vadd.f32 %v12280_v12, %v6985_v21  ;;  %v8720_v2 = vld [vmem:[%s12682_s2 + $0xa] ss:$0 sm:$0xff] }
0x4c41   :  { %v6991_v11 = vsel %vm675_vm3, %v6987_v22, -inf }
0x4c42   :  { %6992 = vmax.xlane.f32.xlu1 %v6991_v11 }
0x4cc7   :  { %v6990_v7 = vpop.xlane.xlu0 %6989 }
0x4cc8   :  { %v6994_v53 = vsub.f32 %v6986_v32, %v6990_v7 }
0x4cca   :  { %v6996_v44 = vmul.f32 1.442695, %v6994_v53 }
0x4ccb   :  { %v6993_v25 = vpop.xlane.xlu1 %6992 }
0x4ccc   :  { %10358 = vpow2.f32 %v6996_v44  ;;  %v6995_v13 = vsub.f32 %v6987_v22, %v6993_v25 }
0x4cce   :  { %v6998_v14 = vmul.f32 1.442695, %v6995_v13 }
0x4cd0   :  { %10360 = vpow2.f32 %v6998_v14  ;;  %v8728_v14 = vld [vmem:[%s12685_s9 + $0xa] ss:$0 sm:$0xff] }
0x4cd9   :  { %v10359_v8 = vpop.eup %10358 }
0x4cda   :  { %v7000_v29 = vsel %vm675_vm3, %v10359_v8, 0.0 }
0x4cdb   :  { %7001 = vadd.xlane.f32.xlu0 %v7000_v29 }
0x4cdd   :  { %v10361_v31 = vpop.eup %10360 }
0x4cde   :  { %v7003_v34 = vsel %vm675_vm3, %v10361_v31, 0.0 }
0x4cdf   :  { %7004 = vadd.xlane.f32.xlu1 %v7003_v34 }
0x4d64   :  { %v7002_v37 = vpop.xlane.xlu0 %7001 }
0x4d65   :  { %10362 = vrcp.f32 %v7002_v37 }
0x4d68   :  { %v7005_v38 = vpop.xlane.xlu1 %7004 }
0x4d69   :  { %10364 = vrcp.f32 %v7005_v38 }
0x4d72   :  { %v10363_v39 = vpop.eup %10362 }
0x4d73   :  { %v7008_v24 = vmul.f32 %v10363_v39, %v10359_v8 }
0x4d76   :  { %v10365_v45 = vpop.eup %10364 }
0x4d77   :  { %v7009_v51 = vmul.f32 %v10365_v45, %v10361_v31 }
0x4d79   :  { %v7010_v30 = vpack.c.bf16 %v7009_v51, %v7008_v24 }
0x4d7b   :  { %9940 = vmatmul.mubr.msk.bf16.vlgmr.msra.gmra.mxu1 %vm675_vm3, %v7010_v30 }
0x4d7c   :  { %9950 = vmatpush3.bf16.msra.mxu1 %v7108_v23  ;;  %9951 = vmatprep.mubr.msk.bf16.mxu1 %vm10512_vm0, %v10511_v0 }
0x4d7d   :  { %9963 = vmatprep.subr.bf16.mxu1 %v10511_v0 }
0x4d83   :  { %9952 = vmatmul.mubr.msk.bf16.vlgmr.msra.gmra.mxu1 %vm623_vm2, %v6757_v40 }
0x4d84   :  { %9964 = vmatpush3.bf16.msra.mxu1 %v10152_v46  ;;  %9967 = vmatprep.mubr.msk.bf16.mxu1 %vm10512_vm0, %v10511_v0 }
0x4d85   :  { %9965 = vmatprep.subr.bf16.mxu1 %v10511_v0 }
0x4d88   :  { %9966 = vmatpush3.bf16.msra.mxu1 %v10153_v27 }
0x4d89   :  { %9979 = vmatprep.subr.bf16.mxu1 %v10511_v0 }
0x4d8b   :  { %9968 = vmatmul.mubr.msk.bf16.vlgmr.msra.gmra.mxu1 %vm458_vm1, %v12212_v26 }
0x4d8c   :  { %9981 = vmatprep.mubr.msk.bf16.mxu1 %vm10512_vm0, %v10511_v0 }
0x4e3b   :  { %v7049_v55 = vpop.f32.mrf.mxu1 }
0x4e3d   :  { %v9941_v56 = vpop.f32.mrf.mxu1 }
0x4e3f   :  { %v7052_v57 = vpop.f32.mrf.mxu1 }
0x4e40   :  { %v7056_v52 = vpack.c.bf16 %v7052_v57, %v7049_v55 }
0x4e41   :  { %v9942_v63 = vpop.f32.mrf.mxu1 }
0x4e42   :  { %9946 = vmatmul.mubr.msk.bf16.vlgmr.msra.gmra.mxu0 %vm623_vm2, %v7056_v52 }
0x4e43   :  { %v12360_v33 = vpop.f32.mrf.mxu1  ;;  %9956 = vmatpush3.bf16.msra.mxu0 %v10154_v59  ;;  %9959 = vmatprep.mubr.msk.bf16.mxu0 %vm10512_vm0, %v10511_v0 }
0x4e44   :  { %9957 = vmatprep.subr.bf16.mxu0 %v10511_v0 }
0x4e45   :  { %v9953_v17 = vpop.f32.mrf.mxu1 }
0x4e47   :  { %v12368_v40 = vpop.f32.mrf.mxu1  ;;  %9958 = vmatpush3.bf16.msra.mxu0 %v10155_v19 }
0x4e48   :  { %9971 = vmatprep.subr.bf16.mxu0 %v10511_v0 }
0x4e49   :  { %v9954_v3 = vpop.f32.mrf.mxu1 }
0x4e4a   :  { %9960 = vmatmul.mubr.msk.bf16.vlgmr.msra.gmra.mxu0 %vm458_vm1, %v12212_v26 }
0x4e4b   :  { %v7262_v58 = vpop.f32.mrf.mxu1  ;;  %9972 = vmatpush3.bf16.msra.mxu0 %v10156_v61  ;;  %9975 = vmatprep.mubr.msk.bf16.mxu0 %vm10512_vm0, %v10511_v0 }
0x4e4c   :  { %9973 = vmatprep.subr.bf16.mxu0 %v10511_v0  ;;  %v7263_v10 = vadd.f32 %v8724_v43, %v7262_v58 }
0x4e4d   :  { %v9969_v42 = vpop.f32.mrf.mxu1 }
0x4e4f   :  { %v7265_v41 = vpop.f32.mrf.mxu1  ;;  %9974 = vmatpush3.bf16.msra.mxu0 %v10157_v5 }
0x4e50   :  { %v7266_v50 = vadd.f32 %v8724_v43, %v7265_v41  ;;  %9985 = vmatprep.subr.bf16.mxu0 %v10511_v0 }
0x4e51   :  { %v9970_v20 = vpop.f32.mrf.mxu1 }
0x4e52   :  { %v7329_v1 = vpack.c.bf16 %v7266_v50, %v7263_v10  ;;  %9976 = vmatmul.mubr.msk.bf16.vlgmr.msra.gmra.mxu0 %vm458_vm1, %v12212_v26  ;;  %v10158_v10 = vld [vmem:[%s12679_s11 + $0xb8] sm:$0xff]   ;;  %v10159_v20 = vld [vmem:[%s12679_s11 + $0xb0] sm:$0xff]  }
0x4e53   :  { %9987 = vmatprep.mubr.msk.bf16.mxu0 %vm10512_vm0, %v10511_v0 }
0x4e54   :  { %v7334_v48 = vsel %vm623_vm2, %v7329_v1, 0  ;;  %v10160_v1 = vld [vmem:[%s12683_s7 + $0xb8] sm:$0xff]  }
0x4e55   :  { %9980 = vmatpush3.bf16.xpose.msra.mxu1 %v7334_v48  ;;  %v10161_v48 = vld [vmem:[%s12683_s7 + $0xb0] sm:$0xff]   ;;  %s12690_s7 = sld [smem:[#allocation15_spill]] }
0x4e56   :  { %9991 = vmatprep.subr.bf16.mxu1 %v10511_v0 }
0x4f02   :  { %v12392_v4 = vpop.f32.mrf.mxu0 }
0x4f04   :  { %v9947_v32 = vpop.f32.mrf.mxu0 }
0x4f05   :  { %v8450_v32 = vld [vmem:[%s12686_s29 + $0x28] sm:$0xf] }
0x4f06   :  { %v12394_v6 = vpop.f32.mrf.mxu0 }
0x4f08   :  { %v9948_v21 = vpop.f32.mrf.mxu0 }
0x4f09   :  { %v7454_v21 = vsel %vm1047_vm4, %v8450_v32, 0 }
0x4f0a   :  { %v7203_v9 = vpop.f32.mrf.mxu0 }
0x4f0b   :  { %v7204_v7 = vadd.f32 %v8720_v2, %v7203_v9 }
0x4f0c   :  { %v9961_v22 = vpop.f32.mrf.mxu0 }
0x4f0e   :  { %v7206_v11 = vpop.f32.mrf.mxu0 }
0x4f0f   :  { %v7207_v53 = vadd.f32 %v8720_v2, %v7206_v11  ;;  %v10162_v11 = vld [vmem:[%s12678_s13 + $0xb8] sm:$0xff]  }
0x4f10   :  { %v9962_v44 = vpop.f32.mrf.mxu0 }
0x4f11   :  { %v7328_v25 = vpack.c.bf16 %v7207_v53, %v7204_v7 }
0x4f12   :  { %v7321_v13 = vpop.f32.mrf.mxu0 }
0x4f13   :  { %9982 = vmatmul.mubr.msk.bf16.vlgmr.msra.gmra.mxu1 %vm623_vm2, %v7328_v25  ;;  %v7322_v31 = vadd.f32 %v8728_v14, %v7321_v13  ;;  %v10163_v25 = vld [vmem:[%s12678_s13 + $0xb0] sm:$0xff]   ;;  %v8735_v13 = vld [vmem:[%s12682_s2 + $0xb] ss:$0 sm:$0xff] }
0x4f14   :  { %v9977_v8 = vpop.f32.mrf.mxu0  ;;  %9993 = vmatprep.mubr.msk.bf16.mxu1 %vm10512_vm0, %v10511_v0  ;;  %9992 = vmatpush3.bf16.msra.mxu1 %v7454_v21 }
0x4f15   :  { %10005 = vmatprep.subr.bf16.mxu1 %v10511_v0 }
0x4f16   :  { %v7324_v29 = vpop.f32.mrf.mxu0 }
0x4f17   :  { %v7325_v34 = vadd.f32 %v8728_v14, %v7324_v29 }
0x4f18   :  { %v9978_v37 = vpop.f32.mrf.mxu0 }
0x4f19   :  { %v7404_v38 = vpack.c.bf16 %v7325_v34, %v7322_v31 }
0x4f1b   :  { %9986 = vmatpush3.bf16.msra.mxu0 %v7404_v38 }
0x4f1c   :  { %9997 = vmatprep.subr.bf16.mxu0 %v10511_v0 }
0x4fd3   :  { %v7370_v39 = vpop.f32.mrf.mxu1 }
0x4fd4   :  { %v7377_v45 = vmul.f32 0.35355338, %v7370_v39  ;;  %v8743_v39 = vld [vmem:[%s12685_s9 + $0xb] ss:$0 sm:$0xff] }
0x4fd5   :  { %v9983_v47 = vpop.f32.mrf.mxu1 }
0x4fd6   :  { %v7379_v24 = vadd.f32 %v12273_v18, %v7377_v45 }
0x4fd7   :  { %v7373_v51 = vpop.f32.mrf.mxu1 }
0x4fd8   :  { %v7378_v30 = vmul.f32 0.35355338, %v7373_v51  ;;  %v7381_v23 = vsel %vm675_vm3, %v7379_v24, -inf }
0x4fd9   :  { %7382 = vmax.xlane.f32.xlu0 %v7381_v23  ;;  %v9984_v46 = vpop.f32.mrf.mxu1 }
0x4fda   :  { %v7380_v27 = vadd.f32 %v12280_v12, %v7378_v30 }
0x4fdc   :  { %v7384_v54 = vsel %vm675_vm3, %v7380_v27, -inf }
0x4fdd   :  { %7385 = vmax.xlane.f32.xlu1 %v7384_v54 }
0x5062   :  { %v7383_v36 = vpop.xlane.xlu0 %7382 }
0x5063   :  { %v7387_v55 = vsub.f32 %v7379_v24, %v7383_v36  ;;  %v7148_v36 = vadd.f32 %v12368_v40, %v12394_v6 }
0x5065   :  { %v7389_v56 = vmul.f32 1.442695, %v7387_v55 }
0x5066   :  { %v7386_v57 = vpop.xlane.xlu1 %7385 }
0x5067   :  { %10366 = vpow2.f32 %v7389_v56  ;;  %v7388_v59 = vsub.f32 %v7380_v27, %v7386_v57 }
0x5069   :  { %v7391_v52 = vmul.f32 1.442695, %v7388_v59 }
0x506b   :  { %10368 = vpow2.f32 %v7391_v52  ;;  %v8739_v52 = vld [vmem:[%s12681_s30 + $0xb] ss:$0 sm:$0xff] }
0x5074   :  { %v10367_v63 = vpop.eup %10366 }
0x5075   :  { %v7393_v19 = vsel %vm675_vm3, %v10367_v63, 0.0 }
0x5076   :  { %7394 = vadd.xlane.f32.xlu0 %v7393_v19 }
0x5078   :  { %v10369_v17 = vpop.eup %10368 }
0x5079   :  { %v7396_v61 = vsel %vm675_vm3, %v10369_v17, 0.0 }
0x507a   :  { %7397 = vadd.xlane.f32.xlu1 %v7396_v61 }
0x50ff   :  { %v7395_v3 = vpop.xlane.xlu0 %7394 }
0x5100   :  { %10370 = vrcp.f32 %v7395_v3 }
0x5103   :  { %v7398_v58 = vpop.xlane.xlu1 %7397 }
0x5104   :  { %10372 = vrcp.f32 %v7398_v58 }
0x510d   :  { %v10371_v5 = vpop.eup %10370 }
0x510e   :  { %v7401_v42 = vmul.f32 %v10371_v5, %v10367_v63 }
0x5111   :  { %v10373_v43 = vpop.eup %10372 }
0x5112   :  { %v7402_v41 = vmul.f32 %v10373_v43, %v10369_v17 }
0x5114   :  { %v7403_v50 = vpack.c.bf16 %v7402_v41, %v7401_v42 }
0x5116   :  { %9988 = vmatmul.mubr.msk.bf16.vlgmr.msra.gmra.mxu0 %vm675_vm3, %v7403_v50 }
0x5117   :  { %9998 = vmatpush3.bf16.msra.mxu0 %v10158_v10  ;;  %10001 = vmatprep.mubr.msk.bf16.mxu0 %vm10512_vm0, %v10511_v0 }
0x5118   :  { %9999 = vmatprep.subr.bf16.mxu0 %v10511_v0 }
0x511b   :  { %10000 = vmatpush3.bf16.msra.mxu0 %v10159_v20 }
0x511c   :  { %10013 = vmatprep.subr.bf16.mxu0 %v10511_v0 }
0x511e   :  { %10002 = vmatmul.mubr.msk.bf16.vlgmr.msra.gmra.mxu0 %vm458_vm1, %v12212_v26 }
0x511f   :  { %10014 = vmatpush3.bf16.msra.mxu0 %v10160_v1  ;;  %10017 = vmatprep.mubr.msk.bf16.mxu0 %vm10512_vm0, %v10511_v0 }
0x5120   :  { %10015 = vmatprep.subr.bf16.mxu0 %v10511_v0 }
0x5123   :  { %10016 = vmatpush3.bf16.msra.mxu0 %v10161_v48 }
0x5124   :  { %10027 = vmatprep.subr.bf16.mxu0 %v10511_v0 }
0x5126   :  { %10018 = vmatmul.mubr.msk.bf16.vlgmr.msra.gmra.mxu0 %vm458_vm1, %v12212_v26 }
0x5127   :  { %10029 = vmatprep.mubr.msk.bf16.mxu0 %vm10512_vm0, %v10511_v0 }
0x51d6   :  { %v7442_v9 = vpop.f32.mrf.mxu0 }
0x51d8   :  { %v9989_v2 = vpop.f32.mrf.mxu0 }
0x51da   :  { %v7445_v22 = vpop.f32.mrf.mxu0 }
0x51db   :  { %v7449_v7 = vpack.c.bf16 %v7445_v22, %v7442_v9 }
0x51dc   :  { %v9990_v53 = vpop.f32.mrf.mxu0 }
0x51dd   :  { %9994 = vmatmul.mubr.msk.bf16.vlgmr.msra.gmra.mxu1 %vm623_vm2, %v7449_v7 }
0x51de   :  { %v7551_v44 = vpop.f32.mrf.mxu0  ;;  %10006 = vmatpush3.bf16.msra.mxu1 %v10162_v11  ;;  %10009 = vmatprep.mubr.msk.bf16.mxu1 %vm10512_vm0, %v10511_v0 }
0x51df   :  { %10007 = vmatprep.subr.bf16.mxu1 %v10511_v0  ;;  %v7552_v29 = vadd.f32 %v8735_v13, %v7551_v44 }
0x51e0   :  { %v10003_v14 = vpop.f32.mrf.mxu0 }
0x51e2   :  { %v7554_v8 = vpop.f32.mrf.mxu0  ;;  %10008 = vmatpush3.bf16.msra.mxu1 %v10163_v25 }
0x51e3   :  { %v7555_v31 = vadd.f32 %v8735_v13, %v7554_v8  ;;  %10021 = vmatprep.subr.bf16.mxu1 %v10511_v0 }
0x51e4   :  { %v10004_v34 = vpop.f32.mrf.mxu0 }
0x51e5   :  { %v7676_v37 = vpack.c.bf16 %v7555_v31, %v7552_v29  ;;  %10010 = vmatmul.mubr.msk.bf16.vlgmr.msra.gmra.mxu1 %vm458_vm1, %v12212_v26  ;;  %v7145_v26 = vadd.f32 %v12360_v33, %v12392_v4  ;;  %v8466_v29 = vld [vmem:[%s12686_s29 + $0x2c] sm:$0xf] }
0x51e6   :  { %v7669_v38 = vpop.f32.mrf.mxu0  ;;  %10023 = vmatprep.mubr.msk.bf16.mxu1 %vm10512_vm0, %v10511_v0  ;;  %v7802_v31 = vsel %vm1047_vm4, %v8466_v29, 0 }
0x51e7   :  { %v7670_v24 = vadd.f32 %v8743_v39, %v7669_v38 }
0x51e8   :  { %v10019_v45 = vpop.f32.mrf.mxu0 }
0x51ea   :  { %v7672_v47 = vpop.f32.mrf.mxu0 }
0x51eb   :  { %v7673_v51 = vadd.f32 %v8743_v39, %v7672_v47  ;;  %v8750_v47 = vld [vmem:[%s12687_s12 + $0x2] ss:$0 sm:$0xff] }
0x51ec   :  { %v10020_v30 = vpop.f32.mrf.mxu0 }
0x51ed   :  { %v7752_v23 = vpack.c.bf16 %v7673_v51, %v7670_v24 }
0x51ef   :  { %10028 = vmatpush3.bf16.msra.mxu0 %v7752_v23 }
0x51f0   :  { %10039 = vmatprep.subr.bf16.mxu0 %v10511_v0 }
0x529d   :  { %v7490_v46 = vpop.f32.mrf.mxu1 }
0x529e   :  { %v12468_v27 = vadd.f32 %v7490_v46, %v7145_v26 }
0x529f   :  { %v9995_v54 = vpop.f32.mrf.mxu1 }
0x52a1   :  { %v7493_v55 = vpop.f32.mrf.mxu1 }
0x52a2   :  { %v12472_v56 = vadd.f32 %v7493_v55, %v7148_v36 }
0x52a3   :  { %v9996_v57 = vpop.f32.mrf.mxu1 }
0x52a5   :  { %v7610_v59 = vpop.f32.mrf.mxu1 }
0x52a6   :  { %v7611_v17 = vadd.f32 %v8739_v52, %v7610_v59 }
0x52a7   :  { %v10011_v63 = vpop.f32.mrf.mxu1 }
0x52a9   :  { %v7613_v19 = vpop.f32.mrf.mxu1 }
0x52aa   :  { %v7614_v33 = vadd.f32 %v8739_v52, %v7613_v19 }
0x52ab   :  { %v10012_v4 = vpop.f32.mrf.mxu1 }
0x52ac   :  { %v7677_v61 = vpack.c.bf16 %v7614_v33, %v7611_v17 }
0x52ae   :  { %v7682_v3 = vsel %vm623_vm2, %v7677_v61, 0  ;;  %v3686_v61 = vadd.f32 %v12173_v49, %v11544_v15  ;;  %v10164_v15 = vld [vmem:[%s12688_s14 + $0x28] sm:$0xff]  }
0x52af   :  { %10022 = vmatpush3.bf16.xpose.msra.mxu1 %v7682_v3 }
0x52b0   :  { %10033 = vmatprep.subr.bf16.mxu1 %v10511_v0 }
0x52b6   :  { %10024 = vmatmul.mubr.msk.bf16.vlgmr.msra.gmra.mxu1 %vm623_vm2, %v7676_v37 }
0x52b7   :  { %10035 = vmatprep.mubr.msk.bf16.mxu1 %vm10512_vm0, %v10511_v0  ;;  %10034 = vmatpush3.bf16.msra.mxu1 %v7802_v31 }
0x52b8   :  { %10047 = vmatprep.subr.bf16.mxu1 %v10511_v0 }
0x5376   :  { %v7718_v40 = vpop.f32.mrf.mxu1 }
0x5377   :  { %v7725_v6 = vmul.f32 0.35355338, %v7718_v40 }
0x5378   :  { %v10025_v58 = vpop.f32.mrf.mxu1 }
0x5379   :  { %v7727_v5 = vadd.f32 %v12273_v18, %v7725_v6  ;;  %v12517_v6 = vadd.f32 %v3686_v61, %v11415_v62  ;;  %v10165_v62 = vld [vmem:[%s12688_s14 + $0x20] sm:$0xff]  }
0x537a   :  { %v7721_v43 = vpop.f32.mrf.mxu1 }
0x537b   :  { %v7726_v42 = vmul.f32 0.35355338, %v7721_v43  ;;  %v7729_v41 = vsel %vm675_vm3, %v7727_v5, -inf }
0x537c   :  { %7730 = vmax.xlane.f32.xlu0 %v7729_v41  ;;  %v10026_v10 = vpop.f32.mrf.mxu1 }
0x537d   :  { %v7728_v50 = vadd.f32 %v12280_v12, %v7726_v42 }
0x537f   :  { %v7732_v20 = vsel %vm675_vm3, %v7728_v50, -inf }
0x5380   :  { %7733 = vmax.xlane.f32.xlu1 %v7732_v20 }
0x5405   :  { %v7731_v1 = vpop.xlane.xlu0 %7730 }
0x5406   :  { %v7735_v48 = vsub.f32 %v7727_v5, %v7731_v1  ;;  %v8751_v1 = vld [vmem:[%s12689_s15 + $0x2] ss:$0 sm:$0xff]  ;;  %s12691_s15 = sld [smem:[#allocation16_spill]] }
0x5408   :  { %v7737_v32 = vmul.f32 1.442695, %v7735_v48 }
0x5409   :  { %v7734_v21 = vpop.xlane.xlu1 %7733 }
0x540a   :  { %10374 = vpow2.f32 %v7737_v32  ;;  %v7736_v9 = vsub.f32 %v7728_v50, %v7734_v21 }
0x540c   :  { %v7739_v2 = vmul.f32 1.442695, %v7736_v9  ;;  %v8752_v9 = vld [vmem:[%s12632_s16 + $0x2] ss:$0 sm:$0xff] }
0x540e   :  { %10376 = vpow2.f32 %v7739_v2 }
0x5417   :  { %v10375_v18 = vpop.eup %10374 }
0x5418   :  { %v7741_v22 = vsel %vm675_vm3, %v10375_v18, 0.0 }
0x5419   :  { %7742 = vadd.xlane.f32.xlu0 %v7741_v22 }
0x541b   :  { %v10377_v11 = vpop.eup %10376 }
0x541c   :  { %v7744_v7 = vsel %vm675_vm3, %v10377_v11, 0.0 }
0x541d   :  { %7745 = vadd.xlane.f32.xlu1 %v7744_v7  ;;  %v10166_v7 = vld [vmem:[%s12633_s19 + $0x58] sm:$0xff]  }
0x54a2   :  { %v7743_v12 = vpop.xlane.xlu0 %7742 }
0x54a3   :  { %10378 = vrcp.f32 %v7743_v12  ;;  %v10167_v12 = vld [vmem:[%s12633_s19 + $0x50] sm:$0xff]  }
0x54a6   :  { %v7746_v53 = vpop.xlane.xlu1 %7745 }
0x54a7   :  { %10380 = vrcp.f32 %v7746_v53  ;;  %v10168_v53 = vld [vmem:[%s12633_s19 + $0x48] sm:$0xff]  }
0x54b0   :  { %v10379_v44 = vpop.eup %10378 }
0x54b1   :  { %v7749_v13 = vmul.f32 %v10379_v44, %v10375_v18  ;;  %v10169_v44 = vld [vmem:[%s12633_s19 + $0x40] sm:$0xff]  }
0x54b4   :  { %v10381_v25 = vpop.eup %10380 }
0x54b5   :  { %v7750_v14 = vmul.f32 %v10381_v25, %v10377_v11  ;;  %v8753_v25 = vld [vmem:[%s12634_s18 + $0x2] ss:$0 sm:$0xff]  ;;  %s12693_s18 = sld [smem:[#allocation18_spill]] }
0x54b7   :  { %v7751_v8 = vpack.c.bf16 %v7750_v14, %v7749_v13 }
0x54b9   :  { %10030 = vmatmul.mubr.msk.bf16.vlgmr.msra.gmra.mxu0 %vm675_vm3, %v7751_v8 }
0x54ba   :  { %10043 = vmatprep.mubr.msk.bf16.mxu0 %vm10512_vm0, %v10511_v0  ;;  %10040 = vmatpush3.bf16.msra.mxu0 %v10164_v15 }
0x54bb   :  { %10041 = vmatprep.subr.bf16.mxu0 %v10511_v0 }
0x54be   :  { %10042 = vmatpush3.bf16.msra.mxu0 %v10165_v62 }
0x54bf   :  { %10059 = vmatprep.subr.bf16.mxu0 %v10511_v0 }
0x5579   :  { %v7790_v34 = vpop.f32.mrf.mxu0 }
0x557b   :  { %v10031_v37 = vpop.f32.mrf.mxu0 }
0x557d   :  { %v7793_v38 = vpop.f32.mrf.mxu0 }
0x557e   :  { %v7797_v39 = vpack.c.bf16 %v7793_v38, %v7790_v34 }
0x557f   :  { %v10032_v45 = vpop.f32.mrf.mxu0 }
0x5580   :  { %10036 = vmatmul.mubr.msk.bf16.vlgmr.msra.gmra.mxu1 %vm623_vm2, %v7797_v39 }
0x5581   :  { %10055 = vmatprep.mubr.msk.bf16.mxu1 %vm10512_vm0, %v10511_v0  ;;  %10048 = vmatpush3.bf16.msra.mxu1 %v10166_v7 }
0x5582   :  { %10049 = vmatprep.subr.bf16.mxu1 %v10511_v0 }
0x5585   :  { %10050 = vmatpush3.bf16.msra.mxu1 %v10167_v12 }
0x5586   :  { %10051 = vmatprep.subr.bf16.mxu1 %v10511_v0 }
0x5589   :  { %10052 = vmatpush3.bf16.msra.mxu1 %v10168_v53 }
0x558a   :  { %10053 = vmatprep.subr.bf16.mxu1 %v10511_v0 }
0x558d   :  { %10054 = vmatpush3.bf16.msra.mxu1 %v10169_v44 }
0x5640   :  { %v7838_v24 = vpop.f32.mrf.mxu1 }
0x5641   :  { %v7845_v51 = vadd.f32 %v7838_v24, %v12468_v27  ;;  %v3683_v27 = vadd.f32 %v12173_v49, %v11535_v28 }
0x5642   :  { %v10037_v30 = vpop.f32.mrf.mxu1 }
0x5643   :  { %v7853_v23 = vadd.f32 %v8750_v47, %v7845_v51 }
0x5644   :  { %v7841_v26 = vpop.f32.mrf.mxu1 }
0x5645   :  { %v7846_v46 = vadd.f32 %v7841_v26, %v12472_v56  ;;  %v7855_v54 = vadd.f32 %v7853_v23, %v12203_v60  ;;  %v12511_v60 = vadd.f32 %v3683_v27, %v11413_v35  ;;  %v3694_v35 = vsel %vm458_vm1, %v12517_v6, 0.0 }
0x5646   :  { %v10038_v36 = vpop.f32.mrf.mxu1 }
0x5647   :  { %v7854_v55 = vadd.f32 %v8750_v47, %v7846_v46  ;;  %v7857_v57 = vsel %vm458_vm1, %v7855_v54, 0.0  ;;  %v3691_v28 = vsel %vm458_vm1, %v12511_v60, 0.0 }
0x5648   :  { %7858 = vadd.xlane.f32.xlu0 %v7857_v57 }
0x5649   :  { %v7856_v59 = vadd.f32 %v7854_v55, %v12205_v16 }
0x564b   :  { %v7860_v52 = vsel %vm458_vm1, %v7856_v59, 0.0 }
0x564c   :  { %7861 = vadd.xlane.f32.xlu1 %v7860_v52 }
0x56d1   :  { %v7859_v63 = vpop.xlane.xlu0 %7858 }
0x56d2   :  { %v7863_v19 = vmul.f32 0.03125, %v7859_v63 }
0x56d4   :  { %v7865_v17 = vsub.f32 %v7855_v54, %v7863_v19 }
0x56d5   :  { %v7862_v33 = vpop.xlane.xlu1 %7861 }
0x56d6   :  { %v7864_v56 = vmul.f32 0.03125, %v7862_v33  ;;  %v7867_v4 = vmul.f32 %v7865_v17, %v7865_v17 }
0x56d8   :  { %v7866_v3 = vsub.f32 %v7856_v59, %v7864_v56  ;;  %v7869_v16 = vsel %vm458_vm1, %v7867_v4, 0.0  ;;  %v8757_v56 = vld [vmem:[%s12635_s20 + $0x2] ss:$0 sm:$0xff] }
0x56d9   :  { %7870 = vadd.xlane.f32.xlu0 %v7869_v16 }
0x56da   :  { %v7868_v40 = vmul.f32 %v7866_v3, %v7866_v3 }
0x56dc   :  { %v7872_v58 = vsel %vm458_vm1, %v7868_v40, 0.0 }
0x56dd   :  { %3692 = vadd.xlane.f32.xlu0 %v3691_v28  ;;  %7873 = vadd.xlane.f32.xlu1 %v7872_v58 }
0x56e1   :  { %3695 = vadd.xlane.f32.xlu1 %v3694_v35 }
0x5762   :  { %v7871_v49 = vpop.xlane.xlu0 %7870 }
0x5763   :  { %v7875_v5 = vmul.f32 0.03125, %v7871_v49 }
0x5765   :  { %v7877_v43 = vadd.f32 1e-12, %v7875_v5 }
0x5766   :  { %v7874_v42 = vpop.xlane.xlu1 %7873  ;;  %v3693_v27 = vpop.xlane.xlu0 %3692 }
0x5767   :  { %10382 = vrsqrt.f32 %v7877_v43  ;;  %v7876_v41 = vmul.f32 0.03125, %v7874_v42 }
0x5769   :  { %v7878_v10 = vadd.f32 1e-12, %v7876_v41 }
0x576a   :  { %v3696_v33 = vpop.xlane.xlu1 %3695 }
0x576b   :  { %10384 = vrsqrt.f32 %v7878_v10 }
0x5774   :  { %v10383_v50 = vpop.eup %10382 }
0x5775   :  { %v7881_v20 = vmul.f32 %v10383_v50, %v7865_v17  ;;  %v3697_v17 = vmul.f32 0.03125, %v3693_v27 }
0x5777   :  { %v7889_v32 = vmul.f32 %v8751_v1, %v7881_v20  ;;  %v3699_v61 = vsub.f32 %v12511_v60, %v3697_v17 }
0x5778   :  { %v10385_v48 = vpop.eup %10384 }
0x5779   :  { %v7882_v21 = vmul.f32 %v10385_v48, %v7866_v3  ;;  %v7897_v18 = vadd.f32 %v8752_v9, %v7889_v32  ;;  %v3698_v3 = vmul.f32 0.03125, %v3696_v33  ;;  %v3701_v49 = vmul.f32 %v3699_v61, %v3699_v61 }
0x577b   :  { %v7890_v2 = vmul.f32 %v8751_v1, %v7882_v21  ;;  %v3700_v35 = vsub.f32 %v12517_v6, %v3698_v3  ;;  %v3703_v42 = vsel %vm458_vm1, %v3701_v49, 0.0  ;;  %v10173_v3 = vld [vmem:[%s12643_s25] sm:$0xff]  }
0x577d   :  { %v7898_v22 = vadd.f32 %v8752_v9, %v7890_v2  ;;  %v3702_v10 = vmul.f32 %v3700_v35, %v3700_v35 }
0x577f   :  { %v7899_v11 = vpack.c.bf16 %v7898_v22, %v7897_v18  ;;  %v3706_v60 = vsel %vm458_vm1, %v3702_v10, 0.0 }
0x5781   :  { %10044 = vmatmul.mubr.msk.bf16.vlgmr.msra.gmra.mxu0 %vm458_vm1, %v7899_v11  ;;  %v10171_v11 = vld [vmem:[%s12642_s23] sm:$0xff]  }
0x5782   :  { %10063 = vmatprep.mubr.msk.bf16.mxu0 %vm10512_vm0, %v10511_v0 }
0x5841   :  { %v7955_v13 = vpop.f32.mrf.mxu0 }
0x5842   :  { %v7956_v14 = vadd.f32 %v8753_v25, %v7955_v13 }
0x5843   :  { %v10045_v8 = vpop.f32.mrf.mxu0 }
0x5844   :  { %v7964_v29 = vmul.f32 0.044715, %v7956_v14  ;;  %v7962_v55 = vmul.f32 0.5, %v7956_v14 }
0x5845   :  { %v7958_v31 = vpop.f32.mrf.mxu0 }
0x5846   :  { %v7966_v34 = vmul.f32 %v7964_v29, %v7956_v14  ;;  %v7959_v37 = vadd.f32 %v8753_v25, %v7958_v31 }
0x5847   :  { %v10046_v38 = vpop.f32.mrf.mxu0 }
0x5848   :  { %v7968_v39 = vmul.f32 %v7966_v34, %v7956_v14  ;;  %v7965_v45 = vmul.f32 0.044715, %v7959_v37  ;;  %v7963_v57 = vmul.f32 0.5, %v7959_v37 }
0x584a   :  { %v7970_v47 = vadd.f32 %v7968_v39, %v7956_v14  ;;  %v7967_v24 = vmul.f32 %v7965_v45, %v7959_v37 }
0x584c   :  { %v7972_v51 = vmul.f32 0.7978846, %v7970_v47  ;;  %v7969_v30 = vmul.f32 %v7967_v24, %v7959_v37  ;;  %v8763_v47 = vld [vmem:[%s12636_s21 + $0x2] ss:$0 sm:$0xff] }
0x584e   :  { %10386 = vtanh.f32 %v7972_v51  ;;  %v7971_v23 = vadd.f32 %v7969_v30, %v7959_v37 }
0x5850   :  { %v7973_v26 = vmul.f32 0.7978846, %v7971_v23 }
0x5852   :  { %10388 = vtanh.f32 %v7973_v26 }
0x585b   :  { %v10387_v46 = vpop.eup %10386 }
0x585c   :  { %v7976_v54 = vadd.f32 1.0, %v10387_v46  ;;  %v8764_v46 = vld [vmem:[%s12637_s22 + $0x2] ss:$0 sm:$0xff] }
0x585e   :  { %v7978_v52 = vmul.f32 %v7976_v54, %v7962_v55  ;;  %v10509_v54 = vld [vmem:[%s12636_s21 + $0x1] ss:$0 sm:$0xff] }
0x585f   :  { %v10389_v36 = vpop.eup %10388 }
0x5860   :  { %v7977_v59 = vadd.f32 1.0, %v10389_v36 }
0x5862   :  { %v7979_v63 = vmul.f32 %v7977_v59, %v7963_v57 }
0x5864   :  { %v7980_v19 = vpack.c.bf16 %v7979_v63, %v7978_v52  ;;  %v10510_v63 = vld [vmem:[%s12637_s22 + $0x1] ss:$0 sm:$0xff] }
0x5866   :  { %10056 = vmatmul.mubr.msk.bf16.vlgmr.msra.gmra.mxu1 %vm2000_vm5, %v7980_v19 }
0x5926   :  { %v8048_v4 = vpop.f32.mrf.mxu1 }
0x5927   :  { %v8049_v16 = vadd.f32 %v8757_v56, %v8048_v4  ;;  %v10172_v4 = vld [vmem:[%s12643_s25 + $0x8] sm:$0xff]  }
0x5928   :  { %v10057_v40 = vpop.f32.mrf.mxu1 }
0x5929   :  { %v8055_v28 = vadd.f32 %v8049_v16, %v7897_v18  ;;  %v32_v40 = vstv %s12690_s7 }
0x592a   :  { %v8051_v58 = vpop.f32.mrf.mxu1  ;;  %33 = vst [vmem:[#allocation2] sm:$0x1] %v32_v40 }
0x592b   :  { %v8052_v15 = vadd.f32 %v8757_v56, %v8051_v58  ;;  %v8057_v62 = vsel %vm458_vm1, %v8055_v28, 0.0 }
0x592c   :  { %8058 = vadd.xlane.f32.xlu0 %v8057_v62  ;;  %v10058_v5 = vpop.f32.mrf.mxu1 }
0x592d   :  { %v8056_v43 = vadd.f32 %v8052_v15, %v7898_v22  ;;  %v10170_v22 = vld [vmem:[%s12642_s23 + $0x8] sm:$0xff]  }
0x592e   :  { %10060 = vmatpush3.bf16.msra.mxu0 %v10170_v22  ;;  %v8248_v22 = vld [vmem:[%s12691_s15 + $0x8] sm:$0xff] }
0x592f   :  { %v8060_v41 = vsel %vm458_vm1, %v8056_v43, 0.0  ;;  %10061 = vmatprep.subr.bf16.mxu0 %v10511_v0 }
0x5930   :  { %3704 = vadd.xlane.f32.xlu0 %v3703_v42  ;;  %8061 = vadd.xlane.f32.xlu1 %v8060_v41 }
0x5931   :  { %v8769_v49 = vld [vmem:[#allocation2] ss:$0 sm:$0xff] }
0x5932   :  { %10062 = vmatpush3.bf16.msra.mxu0 %v10171_v11 }
0x5933   :  { %10067 = vmatprep.subr.bf16.mxu0 %v10511_v0 }
0x5934   :  { %3707 = vadd.xlane.f32.xlu1 %v3706_v60 }
0x59b5   :  { %v8059_v50 = vpop.xlane.xlu0 %8058 }
0x59b6   :  { %v8063_v20 = vmul.f32 0.03125, %v8059_v50 }
0x59b8   :  { %v8065_v6 = vsub.f32 %v8055_v28, %v8063_v20  ;;  %v10513_v28 = vmov 0  }
0x59b9   :  { %v8062_v1 = vpop.xlane.xlu1 %8061  ;;  %v3705_v7 = vpop.xlane.xlu0 %3704  ;;  %10078 = vset.pattern.permute.xlu0 %v10513_v28  ;;  %10079 = vset.pattern.permute.xlu1 %v10513_v28 }
0x59ba   :  { %v8064_v48 = vmul.f32 0.03125, %v8062_v1  ;;  %v8067_v32 = vmul.f32 %v8065_v6, %v8065_v6  ;;  %v3709_v53 = vmul.f32 0.03125, %v3705_v7 }
0x59bc   :  { %v8066_v21 = vsub.f32 %v8056_v43, %v8064_v48  ;;  %v8069_v9 = vsel %vm458_vm1, %v8067_v32, 0.0  ;;  %v3711_v25 = vadd.f32 1e-12, %v3709_v53 }
0x59bd   :  { %8070 = vadd.xlane.f32.xlu0 %v8069_v9  ;;  %v3708_v12 = vpop.xlane.xlu1 %3707  ;;  %v8247_v9 = vld [vmem:[%s12691_s15] sm:$0xff] }
0x59be   :  { %v8068_v2 = vmul.f32 %v8066_v21, %v8066_v21  ;;  %v3710_v44 = vmul.f32 0.03125, %v3708_v12  ;;  %10390 = vrsqrt.f32 %v3711_v25  ;;  %v8251_v12 = vlaneseq }
0x59c0   :  { %v8072_v18 = vsel %vm458_vm1, %v8068_v2, 0.0  ;;  %v3712_v13 = vadd.f32 1e-12, %v3710_v44  ;;  %v8252_v53 = vand.u32 127, %v8251_v12  ;;  %v8765_v44 = vld [vmem:[%s12692_s4] ss:$0 sm:$0xff] }
0x59c1   :  { %8073 = vadd.xlane.f32.xlu1 %v8072_v18 }
0x59c2   :  { %10392 = vrsqrt.f32 %v3712_v13  ;;  %vm8253_vm6 = vcmp.eq.s32.totalorder %v8252_v53, 64 }
0x59cb   :  { %v10391_v38 = vpop.eup %10390 }
0x59cc   :  { %v3715_v24 = vmul.f32 %v10391_v38, %v3699_v61 }
0x59ce   :  { %v3723_v36 = vmul.f32 %v10509_v54, %v3715_v24 }
0x59cf   :  { %v10393_v39 = vpop.eup %10392 }
0x59d0   :  { %v3716_v51 = vmul.f32 %v10393_v39, %v3700_v35  ;;  %v3731_v19 = vadd.f32 %v10510_v63, %v3723_v36 }
0x59d2   :  { %v3724_v55 = vmul.f32 %v10509_v54, %v3716_v51 }
0x59d4   :  { %v3732_v27 = vadd.f32 %v10510_v63, %v3724_v55 }
0x59d6   :  { %v8169_v16 = vpack.c.bf16 %v3732_v27, %v3731_v19 }
0x5a46   :  { %v8071_v14 = vpop.xlane.xlu0 %8070 }
0x5a47   :  { %v8075_v8 = vmul.f32 0.03125, %v8071_v14 }
0x5a49   :  { %v8077_v29 = vadd.f32 1e-12, %v8075_v8 }
0x5a4a   :  { %v8074_v31 = vpop.xlane.xlu1 %8073 }
0x5a4b   :  { %10394 = vrsqrt.f32 %v8077_v29  ;;  %v8076_v34 = vmul.f32 0.03125, %v8074_v31 }
0x5a4d   :  { %v8078_v37 = vadd.f32 1e-12, %v8076_v34 }
0x5a4f   :  { %10396 = vrsqrt.f32 %v8078_v37 }
0x5a58   :  { %v10395_v45 = vpop.eup %10394 }
0x5a59   :  { %v8081_v30 = vmul.f32 %v10395_v45, %v8065_v6 }
0x5a5b   :  { %v8089_v23 = vmul.f32 %v8763_v47, %v8081_v30 }
0x5a5c   :  { %v10397_v26 = vpop.eup %10396 }
0x5a5d   :  { %v8082_v57 = vmul.f32 %v10397_v26, %v8066_v21  ;;  %v8097_v59 = vadd.f32 %v8764_v46, %v8089_v23 }
0x5a5f   :  { %v8090_v52 = vmul.f32 %v8763_v47, %v8082_v57  ;;  %v8099_v33 = vadd.f32 %v8097_v59, %v3731_v19 }
0x5a61   :  { %v8098_v17 = vadd.f32 %v8764_v46, %v8090_v52 }
0x5a63   :  { %v8100_v56 = vadd.f32 %v8098_v17, %v3732_v27 }
0x5a65   :  { %v8101_v61 = vpack.c.bf16 %v8100_v56, %v8099_v33 }
0x5a67   :  { %10064 = vmatmul.mubr.msk.bf16.vlgmr.msra.gmra.mxu0 %vm458_vm1, %v8101_v61 }
0x5a68   :  { %10068 = vmatpush3.bf16.msra.mxu0 %v10172_v4  ;;  %10071 = vmatprep.mubr.msk.bf16.mxu0 %vm10512_vm0, %v10511_v0 }
0x5a69   :  { %10069 = vmatprep.subr.bf16.mxu0 %v10511_v0 }
0x5a6c   :  { %10070 = vmatpush3.bf16.msra.mxu0 %v10173_v3 }
0x5a6f   :  { %10072 = vmatmul.mubr.msk.bf16.vlgmr.msra.gmra.mxu0 %vm458_vm1, %v8169_v16 }
0x5b27   :  { %v8162_v58 = vpop.f32.mrf.mxu0 }
0x5b28   :  { %v8163_v25 = vadd.f32 %v8765_v44, %v8162_v58 }
0x5b29   :  { %v10065_v35 = vpop.f32.mrf.mxu0 }
0x5b2b   :  { %v8165_v15 = vpop.f32.mrf.mxu0 }
0x5b2c   :  { %v8166_v8 = vadd.f32 %v8765_v44, %v8165_v15 }
0x5b2d   :  { %v10066_v62 = vpop.f32.mrf.mxu0 }
0x5b2f   :  { %v8230_v5 = vpop.f32.mrf.mxu0 }
0x5b30   :  { %v8231_v43 = vadd.f32 %v8769_v49, %v8230_v5 }
0x5b31   :  { %v10073_v0 = vpop.f32.mrf.mxu0 }
0x5b32   :  { %v8237_v42 = vsub.f32 0.0, %v8231_v43 }
0x5b33   :  { %v8233_v41 = vpop.f32.mrf.mxu0 }
0x5b34   :  { %v8239_v10 = vmul.f32 1.442695, %v8237_v42  ;;  %v8234_v60 = vadd.f32 %v8769_v49, %v8233_v41 }
0x5b35   :  { %v10074_v50 = vpop.f32.mrf.mxu0 }
0x5b36   :  { %10398 = vpow2.f32 %v8239_v10  ;;  %v8238_v20 = vsub.f32 0.0, %v8234_v60 }
0x5b38   :  { %v8241_v6 = vmul.f32 1.442695, %v8238_v20 }
0x5b3a   :  { %10400 = vpow2.f32 %v8241_v6 }
0x5b43   :  { %v10399_v1 = vpop.eup %10398 }
0x5b44   :  { %v8243_v48 = vadd.f32 1.0, %v10399_v1 }
0x5b46   :  { %10402 = vrcp.f32 %v8243_v48 }
0x5b47   :  { %v10401_v32 = vpop.eup %10400 }
0x5b48   :  { %v8244_v21 = vadd.f32 1.0, %v10401_v32 }
0x5b4a   :  { %10404 = vrcp.f32 %v8244_v21 }
0x5b53   :  { %v10403_v2 = vpop.eup %10402 }
0x5b54   :  { %v8249_v18 = vmul.f32 %v10403_v2, %v8247_v9 }
0x5b56   :  { %8256 = vperm.xlu0 %10078, %v8249_v18  }
0x5b57   :  { %v10405_v11 = vpop.eup %10404 }
0x5b58   :  { %v8250_v7 = vmul.f32 %v10405_v11, %v8248_v22 }
0x5b5a   :  { %8261 = vperm.xlu1 %10079, %v8250_v7  }
0x5bd1   :  { %v8257_v13 = vpop.permute.xlu0 %8256 }
0x5bd2   :  { %v8264_v14 = vsel %vm8253_vm6, %v8257_v13, %v8163_v25 }
0x5bd3   :  { %8266 = vst [vmem:[%s12693_s18] sm:$0xff] %v8264_v14 }
0x5bd5   :  { %v8262_v29 = vpop.permute.xlu1 %8261 }
0x5bd6   :  { %v8265_v31 = vsel %vm8253_vm6, %v8262_v29, %v8166_v8 }
0x5bd7   :  { %8267 = vst [vmem:[%s12693_s18 + $0x8] sm:$0xff] %v8265_v31 }

</bundles_post_ra>
